<compile_context>
chip_gen: v7x
topology: tpu7x:2x2x1
jax: 0.10.0
libtpu: 0.0.40
codegen_flags: <defaults>
</compile_context>

<pallas_src>
import functools

import jax
import jax.numpy as jnp
from jax.experimental import pallas as pl
from jax.experimental.pallas import tpu as pltpu


def _round_up(n, m):
    return ((n + m - 1) // m) * m


# -----------------------------------------------------------------------------
# Kernel
# -----------------------------------------------------------------------------
def _fused_wn_mlp_kernel(x_ref,
                         w1_ref, sb1_ref,
                         w2_ref, sb2_ref,
                         w3_hbm_ref, sb3_ref,
                         w4_hbm_ref, sb4_ref,
                         o_ref,
                         w3_vmem, w4_vmem, dma_sems):
    """Fused 4-layer weight-normalized MLP (eval-mode dropout = identity).

    x_ref:   (M, K1) f32                 VMEM
    wN_ref:  (K_N, N_N) bf16 raw weights (w1/w2 auto-DMA'd to VMEM;
                                          w3/w4 raw HBM refs, manual DMA)
    sbN_ref: (2, N_N) f32  row 0 = g/||v|| (per out column), row 1 = bias
    o_ref:   (M, num_classes) f32        true-width logits (masked store)
    """
    # Kick off the big layer-3/4 weight copies immediately so they overlap
    # with the layer-1/2 matmuls (manual P4-style overlap; gridless call
    # would otherwise serialize every input DMA before the body runs).
    cp3 = pltpu.make_async_copy(w3_hbm_ref, w3_vmem, dma_sems.at[0])
    cp4 = pltpu.make_async_copy(w4_hbm_ref, w4_vmem, dma_sems.at[1])
    cp3.start()
    cp4.start()

    def wn_layer(h, w, sb_ref, relu):
        # MXU matmul in bf16 with f32 accumulation; the weight-norm scale is
        # applied to the OUTPUT (mathematically identical since it is per
        # output column), so no normalized (K, N) weight temporary exists.
        y = jnp.dot(h.astype(w.dtype), w, preferred_element_type=jnp.float32)
        y = y * sb_ref[0:1, :] + sb_ref[1:2, :]      # f32 VPU work
        if relu:
            y = jnp.maximum(y, 0.0)
        return y

    h = x_ref[...]                                           # fc1_drop (eval) = id
    h = wn_layer(h, w1_ref[...], sb1_ref, relu=True)         # fc1 + ReLU
    h = wn_layer(h, w2_ref[...], sb2_ref, relu=True)         # fc2 + ReLU
    cp3.wait()
    h = wn_layer(h, w3_vmem[...], sb3_ref, relu=True)        # fc3 + ReLU
    cp4.wait()
    h = wn_layer(h, w4_vmem[...], sb4_ref, relu=False)       # fc4 (logits, padded)
    # Masked store of the true-width logits (drops padded columns in-kernel).
    o_ref[...] = h[:, :o_ref.shape[1]]


def _fused_forward(x, w1q, sb1, w2q, sb2, w3q, sb3, w4q, sb4, num_classes):
    M = x.shape[0]
    vmem = pl.BlockSpec(memory_space=pltpu.MemorySpace.VMEM)
    hbm = pl.BlockSpec(memory_space=pl.ANY)    # raw HBM ref, manual DMA in-kernel
    # VMEM footprint: w1/w2 (auto) ~2.1 MiB + w3/w4 scratch ~4.5 MiB + tiny
    # activations/scales -> well under the scoped limit on v5e/v6e/v7x.
    return pl.pallas_call(
        _fused_wn_mlp_kernel,
        out_shape=jax.ShapeDtypeStruct((M, num_classes), jnp.float32),
        in_specs=[vmem,            # x
                  vmem, vmem,      # w1, sb1
                  vmem, vmem,      # w2, sb2
                  hbm, vmem,       # w3 (manual DMA), sb3
                  hbm, vmem],      # w4 (manual DMA), sb4
        out_specs=vmem,
        scratch_shapes=[
            pltpu.VMEM(w3q.shape, w3q.dtype),
            pltpu.VMEM(w4q.shape, w4q.dtype),
            pltpu.SemaphoreType.DMA((2,)),
        ],
        compiler_params=pltpu.CompilerParams(
            vmem_limit_bytes=32 * 1024 * 1024),
    )(x, w1q, sb1, w2q, sb2, w3q, sb3, w4q, sb4)


# -----------------------------------------------------------------------------
# One-time parameter preparation (hoisted OUT of the per-call forward path)
# -----------------------------------------------------------------------------
def _prep_layer(w, g, b, pad_to=None):
    """bf16 weight + packed (2, N) f32 [g/||v||; bias], optional lane padding.

    NOTE: no epsilon in the norm, matching torch's weight_norm exactly
    (an all-zero weight column would yield inf, same as the reference).
    """
    scale = g * jax.lax.rsqrt(jnp.sum(w * w, axis=0))        # (N,) f32
    sb = jnp.stack([scale, b], axis=0)                       # (2, N) f32
    wq = w.astype(jnp.bfloat16)
    if pad_to is not None:
        pad = pad_to - w.shape[1]
        wq = jnp.pad(wq, ((0, 0), (0, pad)))
        sb = jnp.pad(sb, ((0, 0), (0, pad)))                 # scale=0, bias=0
    return wq, sb


def prepare_params(params):
    """Preprocess parameters once (casts, norms, padding, packing).

    Returns (prepared_tensors, num_classes). `prepared_tensors` is what the
    hot forward path consumes; nothing here runs per forward call.
    """
    (w1, g1, b1), (w2, g2, b2), (w3, g3, b3), (w4, g4, b4) = params
    num_classes = w4.shape[1]
    # Layer-4 weights are lane-padded to 128 ONCE here so the overlapped DMA
    # and the final matmul stay lane-dense; the kernel stores only the first
    # num_classes columns.
    n4p = _round_up(max(num_classes, 1), 128)

    w1q, sb1 = _prep_layer(w1, g1, b1)
    w2q, sb2 = _prep_layer(w2, g2, b2)
    w3q, sb3 = _prep_layer(w3, g3, b3)
    w4q, sb4 = _prep_layer(w4, g4, b4, pad_to=n4p)
    prepared = (w1q, sb1, w2q, sb2, w3q, sb3, w4q, sb4)
    return prepared, num_classes


# -----------------------------------------------------------------------------
# Public forward
# -----------------------------------------------------------------------------
def wn_bindo_net_forward(x, prepared, *, num_classes):
    """Forward pass of WN_BinDO_Net (eval mode: dropouts are identity)."""
    w1q, sb1, w2q, sb2, w3q, sb3, w4q, sb4 = prepared
    return _fused_forward(x, w1q, sb1, w2q, sb2, w3q, sb3, w4q, sb4,
                          num_classes)


def init_wn_params(key, in_features, out_features):
    """Deterministic WeightNorm parameter init: v ~ N(0, 0.05), g=1, b=0."""
    w = 0.05 * jax.random.normal(key, (in_features, out_features), jnp.float32)
    g = jnp.ones((out_features,), jnp.float32)
    b = jnp.zeros((out_features,), jnp.float32)
    return w, g, b


def _reference_forward(x, params):
    """Pure-JAX f32 reference (naive weight norm, eval-mode dropout)."""
    out = x
    for i, (w, g, b) in enumerate(params):
        norm = jnp.sqrt(jnp.sum(w * w, axis=0))
        out = out @ (w * (g / norm)) + b
        if i < len(params) - 1:
            out = jnp.maximum(out, 0.0)
    return out


if __name__ == "__main__":
    batch = 8
    input_size = 64
    num_classes = 10

    root = jax.random.PRNGKey(0)
    k_x, k1, k2, k3, k4 = jax.random.split(root, 5)

    x = jax.random.normal(k_x, (batch, input_size), jnp.float32)

    params = (
        init_wn_params(k1, input_size, 1024),
        init_wn_params(k2, 1024, 1024),
        init_wn_params(k3, 1024, 2048),
        init_wn_params(k4, 2048, num_classes),
    )

    # One-time parameter preparation (outside the per-call forward path).
    prepared, nc = prepare_params(params)
    prepared = jax.block_until_ready(prepared)

    fwd = jax.jit(functools.partial(wn_bindo_net_forward, num_classes=nc))
    out = fwd(x, prepared)
    out = jax.block_until_ready(out)
    assert out.shape == (batch, num_classes)
    assert out.dtype == jnp.float32

    # Sanity check against a pure-JAX f32 reference (bf16 matmuls over
    # 4 layers introduce ~0.5% relative error; tolerance set accordingly).
    ref = _reference_forward(x, params)
    assert bool(jnp.all(jnp.isfinite(out)))
    assert bool(jnp.allclose(out, ref, rtol=5e-2, atol=5e-2)), (
        float(jnp.max(jnp.abs(out - ref))))

    print("KERNEL_OK")
</pallas_src>

<mosaic_0001>
module attributes {stable_mosaic.version = 11 : i64} {
  func.func @_fused_wn_mlp_kernel(%arg0: memref<8x64xf32, #tpu.memory_space<vmem>>, %arg1: memref<64x1024xbf16, #tpu.memory_space<vmem>>, %arg2: memref<2x1024xf32, #tpu.memory_space<vmem>>, %arg3: memref<1024x1024xbf16, #tpu.memory_space<vmem>>, %arg4: memref<2x1024xf32, #tpu.memory_space<vmem>>, %arg5: memref<1024x2048xbf16, #tpu.memory_space<any>>, %arg6: memref<2x2048xf32, #tpu.memory_space<vmem>>, %arg7: memref<2048x128xbf16, #tpu.memory_space<any>>, %arg8: memref<2x128xf32, #tpu.memory_space<vmem>>, %arg9: memref<8x10xf32, #tpu.memory_space<vmem>>, %arg10: memref<1024x2048xbf16, #tpu.memory_space<vmem>>, %arg11: memref<2048x128xbf16, #tpu.memory_space<vmem>>, %arg12: memref<2x!tpu.dma_semaphore, #tpu.memory_space<semaphore_mem>>) attributes {dimension_semantics = [], scalar_prefetch = 0 : i64, scratch_operands = 3 : i64, tpu.core_type = #tpu.core_type<tc>} {
    %c0_i32 = arith.constant 0 : i32
    %0 = tpu.memref_slice %arg12[%c0_i32] : memref<2x!tpu.dma_semaphore, #tpu.memory_space<semaphore_mem>> -> memref<1x!tpu.dma_semaphore, #tpu.memory_space<semaphore_mem>>
    %1 = tpu.memref_squeeze %0 : memref<1x!tpu.dma_semaphore, #tpu.memory_space<semaphore_mem>> -> memref<!tpu.dma_semaphore, #tpu.memory_space<semaphore_mem>>
    tpu.enqueue_dma source(%arg5 : memref<1024x2048xbf16, #tpu.memory_space<any>>) target(%arg10 : memref<1024x2048xbf16, #tpu.memory_space<vmem>>) target_semaphore(%1 : memref<!tpu.dma_semaphore, #tpu.memory_space<semaphore_mem>>)
    %c1_i32 = arith.constant 1 : i32
    %2 = tpu.memref_slice %arg12[%c1_i32] : memref<2x!tpu.dma_semaphore, #tpu.memory_space<semaphore_mem>> -> memref<1x!tpu.dma_semaphore, #tpu.memory_space<semaphore_mem>>
    %3 = tpu.memref_squeeze %2 : memref<1x!tpu.dma_semaphore, #tpu.memory_space<semaphore_mem>> -> memref<!tpu.dma_semaphore, #tpu.memory_space<semaphore_mem>>
    tpu.enqueue_dma source(%arg7 : memref<2048x128xbf16, #tpu.memory_space<any>>) target(%arg11 : memref<2048x128xbf16, #tpu.memory_space<vmem>>) target_semaphore(%3 : memref<!tpu.dma_semaphore, #tpu.memory_space<semaphore_mem>>)
    %c0 = arith.constant 0 : index
    %c0_0 = arith.constant 0 : index
    %4 = vector.load %arg0[%c0, %c0_0] : memref<8x64xf32, #tpu.memory_space<vmem>>, vector<8x64xf32>
    %c0_1 = arith.constant 0 : index
    %c0_2 = arith.constant 0 : index
    %5 = vector.load %arg1[%c0_1, %c0_2] : memref<64x1024xbf16, #tpu.memory_space<vmem>>, vector<64x1024xbf16>
    %6 = arith.truncf %4 : vector<8x64xf32> to vector<8x64xbf16>
    %cst = arith.constant dense<0.000000e+00> : vector<8x1024xf32>
    %7 = tpu.matmul %6, %5, %cst {dimension_numbers = #tpu.dot_dimension_numbers<[1], [0], [0], [1], [0, 0, 1, 1], [], []>} : vector<8x64xbf16>, vector<64x1024xbf16>, vector<8x1024xf32> -> vector<8x1024xf32>
    %c0_3 = arith.constant 0 : index
    %c0_4 = arith.constant 0 : index
    %8 = vector.load %arg2[%c0_3, %c0_4] : memref<2x1024xf32, #tpu.memory_space<vmem>>, vector<1x1024xf32>
    %9 = vector.broadcast %8 : vector<1x1024xf32> to vector<8x1024xf32>
    %10 = arith.mulf %7, %9 : vector<8x1024xf32>
    %c1 = arith.constant 1 : index
    %c0_5 = arith.constant 0 : index
    %11 = vector.load %arg2[%c1, %c0_5] : memref<2x1024xf32, #tpu.memory_space<vmem>>, vector<1x1024xf32>
    %12 = vector.broadcast %11 : vector<1x1024xf32> to vector<8x1024xf32>
    %13 = arith.addf %10, %12 : vector<8x1024xf32>
    %cst_6 = arith.constant 0.000000e+00 : f32
    %14 = vector.broadcast %cst_6 : f32 to vector<8x1024xf32>
    %15 = arith.maximumf %13, %14 : vector<8x1024xf32>
    %c0_7 = arith.constant 0 : index
    %c0_8 = arith.constant 0 : index
    %16 = vector.load %arg3[%c0_7, %c0_8] : memref<1024x1024xbf16, #tpu.memory_space<vmem>>, vector<1024x1024xbf16>
    %17 = arith.truncf %15 : vector<8x1024xf32> to vector<8x1024xbf16>
    %cst_9 = arith.constant dense<0.000000e+00> : vector<8x1024xf32>
    %18 = tpu.matmul %17, %16, %cst_9 {dimension_numbers = #tpu.dot_dimension_numbers<[1], [0], [0], [1], [0, 0, 1, 1], [], []>} : vector<8x1024xbf16>, vector<1024x1024xbf16>, vector<8x1024xf32> -> vector<8x1024xf32>
    %c0_10 = arith.constant 0 : index
    %c0_11 = arith.constant 0 : index
    %19 = vector.load %arg4[%c0_10, %c0_11] : memref<2x1024xf32, #tpu.memory_space<vmem>>, vector<1x1024xf32>
    %20 = vector.broadcast %19 : vector<1x1024xf32> to vector<8x1024xf32>
    %21 = arith.mulf %18, %20 : vector<8x1024xf32>
    %c1_12 = arith.constant 1 : index
    %c0_13 = arith.constant 0 : index
    %22 = vector.load %arg4[%c1_12, %c0_13] : memref<2x1024xf32, #tpu.memory_space<vmem>>, vector<1x1024xf32>
    %23 = vector.broadcast %22 : vector<1x1024xf32> to vector<8x1024xf32>
    %24 = arith.addf %21, %23 : vector<8x1024xf32>
    %cst_14 = arith.constant 0.000000e+00 : f32
    %25 = vector.broadcast %cst_14 : f32 to vector<8x1024xf32>
    %26 = arith.maximumf %24, %25 : vector<8x1024xf32>
    %c0_i32_15 = arith.constant 0 : i32
    %27 = tpu.memref_slice %arg12[%c0_i32_15] : memref<2x!tpu.dma_semaphore, #tpu.memory_space<semaphore_mem>> -> memref<1x!tpu.dma_semaphore, #tpu.memory_space<semaphore_mem>>
    %28 = tpu.memref_squeeze %27 : memref<1x!tpu.dma_semaphore, #tpu.memory_space<semaphore_mem>> -> memref<!tpu.dma_semaphore, #tpu.memory_space<semaphore_mem>>
    tpu.wait_dma2 semaphore(%28 : memref<!tpu.dma_semaphore, #tpu.memory_space<semaphore_mem>>) src(%arg5 : memref<1024x2048xbf16, #tpu.memory_space<any>>) dst(%arg10 : memref<1024x2048xbf16, #tpu.memory_space<vmem>>)
    %c0_16 = arith.constant 0 : index
    %c0_17 = arith.constant 0 : index
    %29 = vector.load %arg10[%c0_16, %c0_17] : memref<1024x2048xbf16, #tpu.memory_space<vmem>>, vector<1024x2048xbf16>
    %30 = arith.truncf %26 : vector<8x1024xf32> to vector<8x1024xbf16>
    %cst_18 = arith.constant dense<0.000000e+00> : vector<8x2048xf32>
    %31 = tpu.matmul %30, %29, %cst_18 {dimension_numbers = #tpu.dot_dimension_numbers<[1], [0], [0], [1], [0, 0, 1, 1], [], []>} : vector<8x1024xbf16>, vector<1024x2048xbf16>, vector<8x2048xf32> -> vector<8x2048xf32>
    %c0_19 = arith.constant 0 : index
    %c0_20 = arith.constant 0 : index
    %32 = vector.load %arg6[%c0_19, %c0_20] : memref<2x2048xf32, #tpu.memory_space<vmem>>, vector<1x2048xf32>
    %33 = vector.broadcast %32 : vector<1x2048xf32> to vector<8x2048xf32>
    %34 = arith.mulf %31, %33 : vector<8x2048xf32>
    %c1_21 = arith.constant 1 : index
    %c0_22 = arith.constant 0 : index
    %35 = vector.load %arg6[%c1_21, %c0_22] : memref<2x2048xf32, #tpu.memory_space<vmem>>, vector<1x2048xf32>
    %36 = vector.broadcast %35 : vector<1x2048xf32> to vector<8x2048xf32>
    %37 = arith.addf %34, %36 : vector<8x2048xf32>
    %cst_23 = arith.constant 0.000000e+00 : f32
    %38 = vector.broadcast %cst_23 : f32 to vector<8x2048xf32>
    %39 = arith.maximumf %37, %38 : vector<8x2048xf32>
    %c1_i32_24 = arith.constant 1 : i32
    %40 = tpu.memref_slice %arg12[%c1_i32_24] : memref<2x!tpu.dma_semaphore, #tpu.memory_space<semaphore_mem>> -> memref<1x!tpu.dma_semaphore, #tpu.memory_space<semaphore_mem>>
    %41 = tpu.memref_squeeze %40 : memref<1x!tpu.dma_semaphore, #tpu.memory_space<semaphore_mem>> -> memref<!tpu.dma_semaphore, #tpu.memory_space<semaphore_mem>>
    tpu.wait_dma2 semaphore(%41 : memref<!tpu.dma_semaphore, #tpu.memory_space<semaphore_mem>>) src(%arg7 : memref<2048x128xbf16, #tpu.memory_space<any>>) dst(%arg11 : memref<2048x128xbf16, #tpu.memory_space<vmem>>)
    %c0_25 = arith.constant 0 : index
    %c0_26 = arith.constant 0 : index
    %42 = vector.load %arg11[%c0_25, %c0_26] : memref<2048x128xbf16, #tpu.memory_space<vmem>>, vector<2048x128xbf16>
    %43 = arith.truncf %39 : vector<8x2048xf32> to vector<8x2048xbf16>
    %cst_27 = arith.constant dense<0.000000e+00> : vector<8x128xf32>
    %44 = tpu.matmul %43, %42, %cst_27 {dimension_numbers = #tpu.dot_dimension_numbers<[1], [0], [0], [1], [0, 0, 1, 1], [], []>} : vector<8x2048xbf16>, vector<2048x128xbf16>, vector<8x128xf32> -> vector<8x128xf32>
    %c0_28 = arith.constant 0 : index
    %c0_29 = arith.constant 0 : index
    %45 = vector.load %arg8[%c0_28, %c0_29] : memref<2x128xf32, #tpu.memory_space<vmem>>, vector<1x128xf32>
    %46 = vector.broadcast %45 : vector<1x128xf32> to vector<8x128xf32>
    %47 = arith.mulf %44, %46 : vector<8x128xf32>
    %c1_30 = arith.constant 1 : index
    %c0_31 = arith.constant 0 : index
    %48 = vector.load %arg8[%c1_30, %c0_31] : memref<2x128xf32, #tpu.memory_space<vmem>>, vector<1x128xf32>
    %49 = vector.broadcast %48 : vector<1x128xf32> to vector<8x128xf32>
    %50 = arith.addf %47, %49 : vector<8x128xf32>
    %51 = vector.extract_strided_slice %50 {offsets = [0, 0], sizes = [8, 10], strides = [1, 1]} : vector<8x128xf32> to vector<8x10xf32>
    %c0_32 = arith.constant 0 : index
    %c0_33 = arith.constant 0 : index
    %52 = vector.load %arg9[%c0_32, %c0_33] : memref<8x10xf32, #tpu.memory_space<vmem>>, vector<8x10xf32>
    tpu.vector_store %arg9[%c0_32, %c0_33], %51 {strides = array<i32>} : memref<8x10xf32, #tpu.memory_space<vmem>>, vector<8x10xf32>,
    return
  }
}

</mosaic_0001>

<bundles_post_ra>
// kernel: wn_bindo_net_forward.1
= control target key start
LH: loop header
LB: loop body
LE: loop exit
PB: predicated region body
PF: predicated region fallthrough
CT: control target
= control target key end

     0   :  { %14 = vsyncpa [#allocation6], 0  ;;  %s9302_s0 = inlined_call_operand.hbm [shape: f32[8,64], index: 0, kind: input, shape index: {}]   ;;  %s9303_s1 = inlined_call_operand.hbm [shape: bf16[64,1024], index: 1, kind: input, shape index: {}]   ;;  %s9304_s2 = inlined_call_operand.hbm [shape: f32[2,1024], index: 2, kind: input, shape index: {}]   ;;  %s9305_s3 = inlined_call_operand.hbm [shape: bf16[1024,1024], index: 3, kind: input, shape index: {}]   ;;  %s9306_s4 = inlined_call_operand.hbm [shape: f32[2,1024], index: 4, kind: input, shape index: {}]   ;;  %s9307_s5 = inlined_call_operand.hbm [shape: bf16[1024,2048], index: 5, kind: input, shape index: {}]   ;;  %s9308_s6 = inlined_call_operand.hbm [shape: f32[2,2048], index: 6, kind: input, shape index: {}]   ;;  %s9309_s7 = inlined_call_operand.hbm [shape: bf16[2048,128], index: 7, kind: input, shape index: {}]   ;;  %s9310_s8 = inlined_call_operand.hbm [shape: f32[2,128], index: 8, kind: input, shape index: {}]   ;;  %s9311_s9 = inlined_call_operand.hbm [shape: f32[8,10], index: 9, kind: output, shape index: {}]  }
   0x1   :  { %15 = vsyncpa [#allocation9], 0 }
   0x2   :  { %16 = vsyncpa [#allocation12], 0 }
   0x3   :  { %17 = vsyncpa [#allocation15], 0 }
   0x4   :  { %18 = vsyncpa [#allocation7], 0  ;;  %s8670_s30 = smov [#allocation8]   ;;  %s8458_s13 = scalar_lea.hbm %s9303_s1, 4096 }
   0x5   :  { %s34_s10 = sshll.u32 %s8670_s30, 4  ;;  %p8459_p0 = scmp.ne.s32.totalorder %s9303_s1, %s8458_s13  ;;  %s35_s10 = int_to_ptr.vmem [resolvable:$true] %s34_s10 }
   0x6   :  { %p8462_p1 = scmp.lt.u32.totalorder %s8458_s13, %s9303_s1 }
   0x8   :  { %p8464_p2 = pnand %p8462_p1, %p8459_p0 }
   0xa   :  { %8467 = shalt.err (!%p8464_p2)
}
   0xb   :  { %s8468_s18 = scalar_lea.vmem %s35_s10, 4096  ;;  %p8473_p4 = scmp.lt.s32.totalorder %s35_s10, %s35_s10 }
   0xc   :  { %p8469_p3 = scmp.ne.s32.totalorder %s35_s10, %s8468_s18  ;;  %p8474_p5 = scmp.lt.s32.totalorder %s8468_s18, %s8468_s18 }
   0xe   :  { %p8475_p6 = por %p8474_p5, %p8473_p4 }
  0x10   :  { %p8476_p7 = pnand %p8475_p6, %p8469_p3 }
  0x12   :  { %8479 = shalt.err (!%p8476_p7)
}
  0x13   :  { %s8671_s19 = smov 512   ;;  %s8672_s20 = smov 32  }
  0x14   :  { %40 = dma.hbm_to_vmem [thread:$0]  %s9303_s1, 4096, %s35_s10, [#allocation9], %s8671_s19, %s8671_s19, %s8672_s20  }
  0x15   :  { %s8673_s23 = smov [#allocation11]   ;;  %s8674_s25 = smov [#allocation14]  }
  0x16   :  { %s56_s24 = sshll.u32 %s8673_s23, 4  ;;  %s79_s26 = sshll.u32 %s8674_s25, 4  ;;  %s57_s24 = int_to_ptr.vmem [resolvable:$true] %s56_s24  ;;  %s80_s26 = int_to_ptr.vmem [resolvable:$true] %s79_s26 }
  0x17   :  { %s8480_s29 = scalar_lea.hbm %s9305_s3, 65536 }
  0x18   :  { %p8481_p8 = scmp.ne.s32.totalorder %s9305_s3, %s8480_s29  ;;  %p8484_p9 = scmp.lt.u32.totalorder %s8480_s29, %s9305_s3 }
  0x1a   :  { %p8486_p10 = pnand %p8484_p9, %p8481_p8 }
  0x1c   :  { %8489 = shalt.err (!%p8486_p10)
}
  0x1d   :  { %s8490_s1 = scalar_lea.vmem %s57_s24, 65536  ;;  %p8495_p12 = scmp.lt.s32.totalorder %s57_s24, %s57_s24 }
  0x1e   :  { %p8491_p11 = scmp.ne.s32.totalorder %s57_s24, %s8490_s1  ;;  %p8496_p13 = scmp.lt.s32.totalorder %s8490_s1, %s8490_s1 }
  0x20   :  { %p8497_p0 = por %p8496_p13, %p8495_p12 }
  0x22   :  { %p8498_p1 = pnand %p8497_p0, %p8491_p11 }
  0x24   :  { %8501 = shalt.err (!%p8498_p1)
}
  0x25   :  { %62 = dma.hbm_to_vmem [thread:$0]  %s9305_s3, 65536, %s57_s24, [#allocation12], %s8671_s19, %s8671_s19, %s8672_s20  }
  0x26   :  { %s8502_s17 = scalar_lea.hbm %s9308_s6, 512 }
  0x27   :  { %p8503_p2 = scmp.ne.s32.totalorder %s9308_s6, %s8502_s17  ;;  %p8506_p3 = scmp.lt.u32.totalorder %s8502_s17, %s9308_s6 }
  0x29   :  { %p8508_p4 = pnand %p8506_p3, %p8503_p2 }
  0x2b   :  { %8511 = shalt.err (!%p8508_p4)
}
  0x2c   :  { %s8512_s25 = scalar_lea.vmem %s80_s26, 512  ;;  %p8517_p6 = scmp.lt.s32.totalorder %s80_s26, %s80_s26 }
  0x2d   :  { %p8513_p5 = scmp.ne.s32.totalorder %s80_s26, %s8512_s25  ;;  %p8518_p7 = scmp.lt.s32.totalorder %s8512_s25, %s8512_s25 }
  0x2f   :  { %p8519_p8 = por %p8518_p7, %p8517_p6 }
  0x31   :  { %p8520_p9 = pnand %p8519_p8, %p8513_p5 }
  0x33   :  { %8523 = shalt.err (!%p8520_p9)
}
  0x34   :  { %82 = dma.hbm_to_vmem [thread:$0]  %s9308_s6, 512, %s80_s26, [#allocation15]  }
  0x35   :  { %s8675_s20 = smov [#allocation5]   ;;  %s8676_s27 = smov [#allocation10]  }
  0x36   :  { %s25_s24 = sshll.u32 %s8675_s20, 4  ;;  %s47_s28 = sshll.u32 %s8676_s27, 4  ;;  %s26_s24 = int_to_ptr.vmem [resolvable:$true] %s25_s24  ;;  %s48_s28 = int_to_ptr.vmem [resolvable:$true] %s47_s28 }
  0x37   :  { %s8524_s11 = scalar_lea.hbm %s9302_s0, 128 }
  0x38   :  { %p8525_p10 = scmp.ne.s32.totalorder %s9302_s0, %s8524_s11  ;;  %p8528_p11 = scmp.lt.u32.totalorder %s8524_s11, %s9302_s0 }
  0x3a   :  { %p8530_p12 = pnand %p8528_p11, %p8525_p10 }
  0x3c   :  { %8533 = shalt.err (!%p8530_p12)
}
  0x3d   :  { %s8534_s6 = scalar_lea.vmem %s26_s24, 128  ;;  %p8539_p0 = scmp.lt.s32.totalorder %s26_s24, %s26_s24 }
  0x3e   :  { %p8535_p13 = scmp.ne.s32.totalorder %s26_s24, %s8534_s6  ;;  %p8540_p1 = scmp.lt.s32.totalorder %s8534_s6, %s8534_s6 }
  0x40   :  { %p8541_p2 = por %p8540_p1, %p8539_p0 }
  0x42   :  { %p8542_p3 = pnand %p8541_p2, %p8535_p13 }
  0x44   :  { %8545 = shalt.err (!%p8542_p3)
}
  0x45   :  { %28 = dma.hbm_to_vmem [thread:$0]  %s9302_s0, 128, %s26_s24, [#allocation6]  }
  0x46   :  { %s8546_s17 = scalar_lea.hbm %s9304_s2, 256 }
  0x47   :  { %p8547_p4 = scmp.ne.s32.totalorder %s9304_s2, %s8546_s17  ;;  %p8550_p5 = scmp.lt.u32.totalorder %s8546_s17, %s9304_s2 }
  0x49   :  { %p8552_p6 = pnand %p8550_p5, %p8547_p4 }
  0x4b   :  { %8555 = shalt.err (!%p8552_p6)
}
  0x4c   :  { %s8556_s25 = scalar_lea.vmem %s48_s28, 256  ;;  %p8561_p8 = scmp.lt.s32.totalorder %s48_s28, %s48_s28 }
  0x4d   :  { %p8557_p7 = scmp.ne.s32.totalorder %s48_s28, %s8556_s25  ;;  %p8562_p9 = scmp.lt.s32.totalorder %s8556_s25, %s8556_s25 }
  0x4f   :  { %p8563_p10 = por %p8562_p9, %p8561_p8 }
  0x51   :  { %p8564_p11 = pnand %p8563_p10, %p8557_p7 }
  0x53   :  { %8567 = shalt.err (!%p8564_p11)
}
  0x54   :  { %50 = dma.hbm_to_vmem [thread:$0]  %s9304_s2, 256, %s48_s28, [#allocation9]  }
  0x55   :  { %s8677_s19 = smov [#allocation13]   ;;  %s8678_s24 = smov [#allocation16]  }
  0x56   :  { %s69_s20 = sshll.u32 %s8677_s19, 4  ;;  %s89_s27 = sshll.u32 %s8678_s24, 4  ;;  %s70_s20 = int_to_ptr.vmem [resolvable:$true] %s69_s20  ;;  %s90_s27 = int_to_ptr.vmem [resolvable:$true] %s89_s27 }
  0x57   :  { %s8568_s11 = scalar_lea.hbm %s9306_s4, 256 }
  0x58   :  { %p8569_p12 = scmp.ne.s32.totalorder %s9306_s4, %s8568_s11  ;;  %p8572_p13 = scmp.lt.u32.totalorder %s8568_s11, %s9306_s4 }
  0x5a   :  { %p8574_p0 = pnand %p8572_p13, %p8569_p12 }
  0x5c   :  { %8577 = shalt.err (!%p8574_p0)
}
  0x5d   :  { %s8578_s2 = scalar_lea.vmem %s70_s20, 256  ;;  %p8583_p2 = scmp.lt.s32.totalorder %s70_s20, %s70_s20 }
  0x5e   :  { %p8579_p1 = scmp.ne.s32.totalorder %s70_s20, %s8578_s2  ;;  %p8584_p3 = scmp.lt.s32.totalorder %s8578_s2, %s8578_s2 }
  0x60   :  { %p8585_p4 = por %p8584_p3, %p8583_p2 }
  0x62   :  { %p8586_p5 = pnand %p8585_p4, %p8579_p1 }
  0x64   :  { %8589 = shalt.err (!%p8586_p5)
}
  0x65   :  { %72 = dma.hbm_to_vmem [thread:$0]  %s9306_s4, 256, %s70_s20, [#allocation12]  }
  0x66   :  { %s8590_s15 = scalar_lea.hbm %s9310_s8, 32 }
  0x67   :  { %p8591_p6 = scmp.ne.s32.totalorder %s9310_s8, %s8590_s15  ;;  %p8594_p7 = scmp.lt.u32.totalorder %s8590_s15, %s9310_s8 }
  0x69   :  { %p8596_p8 = pnand %p8594_p7, %p8591_p6 }
  0x6b   :  { %8599 = shalt.err (!%p8596_p8)
}
  0x6c   :  { %s8600_s22 = scalar_lea.vmem %s90_s27, 32  ;;  %p8605_p10 = scmp.lt.s32.totalorder %s90_s27, %s90_s27 }
  0x6d   :  { %p8601_p9 = scmp.ne.s32.totalorder %s90_s27, %s8600_s22  ;;  %p8606_p11 = scmp.lt.s32.totalorder %s8600_s22, %s8600_s22 }
  0x6f   :  { %p8607_p12 = por %p8606_p11, %p8605_p10 }
  0x71   :  { %p8608_p13 = pnand %p8607_p12, %p8601_p9 }
  0x73   :  { %8611 = shalt.err (!%p8608_p13)
}
  0x74   :  { %92 = dma.hbm_to_vmem [thread:$0]  %s9310_s8, 32, %s90_s27, [#allocation15]  }
  0x75   :  { %8656 = dma.done.wait [#allocation6], 128  }
  0x76   :  { %8657 = vsyncadd [#allocation6], 4294967168 }
  0x77   :  { %8658 = dma.done.wait [#allocation9], 4352  }
  0x78   :  { %8659 = vsyncadd [#allocation9], 4294962944 }
  0x79   :  { %8660 = dma.done.wait [#allocation12], 65792  }
  0x7a   :  { %8661 = vsyncadd [#allocation12], 4294901504 }
  0x7b   :  { %8662 = dma.done.wait [#allocation15], 544  }
  0x7c   :  { %8663 = vsyncadd [#allocation15], 4294966752  ;;  %s119_s25 = sld [smem:[#allocation0]]   ;;  %s8679_s0 = smov 2048   ;;  %v8680_v0 = vmov 0   ;;  %vm356_vm0 = vcmask 523264  }
  0x7d   :  { %131 = sst [smem:[#allocation19]] %s8679_s0  ;;  %392 = vmatprep.mubr.bf16.mxu0 %v8680_v0  ;;  %433 = vmatprep.mubr.bf16.mxu1 %v8680_v0  ;;  %s8681_s3 = smov 16  }
  0x7e   :  { %133 = sst [smem:[#allocation19 + $0x1]] %s8679_s0  ;;  %s8682_s8 = smov 64  }
  0x7f   :  { %135 = sst [smem:[#allocation19 + $0x2]] %s8681_s3  ;;  %s8683_s19 = smov 128  }
  0x80   :  { %137 = sst [smem:[#allocation19 + $0x3]] %s8682_s8  ;;  %s8684_s20 = smov 2  }
  0x81   :  { %139 = sst [smem:[#allocation19 + $0x4]] %s8683_s19  ;;  %s8685_s27 = smov 1024  }
  0x82   :  { %141 = sst [smem:[#allocation19 + $0x5]] %s8684_s20  ;;  %s7558_s24 = sshll.u32 %s119_s25, 26 }
  0x83   :  { %143 = sst [smem:[#allocation19 + $0x6]] %s8685_s27  ;;  %s7559_s29 = sadd.s32 134217728, %s7558_s24 }
  0x84   :  { %145 = sst [smem:[#allocation19 + $0x7]] %s8682_s8  ;;  %s8686_s30 = smov 4  }
  0x85   :  { %147 = sst [smem:[#allocation19 + $0x8]] %s8686_s30  ;;  %s8687_s11 = smov [#allocation2]  }
  0x86   :  { %s127_s12 = sshll.u32 %s8687_s11, 4  ;;  %s8688_s13 = smov [#allocation4]   ;;  %s128_s12 = int_to_ptr.vmem [resolvable:$true] %s127_s12 }
  0x87   :  { %s8689_s1 = smov [#allocation18]   ;;  %s8612_s14 = scalar_lea.hbm %s9309_s7, 16384 }
  0x88   :  { %149 = dma.general %s9307_s5, 131072, %s128_s12, %s8688_s13, %s8689_s1, [#allocation19], %s7559_s29, 0  }
  0x89   :  { %v163_v1 = vld [vmem:[#allocation8] sm:$0xff]  ;;  %v164_v10 = vld [vmem:[#allocation8 + $0x8] sm:$0xff]  ;;  %v165_v29 = vld [vmem:[#allocation8 + $0x10] sm:$0xff]  ;;  %s8690_s5 = smov [#allocation3]   ;;  %p8613_p0 = scmp.ne.s32.totalorder %s9309_s7, %s8612_s14 }
  0x8a   :  { %v167_v2 = vld [vmem:[#allocation8 + $0x20] sm:$0xff]  ;;  %v168_v11 = vld [vmem:[#allocation8 + $0x28] sm:$0xff]  ;;  %v169_v30 = vld [vmem:[#allocation8 + $0x30] sm:$0xff]  ;;  %s158_s28 = sshll.u32 %s8690_s5, 4  ;;  %p8616_p1 = scmp.lt.u32.totalorder %s8612_s14, %s9309_s7  ;;  %s159_s28 = int_to_ptr.vmem [resolvable:$true] %s158_s28 }
  0x8b   :  { %v171_v3 = vld [vmem:[#allocation8 + $0x40] sm:$0xff]  ;;  %v7561_v4 = vcombine.high %v163_v1, %v167_v2  ;;  %v7560_v5 = vcombine.low %v163_v1, %v167_v2  ;;  %v172_v12 = vld [vmem:[#allocation8 + $0x48] sm:$0xff]  ;;  %v7563_v14 = vcombine.high %v164_v10, %v168_v11  ;;  %v7562_v15 = vcombine.low %v164_v10, %v168_v11  ;;  %v162_v33 = vld [vmem:[#allocation5] sm:$0xff] }
  0x8c   :  { %v175_v6 = vld [vmem:[#allocation8 + $0x60] sm:$0xff]  ;;  %v176_v16 = vld [vmem:[#allocation8 + $0x68] sm:$0xff]  ;;  %v7565_v35 = vcombine.high %v165_v29, %v169_v30  ;;  %v173_v36 = vld [vmem:[#allocation8 + $0x50] sm:$0xff]  ;;  %v8831_v40 = vpack.c.bf16 %v162_v33, %v162_v33  ;;  %v7564_v42 = vcombine.low %v165_v29, %v169_v30  ;;  %p8618_p2 = pnand %p8616_p1, %p8613_p0 }
  0x8d   :  { %v7569_v7 = vcombine.high %v171_v3, %v175_v6  ;;  %v179_v8 = vld [vmem:[#allocation8 + $0x80] sm:$0xff]  ;;  %360 = vmatprep.subr.bf16.mxu0 %v7561_v4  ;;  %v7568_v13 = vcombine.low %v171_v3, %v175_v6  ;;  %v7571_v18 = vcombine.high %v172_v12, %v176_v16  ;;  %v180_v19 = vld [vmem:[#allocation8 + $0x88] sm:$0xff]  ;;  %401 = vmatprep.subr.bf16.mxu1 %v7563_v14  ;;  %v177_v37 = vld [vmem:[#allocation8 + $0x70] sm:$0xff] }
  0x8e   :  { %v183_v9 = vld [vmem:[#allocation8 + $0xa0] sm:$0xff]  ;;  %361 = vmatpush1.bf16.msra.mxu0 %v7560_v5  ;;  %v184_v20 = vld [vmem:[#allocation8 + $0xa8] sm:$0xff]  ;;  %402 = vmatpush1.bf16.msra.mxu1 %v7562_v15  ;;  %v7570_v23 = vcombine.low %v172_v12, %v176_v16  ;;  %v166_v38 = vld [vmem:[#allocation8 + $0x18] sm:$0xff]  ;;  %v7573_v43 = vcombine.high %v173_v36, %v177_v37  ;;  %v7572_v50 = vcombine.low %v173_v36, %v177_v37 }
  0x8f   :  { %362 = vmatprep.subr.bf16.mxu0 %v7569_v7  ;;  %v7577_v17 = vcombine.high %v179_v8, %v183_v9  ;;  %v187_v21 = vld [vmem:[#allocation8 + $0xc0] sm:$0xff]  ;;  %v7576_v24 = vcombine.low %v179_v8, %v183_v9  ;;  %403 = vmatprep.subr.bf16.mxu1 %v7571_v18  ;;  %v7579_v25 = vcombine.high %v180_v19, %v184_v20  ;;  %v188_v27 = vld [vmem:[#allocation8 + $0xc8] sm:$0xff]  ;;  %v170_v39 = vld [vmem:[#allocation8 + $0x38] sm:$0xff] }
  0x90   :  { %v191_v22 = vld [vmem:[#allocation8 + $0xe0] sm:$0xff]  ;;  %v192_v28 = vld [vmem:[#allocation8 + $0xe8] sm:$0xff]  ;;  %v7578_v31 = vcombine.low %v180_v19, %v184_v20  ;;  %v7567_v44 = vcombine.high %v166_v38, %v170_v39  ;;  %v174_v45 = vld [vmem:[#allocation8 + $0x58] sm:$0xff]  ;;  %v7566_v49 = vcombine.low %v166_v38, %v170_v39 }
  0x91   :  { %v7585_v26 = vcombine.high %v187_v21, %v191_v22  ;;  %v7584_v32 = vcombine.low %v187_v21, %v191_v22  ;;  %v7587_v34 = vcombine.high %v188_v27, %v192_v28  ;;  %v7586_v41 = vcombine.low %v188_v27, %v192_v28  ;;  %v178_v46 = vld [vmem:[#allocation8 + $0x78] sm:$0xff]  ;;  %v181_v47 = vld [vmem:[#allocation8 + $0x90] sm:$0xff] }
  0x92   :  { %363 = vmatpush1.bf16.msra.mxu0 %v7568_v13  ;;  %404 = vmatpush1.bf16.msra.mxu1 %v7570_v23  ;;  %v185_v48 = vld [vmem:[#allocation8 + $0xb0] sm:$0xff]  ;;  %v7575_v51 = vcombine.high %v174_v45, %v178_v46  ;;  %v182_v53 = vld [vmem:[#allocation8 + $0x98] sm:$0xff]  ;;  %v7574_v57 = vcombine.low %v174_v45, %v178_v46 }
  0x93   :  { %364 = vmatprep.subr.bf16.mxu0 %v7577_v17  ;;  %405 = vmatprep.subr.bf16.mxu1 %v7579_v25  ;;  %v7581_v52 = vcombine.high %v181_v47, %v185_v48  ;;  %v186_v54 = vld [vmem:[#allocation8 + $0xb8] sm:$0xff]  ;;  %v189_v55 = vld [vmem:[#allocation8 + $0xd0] sm:$0xff]  ;;  %v7580_v58 = vcombine.low %v181_v47, %v185_v48 }
  0x94   :  { %v193_v56 = vld [vmem:[#allocation8 + $0xf0] sm:$0xff]  ;;  %v7583_v59 = vcombine.high %v182_v53, %v186_v54  ;;  %v190_v61 = vld [vmem:[#allocation8 + $0xd8] sm:$0xff]  ;;  %v7582_v2 = vcombine.low %v182_v53, %v186_v54 }
  0x95   :  { %v7589_v60 = vcombine.high %v189_v55, %v193_v56  ;;  %v194_v62 = vld [vmem:[#allocation8 + $0xf8] sm:$0xff]  ;;  %v633_v63 = vld [vmem:[#allocation11] sm:$0xff]  ;;  %v7588_v3 = vcombine.low %v189_v55, %v193_v56 }
  0x96   :  { %365 = vmatpush1.bf16.msra.mxu0 %v7576_v24  ;;  %406 = vmatpush1.bf16.msra.mxu1 %v7578_v31  ;;  %v637_v1 = vld [vmem:[#allocation11 + $0x20] sm:$0xff]  ;;  %v7591_v4 = vcombine.high %v190_v61, %v194_v62  ;;  %v634_v6 = vld [vmem:[#allocation11 + $0x8] sm:$0xff]  ;;  %v7590_v9 = vcombine.low %v190_v61, %v194_v62 }
  0x97   :  { %366 = vmatprep.subr.bf16.mxu0 %v7585_v26  ;;  %407 = vmatprep.subr.bf16.mxu1 %v7587_v34  ;;  %v7597_v5 = vcombine.high %v633_v63, %v637_v1  ;;  %v641_v7 = vld [vmem:[#allocation11 + $0x40] sm:$0xff]  ;;  %v7596_v10 = vcombine.low %v633_v63, %v637_v1  ;;  %v642_v13 = vld [vmem:[#allocation11 + $0x48] sm:$0xff] }
  0x98   :  { %v645_v8 = vld [vmem:[#allocation11 + $0x60] sm:$0xff]  ;;  %v646_v14 = vld [vmem:[#allocation11 + $0x68] sm:$0xff] }
  0x99   :  { %v7605_v12 = vcombine.high %v641_v7, %v645_v8  ;;  %v649_v15 = vld [vmem:[#allocation11 + $0x80] sm:$0xff]  ;;  %v7604_v18 = vcombine.low %v641_v7, %v645_v8  ;;  %v7607_v19 = vcombine.high %v642_v13, %v646_v14  ;;  %v650_v21 = vld [vmem:[#allocation11 + $0x88] sm:$0xff]  ;;  %v7606_v25 = vcombine.low %v642_v13, %v646_v14 }
  0x9a   :  { %367 = vmatpush1.bf16.msra.mxu0 %v7584_v32  ;;  %408 = vmatpush1.bf16.msra.mxu1 %v7586_v41  ;;  %v653_v16 = vld [vmem:[#allocation11 + $0xa0] sm:$0xff]  ;;  %v654_v22 = vld [vmem:[#allocation11 + $0xa8] sm:$0xff] }
  0x9b   :  { %442 = vmatprep.subr.bf16.mxu0 %v7565_v35  ;;  %483 = vmatprep.subr.bf16.mxu1 %v7567_v44  ;;  %v7613_v20 = vcombine.high %v649_v15, %v653_v16  ;;  %v657_v23 = vld [vmem:[#allocation11 + $0xc0] sm:$0xff]  ;;  %v7612_v26 = vcombine.low %v649_v15, %v653_v16  ;;  %v7615_v27 = vcombine.high %v650_v21, %v654_v22  ;;  %v658_v29 = vld [vmem:[#allocation11 + $0xc8] sm:$0xff] }
  0x9c   :  { %v661_v24 = vld [vmem:[#allocation11 + $0xe0] sm:$0xff]  ;;  %v662_v30 = vld [vmem:[#allocation11 + $0xe8] sm:$0xff]  ;;  %v7614_v33 = vcombine.low %v650_v21, %v654_v22 }
  0x9d   :  { %7592 = vmatmul.mubr.msk.bf16.vlgmr.msra.gmra.mrb[0].mxu0 %vm356_vm0, %v8831_v40  ;;  %7593 = vmatmul.mubr.msk.bf16.vlgmr.msra.gmra.mrb[0].mxu1 %vm356_vm0, %v8831_v40  ;;  %v7621_v28 = vcombine.high %v657_v23, %v661_v24  ;;  %v665_v31 = vld [vmem:[#allocation11 + $0x100] sm:$0xff]  ;;  %v7620_v34 = vcombine.low %v657_v23, %v661_v24  ;;  %v7623_v35 = vcombine.high %v658_v29, %v662_v30  ;;  %v666_v37 = vld [vmem:[#allocation11 + $0x108] sm:$0xff] }
  0x9e   :  { %443 = vmatpush1.bf16.msra.mxu0 %v7564_v42  ;;  %474 = vmatprep.mubr.bf16.mxu0 %v8680_v0  ;;  %v669_v32 = vld [vmem:[#allocation11 + $0x120] sm:$0xff]  ;;  %v670_v38 = vld [vmem:[#allocation11 + $0x128] sm:$0xff]  ;;  %v7622_v41 = vcombine.low %v658_v29, %v662_v30 }
  0x9f   :  { %444 = vmatprep.subr.bf16.mxu0 %v7573_v43  ;;  %484 = vmatpush1.bf16.msra.mxu1 %v7566_v49  ;;  %v7629_v36 = vcombine.high %v665_v31, %v669_v32  ;;  %v673_v39 = vld [vmem:[#allocation11 + $0x140] sm:$0xff]  ;;  %v7628_v42 = vcombine.low %v665_v31, %v669_v32  ;;  %v7631_v43 = vcombine.high %v666_v37, %v670_v38  ;;  %v674_v45 = vld [vmem:[#allocation11 + $0x148] sm:$0xff] }
  0xa0   :  { %515 = vmatprep.mubr.bf16.mxu1 %v8680_v0  ;;  %485 = vmatprep.subr.bf16.mxu1 %v7575_v51  ;;  %v638_v0 = vld [vmem:[#allocation11 + $0x28] sm:$0xff]  ;;  %v681_v47 = vld [vmem:[#allocation11 + $0x180] sm:$0xff]  ;;  %v7630_v49 = vcombine.low %v666_v37, %v670_v38 }
  0xa1   :  { %v7599_v11 = vcombine.high %v634_v6, %v638_v0  ;;  %v7598_v17 = vcombine.low %v634_v6, %v638_v0  ;;  %v678_v46 = vld [vmem:[#allocation11 + $0x168] sm:$0xff]  ;;  %v685_v48 = vld [vmem:[#allocation11 + $0x1a0] sm:$0xff] }
  0xa2   :  { %445 = vmatpush1.bf16.msra.mxu0 %v7572_v50  ;;  %v7639_v51 = vcombine.high %v674_v45, %v678_v46  ;;  %v682_v53 = vld [vmem:[#allocation11 + $0x188] sm:$0xff]  ;;  %v689_v55 = vld [vmem:[#allocation11 + $0x1c0] sm:$0xff] }
  0xa3   :  { %446 = vmatprep.subr.bf16.mxu0 %v7581_v52  ;;  %486 = vmatpush1.bf16.msra.mxu1 %v7574_v57  ;;  %v7645_v52 = vcombine.high %v681_v47, %v685_v48  ;;  %v686_v54 = vld [vmem:[#allocation11 + $0x1a8] sm:$0xff]  ;;  %v693_v56 = vld [vmem:[#allocation11 + $0x1e0] sm:$0xff]  ;;  %v7638_v57 = vcombine.low %v674_v45, %v678_v46 }
  0xa4   :  { %487 = vmatprep.subr.bf16.mxu1 %v7583_v59  ;;  %v7647_v59 = vcombine.high %v682_v53, %v686_v54  ;;  %v690_v61 = vld [vmem:[#allocation11 + $0x1c8] sm:$0xff]  ;;  %v697_v63 = vld [vmem:[#allocation11 + $0x200] sm:$0xff] }
  0xa5   :  { %v694_v62 = vld [vmem:[#allocation11 + $0x1e8] sm:$0xff]  ;;  %v701_v1 = vld [vmem:[#allocation11 + $0x220] sm:$0xff] }
  0xa6   :  { %447 = vmatpush1.bf16.msra.mxu0 %v7580_v58  ;;  %v7644_v58 = vcombine.low %v681_v47, %v685_v48  ;;  %v698_v6 = vld [vmem:[#allocation11 + $0x208] sm:$0xff]  ;;  %v705_v7 = vld [vmem:[#allocation11 + $0x240] sm:$0xff] }
  0xa7   :  { %448 = vmatprep.subr.bf16.mxu0 %v7589_v60  ;;  %488 = vmatpush1.bf16.msra.mxu1 %v7582_v2  ;;  %v7653_v60 = vcombine.high %v689_v55, %v693_v56  ;;  %v7646_v2 = vcombine.low %v682_v53, %v686_v54  ;;  %v702_v0 = vld [vmem:[#allocation11 + $0x228] sm:$0xff]  ;;  %v709_v8 = vld [vmem:[#allocation11 + $0x260] sm:$0xff] }
  0xa8   :  { %489 = vmatprep.subr.bf16.mxu1 %v7591_v4  ;;  %v7655_v4 = vcombine.high %v690_v61, %v694_v62  ;;  %v706_v13 = vld [vmem:[#allocation11 + $0x248] sm:$0xff]  ;;  %v713_v15 = vld [vmem:[#allocation11 + $0x280] sm:$0xff] }
  0xa9   :  { %v710_v14 = vld [vmem:[#allocation11 + $0x268] sm:$0xff]  ;;  %v717_v16 = vld [vmem:[#allocation11 + $0x2a0] sm:$0xff] }
  0xaa   :  { %449 = vmatpush1.bf16.msra.mxu0 %v7588_v3  ;;  %v7652_v3 = vcombine.low %v689_v55, %v693_v56  ;;  %v714_v21 = vld [vmem:[#allocation11 + $0x288] sm:$0xff]  ;;  %v721_v23 = vld [vmem:[#allocation11 + $0x2c0] sm:$0xff] }
  0xab   :  { %3713 = vmatprep.subr.bf16.mxu0 %v7597_v5  ;;  %490 = vmatpush1.bf16.msra.mxu1 %v7590_v9  ;;  %v7661_v5 = vcombine.high %v697_v63, %v701_v1  ;;  %v7654_v9 = vcombine.low %v690_v61, %v694_v62  ;;  %v718_v22 = vld [vmem:[#allocation11 + $0x2a8] sm:$0xff]  ;;  %v725_v24 = vld [vmem:[#allocation11 + $0x2e0] sm:$0xff] }
  0xac   :  { %3877 = vmatprep.subr.bf16.mxu1 %v7599_v11  ;;  %v7663_v11 = vcombine.high %v698_v6, %v702_v0  ;;  %v722_v29 = vld [vmem:[#allocation11 + $0x2c8] sm:$0xff]  ;;  %v729_v31 = vld [vmem:[#allocation11 + $0x300] sm:$0xff] }
  0xad   :  { %7594 = vmatmul.mubr.msk.bf16.vlgmr.msra.gmra.mrb[4].mxu0 %vm356_vm0, %v8831_v40  ;;  %v726_v30 = vld [vmem:[#allocation11 + $0x2e8] sm:$0xff]  ;;  %v733_v32 = vld [vmem:[#allocation11 + $0x320] sm:$0xff] }
  0xae   :  { %3714 = vmatpush1.bf16.msra.mxu0 %v7596_v10  ;;  %7595 = vmatmul.mubr.msk.bf16.vlgmr.msra.gmra.mrb[4].mxu1 %vm356_vm0, %v8831_v40  ;;  %v677_v40 = vld [vmem:[#allocation11 + $0x160] sm:$0xff]  ;;  %v7660_v10 = vcombine.low %v697_v63, %v701_v1  ;;  %v730_v37 = vld [vmem:[#allocation11 + $0x308] sm:$0xff] }
  0xaf   :  { %3715 = vmatprep.subr.bf16.mxu0 %v7605_v12  ;;  %3878 = vmatpush1.bf16.msra.mxu1 %v7598_v17  ;;  %v7637_v44 = vcombine.high %v673_v39, %v677_v40  ;;  %v7636_v50 = vcombine.low %v673_v39, %v677_v40  ;;  %v7669_v12 = vcombine.high %v705_v7, %v709_v8  ;;  %v734_v38 = vld [vmem:[#allocation11 + $0x328] sm:$0xff]  ;;  %v737_v39 = vld [vmem:[#allocation11 + $0x340] sm:$0xff] }
  0xb0   :  { %3879 = vmatprep.subr.bf16.mxu1 %v7607_v19  ;;  %v7662_v17 = vcombine.low %v698_v6, %v702_v0  ;;  %v7671_v19 = vcombine.high %v706_v13, %v710_v14  ;;  %v741_v40 = vld [vmem:[#allocation11 + $0x360] sm:$0xff]  ;;  %v738_v45 = vld [vmem:[#allocation11 + $0x348] sm:$0xff]  ;;  %v7694_v47 = vcombine.low %v730_v37, %v734_v38 }
  0xb1   :  { %v742_v46 = vld [vmem:[#allocation11 + $0x368] sm:$0xff]  ;;  %v7700_v48 = vcombine.low %v737_v39, %v741_v40 }
  0xb2   :  { %3716 = vmatpush1.bf16.msra.mxu0 %v7604_v18  ;;  %v7668_v18 = vcombine.low %v705_v7, %v709_v8  ;;  %v746_v53 = vld [vmem:[#allocation11 + $0x388] sm:$0xff] }
  0xb3   :  { %3717 = vmatprep.subr.bf16.mxu0 %v7613_v20  ;;  %3880 = vmatpush1.bf16.msra.mxu1 %v7606_v25  ;;  %v7677_v20 = vcombine.high %v713_v15, %v717_v16  ;;  %v7670_v25 = vcombine.low %v706_v13, %v710_v14  ;;  %v750_v55 = vld [vmem:[#allocation11 + $0x3a8] sm:$0xff]  ;;  %v8848_v14 = vld [vmem:[#allocation10] ss:$2 sm:$0xff] }
  0xb4   :  { %3881 = vmatprep.subr.bf16.mxu1 %v7615_v27  ;;  %v7679_v27 = vcombine.high %v714_v21, %v718_v22  ;;  %v754_v61 = vld [vmem:[#allocation11 + $0x3c8] sm:$0xff] }
  0xb5   :  { %v758_v63 = vld [vmem:[#allocation11 + $0x3e8] sm:$0xff] }
  0xb6   :  { %3718 = vmatpush1.bf16.msra.mxu0 %v7612_v26  ;;  %v7676_v26 = vcombine.low %v713_v15, %v717_v16  ;;  %v762_v6 = vld [vmem:[#allocation11 + $0x408] sm:$0xff]  ;;  %v8853_v16 = vld [vmem:[#allocation10 + $0x1] ss:$2 sm:$0xff] }
  0xb7   :  { %3719 = vmatprep.subr.bf16.mxu0 %v7621_v28  ;;  %3882 = vmatpush1.bf16.msra.mxu1 %v7614_v33  ;;  %v7685_v28 = vcombine.high %v721_v23, %v725_v24  ;;  %v7678_v33 = vcombine.low %v714_v21, %v718_v22  ;;  %v766_v7 = vld [vmem:[#allocation11 + $0x428] sm:$0xff] }
  0xb8   :  { %3883 = vmatprep.subr.bf16.mxu1 %v7623_v35  ;;  %v7687_v35 = vcombine.high %v722_v29, %v726_v30 }
  0xba   :  { %3720 = vmatpush1.bf16.msra.mxu0 %v7620_v34  ;;  %v7684_v34 = vcombine.low %v721_v23, %v725_v24 }
  0xbb   :  { %3721 = vmatprep.subr.bf16.mxu0 %v7629_v36  ;;  %3884 = vmatpush1.bf16.msra.mxu1 %v7622_v41  ;;  %v7693_v36 = vcombine.high %v729_v31, %v733_v32  ;;  %v7686_v41 = vcombine.low %v722_v29, %v726_v30 }
  0xbc   :  { %3885 = vmatprep.subr.bf16.mxu1 %v7631_v43  ;;  %v7695_v43 = vcombine.high %v730_v37, %v734_v38 }
  0xbe   :  { %3722 = vmatpush1.bf16.msra.mxu0 %v7628_v42  ;;  %v7692_v42 = vcombine.low %v729_v31, %v733_v32 }
  0xbf   :  { %3723 = vmatprep.subr.bf16.mxu0 %v7637_v44  ;;  %3886 = vmatpush1.bf16.msra.mxu1 %v7630_v49  ;;  %v7701_v44 = vcombine.high %v737_v39, %v741_v40  ;;  %v7703_v49 = vcombine.high %v738_v45, %v742_v46  ;;  %v773_v39 = vld [vmem:[#allocation11 + $0x460] sm:$0xff]  ;;  %v770_v40 = vld [vmem:[#allocation11 + $0x448] sm:$0xff] }
  0xc0   :  { %3887 = vmatprep.subr.bf16.mxu1 %v7639_v51  ;;  %v745_v51 = vld [vmem:[#allocation11 + $0x380] sm:$0xff] }
  0xc2   :  { %3724 = vmatpush1.bf16.msra.mxu0 %v7636_v50  ;;  %v7702_v50 = vcombine.low %v738_v45, %v742_v46 }
  0xc3   :  { %3725 = vmatprep.subr.bf16.mxu0 %v7645_v52  ;;  %3888 = vmatpush1.bf16.msra.mxu1 %v7638_v57  ;;  %v749_v52 = vld [vmem:[#allocation11 + $0x3a0] sm:$0xff]  ;;  %v7710_v57 = vcombine.low %v746_v53, %v750_v55 }
  0xc4   :  { %3889 = vmatprep.subr.bf16.mxu1 %v7647_v59  ;;  %v7709_v54 = vcombine.high %v745_v51, %v749_v52  ;;  %v7708_v56 = vcombine.low %v745_v51, %v749_v52  ;;  %v753_v59 = vld [vmem:[#allocation11 + $0x3c0] sm:$0xff]  ;;  %v778_v51 = vld [vmem:[#allocation11 + $0x488] sm:$0xff] }
  0xc5   :  { %v782_v52 = vld [vmem:[#allocation11 + $0x4a8] sm:$0xff] }
  0xc6   :  { %3726 = vmatpush1.bf16.msra.mxu0 %v7644_v58  ;;  %v7711_v58 = vcombine.high %v746_v53, %v750_v55 }
  0xc7   :  { %3727 = vmatprep.subr.bf16.mxu0 %v7653_v60  ;;  %3890 = vmatpush1.bf16.msra.mxu1 %v7646_v2  ;;  %v757_v60 = vld [vmem:[#allocation11 + $0x3e0] sm:$0xff]  ;;  %v7718_v2 = vcombine.low %v754_v61, %v758_v63 }
  0xc8   :  { %3891 = vmatprep.subr.bf16.mxu1 %v7655_v4  ;;  %v7717_v62 = vcombine.high %v753_v59, %v757_v60  ;;  %v7716_v1 = vcombine.low %v753_v59, %v757_v60  ;;  %v761_v4 = vld [vmem:[#allocation11 + $0x400] sm:$0xff]  ;;  %v786_v60 = vld [vmem:[#allocation11 + $0x4c8] sm:$0xff] }
  0xc9   :  { %v789_v59 = vld [vmem:[#allocation11 + $0x4e0] sm:$0xff] }
  0xca   :  { %3728 = vmatpush1.bf16.msra.mxu0 %v7652_v3  ;;  %v7719_v3 = vcombine.high %v754_v61, %v758_v63  ;;  %v790_v61 = vld [vmem:[#allocation11 + $0x4e8] sm:$0xff]  ;;  %v7742_v63 = vcombine.low %v778_v51, %v782_v52 }
  0xcb   :  { %3729 = vmatprep.subr.bf16.mxu0 %v7661_v5  ;;  %3892 = vmatpush1.bf16.msra.mxu1 %v7654_v9  ;;  %v765_v5 = vld [vmem:[#allocation11 + $0x420] sm:$0xff]  ;;  %v7726_v9 = vcombine.low %v762_v6, %v766_v7 }
  0xcc   :  { %3893 = vmatprep.subr.bf16.mxu1 %v7663_v11  ;;  %v7725_v0 = vcombine.high %v761_v4, %v765_v5  ;;  %v7724_v8 = vcombine.low %v761_v4, %v765_v5  ;;  %v526_v11 = vlaneseq  ;;  %v793_v4 = vld [vmem:[#allocation11 + $0x500] sm:$0xff] }
  0xce   :  { %3730 = vmatpush1.bf16.msra.mxu0 %v7660_v10  ;;  %v7727_v10 = vcombine.high %v762_v6, %v766_v7  ;;  %v797_v6 = vld [vmem:[#allocation11 + $0x520] sm:$0xff]  ;;  %v798_v7 = vld [vmem:[#allocation11 + $0x528] sm:$0xff] }
  0xcf   :  { %3731 = vmatprep.subr.bf16.mxu0 %v7669_v12  ;;  %3894 = vmatpush1.bf16.msra.mxu1 %v7662_v17  ;;  %v8843_v12 = vshrl.u32 %v526_v11, 7  ;;  %v7750_v11 = vcombine.low %v786_v60, %v790_v61 }
  0xd0   :  { %3895 = vmatprep.subr.bf16.mxu1 %v7671_v19 }
  0xd1   :  { %v8846_v13 = vsub.s32 0, %v8843_v12  ;;  %v8851_v15 = vsub.s32 1, %v8843_v12 }
  0xd2   :  { %3732 = vmatpush1.bf16.msra.mxu0 %v7668_v18  ;;  %v8858_v18 = vsub.s32 3, %v8843_v12 }
  0xd3   :  { %3733 = vmatprep.subr.bf16.mxu0 %v7677_v20  ;;  %3896 = vmatpush1.bf16.msra.mxu1 %v7670_v25  ;;  %v529_v17 = vrot.slane %v8848_v14, %v8846_v13  ;;  %v533_v19 = vrot.slane %v8848_v14, %v8851_v15  ;;  %v580_v20 = vrot.slane %v8853_v16, %v8846_v13 }
  0xd4   :  { %3897 = vmatprep.subr.bf16.mxu1 %v7679_v27  ;;  %v584_v22 = vrot.slane %v8853_v16, %v8851_v15  ;;  %v541_v25 = vrot.slane %v8848_v14, %v8858_v18  ;;  %v592_v31 = vrot.slane %v8853_v16, %v8858_v18 }
  0xd6   :  { %3734 = vmatpush1.bf16.msra.mxu0 %v7676_v26 }
  0xd7   :  { %3735 = vmatprep.subr.bf16.mxu0 %v7685_v28  ;;  %3898 = vmatpush1.bf16.msra.mxu1 %v7678_v33 }
  0xd8   :  { %3899 = vmatprep.subr.bf16.mxu1 %v7687_v35  ;;  %v769_v35 = vld [vmem:[#allocation11 + $0x440] sm:$0xff] }
  0xd9   :  { %v7733_v46 = vcombine.high %v769_v35, %v773_v39 }
  0xda   :  { %3736 = vmatpush1.bf16.msra.mxu0 %v7684_v34 }
  0xdb   :  { %3737 = vmatprep.subr.bf16.mxu0 %v7693_v36  ;;  %3900 = vmatpush1.bf16.msra.mxu1 %v7686_v41  ;;  %v774_v41 = vld [vmem:[#allocation11 + $0x468] sm:$0xff] }
  0xdc   :  { %3901 = vmatprep.subr.bf16.mxu1 %v7695_v43  ;;  %v7734_v55 = vcombine.low %v770_v40, %v774_v41 }
  0xde   :  { %3738 = vmatpush1.bf16.msra.mxu0 %v7692_v42 }
  0xdf   :  { %3739 = vmatprep.subr.bf16.mxu0 %v7701_v44  ;;  %3902 = vmatpush1.bf16.msra.mxu1 %v7694_v47  ;;  %v7735_v47 = vcombine.high %v770_v40, %v774_v41  ;;  %v821_v41 = vld [vmem:[#allocation11 + $0x5e0] sm:$0xff] }
  0xe0   :  { %3903 = vmatprep.subr.bf16.mxu1 %v7703_v49 }
  0xe2   :  { %3740 = vmatpush1.bf16.msra.mxu0 %v7700_v48  ;;  %v777_v48 = vld [vmem:[#allocation11 + $0x480] sm:$0xff] }
  0xe3   :  { %3904 = vmatpush1.bf16.msra.mxu1 %v7702_v50  ;;  %3741 = vmatprep.subr.bf16.mxu0 %v7709_v54  ;;  %v781_v50 = vld [vmem:[#allocation11 + $0x4a0] sm:$0xff]  ;;  %v7732_v54 = vcombine.low %v769_v35, %v773_v39 }
  0xe4   :  { %3905 = vmatprep.subr.bf16.mxu1 %v7711_v58  ;;  %v785_v58 = vld [vmem:[#allocation11 + $0x4c0] sm:$0xff] }
  0xe5   :  { %v817_v39 = vld [vmem:[#allocation11 + $0x5c0] sm:$0xff] }
  0xe6   :  { %3742 = vmatpush1.bf16.msra.mxu0 %v7708_v56  ;;  %v7741_v56 = vcombine.high %v777_v48, %v781_v50 }
  0xe7   :  { %3906 = vmatpush1.bf16.msra.mxu1 %v7710_v57  ;;  %3743 = vmatprep.subr.bf16.mxu0 %v7717_v62  ;;  %v7743_v57 = vcombine.high %v778_v51, %v782_v52  ;;  %v7740_v62 = vcombine.low %v777_v48, %v781_v50  ;;  %v825_v51 = vld [vmem:[#allocation11 + $0x600] sm:$0xff] }
  0xe8   :  { %3907 = vmatprep.subr.bf16.mxu1 %v7719_v3  ;;  %v7751_v3 = vcombine.high %v786_v60, %v790_v61  ;;  %v829_v52 = vld [vmem:[#allocation11 + $0x620] sm:$0xff] }
  0xe9   :  { %v833_v60 = vld [vmem:[#allocation11 + $0x640] sm:$0xff] }
  0xea   :  { %3744 = vmatpush1.bf16.msra.mxu0 %v7716_v1  ;;  %v837_v61 = vld [vmem:[#allocation11 + $0x660] sm:$0xff] }
  0xeb   :  { %3908 = vmatpush1.bf16.msra.mxu1 %v7718_v2  ;;  %3754 = vmatprep.subr.bf16.mxu0 %v7725_v0  ;;  %v7749_v2 = vcombine.high %v785_v58, %v789_v59  ;;  %v794_v0 = vld [vmem:[#allocation11 + $0x508] sm:$0xff] }
  0xec   :  { %3918 = vmatprep.subr.bf16.mxu1 %v7727_v10  ;;  %v7748_v10 = vcombine.low %v785_v58, %v789_v59  ;;  %v7789_v58 = vcombine.high %v825_v51, %v829_v52 }
 0x170   :  { %v394_v21 = vpop.f32.mrb[0].mxu0  ;;  %v8868_v30 = vpop.f32.mrb[0].mxu1 }
 0x171   :  { %v566_v23 = vmul.f32 %v529_v17, %v394_v21  ;;  %v396_v24 = vpop.f32.mrb[1].mxu0  ;;  %v437_v33 = vpop.f32.mrb[1].mxu1  ;;  %v7757_v17 = vcombine.high %v793_v4, %v797_v6  ;;  %v805_v21 = vld [vmem:[#allocation11 + $0x560] sm:$0xff] }
 0x172   :  { %v567_v26 = vmul.f32 %v533_v19, %v396_v24  ;;  %v398_v27 = vpop.f32.mrb[2].mxu0  ;;  %v569_v36 = vmul.f32 %v541_v25, %v437_v33  ;;  %v439_v37 = vpop.f32.mrb[2].mxu1  ;;  %v7759_v19 = vcombine.high %v794_v0, %v798_v7  ;;  %v7756_v24 = vcombine.low %v793_v4, %v797_v6  ;;  %v814_v33 = vld [vmem:[#allocation11 + $0x5a8] sm:$0xff] }
 0x173   :  { %v617_v28 = vadd.f32 %v580_v20, %v566_v23  ;;  %v399_v29 = vpop.f32.mrb[3].mxu0  ;;  %v440_v42 = vpop.f32.mrb[3].mxu1  ;;  %v801_v20 = vld [vmem:[#allocation11 + $0x540] sm:$0xff]  ;;  %v806_v23 = vld [vmem:[#allocation11 + $0x568] sm:$0xff]  ;;  %v7758_v25 = vcombine.low %v794_v0, %v798_v7  ;;  %v7797_v4 = vcombine.high %v833_v60, %v837_v61 }
 0x174   :  { %v618_v32 = vadd.f32 %v584_v22, %v567_v26  ;;  %v620_v43 = vadd.f32 %v592_v31, %v569_v36  ;;  %v802_v22 = vld [vmem:[#allocation11 + $0x548] sm:$0xff]  ;;  %v7765_v26 = vcombine.high %v801_v20, %v805_v21  ;;  %v813_v31 = vld [vmem:[#allocation11 + $0x5a0] sm:$0xff] }
 0x175   :  { %v625_v34 = vmax.f32 %v617_v28, 0.0  ;;  %v7767_v27 = vcombine.high %v802_v22, %v806_v23  ;;  %v809_v28 = vld [vmem:[#allocation11 + $0x580] sm:$0xff]  ;;  %v7766_v35 = vcombine.low %v802_v22, %v806_v23  ;;  %v818_v42 = vld [vmem:[#allocation11 + $0x5c8] sm:$0xff] }
 0x176   :  { %v626_v38 = vmax.f32 %v618_v32, 0.0  ;;  %v628_v49 = vmax.f32 %v620_v43, 0.0  ;;  %v810_v32 = vld [vmem:[#allocation11 + $0x588] sm:$0xff]  ;;  %v7773_v37 = vcombine.high %v809_v28, %v813_v31  ;;  %v841_v0 = vld [vmem:[#allocation11 + $0x680] sm:$0xff] }
 0x177   :  { %v8874_v45 = vpack.c.bf16 %v625_v34, %v625_v34  ;;  %v7764_v34 = vcombine.low %v801_v20, %v805_v21  ;;  %v822_v43 = vld [vmem:[#allocation11 + $0x5e8] sm:$0xff]  ;;  %v7774_v48 = vcombine.low %v810_v32, %v814_v33  ;;  %v845_v7 = vld [vmem:[#allocation11 + $0x6a0] sm:$0xff] }
 0x178   :  { %v8872_v44 = vpack.c.bf16 %v626_v38, %v626_v38  ;;  %v8880_v53 = vpack.c.bf16 %v628_v49, %v628_v49  ;;  %v7775_v38 = vcombine.high %v810_v32, %v814_v33  ;;  %v7781_v49 = vcombine.high %v817_v39, %v821_v41  ;;  %v849_v20 = vld [vmem:[#allocation11 + $0x6c0] sm:$0xff]  ;;  %v850_v22 = vld [vmem:[#allocation11 + $0x6c8] sm:$0xff] }
 0x179   :  { %v7783_v50 = vcombine.high %v818_v42, %v822_v43  ;;  %v853_v21 = vld [vmem:[#allocation11 + $0x6e0] sm:$0xff]  ;;  %v854_v23 = vld [vmem:[#allocation11 + $0x6e8] sm:$0xff] }
 0x17a   :  { %3745 = vmatprep.mubr.bf16.mxu0 %v8872_v44  ;;  %3909 = vmatprep.mubr.bf16.mxu1 %v8872_v44  ;;  %v858_v32 = vld [vmem:[#allocation11 + $0x708] sm:$0xff] }
 0x17b   :  { %3746 = vmatmul.mubr.bf16.vlgmr.msra.gmra.mrb[8].mxu0 %v8874_v45  ;;  %3910 = vmatmul.mubr.bf16.vlgmr.msra.gmra.mrb[8].mxu1 %v8874_v45  ;;  %v862_v33 = vld [vmem:[#allocation11 + $0x728] sm:$0xff] }
 0x17c   :  { %3755 = vmatpush1.bf16.msra.mxu0 %v7724_v8  ;;  %3919 = vmatpush1.bf16.msra.mxu1 %v7726_v9 }
 0x17d   :  { %3756 = vmatprep.subr.bf16.mxu0 %v7733_v46  ;;  %3920 = vmatprep.subr.bf16.mxu1 %v7735_v47  ;;  %v7772_v47 = vcombine.low %v809_v28, %v813_v31  ;;  %v857_v28 = vld [vmem:[#allocation11 + $0x700] sm:$0xff] }
 0x17e   :  { %3786 = vmatprep.mubr.bf16.mxu0 %v8880_v53  ;;  %3950 = vmatprep.mubr.bf16.mxu1 %v8880_v53  ;;  %v861_v31 = vld [vmem:[#allocation11 + $0x720] sm:$0xff] }
 0x180   :  { %3757 = vmatpush1.bf16.msra.mxu0 %v7732_v54  ;;  %3921 = vmatpush1.bf16.msra.mxu1 %v7734_v55  ;;  %v8884_v1 = vpop.f32.mrb[4].mxu0  ;;  %v826_v54 = vld [vmem:[#allocation11 + $0x608] sm:$0xff] }
 0x181   :  { %3758 = vmatprep.subr.bf16.mxu0 %v7741_v56  ;;  %3922 = vmatprep.subr.bf16.mxu1 %v7743_v57  ;;  %v8886_v5 = vpop.f32.mrb[5].mxu0  ;;  %v8888_v29 = vpop.f32.mrb[4].mxu1  ;;  %v830_v55 = vld [vmem:[#allocation11 + $0x628] sm:$0xff]  ;;  %v7780_v56 = vcombine.low %v817_v39, %v821_v41  ;;  %v7782_v57 = vcombine.low %v818_v42, %v822_v43  ;;  %v7823_v39 = vcombine.high %v858_v32, %v862_v33  ;;  %v869_v41 = vld [vmem:[#allocation11 + $0x760] sm:$0xff] }
 0x182   :  { %v480_v8 = vpop.f32.mrb[6].mxu0  ;;  %v8890_v36 = vpop.f32.mrb[5].mxu1  ;;  %v7791_v59 = vcombine.high %v826_v54, %v830_v55  ;;  %v866_v42 = vld [vmem:[#allocation11 + $0x748] sm:$0xff] }
 0x183   :  { %v481_v9 = vpop.f32.mrb[7].mxu0  ;;  %v521_v40 = vpop.f32.mrb[6].mxu1  ;;  %v842_v8 = vld [vmem:[#allocation11 + $0x688] sm:$0xff] }
 0x184   :  { %3759 = vmatpush1.bf16.msra.mxu0 %v7740_v62  ;;  %3923 = vmatpush1.bf16.msra.mxu1 %v7742_v63  ;;  %v522_v46 = vpop.f32.mrb[7].mxu1  ;;  %v834_v62 = vld [vmem:[#allocation11 + $0x648] sm:$0xff]  ;;  %v865_v40 = vld [vmem:[#allocation11 + $0x740] sm:$0xff] }
 0x185   :  { %3760 = vmatprep.subr.bf16.mxu0 %v7749_v2  ;;  %3924 = vmatprep.subr.bf16.mxu1 %v7751_v3  ;;  %v838_v63 = vld [vmem:[#allocation11 + $0x668] sm:$0xff]  ;;  %v7788_v2 = vcombine.low %v825_v51, %v829_v52  ;;  %v7790_v3 = vcombine.low %v826_v54, %v830_v55  ;;  %v8896_v46 = vsub.s32 5, %v8843_v12  ;;  %v873_v52 = vld [vmem:[#allocation11 + $0x780] sm:$0xff] }
 0x186   :  { %v7799_v6 = vcombine.high %v834_v62, %v838_v63  ;;  %v846_v9 = vld [vmem:[#allocation11 + $0x6a8] sm:$0xff]  ;;  %v877_v54 = vld [vmem:[#allocation11 + $0x7a0] sm:$0xff] }
 0x187   :  { %v870_v43 = vld [vmem:[#allocation11 + $0x768] sm:$0xff] }
 0x188   :  { %3761 = vmatpush1.bf16.msra.mxu0 %v7748_v10  ;;  %3925 = vmatpush1.bf16.msra.mxu1 %v7750_v11  ;;  %v7796_v10 = vcombine.low %v833_v60, %v837_v61  ;;  %v7798_v11 = vcombine.low %v834_v62, %v838_v63  ;;  %v7831_v51 = vcombine.high %v866_v42, %v870_v43  ;;  %v874_v55 = vld [vmem:[#allocation11 + $0x788] sm:$0xff] }
 0x189   :  { %3762 = vmatprep.subr.bf16.mxu0 %v7757_v17  ;;  %3926 = vmatprep.subr.bf16.mxu1 %v7759_v19  ;;  %v7805_v17 = vcombine.high %v841_v0, %v845_v7  ;;  %v7807_v19 = vcombine.high %v842_v8, %v846_v9  ;;  %v7828_v60 = vcombine.low %v865_v40, %v869_v41 }
 0x18a   :  { %v7830_v61 = vcombine.low %v866_v42, %v870_v43  ;;  %v7837_v62 = vcombine.high %v873_v52, %v877_v54  ;;  %v909_v42 = vld [vmem:[#allocation11 + $0x8a0] sm:$0xff]  ;;  %v906_v43 = vld [vmem:[#allocation11 + $0x888] sm:$0xff] }
 0x18c   :  { %3763 = vmatpush1.bf16.msra.mxu0 %v7756_v24  ;;  %3927 = vmatpush1.bf16.msra.mxu1 %v7758_v25  ;;  %v7804_v24 = vcombine.low %v841_v0, %v845_v7  ;;  %v7806_v25 = vcombine.low %v842_v8, %v846_v9  ;;  %v7836_v8 = vcombine.low %v873_v52, %v877_v54  ;;  %v913_v54 = vld [vmem:[#allocation11 + $0x8c0] sm:$0xff] }
 0x18d   :  { %3764 = vmatprep.subr.bf16.mxu0 %v7765_v26  ;;  %3928 = vmatprep.subr.bf16.mxu1 %v7767_v27  ;;  %v7813_v26 = vcombine.high %v849_v20, %v853_v21  ;;  %v7815_v27 = vcombine.high %v850_v22, %v854_v23 }
 0x190   :  { %3765 = vmatpush1.bf16.msra.mxu0 %v7764_v34  ;;  %3929 = vmatpush1.bf16.msra.mxu1 %v7766_v35  ;;  %v8893_v34 = vsub.s32 2, %v8843_v12  ;;  %v7812_v35 = vcombine.low %v849_v20, %v853_v21  ;;  %v890_v20 = vld [vmem:[#allocation11 + $0x808] sm:$0xff] }
 0x191   :  { %3766 = vmatprep.subr.bf16.mxu0 %v7773_v37  ;;  %3930 = vmatprep.subr.bf16.mxu1 %v7775_v38  ;;  %v7814_v37 = vcombine.low %v850_v22, %v854_v23  ;;  %v7821_v38 = vcombine.high %v857_v28, %v861_v31  ;;  %v894_v21 = vld [vmem:[#allocation11 + $0x828] sm:$0xff] }
 0x194   :  { %3767 = vmatpush1.bf16.msra.mxu0 %v7772_v47  ;;  %3931 = vmatpush1.bf16.msra.mxu1 %v7774_v48  ;;  %v537_v47 = vrot.slane %v8848_v14, %v8893_v34  ;;  %v7820_v48 = vcombine.low %v857_v28, %v861_v31  ;;  %v901_v28 = vld [vmem:[#allocation11 + $0x860] sm:$0xff]  ;;  %v898_v31 = vld [vmem:[#allocation11 + $0x848] sm:$0xff] }
 0x195   :  { %3768 = vmatprep.subr.bf16.mxu0 %v7781_v49  ;;  %3932 = vmatprep.subr.bf16.mxu1 %v7783_v50  ;;  %v7822_v49 = vcombine.low %v858_v32, %v862_v33  ;;  %v7829_v50 = vcombine.high %v865_v40, %v869_v41  ;;  %v902_v32 = vld [vmem:[#allocation11 + $0x868] sm:$0xff]  ;;  %v905_v41 = vld [vmem:[#allocation11 + $0x880] sm:$0xff] }
 0x196   :  { %v7863_v40 = vcombine.high %v898_v31, %v902_v32 }
 0x198   :  { %3769 = vmatpush1.bf16.msra.mxu0 %v7780_v56  ;;  %3933 = vmatpush1.bf16.msra.mxu1 %v7782_v57  ;;  %v878_v56 = vld [vmem:[#allocation11 + $0x7a8] sm:$0xff]  ;;  %v549_v57 = vrot.slane %v8848_v14, %v8896_v46 }
 0x199   :  { %3770 = vmatprep.subr.bf16.mxu0 %v7789_v58  ;;  %3934 = vmatprep.subr.bf16.mxu1 %v7791_v59  ;;  %v568_v58 = vmul.f32 %v537_v47, %v8868_v30  ;;  %v588_v59 = vrot.slane %v8853_v16, %v8893_v34  ;;  %v7839_v63 = vcombine.high %v874_v55, %v878_v56  ;;  %v910_v47 = vld [vmem:[#allocation11 + $0x8a8] sm:$0xff] }
 0x19a   :  { %v571_v0 = vmul.f32 %v549_v57, %v8886_v5  ;;  %v600_v30 = vrot.slane %v8853_v16, %v8896_v46  ;;  %v7838_v9 = vcombine.low %v874_v55, %v878_v56  ;;  %v7871_v52 = vcombine.high %v906_v43, %v910_v47  ;;  %v917_v55 = vld [vmem:[#allocation11 + $0x8e0] sm:$0xff]  ;;  %v914_v56 = vld [vmem:[#allocation11 + $0x8c8] sm:$0xff] }
 0x19b   :  { %v619_v7 = vadd.f32 %v588_v59, %v568_v58  ;;  %v918_v57 = vld [vmem:[#allocation11 + $0x8e8] sm:$0xff]  ;;  %v7868_v58 = vcombine.low %v905_v41, %v909_v42  ;;  %v7870_v59 = vcombine.low %v906_v43, %v910_v47 }
 0x19c   :  { %3771 = vmatpush1.bf16.msra.mxu0 %v7788_v2  ;;  %3935 = vmatpush1.bf16.msra.mxu1 %v7790_v3  ;;  %v881_v2 = vld [vmem:[#allocation11 + $0x7c0] sm:$0xff]  ;;  %v622_v22 = vadd.f32 %v600_v30, %v571_v0  ;;  %v954_v43 = vld [vmem:[#allocation11 + $0xa08] sm:$0xff] }
 0x19d   :  { %3772 = vmatprep.subr.bf16.mxu0 %v7797_v4  ;;  %3936 = vmatprep.subr.bf16.mxu1 %v7799_v6  ;;  %v885_v3 = vld [vmem:[#allocation11 + $0x7e0] sm:$0xff]  ;;  %v882_v4 = vld [vmem:[#allocation11 + $0x7c8] sm:$0xff]  ;;  %v627_v23 = vmax.f32 %v619_v7, 0.0 }
 0x19e   :  { %v886_v6 = vld [vmem:[#allocation11 + $0x7e8] sm:$0xff]  ;;  %v7844_v5 = vcombine.low %v881_v2, %v885_v3  ;;  %v630_v33 = vmax.f32 %v622_v22, 0.0  ;;  %v929_v7 = vld [vmem:[#allocation11 + $0x940] sm:$0xff] }
 0x19f   :  { %v941_v22 = vld [vmem:[#allocation11 + $0x9a0] sm:$0xff]  ;;  %v958_v47 = vld [vmem:[#allocation11 + $0xa28] sm:$0xff] }
 0x1a0   :  { %3773 = vmatpush1.bf16.msra.mxu0 %v7796_v10  ;;  %3937 = vmatpush1.bf16.msra.mxu1 %v7798_v11  ;;  %v7845_v10 = vcombine.high %v881_v2, %v885_v3  ;;  %v7847_v11 = vcombine.high %v882_v4, %v886_v6  ;;  %v922_v2 = vld [vmem:[#allocation11 + $0x908] sm:$0xff] }
 0x1a1   :  { %3774 = vmatprep.subr.bf16.mxu0 %v7805_v17  ;;  %3938 = vmatprep.subr.bf16.mxu1 %v7807_v19  ;;  %v889_v17 = vld [vmem:[#allocation11 + $0x800] sm:$0xff]  ;;  %v926_v3 = vld [vmem:[#allocation11 + $0x928] sm:$0xff] }
 0x1a2   :  { %v893_v19 = vld [vmem:[#allocation11 + $0x820] sm:$0xff]  ;;  %v7887_v30 = vcombine.high %v922_v2, %v926_v3 }
 0x1a4   :  { %3775 = vmatpush1.bf16.msra.mxu0 %v7804_v24  ;;  %3939 = vmatpush1.bf16.msra.mxu1 %v7806_v25  ;;  %v7846_v24 = vcombine.low %v882_v4, %v886_v6  ;;  %v7853_v25 = vcombine.high %v889_v17, %v893_v19  ;;  %v7876_v4 = vcombine.low %v913_v54, %v917_v55 }
 0x1a5   :  { %3776 = vmatprep.subr.bf16.mxu0 %v7813_v26  ;;  %3940 = vmatprep.subr.bf16.mxu1 %v7815_v27  ;;  %v7855_v26 = vcombine.high %v890_v20, %v894_v21  ;;  %v897_v27 = vld [vmem:[#allocation11 + $0x840] sm:$0xff]  ;;  %v7878_v6 = vcombine.low %v914_v56, %v918_v57 }
 0x1a8   :  { %3777 = vmatpush1.bf16.msra.mxu0 %v7812_v35  ;;  %3941 = vmatpush1.bf16.msra.mxu1 %v7814_v37  ;;  %v8908_v35 = vpack.c.bf16 %v627_v23, %v627_v23  ;;  %v7852_v37 = vcombine.low %v889_v17, %v893_v19  ;;  %v7886_v17 = vcombine.low %v922_v2, %v926_v3  ;;  %v938_v23 = vld [vmem:[#allocation11 + $0x988] sm:$0xff] }
 0x1a9   :  { %3778 = vmatprep.subr.bf16.mxu0 %v7821_v38  ;;  %3942 = vmatprep.subr.bf16.mxu1 %v7823_v39  ;;  %v7854_v38 = vcombine.low %v890_v20, %v894_v21  ;;  %v7861_v39 = vcombine.high %v897_v27, %v901_v28  ;;  %v937_v21 = vld [vmem:[#allocation11 + $0x980] sm:$0xff]  ;;  %v970_v2 = vld [vmem:[#allocation11 + $0xa88] sm:$0xff] }
 0x1aa   :  { %v974_v3 = vld [vmem:[#allocation11 + $0xaa8] sm:$0xff] }
 0x1ac   :  { %3779 = vmatpush1.bf16.msra.mxu0 %v7820_v48  ;;  %3943 = vmatpush1.bf16.msra.mxu1 %v7822_v49  ;;  %v8910_v48 = vpack.c.bf16 %v630_v33, %v630_v33  ;;  %v7860_v49 = vcombine.low %v897_v27, %v901_v28  ;;  %v945_v28 = vld [vmem:[#allocation11 + $0x9c0] sm:$0xff]  ;;  %v950_v33 = vld [vmem:[#allocation11 + $0x9e8] sm:$0xff] }
 0x1ad   :  { %3780 = vmatprep.subr.bf16.mxu0 %v7829_v50  ;;  %3944 = vmatprep.subr.bf16.mxu1 %v7831_v51  ;;  %v7862_v50 = vcombine.low %v898_v31, %v902_v32  ;;  %v7869_v51 = vcombine.high %v905_v41, %v909_v42  ;;  %v949_v31 = vld [vmem:[#allocation11 + $0x9e0] sm:$0xff]  ;;  %v946_v32 = vld [vmem:[#allocation11 + $0x9c8] sm:$0xff] }
 0x1ae   :  { %v953_v41 = vld [vmem:[#allocation11 + $0xa00] sm:$0xff] }
 0x1af   :  { %v957_v42 = vld [vmem:[#allocation11 + $0xa20] sm:$0xff] }
 0x1b0   :  { %3781 = vmatpush1.bf16.msra.mxu0 %v7828_v60  ;;  %3945 = vmatpush1.bf16.msra.mxu1 %v7830_v61  ;;  %v7877_v60 = vcombine.high %v913_v54, %v917_v55  ;;  %v7879_v61 = vcombine.high %v914_v56, %v918_v57  ;;  %v961_v54 = vld [vmem:[#allocation11 + $0xa40] sm:$0xff]  ;;  %v962_v56 = vld [vmem:[#allocation11 + $0xa48] sm:$0xff] }
 0x1b1   :  { %3782 = vmatprep.subr.bf16.mxu0 %v7837_v62  ;;  %3946 = vmatprep.subr.bf16.mxu1 %v7839_v63  ;;  %v921_v62 = vld [vmem:[#allocation11 + $0x900] sm:$0xff]  ;;  %v966_v57 = vld [vmem:[#allocation11 + $0xa68] sm:$0xff] }
 0x1b2   :  { %v925_v63 = vld [vmem:[#allocation11 + $0x920] sm:$0xff] }
 0x1b3   :  { %v7885_v0 = vcombine.high %v921_v62, %v925_v63  ;;  %v965_v55 = vld [vmem:[#allocation11 + $0xa60] sm:$0xff] }
 0x1b4   :  { %3783 = vmatpush1.bf16.msra.mxu0 %v7836_v8  ;;  %3947 = vmatpush1.bf16.msra.mxu1 %v7838_v9  ;;  %v933_v8 = vld [vmem:[#allocation11 + $0x960] sm:$0xff]  ;;  %v930_v9 = vld [vmem:[#allocation11 + $0x948] sm:$0xff] }
 0x1b5   :  { %3784 = vmatprep.subr.bf16.mxu0 %v7845_v10  ;;  %3948 = vmatprep.subr.bf16.mxu1 %v7847_v11  ;;  %v934_v10 = vld [vmem:[#allocation11 + $0x968] sm:$0xff]  ;;  %v7884_v11 = vcombine.low %v921_v62, %v925_v63  ;;  %v7893_v19 = vcombine.high %v929_v7, %v933_v8  ;;  %v969_v62 = vld [vmem:[#allocation11 + $0xa80] sm:$0xff] }
 0x1b6   :  { %v7895_v20 = vcombine.high %v930_v9, %v934_v10  ;;  %v973_v63 = vld [vmem:[#allocation11 + $0xaa0] sm:$0xff] }
 0x1b8   :  { %3785 = vmatpush1.bf16.msra.mxu0 %v7844_v5  ;;  %3949 = vmatpush1.bf16.msra.mxu1 %v7846_v24  ;;  %v942_v5 = vld [vmem:[#allocation11 + $0x9a8] sm:$0xff]  ;;  %v7892_v24 = vcombine.low %v929_v7, %v933_v8  ;;  %v977_v7 = vld [vmem:[#allocation11 + $0xac0] sm:$0xff] }
 0x1b9   :  { %3795 = vmatprep.subr.bf16.mxu0 %v7853_v25  ;;  %3959 = vmatprep.subr.bf16.mxu1 %v7855_v26  ;;  %v7894_v25 = vcombine.low %v930_v9, %v934_v10  ;;  %v7901_v26 = vcombine.high %v937_v21, %v941_v22  ;;  %v7903_v27 = vcombine.high %v938_v23, %v942_v5  ;;  %v981_v8 = vld [vmem:[#allocation11 + $0xae0] sm:$0xff]  ;;  %v978_v9 = vld [vmem:[#allocation11 + $0xac8] sm:$0xff] }
 0x1ba   :  { %v982_v10 = vld [vmem:[#allocation11 + $0xae8] sm:$0xff] }
 0x1bb   :  { %3787 = vmatmul.mubr.bf16.vlgmr.msra.gmra.mrb[8].mxu0 %v8908_v35  ;;  %3951 = vmatmul.mubr.bf16.vlgmr.msra.gmra.mrb[8].mxu1 %v8908_v35 }
 0x1bc   :  { %3796 = vmatpush1.bf16.msra.mxu0 %v7852_v37  ;;  %3960 = vmatpush1.bf16.msra.mxu1 %v7854_v38  ;;  %v7900_v37 = vcombine.low %v937_v21, %v941_v22  ;;  %v7902_v38 = vcombine.low %v938_v23, %v942_v5  ;;  %v985_v21 = vld [vmem:[#allocation11 + $0xb00] sm:$0xff]  ;;  %v986_v23 = vld [vmem:[#allocation11 + $0xb08] sm:$0xff] }
 0x1bd   :  { %3797 = vmatprep.subr.bf16.mxu0 %v7861_v39  ;;  %3961 = vmatprep.subr.bf16.mxu1 %v7863_v40  ;;  %v7909_v39 = vcombine.high %v945_v28, %v949_v31  ;;  %v7911_v40 = vcombine.high %v946_v32, %v950_v33  ;;  %v989_v22 = vld [vmem:[#allocation11 + $0xb20] sm:$0xff]  ;;  %v990_v5 = vld [vmem:[#allocation11 + $0xb28] sm:$0xff] }
 0x1be   :  { %3827 = vmatprep.mubr.bf16.mxu0 %v8910_v48  ;;  %3991 = vmatprep.mubr.bf16.mxu1 %v8910_v48 }
 0x1c0   :  { %3798 = vmatpush1.bf16.msra.mxu0 %v7860_v49  ;;  %3962 = vmatpush1.bf16.msra.mxu1 %v7862_v50  ;;  %v7908_v49 = vcombine.low %v945_v28, %v949_v31  ;;  %v7910_v50 = vcombine.low %v946_v32, %v950_v33  ;;  %v7951_v28 = vcombine.high %v986_v23, %v990_v5  ;;  %v993_v31 = vld [vmem:[#allocation11 + $0xb40] sm:$0xff]  ;;  %v994_v33 = vld [vmem:[#allocation11 + $0xb48] sm:$0xff] }
 0x1c1   :  { %3799 = vmatprep.subr.bf16.mxu0 %v7869_v51  ;;  %3963 = vmatprep.subr.bf16.mxu1 %v7871_v52  ;;  %v7917_v51 = vcombine.high %v953_v41, %v957_v42  ;;  %v7919_v52 = vcombine.high %v954_v43, %v958_v47  ;;  %v997_v32 = vld [vmem:[#allocation11 + $0xb60] sm:$0xff] }
 0x1c4   :  { %3800 = vmatpush1.bf16.msra.mxu0 %v7868_v58  ;;  %3964 = vmatpush1.bf16.msra.mxu1 %v7870_v59  ;;  %v7916_v58 = vcombine.low %v953_v41, %v957_v42  ;;  %v7918_v59 = vcombine.low %v954_v43, %v958_v47  ;;  %v7950_v41 = vcombine.low %v986_v23, %v990_v5  ;;  %v1001_v47 = vld [vmem:[#allocation11 + $0xb80] sm:$0xff]  ;;  %v1030_v23 = vld [vmem:[#allocation11 + $0xc68] sm:$0xff] }
 0x1c5   :  { %3801 = vmatprep.subr.bf16.mxu0 %v7877_v60  ;;  %3965 = vmatprep.subr.bf16.mxu1 %v7879_v61  ;;  %v7925_v60 = vcombine.high %v961_v54, %v965_v55  ;;  %v7927_v61 = vcombine.high %v962_v56, %v966_v57  ;;  %v7957_v42 = vcombine.high %v993_v31, %v997_v32 }
 0x1c8   :  { %3802 = vmatpush1.bf16.msra.mxu0 %v7876_v4  ;;  %3966 = vmatpush1.bf16.msra.mxu1 %v7878_v6  ;;  %v7924_v4 = vcombine.low %v961_v54, %v965_v55  ;;  %v7926_v6 = vcombine.low %v962_v56, %v966_v57  ;;  %v7956_v56 = vcombine.low %v993_v31, %v997_v32  ;;  %v1033_v32 = vld [vmem:[#allocation11 + $0xc80] sm:$0xff] }
 0x1c9   :  { %3803 = vmatprep.subr.bf16.mxu0 %v7885_v0  ;;  %3967 = vmatprep.subr.bf16.mxu1 %v7887_v30  ;;  %v7933_v0 = vcombine.high %v969_v62, %v973_v63  ;;  %v7935_v30 = vcombine.high %v970_v2, %v974_v3 }
 0x1cc   :  { %3804 = vmatpush1.bf16.msra.mxu0 %v7884_v11  ;;  %3968 = vmatpush1.bf16.msra.mxu1 %v7886_v17  ;;  %v7932_v11 = vcombine.low %v969_v62, %v973_v63  ;;  %v7934_v17 = vcombine.low %v970_v2, %v974_v3  ;;  %v1010_v62 = vld [vmem:[#allocation11 + $0xbc8] sm:$0xff] }
 0x1cd   :  { %3805 = vmatprep.subr.bf16.mxu0 %v7893_v19  ;;  %3969 = vmatprep.subr.bf16.mxu1 %v7895_v20  ;;  %v7941_v19 = vcombine.high %v977_v7, %v981_v8  ;;  %v7943_v20 = vcombine.high %v978_v9, %v982_v10  ;;  %v1014_v63 = vld [vmem:[#allocation11 + $0xbe8] sm:$0xff] }
 0x1d0   :  { %3806 = vmatpush1.bf16.msra.mxu0 %v7892_v24  ;;  %3970 = vmatpush1.bf16.msra.mxu1 %v7894_v25  ;;  %v8917_v24 = vsub.s32 4, %v8843_v12  ;;  %v7940_v25 = vcombine.low %v977_v7, %v981_v8  ;;  %v1021_v7 = vld [vmem:[#allocation11 + $0xc20] sm:$0xff]  ;;  %v1018_v8 = vld [vmem:[#allocation11 + $0xc08] sm:$0xff] }
 0x1d1   :  { %3807 = vmatprep.subr.bf16.mxu0 %v7901_v26  ;;  %3971 = vmatprep.subr.bf16.mxu1 %v7903_v27  ;;  %v7942_v26 = vcombine.low %v978_v9, %v982_v10  ;;  %v7949_v27 = vcombine.high %v985_v21, %v989_v22  ;;  %v1022_v9 = vld [vmem:[#allocation11 + $0xc28] sm:$0xff] }
 0x1d2   :  { %v596_v55 = vrot.slane %v8853_v16, %v8917_v24 }
 0x1d4   :  { %3808 = vmatpush1.bf16.msra.mxu0 %v7900_v37  ;;  %3972 = vmatpush1.bf16.msra.mxu1 %v7902_v38  ;;  %v998_v37 = vld [vmem:[#allocation11 + $0xb68] sm:$0xff]  ;;  %v8920_v38 = vsub.s32 7, %v8843_v12 }
 0x1d5   :  { %3809 = vmatprep.subr.bf16.mxu0 %v7909_v39  ;;  %3973 = vmatprep.subr.bf16.mxu1 %v7911_v40  ;;  %v545_v39 = vrot.slane %v8848_v14, %v8917_v24  ;;  %v7948_v40 = vcombine.low %v985_v21, %v989_v22  ;;  %v7959_v43 = vcombine.high %v994_v33, %v998_v37  ;;  %v1029_v21 = vld [vmem:[#allocation11 + $0xc60] sm:$0xff]  ;;  %v1026_v22 = vld [vmem:[#allocation11 + $0xc48] sm:$0xff] }
 0x1d6   :  { %v7958_v57 = vcombine.low %v994_v33, %v998_v37  ;;  %v7991_v31 = vcombine.high %v1026_v22, %v1030_v23  ;;  %v1037_v33 = vld [vmem:[#allocation11 + $0xca0] sm:$0xff]  ;;  %v1034_v37 = vld [vmem:[#allocation11 + $0xc88] sm:$0xff] }
 0x1d7   :  { %v570_v54 = vmul.f32 %v545_v39, %v8884_v1  ;;  %v1038_v39 = vld [vmem:[#allocation11 + $0xca8] sm:$0xff] }
 0x1d8   :  { %3810 = vmatpush1.bf16.msra.mxu0 %v7908_v49  ;;  %3974 = vmatpush1.bf16.msra.mxu1 %v7910_v50  ;;  %v1005_v49 = vld [vmem:[#allocation11 + $0xba0] sm:$0xff]  ;;  %v1002_v50 = vld [vmem:[#allocation11 + $0xb88] sm:$0xff] }
 0x1d9   :  { %3811 = vmatprep.subr.bf16.mxu0 %v7917_v51  ;;  %3975 = vmatprep.subr.bf16.mxu1 %v7919_v52  ;;  %v1006_v51 = vld [vmem:[#allocation11 + $0xba8] sm:$0xff]  ;;  %v557_v52 = vrot.slane %v8848_v14, %v8920_v38  ;;  %v608_v14 = vrot.slane %v8853_v16, %v8920_v38  ;;  %v621_v1 = vadd.f32 %v596_v55, %v570_v54 }
 0x1da   :  { %v7964_v3 = vcombine.low %v1001_v47, %v1005_v49  ;;  %v7996_v54 = vcombine.low %v1033_v32, %v1037_v33  ;;  %v7998_v55 = vcombine.low %v1034_v37, %v1038_v39 }
 0x1db   :  { %v573_v2 = vmul.f32 %v557_v52, %v8890_v36  ;;  %v1046_v52 = vld [vmem:[#allocation11 + $0xce8] sm:$0xff] }
 0x1dc   :  { %3812 = vmatpush1.bf16.msra.mxu0 %v7916_v58  ;;  %3976 = vmatpush1.bf16.msra.mxu1 %v7918_v59  ;;  %v7965_v58 = vcombine.high %v1001_v47, %v1005_v49  ;;  %v7967_v59 = vcombine.high %v1002_v50, %v1006_v51  ;;  %v7999_v47 = vcombine.high %v1034_v37, %v1038_v39  ;;  %v1041_v49 = vld [vmem:[#allocation11 + $0xcc0] sm:$0xff]  ;;  %v1082_v37 = vld [vmem:[#allocation11 + $0xe08] sm:$0xff] }
 0x1dd   :  { %3813 = vmatprep.subr.bf16.mxu0 %v7925_v60  ;;  %3977 = vmatprep.subr.bf16.mxu1 %v7927_v61  ;;  %v1009_v60 = vld [vmem:[#allocation11 + $0xbc0] sm:$0xff]  ;;  %v624_v10 = vadd.f32 %v608_v14, %v573_v2  ;;  %v1086_v39 = vld [vmem:[#allocation11 + $0xe28] sm:$0xff] }
 0x1de   :  { %v1013_v61 = vld [vmem:[#allocation11 + $0xbe0] sm:$0xff] }
 0x1df   :  { %v7972_v36 = vcombine.low %v1009_v60, %v1013_v61  ;;  %v632_v5 = vmax.f32 %v624_v10, 0.0  ;;  %v1069_v10 = vld [vmem:[#allocation11 + $0xda0] sm:$0xff] }
 0x1e0   :  { %3814 = vmatpush1.bf16.msra.mxu0 %v7924_v4  ;;  %3978 = vmatpush1.bf16.msra.mxu1 %v7926_v6  ;;  %v7966_v4 = vcombine.low %v1002_v50, %v1006_v51  ;;  %v7973_v6 = vcombine.high %v1009_v60, %v1013_v61  ;;  %v1045_v50 = vld [vmem:[#allocation11 + $0xce0] sm:$0xff]  ;;  %v1042_v51 = vld [vmem:[#allocation11 + $0xcc8] sm:$0xff] }
 0x1e1   :  { %3815 = vmatprep.subr.bf16.mxu0 %v7933_v0  ;;  %3979 = vmatprep.subr.bf16.mxu1 %v7935_v30  ;;  %v7975_v0 = vcombine.high %v1010_v62, %v1014_v63  ;;  %v1017_v30 = vld [vmem:[#allocation11 + $0xc00] sm:$0xff]  ;;  %v1050_v60 = vld [vmem:[#allocation11 + $0xd08] sm:$0xff] }
 0x1e2   :  { %v7981_v16 = vcombine.high %v1017_v30, %v1021_v7  ;;  %v1054_v61 = vld [vmem:[#allocation11 + $0xd28] sm:$0xff] }
 0x1e3   :  { %v8015_v14 = vcombine.high %v1050_v60, %v1054_v61 }
 0x1e4   :  { %3816 = vmatpush1.bf16.msra.mxu0 %v7932_v11  ;;  %3980 = vmatpush1.bf16.msra.mxu1 %v7934_v17  ;;  %v629_v11 = vmax.f32 %v621_v1, 0.0  ;;  %v7974_v17 = vcombine.low %v1010_v62, %v1014_v63  ;;  %v8004_v62 = vcombine.low %v1041_v49, %v1045_v50  ;;  %v8006_v63 = vcombine.low %v1042_v51, %v1046_v52  ;;  %v1057_v1 = vld [vmem:[#allocation11 + $0xd40] sm:$0xff] }
 0x1e5   :  { %3817 = vmatprep.subr.bf16.mxu0 %v7941_v19  ;;  %3981 = vmatprep.subr.bf16.mxu1 %v7943_v20  ;;  %v7983_v19 = vcombine.high %v1018_v8, %v1022_v9  ;;  %v1025_v20 = vld [vmem:[#allocation11 + $0xc40] sm:$0xff] }
 0x1e8   :  { %3818 = vmatpush1.bf16.msra.mxu0 %v7940_v25  ;;  %3982 = vmatpush1.bf16.msra.mxu1 %v7942_v26  ;;  %v8932_v25 = vpack.c.bf16 %v629_v11, %v629_v11  ;;  %v7980_v26 = vcombine.low %v1017_v30, %v1021_v7  ;;  %v8014_v30 = vcombine.low %v1050_v60, %v1054_v61  ;;  %v1066_v11 = vld [vmem:[#allocation11 + $0xd88] sm:$0xff] }
 0x1e9   :  { %3819 = vmatprep.subr.bf16.mxu0 %v7949_v27  ;;  %3983 = vmatprep.subr.bf16.mxu1 %v7951_v28  ;;  %v7982_v27 = vcombine.low %v1018_v8, %v1022_v9  ;;  %v7989_v28 = vcombine.high %v1025_v20, %v1029_v21  ;;  %v1065_v9 = vld [vmem:[#allocation11 + $0xd80] sm:$0xff]  ;;  %v1098_v60 = vld [vmem:[#allocation11 + $0xe88] sm:$0xff] }
 0x1ea   :  { %v1102_v61 = vld [vmem:[#allocation11 + $0xea8] sm:$0xff] }
 0x1ec   :  { %3820 = vmatpush1.bf16.msra.mxu0 %v7948_v40  ;;  %3984 = vmatpush1.bf16.msra.mxu1 %v7950_v41  ;;  %v8934_v40 = vpack.c.bf16 %v632_v5, %v632_v5  ;;  %v7988_v41 = vcombine.low %v1025_v20, %v1029_v21  ;;  %v1073_v21 = vld [vmem:[#allocation11 + $0xdc0] sm:$0xff]  ;;  %v1078_v5 = vld [vmem:[#allocation11 + $0xde8] sm:$0xff] }
 0x1ed   :  { %3821 = vmatprep.subr.bf16.mxu0 %v7957_v42  ;;  %3985 = vmatprep.subr.bf16.mxu1 %v7959_v43  ;;  %v7990_v42 = vcombine.low %v1026_v22, %v1030_v23  ;;  %v7997_v43 = vcombine.high %v1033_v32, %v1037_v33  ;;  %v1077_v22 = vld [vmem:[#allocation11 + $0xde0] sm:$0xff]  ;;  %v1074_v23 = vld [vmem:[#allocation11 + $0xdc8] sm:$0xff] }
 0x1ee   :  { %v1081_v32 = vld [vmem:[#allocation11 + $0xe00] sm:$0xff] }
 0x1ef   :  { %v1085_v33 = vld [vmem:[#allocation11 + $0xe20] sm:$0xff] }
 0x1f0   :  { %3822 = vmatpush1.bf16.msra.mxu0 %v7956_v56  ;;  %3986 = vmatpush1.bf16.msra.mxu1 %v7958_v57  ;;  %v8005_v56 = vcombine.high %v1041_v49, %v1045_v50  ;;  %v8007_v57 = vcombine.high %v1042_v51, %v1046_v52  ;;  %v1089_v49 = vld [vmem:[#allocation11 + $0xe40] sm:$0xff]  ;;  %v1090_v51 = vld [vmem:[#allocation11 + $0xe48] sm:$0xff] }
 0x1f1   :  { %3823 = vmatprep.subr.bf16.mxu0 %v7965_v58  ;;  %3987 = vmatprep.subr.bf16.mxu1 %v7967_v59  ;;  %v1049_v58 = vld [vmem:[#allocation11 + $0xd00] sm:$0xff]  ;;  %v1094_v52 = vld [vmem:[#allocation11 + $0xe68] sm:$0xff] }
 0x1f2   :  { %v1053_v59 = vld [vmem:[#allocation11 + $0xd20] sm:$0xff] }
 0x1f3   :  { %v8013_v2 = vcombine.high %v1049_v58, %v1053_v59  ;;  %v1093_v50 = vld [vmem:[#allocation11 + $0xe60] sm:$0xff] }
 0x1f4   :  { %3824 = vmatpush1.bf16.msra.mxu0 %v7964_v3  ;;  %3988 = vmatpush1.bf16.msra.mxu1 %v7966_v4  ;;  %v1061_v3 = vld [vmem:[#allocation11 + $0xd60] sm:$0xff]  ;;  %v1058_v4 = vld [vmem:[#allocation11 + $0xd48] sm:$0xff] }
 0x1f5   :  { %3825 = vmatprep.subr.bf16.mxu0 %v7973_v6  ;;  %3989 = vmatprep.subr.bf16.mxu1 %v7975_v0  ;;  %v1062_v6 = vld [vmem:[#allocation11 + $0xd68] sm:$0xff]  ;;  %v8012_v0 = vcombine.low %v1049_v58, %v1053_v59  ;;  %v8021_v7 = vcombine.high %v1057_v1, %v1061_v3  ;;  %v1097_v58 = vld [vmem:[#allocation11 + $0xe80] sm:$0xff] }
 0x1f6   :  { %v8023_v8 = vcombine.high %v1058_v4, %v1062_v6  ;;  %v1101_v59 = vld [vmem:[#allocation11 + $0xea0] sm:$0xff] }
 0x1f8   :  { %3826 = vmatpush1.bf16.msra.mxu0 %v7972_v36  ;;  %3990 = vmatpush1.bf16.msra.mxu1 %v7974_v17  ;;  %v1070_v36 = vld [vmem:[#allocation11 + $0xda8] sm:$0xff]  ;;  %v8020_v17 = vcombine.low %v1057_v1, %v1061_v3  ;;  %v1105_v1 = vld [vmem:[#allocation11 + $0xec0] sm:$0xff] }
 0x1f9   :  { %3836 = vmatprep.subr.bf16.mxu0 %v7981_v16  ;;  %4000 = vmatprep.subr.bf16.mxu1 %v7983_v19  ;;  %v8022_v16 = vcombine.low %v1058_v4, %v1062_v6  ;;  %v8029_v19 = vcombine.high %v1065_v9, %v1069_v10  ;;  %v8031_v20 = vcombine.high %v1066_v11, %v1070_v36  ;;  %v1109_v3 = vld [vmem:[#allocation11 + $0xee0] sm:$0xff]  ;;  %v1106_v4 = vld [vmem:[#allocation11 + $0xec8] sm:$0xff] }
 0x1fa   :  { %v1110_v6 = vld [vmem:[#allocation11 + $0xee8] sm:$0xff] }
 0x1fb   :  { %3828 = vmatmul.mubr.bf16.vlgmr.msra.gmra.mrb[8].mxu0 %v8932_v25  ;;  %3992 = vmatmul.mubr.bf16.vlgmr.msra.gmra.mrb[8].mxu1 %v8932_v25 }
 0x1fc   :  { %3837 = vmatpush1.bf16.msra.mxu0 %v7980_v26  ;;  %4001 = vmatpush1.bf16.msra.mxu1 %v7982_v27  ;;  %v8028_v26 = vcombine.low %v1065_v9, %v1069_v10  ;;  %v8030_v27 = vcombine.low %v1066_v11, %v1070_v36  ;;  %v1113_v9 = vld [vmem:[#allocation11 + $0xf00] sm:$0xff]  ;;  %v1114_v11 = vld [vmem:[#allocation11 + $0xf08] sm:$0xff] }
 0x1fd   :  { %3838 = vmatprep.subr.bf16.mxu0 %v7989_v28  ;;  %4002 = vmatprep.subr.bf16.mxu1 %v7991_v31  ;;  %v8037_v28 = vcombine.high %v1073_v21, %v1077_v22  ;;  %v8039_v31 = vcombine.high %v1074_v23, %v1078_v5  ;;  %v1117_v10 = vld [vmem:[#allocation11 + $0xf20] sm:$0xff]  ;;  %v1118_v36 = vld [vmem:[#allocation11 + $0xf28] sm:$0xff] }
 0x1fe   :  { %3868 = vmatprep.mubr.bf16.mxu0 %v8934_v40  ;;  %4032 = vmatprep.mubr.bf16.mxu1 %v8934_v40 }
 0x200   :  { %3839 = vmatpush1.bf16.msra.mxu0 %v7988_v41  ;;  %4003 = vmatpush1.bf16.msra.mxu1 %v7990_v42  ;;  %v8036_v41 = vcombine.low %v1073_v21, %v1077_v22  ;;  %v8038_v42 = vcombine.low %v1074_v23, %v1078_v5  ;;  %v8079_v21 = vcombine.high %v1114_v11, %v1118_v36  ;;  %v1121_v22 = vld [vmem:[#allocation11 + $0xf40] sm:$0xff]  ;;  %v1122_v5 = vld [vmem:[#allocation11 + $0xf48] sm:$0xff] }
 0x201   :  { %3840 = vmatprep.subr.bf16.mxu0 %v7997_v43  ;;  %4004 = vmatprep.subr.bf16.mxu1 %v7999_v47  ;;  %v8045_v43 = vcombine.high %v1081_v32, %v1085_v33  ;;  %v8047_v47 = vcombine.high %v1082_v37, %v1086_v39  ;;  %v1125_v23 = vld [vmem:[#allocation11 + $0xf60] sm:$0xff] }
 0x204   :  { %3841 = vmatpush1.bf16.msra.mxu0 %v7996_v54  ;;  %4005 = vmatpush1.bf16.msra.mxu1 %v7998_v55  ;;  %v8044_v54 = vcombine.low %v1081_v32, %v1085_v33  ;;  %v8046_v55 = vcombine.low %v1082_v37, %v1086_v39  ;;  %v8085_v33 = vcombine.high %v1121_v22, %v1125_v23  ;;  %v1129_v37 = vld [vmem:[#allocation11 + $0xf80] sm:$0xff] }
 0x205   :  { %3842 = vmatprep.subr.bf16.mxu0 %v8005_v56  ;;  %4006 = vmatprep.subr.bf16.mxu1 %v8007_v57  ;;  %v8053_v56 = vcombine.high %v1089_v49, %v1093_v50  ;;  %v8055_v57 = vcombine.high %v1090_v51, %v1094_v52  ;;  %v1133_v39 = vld [vmem:[#allocation11 + $0xfa0] sm:$0xff] }
 0x208   :  { %3843 = vmatpush1.bf16.msra.mxu0 %v8004_v62  ;;  %4007 = vmatpush1.bf16.msra.mxu1 %v8006_v63  ;;  %v8052_v62 = vcombine.low %v1089_v49, %v1093_v50  ;;  %v8054_v63 = vcombine.low %v1090_v51, %v1094_v52  ;;  %v8084_v49 = vcombine.low %v1121_v22, %v1125_v23  ;;  %v655_v22 = vld [vmem:[#allocation11 + $0xb0] sm:$0xff]  ;;  %v652_v23 = vld [vmem:[#allocation11 + $0x98] sm:$0xff] }
 0x209   :  { %3844 = vmatprep.subr.bf16.mxu0 %v8013_v2  ;;  %4008 = vmatprep.subr.bf16.mxu1 %v8015_v14  ;;  %v8061_v2 = vcombine.high %v1097_v58, %v1101_v59  ;;  %v8063_v14 = vcombine.high %v1098_v60, %v1102_v61  ;;  %v8093_v52 = vcombine.high %v1129_v37, %v1133_v39 }
 0x20c   :  { %3845 = vmatpush1.bf16.msra.mxu0 %v8012_v0  ;;  %4009 = vmatpush1.bf16.msra.mxu1 %v8014_v30  ;;  %v8060_v0 = vcombine.low %v1097_v58, %v1101_v59  ;;  %v8062_v30 = vcombine.low %v1098_v60, %v1102_v61  ;;  %v1142_v58 = vld [vmem:[#allocation11 + $0xfe8] sm:$0xff]  ;;  %v8092_v59 = vcombine.low %v1129_v37, %v1133_v39  ;;  %v664_v37 = vld [vmem:[#allocation11 + $0xf8] sm:$0xff] }
 0x20d   :  { %3846 = vmatprep.subr.bf16.mxu0 %v8021_v7  ;;  %4010 = vmatprep.subr.bf16.mxu1 %v8023_v8  ;;  %v8069_v7 = vcombine.high %v1105_v1, %v1109_v3  ;;  %v8071_v8 = vcombine.high %v1106_v4, %v1110_v6 }
 0x210   :  { %3847 = vmatpush1.bf16.msra.mxu0 %v8020_v17  ;;  %4011 = vmatpush1.bf16.msra.mxu1 %v8022_v16  ;;  %v8068_v17 = vcombine.low %v1105_v1, %v1109_v3  ;;  %v8070_v16 = vcombine.low %v1106_v4, %v1110_v6  ;;  %v640_v1 = vld [vmem:[#allocation11 + $0x38] sm:$0xff] }
 0x211   :  { %3848 = vmatprep.subr.bf16.mxu0 %v8029_v19  ;;  %4012 = vmatprep.subr.bf16.mxu1 %v8031_v20  ;;  %v8941_v19 = vsub.s32 6, %v8843_v12  ;;  %v8077_v20 = vcombine.high %v1113_v9, %v1117_v10 }
 0x214   :  { %3849 = vmatpush1.bf16.msra.mxu0 %v8028_v26  ;;  %4013 = vmatpush1.bf16.msra.mxu1 %v8030_v27  ;;  %v1126_v26 = vld [vmem:[#allocation11 + $0xf68] sm:$0xff]  ;;  %v8076_v27 = vcombine.low %v1113_v9, %v1117_v10  ;;  %v644_v9 = vld [vmem:[#allocation11 + $0x58] sm:$0xff] }
 0x215   :  { %3850 = vmatprep.subr.bf16.mxu0 %v8037_v28  ;;  %4014 = vmatprep.subr.bf16.mxu1 %v8039_v31  ;;  %v8078_v28 = vcombine.low %v1114_v11, %v1118_v36  ;;  %v8454_v31 = vld [vmem:[#allocation10] ss:$2 sm:$0xff]  ;;  %v8087_v12 = vcombine.high %v1122_v5, %v1126_v26  ;;  %v8086_v50 = vcombine.low %v1122_v5, %v1126_v26 }
 0x216   :  { %v553_v32 = vrot.slane %v8454_v31, %v8941_v19  ;;  %v648_v10 = vld [vmem:[#allocation11 + $0x78] sm:$0xff] }
 0x217   :  { %v656_v5 = vld [vmem:[#allocation11 + $0xb8] sm:$0xff] }
 0x218   :  { %3851 = vmatpush1.bf16.msra.mxu0 %v8036_v41  ;;  %4015 = vmatpush1.bf16.msra.mxu1 %v8038_v42  ;;  %v1130_v41 = vld [vmem:[#allocation11 + $0xf88] sm:$0xff]  ;;  %v572_v51 = vmul.f32 %v553_v32, %v8888_v29  ;;  %v636_v29 = vld [vmem:[#allocation11 + $0x18] sm:$0xff]  ;;  %v7619_v31 = vcombine.high %v652_v23, %v656_v5  ;;  %v659_v32 = vld [vmem:[#allocation11 + $0xd0] sm:$0xff] }
 0x219   :  { %3852 = vmatprep.subr.bf16.mxu0 %v8045_v43  ;;  %4016 = vmatprep.subr.bf16.mxu1 %v8047_v47  ;;  %v1134_v42 = vld [vmem:[#allocation11 + $0xfa8] sm:$0xff]  ;;  %v8455_v43 = vld [vmem:[#allocation10 + $0x1] ss:$2 sm:$0xff] }
 0x21a   :  { %v604_v47 = vrot.slane %v8455_v43, %v8941_v19  ;;  %v8094_v60 = vcombine.low %v1130_v41, %v1134_v42 }
 0x21c   :  { %3853 = vmatpush1.bf16.msra.mxu0 %v8044_v54  ;;  %4017 = vmatpush1.bf16.msra.mxu1 %v8046_v55  ;;  %v8095_v54 = vcombine.high %v1130_v41, %v1134_v42  ;;  %v1137_v55 = vld [vmem:[#allocation11 + $0xfc0] sm:$0xff]  ;;  %v623_v61 = vadd.f32 %v604_v47, %v572_v51  ;;  %v7618_v41 = vcombine.low %v652_v23, %v656_v5  ;;  %v667_v47 = vld [vmem:[#allocation11 + $0x110] sm:$0xff]  ;;  %v704_v23 = vld [vmem:[#allocation11 + $0x238] sm:$0xff] }
 0x21d   :  { %3854 = vmatprep.subr.bf16.mxu0 %v8053_v56  ;;  %4018 = vmatprep.subr.bf16.mxu1 %v8055_v57  ;;  %v1141_v56 = vld [vmem:[#allocation11 + $0xfe0] sm:$0xff]  ;;  %v1138_v57 = vld [vmem:[#allocation11 + $0xfc8] sm:$0xff] }
 0x21e   :  { %v8100_v3 = vcombine.low %v1137_v55, %v1141_v56  ;;  %v8102_v4 = vcombine.low %v1138_v57, %v1142_v58  ;;  %v631_v6 = vmax.f32 %v623_v61, 0.0 }
 0x220   :  { %3855 = vmatpush1.bf16.msra.mxu0 %v8052_v62  ;;  %4019 = vmatpush1.bf16.msra.mxu1 %v8054_v63  ;;  %v8101_v62 = vcombine.high %v1137_v55, %v1141_v56  ;;  %v8103_v63 = vcombine.high %v1138_v57, %v1142_v58  ;;  %v8946_v36 = vpack.c.bf16 %v631_v6, %v631_v6  ;;  %v675_v56 = vld [vmem:[#allocation11 + $0x150] sm:$0xff]  ;;  %v676_v58 = vld [vmem:[#allocation11 + $0x158] sm:$0xff] }
 0x221   :  { %3856 = vmatprep.subr.bf16.mxu0 %v8061_v2  ;;  %4020 = vmatprep.subr.bf16.mxu1 %v8063_v14  ;;  %v635_v2 = vld [vmem:[#allocation11 + $0x10] sm:$0xff] }
 0x222   :  { %v639_v14 = vld [vmem:[#allocation11 + $0x30] sm:$0xff] }
 0x223   :  { %v7600_v11 = vcombine.low %v635_v2, %v639_v14  ;;  %v679_v57 = vld [vmem:[#allocation11 + $0x170] sm:$0xff] }
 0x224   :  { %3857 = vmatpush1.bf16.msra.mxu0 %v8060_v0  ;;  %4021 = vmatpush1.bf16.msra.mxu1 %v8062_v30  ;;  %v7601_v0 = vcombine.high %v635_v2, %v639_v14  ;;  %v7603_v30 = vcombine.high %v636_v29, %v640_v1  ;;  %v683_v2 = vld [vmem:[#allocation11 + $0x190] sm:$0xff] }
 0x225   :  { %3858 = vmatprep.subr.bf16.mxu0 %v8069_v7  ;;  %4022 = vmatprep.subr.bf16.mxu1 %v8071_v8  ;;  %v643_v7 = vld [vmem:[#allocation11 + $0x50] sm:$0xff] }
 0x226   :  { %v647_v8 = vld [vmem:[#allocation11 + $0x70] sm:$0xff] }
 0x227   :  { %v7608_v26 = vcombine.low %v643_v7, %v647_v8  ;;  %v687_v14 = vld [vmem:[#allocation11 + $0x1b0] sm:$0xff] }
 0x228   :  { %3859 = vmatpush1.bf16.msra.mxu0 %v8068_v17  ;;  %4023 = vmatpush1.bf16.msra.mxu1 %v8070_v16  ;;  %v7602_v17 = vcombine.low %v636_v29, %v640_v1  ;;  %v7609_v16 = vcombine.high %v643_v7, %v647_v8  ;;  %v684_v29 = vld [vmem:[#allocation11 + $0x198] sm:$0xff]  ;;  %v7649_v6 = vcombine.high %v683_v2, %v687_v14  ;;  %v695_v7 = vld [vmem:[#allocation11 + $0x1f0] sm:$0xff] }
 0x229   :  { %3860 = vmatprep.subr.bf16.mxu0 %v8077_v20  ;;  %4024 = vmatprep.subr.bf16.mxu1 %v8079_v21  ;;  %v7611_v20 = vcombine.high %v644_v9, %v648_v10  ;;  %v651_v21 = vld [vmem:[#allocation11 + $0x90] sm:$0xff]  ;;  %v688_v1 = vld [vmem:[#allocation11 + $0x1b8] sm:$0xff] }
 0x22a   :  { %v7616_v39 = vcombine.low %v651_v21, %v655_v22  ;;  %v692_v8 = vld [vmem:[#allocation11 + $0x1d8] sm:$0xff] }
 0x22c   :  { %3861 = vmatpush1.bf16.msra.mxu0 %v8076_v27  ;;  %4025 = vmatpush1.bf16.msra.mxu1 %v8078_v28  ;;  %v7610_v27 = vcombine.low %v644_v9, %v648_v10  ;;  %v7617_v28 = vcombine.high %v651_v21, %v655_v22  ;;  %v696_v9 = vld [vmem:[#allocation11 + $0x1f8] sm:$0xff]  ;;  %v7648_v10 = vcombine.low %v683_v2, %v687_v14  ;;  %v703_v21 = vld [vmem:[#allocation11 + $0x230] sm:$0xff] }
 0x22d   :  { %3862 = vmatprep.subr.bf16.mxu0 %v8085_v33  ;;  %4026 = vmatprep.subr.bf16.mxu1 %v8087_v12  ;;  %v663_v33 = vld [vmem:[#allocation11 + $0xf0] sm:$0xff]  ;;  %v660_v12 = vld [vmem:[#allocation11 + $0xd8] sm:$0xff] }
 0x22e   :  { %v7625_v42 = vcombine.high %v659_v32, %v663_v33  ;;  %v7627_v43 = vcombine.high %v660_v12, %v664_v37  ;;  %v7624_v51 = vcombine.low %v659_v32, %v663_v33  ;;  %v700_v22 = vld [vmem:[#allocation11 + $0x218] sm:$0xff]  ;;  %v711_v32 = vld [vmem:[#allocation11 + $0x270] sm:$0xff] }
 0x22f   :  { %v708_v33 = vld [vmem:[#allocation11 + $0x258] sm:$0xff]  ;;  %v735_v2 = vld [vmem:[#allocation11 + $0x330] sm:$0xff] }
 0x230   :  { %3863 = vmatpush1.bf16.msra.mxu0 %v8084_v49  ;;  %4027 = vmatpush1.bf16.msra.mxu1 %v8086_v50  ;;  %v671_v49 = vld [vmem:[#allocation11 + $0x130] sm:$0xff]  ;;  %v672_v50 = vld [vmem:[#allocation11 + $0x138] sm:$0xff] }
 0x231   :  { %3864 = vmatprep.subr.bf16.mxu0 %v8093_v52  ;;  %4028 = vmatprep.subr.bf16.mxu1 %v8095_v54  ;;  %v7626_v52 = vcombine.low %v660_v12, %v664_v37  ;;  %v7633_v54 = vcombine.high %v667_v47, %v671_v49  ;;  %v712_v12 = vld [vmem:[#allocation11 + $0x278] sm:$0xff] }
 0x232   :  { %v732_v14 = vld [vmem:[#allocation11 + $0x318] sm:$0xff] }
 0x234   :  { %3865 = vmatpush1.bf16.msra.mxu0 %v8092_v59  ;;  %4029 = vmatpush1.bf16.msra.mxu1 %v8094_v60  ;;  %v680_v59 = vld [vmem:[#allocation11 + $0x178] sm:$0xff]  ;;  %v7632_v60 = vcombine.low %v667_v47, %v671_v49  ;;  %v719_v47 = vld [vmem:[#allocation11 + $0x2b0] sm:$0xff] }
 0x235   :  { %3866 = vmatprep.subr.bf16.mxu0 %v8101_v62  ;;  %4030 = vmatprep.subr.bf16.mxu1 %v8103_v63  ;;  %v7641_v62 = vcombine.high %v675_v56, %v679_v57  ;;  %v7643_v63 = vcombine.high %v676_v58, %v680_v59  ;;  %v716_v49 = vld [vmem:[#allocation11 + $0x298] sm:$0xff] }
 0x238   :  { %3867 = vmatpush1.bf16.msra.mxu0 %v8100_v3  ;;  %4031 = vmatpush1.bf16.msra.mxu1 %v8102_v4  ;;  %v7640_v3 = vcombine.low %v675_v56, %v679_v57  ;;  %v7642_v4 = vcombine.low %v676_v58, %v680_v59  ;;  %v727_v56 = vld [vmem:[#allocation11 + $0x2f0] sm:$0xff]  ;;  %v724_v57 = vld [vmem:[#allocation11 + $0x2d8] sm:$0xff] }
 0x239   :  { %4041 = vmatprep.subr.bf16.mxu0 %v7601_v0  ;;  %4205 = vmatprep.subr.bf16.mxu1 %v7603_v30  ;;  %v7651_v0 = vcombine.high %v684_v29, %v688_v1  ;;  %v691_v30 = vld [vmem:[#allocation11 + $0x1d0] sm:$0xff]  ;;  %v728_v58 = vld [vmem:[#allocation11 + $0x2f8] sm:$0xff] }
 0x23a   :  { %v7656_v5 = vcombine.low %v691_v30, %v695_v7 }
 0x23b   :  { %3869 = vmatmul.mubr.bf16.vlgmr.msra.gmra.mrb[8].mxu0 %v8946_v36  ;;  %4033 = vmatmul.mubr.bf16.vlgmr.msra.gmra.mrb[8].mxu1 %v8946_v36 }
 0x23c   :  { %4042 = vmatpush1.bf16.msra.mxu0 %v7600_v11  ;;  %4073 = vmatprep.mubr.bf16.mxu0 %v8872_v44  ;;  %v7650_v11 = vcombine.low %v684_v29, %v688_v1  ;;  %v736_v29 = vld [vmem:[#allocation11 + $0x338] sm:$0xff] }
 0x23d   :  { %4206 = vmatpush1.bf16.msra.mxu1 %v7602_v17  ;;  %4237 = vmatprep.mubr.bf16.mxu1 %v8872_v44  ;;  %v668_v44 = vld [vmem:[#allocation11 + $0x118] sm:$0xff]  ;;  %v7657_v17 = vcombine.high %v691_v30, %v695_v7  ;;  %v743_v30 = vld [vmem:[#allocation11 + $0x370] sm:$0xff] }
 0x23e   :  { %4043 = vmatprep.subr.bf16.mxu0 %v7609_v16  ;;  %4207 = vmatprep.subr.bf16.mxu1 %v7611_v20  ;;  %v7635_v55 = vcombine.high %v668_v44, %v672_v50  ;;  %v7634_v61 = vcombine.low %v668_v44, %v672_v50  ;;  %v7659_v16 = vcombine.high %v692_v8, %v696_v9  ;;  %v699_v20 = vld [vmem:[#allocation11 + $0x210] sm:$0xff]  ;;  %v720_v44 = vld [vmem:[#allocation11 + $0x2b8] sm:$0xff] }
 0x23f   :  { %v7664_v37 = vcombine.low %v699_v20, %v703_v21  ;;  %v740_v7 = vld [vmem:[#allocation11 + $0x358] sm:$0xff] }
 0x240   :  { %4044 = vmatpush1.bf16.msra.mxu0 %v7608_v26  ;;  %v7658_v26 = vcombine.low %v692_v8, %v696_v9  ;;  %v744_v8 = vld [vmem:[#allocation11 + $0x378] sm:$0xff] }
 0x241   :  { %4208 = vmatpush1.bf16.msra.mxu1 %v7610_v27  ;;  %4045 = vmatprep.subr.bf16.mxu0 %v7617_v28  ;;  %v7665_v27 = vcombine.high %v699_v20, %v703_v21  ;;  %v7667_v28 = vcombine.high %v700_v22, %v704_v23  ;;  %v751_v20 = vld [vmem:[#allocation11 + $0x3b0] sm:$0xff]  ;;  %v748_v21 = vld [vmem:[#allocation11 + $0x398] sm:$0xff] }
 0x242   :  { %4209 = vmatprep.subr.bf16.mxu1 %v7619_v31  ;;  %v707_v31 = vld [vmem:[#allocation11 + $0x250] sm:$0xff] }
 0x243   :  { %v7672_v50 = vcombine.low %v707_v31, %v711_v32 }
 0x244   :  { %4046 = vmatpush1.bf16.msra.mxu0 %v7616_v39  ;;  %v7666_v39 = vcombine.low %v700_v22, %v704_v23  ;;  %v752_v22 = vld [vmem:[#allocation11 + $0x3b8] sm:$0xff] }
 0x245   :  { %4210 = vmatpush1.bf16.msra.mxu1 %v7618_v41  ;;  %4047 = vmatprep.subr.bf16.mxu0 %v7625_v42  ;;  %v7673_v41 = vcombine.high %v707_v31, %v711_v32  ;;  %v7675_v42 = vcombine.high %v708_v33, %v712_v12  ;;  %v759_v31 = vld [vmem:[#allocation11 + $0x3f0] sm:$0xff]  ;;  %v756_v32 = vld [vmem:[#allocation11 + $0x3d8] sm:$0xff] }
 0x246   :  { %4211 = vmatprep.subr.bf16.mxu1 %v7627_v43  ;;  %v715_v43 = vld [vmem:[#allocation11 + $0x290] sm:$0xff] }
 0x247   :  { %v7680_v59 = vcombine.low %v715_v43, %v719_v47 }
 0x248   :  { %4048 = vmatpush1.bf16.msra.mxu0 %v7624_v51  ;;  %v7674_v51 = vcombine.low %v708_v33, %v712_v12  ;;  %v760_v33 = vld [vmem:[#allocation11 + $0x3f8] sm:$0xff] }
 0x249   :  { %4212 = vmatpush1.bf16.msra.mxu1 %v7626_v52  ;;  %4049 = vmatprep.subr.bf16.mxu0 %v7633_v54  ;;  %v7681_v52 = vcombine.high %v715_v43, %v719_v47  ;;  %v7683_v54 = vcombine.high %v716_v49, %v720_v44  ;;  %v767_v43 = vld [vmem:[#allocation11 + $0x430] sm:$0xff]  ;;  %v764_v47 = vld [vmem:[#allocation11 + $0x418] sm:$0xff] }
 0x24a   :  { %4213 = vmatprep.subr.bf16.mxu1 %v7635_v55  ;;  %v723_v55 = vld [vmem:[#allocation11 + $0x2d0] sm:$0xff] }
 0x24b   :  { %v7688_v1 = vcombine.low %v723_v55, %v727_v56 }
 0x24c   :  { %4050 = vmatpush1.bf16.msra.mxu0 %v7632_v60  ;;  %v7682_v60 = vcombine.low %v716_v49, %v720_v44  ;;  %v768_v49 = vld [vmem:[#allocation11 + $0x438] sm:$0xff] }
 0x24d   :  { %4214 = vmatpush1.bf16.msra.mxu1 %v7634_v61  ;;  %4051 = vmatprep.subr.bf16.mxu0 %v7641_v62  ;;  %v7689_v61 = vcombine.high %v723_v55, %v727_v56  ;;  %v7691_v62 = vcombine.high %v724_v57, %v728_v58  ;;  %v775_v55 = vld [vmem:[#allocation11 + $0x470] sm:$0xff] }
 0x24e   :  { %4215 = vmatprep.subr.bf16.mxu1 %v7643_v63  ;;  %v731_v63 = vld [vmem:[#allocation11 + $0x310] sm:$0xff] }
 0x24f   :  { %v7696_v9 = vcombine.low %v731_v63, %v735_v2 }
 0x250   :  { %4052 = vmatpush1.bf16.msra.mxu0 %v7640_v3  ;;  %v7690_v3 = vcombine.low %v724_v57, %v728_v58  ;;  %v772_v57 = vld [vmem:[#allocation11 + $0x458] sm:$0xff] }
 0x251   :  { %4216 = vmatpush1.bf16.msra.mxu1 %v7642_v4  ;;  %4053 = vmatprep.subr.bf16.mxu0 %v7649_v6  ;;  %v7697_v4 = vcombine.high %v731_v63, %v735_v2  ;;  %v7699_v6 = vcombine.high %v732_v14, %v736_v29  ;;  %v776_v58 = vld [vmem:[#allocation11 + $0x478] sm:$0xff] }
 0x252   :  { %4217 = vmatprep.subr.bf16.mxu1 %v7651_v0  ;;  %v739_v0 = vld [vmem:[#allocation11 + $0x350] sm:$0xff]  ;;  %v7739_v63 = vcombine.high %v772_v57, %v776_v58  ;;  %v780_v2 = vld [vmem:[#allocation11 + $0x498] sm:$0xff] }
 0x253   :  { %v7704_v23 = vcombine.low %v739_v0, %v743_v30 }
 0x254   :  { %4054 = vmatpush1.bf16.msra.mxu0 %v7648_v10  ;;  %v7698_v10 = vcombine.low %v732_v14, %v736_v29  ;;  %v784_v14 = vld [vmem:[#allocation11 + $0x4b8] sm:$0xff] }
 0x255   :  { %4218 = vmatpush1.bf16.msra.mxu1 %v7650_v11  ;;  %4055 = vmatprep.subr.bf16.mxu0 %v7657_v17  ;;  %v7705_v11 = vcombine.high %v739_v0, %v743_v30  ;;  %v7707_v17 = vcombine.high %v740_v7, %v744_v8  ;;  %v791_v0 = vld [vmem:[#allocation11 + $0x4f0] sm:$0xff]  ;;  %v788_v30 = vld [vmem:[#allocation11 + $0x4d8] sm:$0xff] }
 0x256   :  { %4219 = vmatprep.subr.bf16.mxu1 %v7659_v16  ;;  %v747_v16 = vld [vmem:[#allocation11 + $0x390] sm:$0xff] }
 0x257   :  { %v7712_v12 = vcombine.low %v747_v16, %v751_v20 }
 0x258   :  { %4056 = vmatpush1.bf16.msra.mxu0 %v7656_v5  ;;  %v7706_v5 = vcombine.low %v740_v7, %v744_v8  ;;  %v792_v7 = vld [vmem:[#allocation11 + $0x4f8] sm:$0xff] }
 0x259   :  { %4220 = vmatpush1.bf16.msra.mxu1 %v7658_v26  ;;  %4057 = vmatprep.subr.bf16.mxu0 %v7665_v27  ;;  %v7713_v26 = vcombine.high %v747_v16, %v751_v20  ;;  %v7715_v27 = vcombine.high %v748_v21, %v752_v22  ;;  %v796_v16 = vld [vmem:[#allocation11 + $0x518] sm:$0xff] }
 0x25a   :  { %4221 = vmatprep.subr.bf16.mxu1 %v7667_v28  ;;  %v755_v28 = vld [vmem:[#allocation11 + $0x3d0] sm:$0xff]  ;;  %v800_v20 = vld [vmem:[#allocation11 + $0x538] sm:$0xff] }
 0x25b   :  { %v7720_v44 = vcombine.low %v755_v28, %v759_v31 }
 0x25c   :  { %4058 = vmatpush1.bf16.msra.mxu0 %v7664_v37  ;;  %v7714_v37 = vcombine.low %v748_v21, %v752_v22  ;;  %v7754_v21 = vcombine.low %v788_v30, %v792_v7 }
 0x25d   :  { %4222 = vmatpush1.bf16.msra.mxu1 %v7666_v39  ;;  %4059 = vmatprep.subr.bf16.mxu0 %v7673_v41  ;;  %v7721_v39 = vcombine.high %v755_v28, %v759_v31  ;;  %v7723_v41 = vcombine.high %v756_v32, %v760_v33  ;;  %v808_v28 = vld [vmem:[#allocation11 + $0x578] sm:$0xff] }
 0x25e   :  { %4223 = vmatprep.subr.bf16.mxu1 %v7675_v42  ;;  %v763_v42 = vld [vmem:[#allocation11 + $0x410] sm:$0xff] }
 0x25f   :  { %v7728_v56 = vcombine.low %v763_v42, %v767_v43 }
 0x260   :  { %4060 = vmatpush1.bf16.msra.mxu0 %v7672_v50  ;;  %v7722_v50 = vcombine.low %v756_v32, %v760_v33  ;;  %v7762_v32 = vcombine.low %v796_v16, %v800_v20 }
 0x261   :  { %4224 = vmatpush1.bf16.msra.mxu1 %v7674_v51  ;;  %4061 = vmatprep.subr.bf16.mxu0 %v7681_v52  ;;  %v7729_v51 = vcombine.high %v763_v42, %v767_v43  ;;  %v7731_v52 = vcombine.high %v764_v47, %v768_v49  ;;  %v816_v42 = vld [vmem:[#allocation11 + $0x5b8] sm:$0xff] }
 0x262   :  { %4225 = vmatprep.subr.bf16.mxu1 %v7683_v54  ;;  %v771_v54 = vld [vmem:[#allocation11 + $0x450] sm:$0xff] }
 0x263   :  { %v7736_v29 = vcombine.low %v771_v54, %v775_v55 }
 0x264   :  { %4062 = vmatpush1.bf16.msra.mxu0 %v7680_v59  ;;  %v7730_v59 = vcombine.low %v764_v47, %v768_v49 }
 0x265   :  { %4226 = vmatpush1.bf16.msra.mxu1 %v7682_v60  ;;  %4063 = vmatprep.subr.bf16.mxu0 %v7689_v61  ;;  %v7737_v60 = vcombine.high %v771_v54, %v775_v55  ;;  %v779_v61 = vld [vmem:[#allocation11 + $0x490] sm:$0xff]  ;;  %v824_v54 = vld [vmem:[#allocation11 + $0x5f8] sm:$0xff] }
 0x266   :  { %4227 = vmatprep.subr.bf16.mxu1 %v7691_v62  ;;  %v783_v62 = vld [vmem:[#allocation11 + $0x4b0] sm:$0xff] }
 0x267   :  { %v7744_v8 = vcombine.low %v779_v61, %v783_v62 }
 0x268   :  { %4064 = vmatpush1.bf16.msra.mxu0 %v7688_v1  ;;  %v7738_v1 = vcombine.low %v772_v57, %v776_v58 }
 0x269   :  { %4228 = vmatpush1.bf16.msra.mxu1 %v7690_v3  ;;  %4065 = vmatprep.subr.bf16.mxu0 %v7697_v4  ;;  %v7745_v3 = vcombine.high %v779_v61, %v783_v62  ;;  %v7747_v4 = vcombine.high %v780_v2, %v784_v14  ;;  %v828_v61 = vld [vmem:[#allocation11 + $0x618] sm:$0xff] }
 0x26a   :  { %4229 = vmatprep.subr.bf16.mxu1 %v7699_v6  ;;  %v787_v6 = vld [vmem:[#allocation11 + $0x4d0] sm:$0xff]  ;;  %v832_v62 = vld [vmem:[#allocation11 + $0x638] sm:$0xff] }
 0x26c   :  { %4066 = vmatpush1.bf16.msra.mxu0 %v7696_v9  ;;  %v7753_v9 = vcombine.high %v787_v6, %v791_v0 }
 0x26d   :  { %4230 = vmatpush1.bf16.msra.mxu1 %v7698_v10  ;;  %4067 = vmatprep.subr.bf16.mxu0 %v7705_v11  ;;  %v7755_v10 = vcombine.high %v788_v30, %v792_v7  ;;  %v795_v11 = vld [vmem:[#allocation11 + $0x510] sm:$0xff]  ;;  %v7794_v30 = vcombine.low %v828_v61, %v832_v62 }
 0x26e   :  { %4231 = vmatprep.subr.bf16.mxu1 %v7707_v17  ;;  %v799_v17 = vld [vmem:[#allocation11 + $0x530] sm:$0xff] }
 0x26f   :  { %v7761_v22 = vcombine.high %v795_v11, %v799_v17  ;;  %v7760_v31 = vcombine.low %v795_v11, %v799_v17  ;;  %v848_v11 = vld [vmem:[#allocation11 + $0x6b8] sm:$0xff] }
 0x270   :  { %4068 = vmatpush1.bf16.msra.mxu0 %v7704_v23  ;;  %v7763_v23 = vcombine.high %v796_v16, %v800_v20 }
 0x271   :  { %4232 = vmatpush1.bf16.msra.mxu1 %v7706_v5  ;;  %4069 = vmatprep.subr.bf16.mxu0 %v7713_v26  ;;  %v803_v5 = vld [vmem:[#allocation11 + $0x550] sm:$0xff] }
 0x272   :  { %4233 = vmatprep.subr.bf16.mxu1 %v7715_v27  ;;  %v807_v26 = vld [vmem:[#allocation11 + $0x570] sm:$0xff]  ;;  %v804_v27 = vld [vmem:[#allocation11 + $0x558] sm:$0xff] }
 0x273   :  { %v7769_v33 = vcombine.high %v803_v5, %v807_v26  ;;  %v7768_v43 = vcombine.low %v803_v5, %v807_v26  ;;  %v7770_v47 = vcombine.low %v804_v27, %v808_v28  ;;  %v856_v5 = vld [vmem:[#allocation11 + $0x6f8] sm:$0xff] }
 0x274   :  { %4070 = vmatpush1.bf16.msra.mxu0 %v7712_v12  ;;  %v7771_v12 = vcombine.high %v804_v27, %v808_v28 }
 0x275   :  { %4234 = vmatpush1.bf16.msra.mxu1 %v7714_v37  ;;  %4071 = vmatprep.subr.bf16.mxu0 %v7721_v39  ;;  %v811_v37 = vld [vmem:[#allocation11 + $0x590] sm:$0xff] }
 0x276   :  { %4235 = vmatprep.subr.bf16.mxu1 %v7723_v41  ;;  %v815_v39 = vld [vmem:[#allocation11 + $0x5b0] sm:$0xff]  ;;  %v812_v41 = vld [vmem:[#allocation11 + $0x598] sm:$0xff] }
 0x277   :  { %v7777_v49 = vcombine.high %v811_v37, %v815_v39  ;;  %v7776_v55 = vcombine.low %v811_v37, %v815_v39  ;;  %v864_v37 = vld [vmem:[#allocation11 + $0x738] sm:$0xff] }
 0x278   :  { %4072 = vmatpush1.bf16.msra.mxu0 %v7720_v44  ;;  %v7779_v44 = vcombine.high %v812_v41, %v816_v42 }
 0x279   :  { %4236 = vmatpush1.bf16.msra.mxu1 %v7722_v50  ;;  %4082 = vmatprep.subr.bf16.mxu0 %v7729_v51  ;;  %v819_v50 = vld [vmem:[#allocation11 + $0x5d0] sm:$0xff] }
 0x27a   :  { %4246 = vmatprep.subr.bf16.mxu1 %v7731_v52  ;;  %v823_v51 = vld [vmem:[#allocation11 + $0x5f0] sm:$0xff]  ;;  %v820_v52 = vld [vmem:[#allocation11 + $0x5d8] sm:$0xff] }
 0x27b   :  { %4074 = vmatmul.mubr.bf16.vlgmr.msra.gmra.mrb[12].mxu0 %v8874_v45  ;;  %v7785_v57 = vcombine.high %v819_v50, %v823_v51  ;;  %v7787_v58 = vcombine.high %v820_v52, %v824_v54 }
 0x27c   :  { %4238 = vmatmul.mubr.bf16.vlgmr.msra.gmra.mrb[12].mxu1 %v8874_v45  ;;  %4083 = vmatpush1.bf16.msra.mxu0 %v7728_v56  ;;  %v7746_v45 = vcombine.low %v780_v2, %v784_v14  ;;  %v7778_v56 = vcombine.low %v812_v41, %v816_v42  ;;  %v7786_v2 = vcombine.low %v820_v52, %v824_v54 }
 0x27d   :  { %4114 = vmatprep.mubr.bf16.mxu0 %v8880_v53  ;;  %4247 = vmatpush1.bf16.msra.mxu1 %v7730_v59  ;;  %v827_v59 = vld [vmem:[#allocation11 + $0x610] sm:$0xff] }
 0x27e   :  { %4278 = vmatprep.mubr.bf16.mxu1 %v8880_v53  ;;  %4084 = vmatprep.subr.bf16.mxu0 %v7737_v60  ;;  %v7752_v53 = vcombine.low %v787_v6, %v791_v0  ;;  %v831_v60 = vld [vmem:[#allocation11 + $0x630] sm:$0xff]  ;;  %v840_v6 = vld [vmem:[#allocation11 + $0x678] sm:$0xff] }
 0x27f   :  { %4248 = vmatprep.subr.bf16.mxu1 %v7739_v63  ;;  %v7784_v63 = vcombine.low %v819_v50, %v823_v51  ;;  %v7793_v14 = vcombine.high %v827_v59, %v831_v60  ;;  %v7792_v0 = vcombine.low %v827_v59, %v831_v60  ;;  %v872_v50 = vld [vmem:[#allocation11 + $0x778] sm:$0xff] }
 0x280   :  { %4085 = vmatpush1.bf16.msra.mxu0 %v7736_v29  ;;  %v7795_v29 = vcombine.high %v828_v61, %v832_v62  ;;  %v880_v59 = vld [vmem:[#allocation11 + $0x7b8] sm:$0xff] }
 0x281   :  { %4249 = vmatpush1.bf16.msra.mxu1 %v7738_v1  ;;  %4086 = vmatprep.subr.bf16.mxu0 %v7745_v3  ;;  %v835_v1 = vld [vmem:[#allocation11 + $0x650] sm:$0xff] }
 0x282   :  { %4250 = vmatprep.subr.bf16.mxu1 %v7747_v4  ;;  %v839_v3 = vld [vmem:[#allocation11 + $0x670] sm:$0xff]  ;;  %v836_v4 = vld [vmem:[#allocation11 + $0x658] sm:$0xff] }
 0x283   :  { %v7801_v7 = vcombine.high %v835_v1, %v839_v3  ;;  %v7800_v17 = vcombine.low %v835_v1, %v839_v3  ;;  %v7802_v16 = vcombine.low %v836_v4, %v840_v6  ;;  %v888_v1 = vld [vmem:[#allocation11 + $0x7f8] sm:$0xff] }
 0x284   :  { %4087 = vmatpush1.bf16.msra.mxu0 %v7744_v8  ;;  %v7803_v8 = vcombine.high %v836_v4, %v840_v6 }
 0x285   :  { %4251 = vmatpush1.bf16.msra.mxu1 %v7746_v45  ;;  %4088 = vmatprep.subr.bf16.mxu0 %v7753_v9  ;;  %v843_v45 = vld [vmem:[#allocation11 + $0x690] sm:$0xff] }
 0x286   :  { %4252 = vmatprep.subr.bf16.mxu1 %v7755_v10  ;;  %v847_v9 = vld [vmem:[#allocation11 + $0x6b0] sm:$0xff]  ;;  %v844_v10 = vld [vmem:[#allocation11 + $0x698] sm:$0xff] }
 0x287   :  { %v7809_v20 = vcombine.high %v843_v45, %v847_v9  ;;  %v7808_v26 = vcombine.low %v843_v45, %v847_v9  ;;  %v7810_v27 = vcombine.low %v844_v10, %v848_v11  ;;  %v896_v45 = vld [vmem:[#allocation11 + $0x838] sm:$0xff] }
 0x288   :  { %4089 = vmatpush1.bf16.msra.mxu0 %v7752_v53  ;;  %v7811_v53 = vcombine.high %v844_v10, %v848_v11 }
 0x289   :  { %4253 = vmatpush1.bf16.msra.mxu1 %v7754_v21  ;;  %4090 = vmatprep.subr.bf16.mxu0 %v7761_v22  ;;  %v851_v21 = vld [vmem:[#allocation11 + $0x6d0] sm:$0xff] }
 0x28a   :  { %4254 = vmatprep.subr.bf16.mxu1 %v7763_v23  ;;  %v855_v22 = vld [vmem:[#allocation11 + $0x6f0] sm:$0xff]  ;;  %v852_v23 = vld [vmem:[#allocation11 + $0x6d8] sm:$0xff] }
 0x28b   :  { %v7817_v28 = vcombine.high %v851_v21, %v855_v22  ;;  %v7816_v39 = vcombine.low %v851_v21, %v855_v22  ;;  %v7818_v41 = vcombine.low %v852_v23, %v856_v5  ;;  %v900_v21 = vld [vmem:[#allocation11 + $0x858] sm:$0xff] }
 0x28c   :  { %4091 = vmatpush1.bf16.msra.mxu0 %v7760_v31  ;;  %v7819_v31 = vcombine.high %v852_v23, %v856_v5  ;;  %v904_v22 = vld [vmem:[#allocation11 + $0x878] sm:$0xff] }
 0x28d   :  { %4255 = vmatpush1.bf16.msra.mxu1 %v7762_v32  ;;  %4092 = vmatprep.subr.bf16.mxu0 %v7769_v33  ;;  %v859_v32 = vld [vmem:[#allocation11 + $0x710] sm:$0xff] }
 0x28e   :  { %4256 = vmatprep.subr.bf16.mxu1 %v7771_v12  ;;  %v863_v33 = vld [vmem:[#allocation11 + $0x730] sm:$0xff]  ;;  %v860_v12 = vld [vmem:[#allocation11 + $0x718] sm:$0xff] }
 0x28f   :  { %v7825_v42 = vcombine.high %v859_v32, %v863_v33  ;;  %v7824_v51 = vcombine.low %v859_v32, %v863_v33  ;;  %v7826_v52 = vcombine.low %v860_v12, %v864_v37  ;;  %v912_v32 = vld [vmem:[#allocation11 + $0x8b8] sm:$0xff] }
 0x290   :  { %4093 = vmatpush1.bf16.msra.mxu0 %v7768_v43  ;;  %v7827_v43 = vcombine.high %v860_v12, %v864_v37  ;;  %v7866_v12 = vcombine.low %v900_v21, %v904_v22 }
 0x291   :  { %4257 = vmatpush1.bf16.msra.mxu1 %v7770_v47  ;;  %4094 = vmatprep.subr.bf16.mxu0 %v7777_v49  ;;  %v867_v47 = vld [vmem:[#allocation11 + $0x750] sm:$0xff] }
 0x292   :  { %4258 = vmatprep.subr.bf16.mxu1 %v7779_v44  ;;  %v871_v49 = vld [vmem:[#allocation11 + $0x770] sm:$0xff]  ;;  %v868_v44 = vld [vmem:[#allocation11 + $0x758] sm:$0xff] }
 0x293   :  { %v7833_v54 = vcombine.high %v867_v47, %v871_v49  ;;  %v7832_v60 = vcombine.low %v867_v47, %v871_v49  ;;  %v7834_v61 = vcombine.low %v868_v44, %v872_v50  ;;  %v920_v47 = vld [vmem:[#allocation11 + $0x8f8] sm:$0xff] }
 0x294   :  { %4095 = vmatpush1.bf16.msra.mxu0 %v7776_v55  ;;  %v7835_v55 = vcombine.high %v868_v44, %v872_v50 }
 0x295   :  { %4259 = vmatpush1.bf16.msra.mxu1 %v7778_v56  ;;  %4096 = vmatprep.subr.bf16.mxu0 %v7785_v57  ;;  %v875_v56 = vld [vmem:[#allocation11 + $0x790] sm:$0xff] }
 0x296   :  { %4260 = vmatprep.subr.bf16.mxu1 %v7787_v58  ;;  %v879_v57 = vld [vmem:[#allocation11 + $0x7b0] sm:$0xff]  ;;  %v876_v58 = vld [vmem:[#allocation11 + $0x798] sm:$0xff] }
 0x297   :  { %v7841_v62 = vcombine.high %v875_v56, %v879_v57  ;;  %v7840_v3 = vcombine.low %v875_v56, %v879_v57  ;;  %v7842_v4 = vcombine.low %v876_v58, %v880_v59 }
 0x298   :  { %4097 = vmatpush1.bf16.msra.mxu0 %v7784_v63  ;;  %v7843_v63 = vcombine.high %v876_v58, %v880_v59  ;;  %v931_v59 = vld [vmem:[#allocation11 + $0x950] sm:$0xff] }
 0x299   :  { %4261 = vmatpush1.bf16.msra.mxu1 %v7786_v2  ;;  %4098 = vmatprep.subr.bf16.mxu0 %v7793_v14  ;;  %v883_v2 = vld [vmem:[#allocation11 + $0x7d0] sm:$0xff] }
 0x29a   :  { %4262 = vmatprep.subr.bf16.mxu1 %v7795_v29  ;;  %v887_v14 = vld [vmem:[#allocation11 + $0x7f0] sm:$0xff]  ;;  %v884_v29 = vld [vmem:[#allocation11 + $0x7d8] sm:$0xff] }
 0x29b   :  { %v7849_v6 = vcombine.high %v883_v2, %v887_v14  ;;  %v7848_v9 = vcombine.low %v883_v2, %v887_v14  ;;  %v7850_v10 = vcombine.low %v884_v29, %v888_v1 }
 0x29c   :  { %4099 = vmatpush1.bf16.msra.mxu0 %v7792_v0  ;;  %v7851_v0 = vcombine.high %v884_v29, %v888_v1  ;;  %v939_v1 = vld [vmem:[#allocation11 + $0x990] sm:$0xff] }
 0x29d   :  { %4263 = vmatpush1.bf16.msra.mxu1 %v7794_v30  ;;  %4100 = vmatprep.subr.bf16.mxu0 %v7801_v7  ;;  %v891_v30 = vld [vmem:[#allocation11 + $0x810] sm:$0xff] }
 0x29e   :  { %4264 = vmatprep.subr.bf16.mxu1 %v7803_v8  ;;  %v895_v7 = vld [vmem:[#allocation11 + $0x830] sm:$0xff]  ;;  %v892_v8 = vld [vmem:[#allocation11 + $0x818] sm:$0xff] }
 0x29f   :  { %v7857_v11 = vcombine.high %v891_v30, %v895_v7  ;;  %v7858_v23 = vcombine.low %v892_v8, %v896_v45 }
 0x2a0   :  { %4101 = vmatpush1.bf16.msra.mxu0 %v7800_v17  ;;  %v7859_v17 = vcombine.high %v892_v8, %v896_v45  ;;  %v947_v45 = vld [vmem:[#allocation11 + $0x9d0] sm:$0xff] }
 0x2a1   :  { %4265 = vmatpush1.bf16.msra.mxu1 %v7802_v16  ;;  %4102 = vmatprep.subr.bf16.mxu0 %v7809_v20  ;;  %v899_v16 = vld [vmem:[#allocation11 + $0x850] sm:$0xff] }
 0x2a2   :  { %4266 = vmatprep.subr.bf16.mxu1 %v7811_v53  ;;  %v903_v20 = vld [vmem:[#allocation11 + $0x870] sm:$0xff]  ;;  %v7856_v53 = vcombine.low %v891_v30, %v895_v7 }
 0x2a3   :  { %v7865_v5 = vcombine.high %v899_v16, %v903_v20  ;;  %v7864_v33 = vcombine.low %v899_v16, %v903_v20 }
 0x2a4   :  { %4103 = vmatpush1.bf16.msra.mxu0 %v7808_v26  ;;  %v907_v26 = vld [vmem:[#allocation11 + $0x890] sm:$0xff] }
 0x2a5   :  { %4267 = vmatpush1.bf16.msra.mxu1 %v7810_v27  ;;  %4104 = vmatprep.subr.bf16.mxu0 %v7817_v28  ;;  %v911_v27 = vld [vmem:[#allocation11 + $0x8b0] sm:$0xff]  ;;  %v7867_v28 = vcombine.high %v900_v21, %v904_v22 }
 0x2a6   :  { %4268 = vmatprep.subr.bf16.mxu1 %v7819_v31  ;;  %v908_v31 = vld [vmem:[#allocation11 + $0x898] sm:$0xff]  ;;  %v7873_v37 = vcombine.high %v907_v26, %v911_v27  ;;  %v7872_v49 = vcombine.low %v907_v26, %v911_v27  ;;  %v955_v21 = vld [vmem:[#allocation11 + $0xa10] sm:$0xff] }
 0x2a7   :  { %v959_v22 = vld [vmem:[#allocation11 + $0xa30] sm:$0xff] }
 0x2a8   :  { %4105 = vmatpush1.bf16.msra.mxu0 %v7816_v39  ;;  %v7875_v39 = vcombine.high %v908_v31, %v912_v32 }
 0x2a9   :  { %4269 = vmatpush1.bf16.msra.mxu1 %v7818_v41  ;;  %4106 = vmatprep.subr.bf16.mxu0 %v7825_v42  ;;  %v915_v41 = vld [vmem:[#allocation11 + $0x8d0] sm:$0xff] }
 0x2aa   :  { %4270 = vmatprep.subr.bf16.mxu1 %v7827_v43  ;;  %v919_v42 = vld [vmem:[#allocation11 + $0x8f0] sm:$0xff]  ;;  %v916_v43 = vld [vmem:[#allocation11 + $0x8d8] sm:$0xff] }
 0x2ab   :  { %v7881_v44 = vcombine.high %v915_v41, %v919_v42  ;;  %v7883_v50 = vcombine.high %v916_v43, %v920_v47  ;;  %v7882_v56 = vcombine.low %v916_v43, %v920_v47  ;;  %v971_v47 = vld [vmem:[#allocation11 + $0xa90] sm:$0xff] }
 0x2ac   :  { %4107 = vmatpush1.bf16.msra.mxu0 %v7824_v51  ;;  %v923_v51 = vld [vmem:[#allocation11 + $0x910] sm:$0xff] }
 0x2ad   :  { %4271 = vmatpush1.bf16.msra.mxu1 %v7826_v52  ;;  %4108 = vmatprep.subr.bf16.mxu0 %v7833_v54  ;;  %v927_v52 = vld [vmem:[#allocation11 + $0x930] sm:$0xff]  ;;  %v924_v54 = vld [vmem:[#allocation11 + $0x918] sm:$0xff] }
 0x2ae   :  { %4272 = vmatprep.subr.bf16.mxu1 %v7835_v55  ;;  %v928_v55 = vld [vmem:[#allocation11 + $0x938] sm:$0xff]  ;;  %v7889_v57 = vcombine.high %v923_v51, %v927_v52 }
 0x2af   :  { %v7891_v58 = vcombine.high %v924_v54, %v928_v55  ;;  %v7890_v2 = vcombine.low %v924_v54, %v928_v55  ;;  %v979_v55 = vld [vmem:[#allocation11 + $0xad0] sm:$0xff] }
 0x2b0   :  { %4109 = vmatpush1.bf16.msra.mxu0 %v7832_v60  ;;  %v935_v60 = vld [vmem:[#allocation11 + $0x970] sm:$0xff] }
 0x2b1   :  { %4273 = vmatpush1.bf16.msra.mxu1 %v7834_v61  ;;  %4110 = vmatprep.subr.bf16.mxu0 %v7841_v62  ;;  %v932_v61 = vld [vmem:[#allocation11 + $0x958] sm:$0xff]  ;;  %v7897_v14 = vcombine.high %v931_v59, %v935_v60 }
 0x2b2   :  { %4274 = vmatprep.subr.bf16.mxu1 %v7843_v63  ;;  %v936_v62 = vld [vmem:[#allocation11 + $0x978] sm:$0xff]  ;;  %v7888_v63 = vcombine.low %v923_v51, %v927_v52 }
 0x2b3   :  { %v7899_v29 = vcombine.high %v932_v61, %v936_v62  ;;  %v7898_v30 = vcombine.low %v932_v61, %v936_v62  ;;  %v987_v62 = vld [vmem:[#allocation11 + $0xb10] sm:$0xff] }
 0x2b4   :  { %4111 = vmatpush1.bf16.msra.mxu0 %v7840_v3  ;;  %v943_v3 = vld [vmem:[#allocation11 + $0x9b0] sm:$0xff] }
 0x2b5   :  { %4275 = vmatpush1.bf16.msra.mxu1 %v7842_v4  ;;  %4112 = vmatprep.subr.bf16.mxu0 %v7849_v6  ;;  %v940_v4 = vld [vmem:[#allocation11 + $0x998] sm:$0xff]  ;;  %v7905_v7 = vcombine.high %v939_v1, %v943_v3 }
 0x2b6   :  { %4276 = vmatprep.subr.bf16.mxu1 %v7851_v0  ;;  %v944_v6 = vld [vmem:[#allocation11 + $0x9b8] sm:$0xff]  ;;  %v7896_v0 = vcombine.low %v931_v59, %v935_v60 }
 0x2b7   :  { %v7907_v8 = vcombine.high %v940_v4, %v944_v6  ;;  %v7906_v16 = vcombine.low %v940_v4, %v944_v6  ;;  %v995_v6 = vld [vmem:[#allocation11 + $0xb50] sm:$0xff] }
 0x2b8   :  { %4113 = vmatpush1.bf16.msra.mxu0 %v7848_v9  ;;  %v951_v9 = vld [vmem:[#allocation11 + $0x9f0] sm:$0xff] }
 0x2b9   :  { %4277 = vmatpush1.bf16.msra.mxu1 %v7850_v10  ;;  %4123 = vmatprep.subr.bf16.mxu0 %v7857_v11  ;;  %v948_v10 = vld [vmem:[#allocation11 + $0x9d8] sm:$0xff]  ;;  %v7913_v20 = vcombine.high %v947_v45, %v951_v9  ;;  %v7912_v26 = vcombine.low %v947_v45, %v951_v9 }
 0x2ba   :  { %4287 = vmatprep.subr.bf16.mxu1 %v7859_v17  ;;  %v952_v11 = vld [vmem:[#allocation11 + $0x9f8] sm:$0xff]  ;;  %v7904_v17 = vcombine.low %v939_v1, %v943_v3 }
 0x2bb   :  { %4115 = vmatmul.mubr.bf16.vlgmr.msra.gmra.mrb[12].mxu0 %v8908_v35  ;;  %v7914_v27 = vcombine.low %v948_v10, %v952_v11 }
 0x2bc   :  { %4279 = vmatmul.mubr.bf16.vlgmr.msra.gmra.mrb[12].mxu1 %v8908_v35  ;;  %4124 = vmatpush1.bf16.msra.mxu0 %v7856_v53  ;;  %v7874_v35 = vcombine.low %v908_v31, %v912_v32  ;;  %v7915_v53 = vcombine.high %v948_v10, %v952_v11  ;;  %v963_v32 = vld [vmem:[#allocation11 + $0xa50] sm:$0xff] }
 0x2bd   :  { %4155 = vmatprep.mubr.bf16.mxu0 %v8910_v48  ;;  %4288 = vmatpush1.bf16.msra.mxu1 %v7858_v23  ;;  %v956_v23 = vld [vmem:[#allocation11 + $0xa18] sm:$0xff]  ;;  %v1003_v11 = vld [vmem:[#allocation11 + $0xb90] sm:$0xff] }
 0x2be   :  { %4319 = vmatprep.mubr.bf16.mxu1 %v8910_v48  ;;  %4125 = vmatprep.subr.bf16.mxu0 %v7865_v5  ;;  %v7880_v48 = vcombine.low %v915_v41, %v919_v42  ;;  %v960_v5 = vld [vmem:[#allocation11 + $0xa38] sm:$0xff] }
 0x2bf   :  { %4289 = vmatprep.subr.bf16.mxu1 %v7867_v28  ;;  %v7921_v28 = vcombine.high %v955_v21, %v959_v22  ;;  %v7923_v31 = vcombine.high %v956_v23, %v960_v5  ;;  %v7922_v41 = vcombine.low %v956_v23, %v960_v5  ;;  %v1011_v5 = vld [vmem:[#allocation11 + $0xbd0] sm:$0xff] }
 0x2c0   :  { %4126 = vmatpush1.bf16.msra.mxu0 %v7864_v33  ;;  %v967_v33 = vld [vmem:[#allocation11 + $0xa70] sm:$0xff] }
 0x2c1   :  { %4290 = vmatpush1.bf16.msra.mxu1 %v7866_v12  ;;  %4127 = vmatprep.subr.bf16.mxu0 %v7873_v37  ;;  %v964_v12 = vld [vmem:[#allocation11 + $0xa58] sm:$0xff]  ;;  %v7929_v42 = vcombine.high %v963_v32, %v967_v33 }
 0x2c2   :  { %4291 = vmatprep.subr.bf16.mxu1 %v7875_v39  ;;  %v968_v37 = vld [vmem:[#allocation11 + $0xa78] sm:$0xff]  ;;  %v7920_v39 = vcombine.low %v955_v21, %v959_v22 }
 0x2c3   :  { %v7931_v43 = vcombine.high %v964_v12, %v968_v37  ;;  %v7930_v51 = vcombine.low %v964_v12, %v968_v37  ;;  %v1019_v37 = vld [vmem:[#allocation11 + $0xc10] sm:$0xff] }
 0x2c4   :  { %4128 = vmatpush1.bf16.msra.mxu0 %v7872_v49  ;;  %v975_v49 = vld [vmem:[#allocation11 + $0xab0] sm:$0xff] }
 0x2c5   :  { %4292 = vmatpush1.bf16.msra.mxu1 %v7874_v35  ;;  %4129 = vmatprep.subr.bf16.mxu0 %v7881_v44  ;;  %v972_v35 = vld [vmem:[#allocation11 + $0xa98] sm:$0xff]  ;;  %v7937_v52 = vcombine.high %v971_v47, %v975_v49 }
 0x2c6   :  { %4293 = vmatprep.subr.bf16.mxu1 %v7883_v50  ;;  %v976_v44 = vld [vmem:[#allocation11 + $0xab8] sm:$0xff]  ;;  %v7928_v50 = vcombine.low %v963_v32, %v967_v33 }
 0x2c7   :  { %v7939_v54 = vcombine.high %v972_v35, %v976_v44  ;;  %v7938_v59 = vcombine.low %v972_v35, %v976_v44  ;;  %v1027_v44 = vld [vmem:[#allocation11 + $0xc50] sm:$0xff] }
 0x2c8   :  { %4130 = vmatpush1.bf16.msra.mxu0 %v7880_v48  ;;  %v983_v48 = vld [vmem:[#allocation11 + $0xaf0] sm:$0xff] }
 0x2c9   :  { %4294 = vmatpush1.bf16.msra.mxu1 %v7882_v56  ;;  %4131 = vmatprep.subr.bf16.mxu0 %v7889_v57  ;;  %v980_v56 = vld [vmem:[#allocation11 + $0xad8] sm:$0xff]  ;;  %v7945_v60 = vcombine.high %v979_v55, %v983_v48 }
 0x2ca   :  { %4295 = vmatprep.subr.bf16.mxu1 %v7891_v58  ;;  %v984_v57 = vld [vmem:[#allocation11 + $0xaf8] sm:$0xff]  ;;  %v7936_v58 = vcombine.low %v971_v47, %v975_v49 }
 0x2cb   :  { %v7947_v61 = vcombine.high %v980_v56, %v984_v57  ;;  %v7946_v1 = vcombine.low %v980_v56, %v984_v57  ;;  %v1035_v56 = vld [vmem:[#allocation11 + $0xc90] sm:$0xff] }
 0x2cc   :  { %4132 = vmatpush1.bf16.msra.mxu0 %v7888_v63  ;;  %v991_v63 = vld [vmem:[#allocation11 + $0xb30] sm:$0xff] }
 0x2cd   :  { %4296 = vmatpush1.bf16.msra.mxu1 %v7890_v2  ;;  %4133 = vmatprep.subr.bf16.mxu0 %v7897_v14  ;;  %v988_v2 = vld [vmem:[#allocation11 + $0xb18] sm:$0xff]  ;;  %v7953_v3 = vcombine.high %v987_v62, %v991_v63  ;;  %v1039_v57 = vld [vmem:[#allocation11 + $0xcb0] sm:$0xff] }
 0x2ce   :  { %4297 = vmatprep.subr.bf16.mxu1 %v7899_v29  ;;  %v992_v14 = vld [vmem:[#allocation11 + $0xb38] sm:$0xff]  ;;  %v7944_v29 = vcombine.low %v979_v55, %v983_v48 }
 0x2cf   :  { %v7955_v4 = vcombine.high %v988_v2, %v992_v14  ;;  %v7954_v45 = vcombine.low %v988_v2, %v992_v14  ;;  %v1043_v14 = vld [vmem:[#allocation11 + $0xcd0] sm:$0xff] }
 0x2d0   :  { %4134 = vmatpush1.bf16.msra.mxu0 %v7896_v0  ;;  %v999_v0 = vld [vmem:[#allocation11 + $0xb70] sm:$0xff] }
 0x2d1   :  { %4298 = vmatpush1.bf16.msra.mxu1 %v7898_v30  ;;  %4135 = vmatprep.subr.bf16.mxu0 %v7905_v7  ;;  %v996_v30 = vld [vmem:[#allocation11 + $0xb58] sm:$0xff]  ;;  %v7961_v9 = vcombine.high %v995_v6, %v999_v0 }
 0x2d2   :  { %4299 = vmatprep.subr.bf16.mxu1 %v7907_v8  ;;  %v1000_v7 = vld [vmem:[#allocation11 + $0xb78] sm:$0xff]  ;;  %v7952_v8 = vcombine.low %v987_v62, %v991_v63  ;;  %v8001_v63 = vcombine.high %v1035_v56, %v1039_v57 }
 0x2d3   :  { %v7963_v10 = vcombine.high %v996_v30, %v1000_v7  ;;  %v7962_v21 = vcombine.low %v996_v30, %v1000_v7  ;;  %v1051_v30 = vld [vmem:[#allocation11 + $0xd10] sm:$0xff] }
 0x2d4   :  { %4136 = vmatpush1.bf16.msra.mxu0 %v7904_v17  ;;  %v1007_v17 = vld [vmem:[#allocation11 + $0xbb0] sm:$0xff] }
 0x2d5   :  { %4300 = vmatpush1.bf16.msra.mxu1 %v7906_v16  ;;  %4137 = vmatprep.subr.bf16.mxu0 %v7913_v20  ;;  %v1004_v16 = vld [vmem:[#allocation11 + $0xb98] sm:$0xff]  ;;  %v7969_v22 = vcombine.high %v1003_v11, %v1007_v17  ;;  %v1055_v7 = vld [vmem:[#allocation11 + $0xd30] sm:$0xff] }
 0x2d6   :  { %4301 = vmatprep.subr.bf16.mxu1 %v7915_v53  ;;  %v1008_v20 = vld [vmem:[#allocation11 + $0xbb8] sm:$0xff]  ;;  %v7960_v53 = vcombine.low %v995_v6, %v999_v0 }
 0x2d7   :  { %v7971_v23 = vcombine.high %v1004_v16, %v1008_v20  ;;  %v7970_v32 = vcombine.low %v1004_v16, %v1008_v20  ;;  %v1063_v16 = vld [vmem:[#allocation11 + $0xd70] sm:$0xff]  ;;  %v1060_v20 = vld [vmem:[#allocation11 + $0xd58] sm:$0xff] }
 0x2d8   :  { %4138 = vmatpush1.bf16.msra.mxu0 %v7912_v26  ;;  %v1015_v26 = vld [vmem:[#allocation11 + $0xbf0] sm:$0xff] }
 0x2d9   :  { %4302 = vmatpush1.bf16.msra.mxu1 %v7914_v27  ;;  %4139 = vmatprep.subr.bf16.mxu0 %v7921_v28  ;;  %v1012_v27 = vld [vmem:[#allocation11 + $0xbd8] sm:$0xff]  ;;  %v7977_v33 = vcombine.high %v1011_v5, %v1015_v26 }
 0x2da   :  { %4303 = vmatprep.subr.bf16.mxu1 %v7923_v31  ;;  %v1016_v28 = vld [vmem:[#allocation11 + $0xbf8] sm:$0xff]  ;;  %v7968_v31 = vcombine.low %v1003_v11, %v1007_v17  ;;  %v1059_v17 = vld [vmem:[#allocation11 + $0xd50] sm:$0xff] }
 0x2db   :  { %v7979_v12 = vcombine.high %v1012_v27, %v1016_v28  ;;  %v7978_v47 = vcombine.low %v1012_v27, %v1016_v28  ;;  %v1067_v28 = vld [vmem:[#allocation11 + $0xd90] sm:$0xff] }
 0x2dc   :  { %4140 = vmatpush1.bf16.msra.mxu0 %v7920_v39  ;;  %v1023_v39 = vld [vmem:[#allocation11 + $0xc30] sm:$0xff] }
 0x2dd   :  { %4304 = vmatpush1.bf16.msra.mxu1 %v7922_v41  ;;  %4141 = vmatprep.subr.bf16.mxu0 %v7929_v42  ;;  %v1020_v41 = vld [vmem:[#allocation11 + $0xc18] sm:$0xff]  ;;  %v7985_v49 = vcombine.high %v1019_v37, %v1023_v39 }
 0x2de   :  { %4305 = vmatprep.subr.bf16.mxu1 %v7931_v43  ;;  %v1024_v42 = vld [vmem:[#allocation11 + $0xc38] sm:$0xff]  ;;  %v7976_v43 = vcombine.low %v1011_v5, %v1015_v26  ;;  %v8966_v5 = vld [vmem:[#allocation13 + $0x1] ss:$2 sm:$0xff]  ;;  %v8025_v26 = vcombine.high %v1059_v17, %v1063_v16 }
 0x2df   :  { %v7987_v35 = vcombine.high %v1020_v41, %v1024_v42  ;;  %v7986_v55 = vcombine.low %v1020_v41, %v1024_v42 }
 0x2e0   :  { %4142 = vmatpush1.bf16.msra.mxu0 %v7928_v50  ;;  %v1031_v50 = vld [vmem:[#allocation11 + $0xc70] sm:$0xff] }
 0x2e1   :  { %4306 = vmatpush1.bf16.msra.mxu1 %v7930_v51  ;;  %4143 = vmatprep.subr.bf16.mxu0 %v7937_v52  ;;  %v7984_v51 = vcombine.low %v1019_v37, %v1023_v39  ;;  %v1028_v52 = vld [vmem:[#allocation11 + $0xc58] sm:$0xff]  ;;  %v7993_v48 = vcombine.high %v1027_v44, %v1031_v50  ;;  %v4425_v39 = vrot.slane %v8966_v5, %v8846_v13 }
 0x2e2   :  { %4307 = vmatprep.subr.bf16.mxu1 %v7939_v54  ;;  %v1032_v54 = vld [vmem:[#allocation11 + $0xc78] sm:$0xff] }
 0x2e3   :  { %v7994_v62 = vcombine.low %v1028_v52, %v1032_v54  ;;  %v1072_v37 = vld [vmem:[#allocation11 + $0xdb8] sm:$0xff] }
 0x2e4   :  { %4144 = vmatpush1.bf16.msra.mxu0 %v7936_v58  ;;  %v7995_v58 = vcombine.high %v1028_v52, %v1032_v54  ;;  %v4437_v52 = vrot.slane %v8966_v5, %v8858_v18 }
 0x2e5   :  { %4308 = vmatpush1.bf16.msra.mxu1 %v7938_v59  ;;  %4145 = vmatprep.subr.bf16.mxu0 %v7945_v60  ;;  %v1036_v59 = vld [vmem:[#allocation11 + $0xc98] sm:$0xff] }
 0x2e6   :  { %4309 = vmatprep.subr.bf16.mxu1 %v7947_v61  ;;  %v1040_v60 = vld [vmem:[#allocation11 + $0xcb8] sm:$0xff]  ;;  %v7992_v61 = vcombine.low %v1027_v44, %v1031_v50 }
 0x2e7   :  { %v8003_v2 = vcombine.high %v1036_v59, %v1040_v60 }
 0x2e8   :  { %4146 = vmatpush1.bf16.msra.mxu0 %v7944_v29  ;;  %v1047_v29 = vld [vmem:[#allocation11 + $0xcf0] sm:$0xff] }
 0x2e9   :  { %4310 = vmatpush1.bf16.msra.mxu1 %v7946_v1  ;;  %4147 = vmatprep.subr.bf16.mxu0 %v7953_v3  ;;  %v1044_v1 = vld [vmem:[#allocation11 + $0xcd8] sm:$0xff]  ;;  %v8009_v6 = vcombine.high %v1043_v14, %v1047_v29 }
 0x2ea   :  { %4311 = vmatprep.subr.bf16.mxu1 %v7955_v4  ;;  %v1048_v3 = vld [vmem:[#allocation11 + $0xcf8] sm:$0xff]  ;;  %v8000_v4 = vcombine.low %v1035_v56, %v1039_v57 }
 0x2eb   :  { %v8011_v0 = vcombine.high %v1044_v1, %v1048_v3 }
 0x2ec   :  { %4148 = vmatpush1.bf16.msra.mxu0 %v7952_v8  ;;  %v1052_v8 = vld [vmem:[#allocation11 + $0xd18] sm:$0xff] }
 0x2ed   :  { %4312 = vmatpush1.bf16.msra.mxu1 %v7954_v45  ;;  %4149 = vmatprep.subr.bf16.mxu0 %v7961_v9  ;;  %v1056_v45 = vld [vmem:[#allocation11 + $0xd38] sm:$0xff]  ;;  %v8010_v9 = vcombine.low %v1044_v1, %v1048_v3 }
 0x2ee   :  { %4313 = vmatprep.subr.bf16.mxu1 %v7963_v10  ;;  %v8017_v10 = vcombine.high %v1051_v30, %v1055_v7  ;;  %v8019_v11 = vcombine.high %v1052_v8, %v1056_v45 }
 0x2f0   :  { %4150 = vmatpush1.bf16.msra.mxu0 %v7960_v53  ;;  %v1064_v53 = vld [vmem:[#allocation11 + $0xd78] sm:$0xff] }
 0x2f1   :  { %4314 = vmatpush1.bf16.msra.mxu1 %v7962_v21  ;;  %4151 = vmatprep.subr.bf16.mxu0 %v7969_v22  ;;  %v8016_v21 = vcombine.low %v1051_v30, %v1055_v7  ;;  %v8964_v22 = vld [vmem:[#allocation13] ss:$2 sm:$0xff]  ;;  %v8027_v27 = vcombine.high %v1060_v20, %v1064_v53 }
 0x2f2   :  { %4315 = vmatprep.subr.bf16.mxu1 %v7971_v23  ;;  %v8018_v23 = vcombine.low %v1052_v8, %v1056_v45  ;;  %v4378_v41 = vrot.slane %v8964_v22, %v8851_v15  ;;  %v4386_v42 = vrot.slane %v8964_v22, %v8858_v18  ;;  %v1083_v45 = vld [vmem:[#allocation11 + $0xe10] sm:$0xff] }
 0x2f4   :  { %4152 = vmatpush1.bf16.msra.mxu0 %v7968_v31  ;;  %v1071_v31 = vld [vmem:[#allocation11 + $0xdb0] sm:$0xff] }
 0x2f5   :  { %4316 = vmatpush1.bf16.msra.mxu1 %v7970_v32  ;;  %4153 = vmatprep.subr.bf16.mxu0 %v7977_v33  ;;  %v4374_v32 = vrot.slane %v8964_v22, %v8846_v13  ;;  %v4382_v33 = vrot.slane %v8964_v22, %v8893_v34 }
 0x2f6   :  { %4317 = vmatprep.subr.bf16.mxu1 %v7979_v12  ;;  %v1068_v12 = vld [vmem:[#allocation11 + $0xd98] sm:$0xff] }
 0x2f7   :  { %v8035_v54 = vcombine.high %v1068_v12, %v1072_v37  ;;  %v8034_v1 = vcombine.low %v1068_v12, %v1072_v37 }
 0x2f8   :  { %4154 = vmatpush1.bf16.msra.mxu0 %v7976_v43  ;;  %v8024_v43 = vcombine.low %v1059_v17, %v1063_v16  ;;  %v1088_v17 = vld [vmem:[#allocation11 + $0xe38] sm:$0xff] }
 0x2f9   :  { %4318 = vmatpush1.bf16.msra.mxu1 %v7978_v47  ;;  %4164 = vmatprep.subr.bf16.mxu0 %v7985_v49  ;;  %v4433_v47 = vrot.slane %v8966_v5, %v8893_v34  ;;  %v8026_v49 = vcombine.low %v1060_v20, %v1064_v53 }
 0x2fa   :  { %4328 = vmatprep.subr.bf16.mxu1 %v7987_v35  ;;  %v8033_v35 = vcombine.high %v1067_v28, %v1071_v31 }
 0x2fb   :  { %4156 = vmatmul.mubr.bf16.vlgmr.msra.gmra.mrb[12].mxu0 %v8932_v25 }
 0x2fc   :  { %4320 = vmatmul.mubr.bf16.vlgmr.msra.gmra.mrb[12].mxu1 %v8932_v25  ;;  %4165 = vmatpush1.bf16.msra.mxu0 %v7984_v51  ;;  %v8002_v25 = vcombine.low %v1036_v59, %v1040_v60  ;;  %v4429_v51 = vrot.slane %v8966_v5, %v8851_v15  ;;  %v1076_v60 = vld [vmem:[#allocation11 + $0xdd8] sm:$0xff] }
 0x2fd   :  { %4196 = vmatprep.mubr.bf16.mxu0 %v8934_v40  ;;  %4329 = vmatpush1.bf16.msra.mxu1 %v7986_v55  ;;  %v1075_v55 = vld [vmem:[#allocation11 + $0xdd0] sm:$0xff] }
 0x2fe   :  { %4360 = vmatprep.mubr.bf16.mxu1 %v8934_v40  ;;  %4166 = vmatprep.subr.bf16.mxu0 %v7993_v48  ;;  %v8008_v40 = vcombine.low %v1043_v14, %v1047_v29  ;;  %v1079_v48 = vld [vmem:[#allocation11 + $0xdf0] sm:$0xff]  ;;  %v8032_v29 = vcombine.low %v1067_v28, %v1071_v31  ;;  %v1092_v31 = vld [vmem:[#allocation11 + $0xe58] sm:$0xff] }
 0x2ff   :  { %4330 = vmatprep.subr.bf16.mxu1 %v7995_v58  ;;  %v8040_v53 = vcombine.low %v1075_v55, %v1079_v48  ;;  %v1095_v28 = vld [vmem:[#allocation11 + $0xe70] sm:$0xff] }
 0x300   :  { %4167 = vmatpush1.bf16.msra.mxu0 %v7992_v61  ;;  %v1080_v61 = vld [vmem:[#allocation11 + $0xdf8] sm:$0xff] }
 0x301   :  { %4331 = vmatpush1.bf16.msra.mxu1 %v7994_v62  ;;  %4168 = vmatprep.subr.bf16.mxu0 %v8001_v63  ;;  %v8043_v8 = vcombine.high %v1076_v60, %v1080_v61 }
 0x302   :  { %4332 = vmatprep.subr.bf16.mxu1 %v8003_v2 }
 0x304   :  { %4169 = vmatpush1.bf16.msra.mxu0 %v8000_v4 }
 0x305   :  { %4333 = vmatpush1.bf16.msra.mxu1 %v8002_v25  ;;  %4170 = vmatprep.subr.bf16.mxu0 %v8009_v6 }
 0x306   :  { %4334 = vmatprep.subr.bf16.mxu1 %v8011_v0  ;;  %v8041_v0 = vcombine.high %v1075_v55, %v1079_v48  ;;  %v1112_v55 = vld [vmem:[#allocation11 + $0xef8] sm:$0xff] }
 0x308   :  { %4171 = vmatpush1.bf16.msra.mxu0 %v8008_v40  ;;  %v1087_v40 = vld [vmem:[#allocation11 + $0xe30] sm:$0xff] }
 0x309   :  { %4335 = vmatpush1.bf16.msra.mxu1 %v8010_v9  ;;  %4172 = vmatprep.subr.bf16.mxu0 %v8017_v10 }
 0x30a   :  { %4336 = vmatprep.subr.bf16.mxu1 %v8019_v11  ;;  %v1084_v11 = vld [vmem:[#allocation11 + $0xe18] sm:$0xff] }
 0x30b   :  { %v8050_v12 = vcombine.low %v1084_v11, %v1088_v17 }
 0x30c   :  { %4173 = vmatpush1.bf16.msra.mxu0 %v8016_v21  ;;  %v8042_v21 = vcombine.low %v1076_v60, %v1080_v61  ;;  %v1119_v60 = vld [vmem:[#allocation11 + $0xf30] sm:$0xff]  ;;  %v1116_v61 = vld [vmem:[#allocation11 + $0xf18] sm:$0xff] }
 0x30d   :  { %4337 = vmatpush1.bf16.msra.mxu1 %v8018_v23  ;;  %4174 = vmatprep.subr.bf16.mxu0 %v8025_v26  ;;  %v8049_v23 = vcombine.high %v1083_v45, %v1087_v40  ;;  %v8051_v26 = vcombine.high %v1084_v11, %v1088_v17  ;;  %v1131_v17 = vld [vmem:[#allocation11 + $0xf90] sm:$0xff] }
 0x30e   :  { %v3870_v44 = vpop.f32.mrb[8].mxu0  ;;  %v4034_v50 = vpop.f32.mrb[8].mxu1  ;;  %4338 = vmatprep.subr.bf16.mxu1 %v8027_v27  ;;  %v1091_v27 = vld [vmem:[#allocation11 + $0xe50] sm:$0xff] }
 0x30f   :  { %v4411_v56 = vmul.f32 %v4374_v32, %v3870_v44  ;;  %v4413_v57 = vmul.f32 %v4382_v33, %v4034_v50  ;;  %v3872_v58 = vpop.f32.mrb[9].mxu0  ;;  %v4036_v59 = vpop.f32.mrb[9].mxu1  ;;  %v1096_v32 = vld [vmem:[#allocation11 + $0xe78] sm:$0xff]  ;;  %v8048_v33 = vcombine.low %v1083_v45, %v1087_v40  ;;  %v8057_v37 = vcombine.high %v1091_v27, %v1095_v28 }
 0x310   :  { %v4412_v62 = vmul.f32 %v4378_v41, %v3872_v58  ;;  %v4414_v63 = vmul.f32 %v4386_v42, %v4036_v59  ;;  %v3874_v2 = vpop.f32.mrb[10].mxu0  ;;  %v4038_v14 = vpop.f32.mrb[10].mxu1  ;;  %4175 = vmatpush1.bf16.msra.mxu0 %v8024_v43  ;;  %v1099_v41 = vld [vmem:[#allocation11 + $0xe90] sm:$0xff]  ;;  %v1100_v43 = vld [vmem:[#allocation11 + $0xe98] sm:$0xff] }
 0x311   :  { %v8984_v3 = vadd.f32 %v4425_v39, %v4411_v56  ;;  %v8986_v4 = vadd.f32 %v4433_v47, %v4413_v57  ;;  %4339 = vmatpush1.bf16.msra.mxu1 %v8026_v49  ;;  %v3875_v25 = vpop.f32.mrb[11].mxu0  ;;  %v4039_v6 = vpop.f32.mrb[11].mxu1  ;;  %4176 = vmatprep.subr.bf16.mxu0 %v8033_v35  ;;  %v8059_v39 = vcombine.high %v1092_v31, %v1096_v32  ;;  %v1103_v42 = vld [vmem:[#allocation11 + $0xeb0] sm:$0xff]  ;;  %v1104_v47 = vld [vmem:[#allocation11 + $0xeb8] sm:$0xff] }
 0x312   :  { %v8988_v30 = vadd.f32 %v4429_v51, %v4412_v62  ;;  %v8990_v7 = vadd.f32 %v4437_v52, %v4414_v63  ;;  %4340 = vmatprep.subr.bf16.mxu1 %v8035_v54  ;;  %v8056_v49 = vcombine.low %v1091_v27, %v1095_v28  ;;  %v8058_v35 = vcombine.low %v1092_v31, %v1096_v32  ;;  %v1107_v51 = vld [vmem:[#allocation11 + $0xed0] sm:$0xff]  ;;  %v1108_v54 = vld [vmem:[#allocation11 + $0xed8] sm:$0xff] }
 0x313   :  { %v4470_v9 = vmax.f32 %v8984_v3, 0.0  ;;  %v4472_v10 = vmax.f32 %v8986_v4, 0.0  ;;  %v8065_v44 = vcombine.high %v1099_v41, %v1103_v42  ;;  %v8067_v50 = vcombine.high %v1100_v43, %v1104_v47  ;;  %v1111_v52 = vld [vmem:[#allocation11 + $0xef0] sm:$0xff]  ;;  %v1120_v62 = vld [vmem:[#allocation11 + $0xf38] sm:$0xff] }
 0x314   :  { %v4471_v16 = vmax.f32 %v8988_v30, 0.0  ;;  %v4473_v20 = vmax.f32 %v8990_v7, 0.0  ;;  %4177 = vmatpush1.bf16.msra.mxu0 %v8032_v29  ;;  %v8064_v48 = vcombine.low %v1099_v41, %v1103_v42  ;;  %v8066_v56 = vcombine.low %v1100_v43, %v1104_v47  ;;  %v1115_v59 = vld [vmem:[#allocation11 + $0xf10] sm:$0xff]  ;;  %v1124_v6 = vld [vmem:[#allocation11 + $0xf58] sm:$0xff] }
 0x315   :  { %4341 = vmatpush1.bf16.msra.mxu1 %v8034_v1  ;;  %4178 = vmatprep.subr.bf16.mxu0 %v8041_v0  ;;  %v8073_v57 = vcombine.high %v1107_v51, %v1111_v52  ;;  %v8075_v58 = vcombine.high %v1108_v54, %v1112_v55  ;;  %v8072_v63 = vcombine.low %v1107_v51, %v1111_v52  ;;  %v1123_v1 = vld [vmem:[#allocation11 + $0xf50] sm:$0xff]  ;;  %v1128_v0 = vld [vmem:[#allocation11 + $0xf78] sm:$0xff] }
 0x316   :  { %4342 = vmatprep.subr.bf16.mxu1 %v8043_v8  ;;  %v8074_v2 = vcombine.low %v1108_v54, %v1112_v55  ;;  %v8081_v14 = vcombine.high %v1115_v59, %v1119_v60  ;;  %v8083_v29 = vcombine.high %v1116_v61, %v1120_v62  ;;  %v1127_v25 = vld [vmem:[#allocation11 + $0xf70] sm:$0xff]  ;;  %v8080_v8 = vcombine.low %v1115_v59, %v1119_v60 }
 0x317   :  { %v8082_v45 = vcombine.low %v1116_v61, %v1120_v62  ;;  %v8089_v40 = vcombine.high %v1123_v1, %v1127_v25  ;;  %v8091_v11 = vcombine.high %v1124_v6, %v1128_v0  ;;  %v8090_v27 = vcombine.low %v1124_v6, %v1128_v0  ;;  %v1139_v32 = vld [vmem:[#allocation11 + $0xfd0] sm:$0xff] }
 0x318   :  { %4179 = vmatpush1.bf16.msra.mxu0 %v8040_v53  ;;  %v1135_v53 = vld [vmem:[#allocation11 + $0xfb0] sm:$0xff] }
 0x319   :  { %4343 = vmatpush1.bf16.msra.mxu1 %v8042_v21  ;;  %4180 = vmatprep.subr.bf16.mxu0 %v8049_v23  ;;  %v1132_v21 = vld [vmem:[#allocation11 + $0xf98] sm:$0xff]  ;;  %v8097_v28 = vcombine.high %v1131_v17, %v1135_v53 }
 0x31a   :  { %4344 = vmatprep.subr.bf16.mxu1 %v8051_v26  ;;  %v1136_v23 = vld [vmem:[#allocation11 + $0xfb8] sm:$0xff]  ;;  %v8088_v26 = vcombine.low %v1123_v1, %v1127_v25 }
 0x31b   :  { %v8099_v31 = vcombine.high %v1132_v21, %v1136_v23  ;;  %v8098_v41 = vcombine.low %v1132_v21, %v1136_v23 }
 0x31c   :  { %4181 = vmatpush1.bf16.msra.mxu0 %v8048_v33  ;;  %v1143_v33 = vld [vmem:[#allocation11 + $0xff0] sm:$0xff] }
 0x31d   :  { %4345 = vmatpush1.bf16.msra.mxu1 %v8050_v12  ;;  %4182 = vmatprep.subr.bf16.mxu0 %v8057_v37  ;;  %v1140_v12 = vld [vmem:[#allocation11 + $0xfd8] sm:$0xff]  ;;  %v8105_v42 = vcombine.high %v1139_v32, %v1143_v33  ;;  %v8104_v47 = vcombine.low %v1139_v32, %v1143_v33 }
 0x31e   :  { %4346 = vmatprep.subr.bf16.mxu1 %v8059_v39  ;;  %v1144_v37 = vld [vmem:[#allocation11 + $0xff8] sm:$0xff]  ;;  %v8096_v39 = vcombine.low %v1131_v17, %v1135_v53 }
 0x31f   :  { %v8107_v43 = vcombine.high %v1140_v12, %v1144_v37 }
 0x320   :  { %4183 = vmatpush1.bf16.msra.mxu0 %v8056_v49  ;;  %v8106_v49 = vcombine.low %v1140_v12, %v1144_v37 }
 0x321   :  { %4347 = vmatpush1.bf16.msra.mxu1 %v8058_v35  ;;  %4184 = vmatprep.subr.bf16.mxu0 %v8065_v44 }
 0x322   :  { %4348 = vmatprep.subr.bf16.mxu1 %v8067_v50 }
 0x324   :  { %4185 = vmatpush1.bf16.msra.mxu0 %v8064_v48 }
 0x325   :  { %4349 = vmatpush1.bf16.msra.mxu1 %v8066_v56  ;;  %4186 = vmatprep.subr.bf16.mxu0 %v8073_v57 }
 0x326   :  { %4350 = vmatprep.subr.bf16.mxu1 %v8075_v58 }
 0x328   :  { %4187 = vmatpush1.bf16.msra.mxu0 %v8072_v63 }
 0x329   :  { %4351 = vmatpush1.bf16.msra.mxu1 %v8074_v2  ;;  %4188 = vmatprep.subr.bf16.mxu0 %v8081_v14 }
 0x32a   :  { %4352 = vmatprep.subr.bf16.mxu1 %v8083_v29 }
 0x32c   :  { %4189 = vmatpush1.bf16.msra.mxu0 %v8080_v8 }
 0x32d   :  { %4353 = vmatpush1.bf16.msra.mxu1 %v8082_v45  ;;  %4190 = vmatprep.subr.bf16.mxu0 %v8089_v40 }
 0x32e   :  { %4354 = vmatprep.subr.bf16.mxu1 %v8091_v11 }
 0x330   :  { %4191 = vmatpush1.bf16.msra.mxu0 %v8088_v26 }
 0x331   :  { %4355 = vmatpush1.bf16.msra.mxu1 %v8090_v27  ;;  %4192 = vmatprep.subr.bf16.mxu0 %v8097_v28 }
 0x332   :  { %4356 = vmatprep.subr.bf16.mxu1 %v8099_v31 }
 0x334   :  { %4193 = vmatpush1.bf16.msra.mxu0 %v8096_v39 }
 0x335   :  { %4357 = vmatpush1.bf16.msra.mxu1 %v8098_v41  ;;  %4194 = vmatprep.subr.bf16.mxu0 %v8105_v42 }
 0x336   :  { %4358 = vmatprep.subr.bf16.mxu1 %v8107_v43 }
 0x338   :  { %4195 = vmatpush1.bf16.msra.mxu0 %v8104_v47 }
 0x339   :  { %4359 = vmatpush1.bf16.msra.mxu1 %v8106_v49 }
 0x33b   :  { %4197 = vmatmul.mubr.bf16.vlgmr.msra.gmra.mrb[12].mxu0 %v8946_v36 }
 0x33c   :  { %4361 = vmatmul.mubr.bf16.vlgmr.msra.gmra.mrb[12].mxu1 %v8946_v36 }
 0x33d   :  { %8621 = shalt.err (!%p8618_p2)  }
 0x33e   :  { %s8622_s21 = scalar_lea.vmem %s159_s28, 16384  ;;  %p8627_p4 = scmp.lt.s32.totalorder %s159_s28, %s159_s28 }
 0x33f   :  { %p8623_p3 = scmp.ne.s32.totalorder %s159_s28, %s8622_s21  ;;  %p8628_p5 = scmp.lt.s32.totalorder %s8622_s21, %s8622_s21 }
 0x341   :  { %p8629_p6 = por %p8628_p5, %p8627_p4 }
 0x343   :  { %p8630_p7 = pnand %p8629_p6, %p8623_p3 }
 0x345   :  { %8633 = shalt.err (!%p8630_p7)  }
 0x346   :  { %161 = dma.hbm_to_vmem [thread:$0]  %s9309_s7, 16384, %s159_s28, [#allocation4 + $0x1]  ;;  %v4390_v36 = vrot.slane %v8964_v22, %v8917_v24  ;;  %v4398_v35 = vrot.slane %v8964_v22, %v8941_v19  ;;  %v4394_v44 = vrot.slane %v8964_v22, %v8896_v46  ;;  %v4441_v50 = vrot.slane %v8966_v5, %v8917_v24 }
 0x347   :  { %v4402_v51 = vrot.slane %v8964_v22, %v8920_v38  ;;  %v4449_v54 = vrot.slane %v8966_v5, %v8941_v19  ;;  %v4445_v55 = vrot.slane %v8966_v5, %v8896_v46  ;;  %v4453_v58 = vrot.slane %v8966_v5, %v8920_v38 }
 0x40e   :  { %v4198_v52 = vpop.f32.mrb[12].mxu0 }
 0x40f   :  { %v4415_v48 = vmul.f32 %v4390_v36, %v4198_v52  ;;  %v4362_v56 = vpop.f32.mrb[12].mxu1  ;;  %v4200_v57 = vpop.f32.mrb[13].mxu0 }
 0x410   :  { %v4417_v59 = vmul.f32 %v4398_v35, %v4362_v56  ;;  %v4416_v60 = vmul.f32 %v4394_v44, %v4200_v57  ;;  %v4364_v61 = vpop.f32.mrb[13].mxu1  ;;  %v4202_v62 = vpop.f32.mrb[14].mxu0 }
 0x411   :  { %v9026_v63 = vadd.f32 %v4441_v50, %v4415_v48  ;;  %v4418_v22 = vmul.f32 %v4402_v51, %v4364_v61  ;;  %v4366_v2 = vpop.f32.mrb[14].mxu1  ;;  %v4203_v14 = vpop.f32.mrb[15].mxu0 }
 0x412   :  { %v9028_v29 = vadd.f32 %v4449_v54, %v4417_v59  ;;  %v9030_v1 = vadd.f32 %v4445_v55, %v4416_v60  ;;  %v4367_v25 = vpop.f32.mrb[15].mxu1 }
 0x413   :  { %v4474_v6 = vmax.f32 %v9026_v63, 0.0  ;;  %v9033_v0 = vadd.f32 %v4453_v58, %v4418_v22 }
 0x414   :  { %v4476_v5 = vmax.f32 %v9028_v29, 0.0  ;;  %v4475_v8 = vmax.f32 %v9030_v1, 0.0 }
 0x415   :  { %v4477_v45 = vmax.f32 %v9033_v0, 0.0 }
 0x416   :  { %8664 = dma.done.wait [#allocation4], 131072 }
 0x417   :  { %8665 = vsyncadd [#allocation4], 4294836224  ;;  %v9041_v40 = vpack.c.bf16 %v4471_v16, %v4471_v16  ;;  %v4483_v11 = vld [vmem:[#allocation2 + $0x8] sm:$0xff]  ;;  %v4485_v17 = vld [vmem:[#allocation2 + $0x18] sm:$0xff] }
 0x418   :  { %v4482_v53 = vld [vmem:[#allocation2] sm:$0xff]  ;;  %5514 = vmatprep.subr.bf16.mxu0 %v4483_v11  ;;  %5678 = vmatprep.subr.bf16.mxu1 %v4485_v17  ;;  %v4484_v21 = vld [vmem:[#allocation2 + $0x10] sm:$0xff]  ;;  %v4499_v23 = vld [vmem:[#allocation2 + $0x88] sm:$0xff] }
 0x419   :  { %5546 = vmatprep.mubr.bf16.mxu0 %v9041_v40  ;;  %5710 = vmatprep.mubr.bf16.mxu1 %v9041_v40  ;;  %v4501_v26 = vld [vmem:[#allocation2 + $0x98] sm:$0xff]  ;;  %v4498_v30 = vld [vmem:[#allocation2 + $0x80] sm:$0xff]  ;;  %v4500_v27 = vld [vmem:[#allocation2 + $0x90] sm:$0xff] }
 0x41a   :  { %5515 = vmatpush1.bf16.msra.mxu0 %v4482_v53  ;;  %5679 = vmatpush1.bf16.msra.mxu1 %v4484_v21  ;;  %v4515_v16 = vld [vmem:[#allocation2 + $0x108] sm:$0xff]  ;;  %v4517_v28 = vld [vmem:[#allocation2 + $0x118] sm:$0xff]  ;;  %v4514_v31 = vld [vmem:[#allocation2 + $0x100] sm:$0xff] }
 0x41b   :  { %5516 = vmatprep.subr.bf16.mxu0 %v4499_v23  ;;  %5680 = vmatprep.subr.bf16.mxu1 %v4501_v26  ;;  %v4516_v32 = vld [vmem:[#allocation2 + $0x110] sm:$0xff]  ;;  %v4531_v33 = vld [vmem:[#allocation2 + $0x188] sm:$0xff]  ;;  %v4533_v12 = vld [vmem:[#allocation2 + $0x198] sm:$0xff] }
 0x41c   :  { %v4530_v37 = vld [vmem:[#allocation2 + $0x180] sm:$0xff]  ;;  %v4532_v39 = vld [vmem:[#allocation2 + $0x190] sm:$0xff]  ;;  %v4547_v41 = vld [vmem:[#allocation2 + $0x208] sm:$0xff] }
 0x41d   :  { %v4549_v42 = vld [vmem:[#allocation2 + $0x218] sm:$0xff]  ;;  %v4546_v43 = vld [vmem:[#allocation2 + $0x200] sm:$0xff]  ;;  %v4548_v47 = vld [vmem:[#allocation2 + $0x210] sm:$0xff] }
 0x41e   :  { %5517 = vmatpush1.bf16.msra.mxu0 %v4498_v30  ;;  %5681 = vmatpush1.bf16.msra.mxu1 %v4500_v27  ;;  %v4563_v49 = vld [vmem:[#allocation2 + $0x288] sm:$0xff]  ;;  %v4565_v36 = vld [vmem:[#allocation2 + $0x298] sm:$0xff]  ;;  %v4562_v35 = vld [vmem:[#allocation2 + $0x280] sm:$0xff] }
 0x41f   :  { %5518 = vmatprep.subr.bf16.mxu0 %v4515_v16  ;;  %5682 = vmatprep.subr.bf16.mxu1 %v4517_v28  ;;  %v4564_v44 = vld [vmem:[#allocation2 + $0x290] sm:$0xff]  ;;  %v4579_v50 = vld [vmem:[#allocation2 + $0x308] sm:$0xff]  ;;  %v4581_v51 = vld [vmem:[#allocation2 + $0x318] sm:$0xff] }
 0x420   :  { %v4578_v52 = vld [vmem:[#allocation2 + $0x300] sm:$0xff]  ;;  %v4580_v54 = vld [vmem:[#allocation2 + $0x310] sm:$0xff]  ;;  %v4595_v55 = vld [vmem:[#allocation2 + $0x388] sm:$0xff] }
 0x421   :  { %v4597_v48 = vld [vmem:[#allocation2 + $0x398] sm:$0xff]  ;;  %v4594_v56 = vld [vmem:[#allocation2 + $0x380] sm:$0xff]  ;;  %v4596_v57 = vld [vmem:[#allocation2 + $0x390] sm:$0xff] }
 0x422   :  { %5519 = vmatpush1.bf16.msra.mxu0 %v4514_v31  ;;  %5683 = vmatpush1.bf16.msra.mxu1 %v4516_v32  ;;  %v4611_v58 = vld [vmem:[#allocation2 + $0x408] sm:$0xff]  ;;  %v4613_v59 = vld [vmem:[#allocation2 + $0x418] sm:$0xff]  ;;  %v4610_v60 = vld [vmem:[#allocation2 + $0x400] sm:$0xff] }
 0x423   :  { %5520 = vmatprep.subr.bf16.mxu0 %v4531_v33  ;;  %5684 = vmatprep.subr.bf16.mxu1 %v4533_v12  ;;  %v4612_v61 = vld [vmem:[#allocation2 + $0x410] sm:$0xff]  ;;  %v4627_v62 = vld [vmem:[#allocation2 + $0x488] sm:$0xff]  ;;  %v4629_v22 = vld [vmem:[#allocation2 + $0x498] sm:$0xff] }
 0x424   :  { %v4626_v2 = vld [vmem:[#allocation2 + $0x480] sm:$0xff]  ;;  %v4628_v14 = vld [vmem:[#allocation2 + $0x490] sm:$0xff]  ;;  %v4643_v25 = vld [vmem:[#allocation2 + $0x508] sm:$0xff] }
 0x425   :  { %v4645_v11 = vld [vmem:[#allocation2 + $0x518] sm:$0xff]  ;;  %v4642_v17 = vld [vmem:[#allocation2 + $0x500] sm:$0xff]  ;;  %v4644_v53 = vld [vmem:[#allocation2 + $0x510] sm:$0xff] }
 0x426   :  { %5521 = vmatpush1.bf16.msra.mxu0 %v4530_v37  ;;  %5685 = vmatpush1.bf16.msra.mxu1 %v4532_v39  ;;  %v4659_v21 = vld [vmem:[#allocation2 + $0x588] sm:$0xff]  ;;  %v4661_v23 = vld [vmem:[#allocation2 + $0x598] sm:$0xff]  ;;  %v4658_v26 = vld [vmem:[#allocation2 + $0x580] sm:$0xff] }
 0x427   :  { %5522 = vmatprep.subr.bf16.mxu0 %v4547_v41  ;;  %5686 = vmatprep.subr.bf16.mxu1 %v4549_v42  ;;  %v4660_v30 = vld [vmem:[#allocation2 + $0x590] sm:$0xff]  ;;  %v4675_v27 = vld [vmem:[#allocation2 + $0x608] sm:$0xff]  ;;  %v4677_v16 = vld [vmem:[#allocation2 + $0x618] sm:$0xff] }
 0x428   :  { %v4674_v28 = vld [vmem:[#allocation2 + $0x600] sm:$0xff]  ;;  %v4676_v31 = vld [vmem:[#allocation2 + $0x610] sm:$0xff]  ;;  %v4691_v32 = vld [vmem:[#allocation2 + $0x688] sm:$0xff] }
 0x429   :  { %v4693_v33 = vld [vmem:[#allocation2 + $0x698] sm:$0xff]  ;;  %v4690_v12 = vld [vmem:[#allocation2 + $0x680] sm:$0xff]  ;;  %v4692_v37 = vld [vmem:[#allocation2 + $0x690] sm:$0xff] }
 0x42a   :  { %5523 = vmatpush1.bf16.msra.mxu0 %v4546_v43  ;;  %5687 = vmatpush1.bf16.msra.mxu1 %v4548_v47  ;;  %v4707_v39 = vld [vmem:[#allocation2 + $0x708] sm:$0xff]  ;;  %v4709_v41 = vld [vmem:[#allocation2 + $0x718] sm:$0xff]  ;;  %v4706_v42 = vld [vmem:[#allocation2 + $0x700] sm:$0xff] }
 0x42b   :  { %5524 = vmatprep.subr.bf16.mxu0 %v4563_v49  ;;  %5688 = vmatprep.subr.bf16.mxu1 %v4565_v36  ;;  %v4708_v43 = vld [vmem:[#allocation2 + $0x710] sm:$0xff]  ;;  %v4723_v47 = vld [vmem:[#allocation2 + $0x788] sm:$0xff]  ;;  %v4725_v49 = vld [vmem:[#allocation2 + $0x798] sm:$0xff] }
 0x42c   :  { %v4722_v36 = vld [vmem:[#allocation2 + $0x780] sm:$0xff] }
 0x42d   :  { %v4754_v3 = vld [vmem:[#allocation2 + $0x880] sm:$0xff] }
 0x42e   :  { %5525 = vmatpush1.bf16.msra.mxu0 %v4562_v35  ;;  %5689 = vmatpush1.bf16.msra.mxu1 %v4564_v44  ;;  %v4724_v35 = vld [vmem:[#allocation2 + $0x790] sm:$0xff]  ;;  %v4739_v44 = vld [vmem:[#allocation2 + $0x808] sm:$0xff]  ;;  %v4770_v7 = vld [vmem:[#allocation2 + $0x900] sm:$0xff] }
 0x42f   :  { %5526 = vmatprep.subr.bf16.mxu0 %v4579_v50  ;;  %5690 = vmatprep.subr.bf16.mxu1 %v4581_v51  ;;  %v4741_v50 = vld [vmem:[#allocation2 + $0x818] sm:$0xff]  ;;  %v9048_v51 = vpack.c.bf16 %v4470_v9, %v4470_v9  ;;  %v4756_v9 = vld [vmem:[#allocation2 + $0x890] sm:$0xff]  ;;  %v5010_v4 = vld [vmem:[#allocation2 + $0x1080] sm:$0xff] }
 0x430   :  { %v5026_v1 = vld [vmem:[#allocation2 + $0x1100] sm:$0xff] }
 0x431   :  { %v5266_v63 = vld [vmem:[#allocation2 + $0x1880] sm:$0xff] }
 0x432   :  { %5527 = vmatpush1.bf16.msra.mxu0 %v4578_v52  ;;  %5691 = vmatpush1.bf16.msra.mxu1 %v4580_v54  ;;  %v4738_v52 = vld [vmem:[#allocation2 + $0x800] sm:$0xff]  ;;  %v4740_v54 = vld [vmem:[#allocation2 + $0x810] sm:$0xff] }
 0x433   :  { %5528 = vmatprep.subr.bf16.mxu0 %v4595_v55  ;;  %5692 = vmatprep.subr.bf16.mxu1 %v4597_v48  ;;  %v4755_v55 = vld [vmem:[#allocation2 + $0x888] sm:$0xff]  ;;  %v4757_v48 = vld [vmem:[#allocation2 + $0x898] sm:$0xff]  ;;  %v5282_v0 = vld [vmem:[#allocation2 + $0x1900] sm:$0xff] }
 0x434   :  { %v4502_v29 = vld [vmem:[#allocation2 + $0xa0] sm:$0xff] }
 0x436   :  { %5529 = vmatpush1.bf16.msra.mxu0 %v4594_v56  ;;  %5693 = vmatpush1.bf16.msra.mxu1 %v4596_v57  ;;  %v9053_v56 = vpack.c.bf16 %v4473_v20, %v4473_v20  ;;  %v4771_v57 = vld [vmem:[#allocation2 + $0x908] sm:$0xff]  ;;  %v4772_v20 = vld [vmem:[#allocation2 + $0x910] sm:$0xff] }
 0x437   :  { %5530 = vmatprep.subr.bf16.mxu0 %v4611_v58  ;;  %5694 = vmatprep.subr.bf16.mxu1 %v4613_v59  ;;  %v4773_v58 = vld [vmem:[#allocation2 + $0x918] sm:$0xff]  ;;  %v4787_v59 = vld [vmem:[#allocation2 + $0x988] sm:$0xff] }
 0x43a   :  { %5531 = vmatpush1.bf16.msra.mxu0 %v4610_v60  ;;  %5695 = vmatpush1.bf16.msra.mxu1 %v4612_v61  ;;  %v4789_v60 = vld [vmem:[#allocation2 + $0x998] sm:$0xff]  ;;  %v4786_v61 = vld [vmem:[#allocation2 + $0x980] sm:$0xff] }
 0x43b   :  { %5532 = vmatprep.subr.bf16.mxu0 %v4627_v62  ;;  %5696 = vmatprep.subr.bf16.mxu1 %v4629_v22  ;;  %v4788_v62 = vld [vmem:[#allocation2 + $0x990] sm:$0xff]  ;;  %v4803_v22 = vld [vmem:[#allocation2 + $0xa08] sm:$0xff] }
 0x43e   :  { %5533 = vmatpush1.bf16.msra.mxu0 %v4626_v2  ;;  %5697 = vmatpush1.bf16.msra.mxu1 %v4628_v14  ;;  %v4805_v2 = vld [vmem:[#allocation2 + $0xa18] sm:$0xff]  ;;  %v4802_v14 = vld [vmem:[#allocation2 + $0xa00] sm:$0xff] }
 0x43f   :  { %5534 = vmatprep.subr.bf16.mxu0 %v4643_v25  ;;  %5698 = vmatprep.subr.bf16.mxu1 %v4645_v11  ;;  %v4804_v25 = vld [vmem:[#allocation2 + $0xa10] sm:$0xff]  ;;  %v4819_v11 = vld [vmem:[#allocation2 + $0xa88] sm:$0xff] }
 0x442   :  { %5535 = vmatpush1.bf16.msra.mxu0 %v4642_v17  ;;  %5699 = vmatpush1.bf16.msra.mxu1 %v4644_v53  ;;  %v4821_v17 = vld [vmem:[#allocation2 + $0xa98] sm:$0xff]  ;;  %v4818_v53 = vld [vmem:[#allocation2 + $0xa80] sm:$0xff] }
 0x443   :  { %5536 = vmatprep.subr.bf16.mxu0 %v4659_v21  ;;  %5700 = vmatprep.subr.bf16.mxu1 %v4661_v23  ;;  %v4820_v21 = vld [vmem:[#allocation2 + $0xa90] sm:$0xff]  ;;  %v4835_v23 = vld [vmem:[#allocation2 + $0xb08] sm:$0xff] }
 0x446   :  { %5537 = vmatpush1.bf16.msra.mxu0 %v4658_v26  ;;  %5701 = vmatpush1.bf16.msra.mxu1 %v4660_v30  ;;  %v4837_v26 = vld [vmem:[#allocation2 + $0xb18] sm:$0xff]  ;;  %v4834_v30 = vld [vmem:[#allocation2 + $0xb00] sm:$0xff] }
 0x447   :  { %5538 = vmatprep.subr.bf16.mxu0 %v4675_v27  ;;  %5702 = vmatprep.subr.bf16.mxu1 %v4677_v16  ;;  %v4836_v27 = vld [vmem:[#allocation2 + $0xb10] sm:$0xff]  ;;  %v4851_v16 = vld [vmem:[#allocation2 + $0xb88] sm:$0xff] }
 0x44a   :  { %5539 = vmatpush1.bf16.msra.mxu0 %v4674_v28  ;;  %5703 = vmatpush1.bf16.msra.mxu1 %v4676_v31  ;;  %v4853_v28 = vld [vmem:[#allocation2 + $0xb98] sm:$0xff]  ;;  %v4850_v31 = vld [vmem:[#allocation2 + $0xb80] sm:$0xff] }
 0x44b   :  { %5540 = vmatprep.subr.bf16.mxu0 %v4691_v32  ;;  %5704 = vmatprep.subr.bf16.mxu1 %v4693_v33  ;;  %v4852_v32 = vld [vmem:[#allocation2 + $0xb90] sm:$0xff]  ;;  %v4867_v33 = vld [vmem:[#allocation2 + $0xc08] sm:$0xff] }
 0x44e   :  { %5541 = vmatpush1.bf16.msra.mxu0 %v4690_v12  ;;  %5705 = vmatpush1.bf16.msra.mxu1 %v4692_v37  ;;  %v4869_v12 = vld [vmem:[#allocation2 + $0xc18] sm:$0xff]  ;;  %v4866_v37 = vld [vmem:[#allocation2 + $0xc00] sm:$0xff] }
 0x44f   :  { %5542 = vmatprep.subr.bf16.mxu0 %v4707_v39  ;;  %5706 = vmatprep.subr.bf16.mxu1 %v4709_v41  ;;  %v4868_v39 = vld [vmem:[#allocation2 + $0xc10] sm:$0xff]  ;;  %v4883_v41 = vld [vmem:[#allocation2 + $0xc88] sm:$0xff] }
 0x452   :  { %5543 = vmatpush1.bf16.msra.mxu0 %v4706_v42  ;;  %5707 = vmatpush1.bf16.msra.mxu1 %v4708_v43  ;;  %v4885_v42 = vld [vmem:[#allocation2 + $0xc98] sm:$0xff]  ;;  %v4882_v43 = vld [vmem:[#allocation2 + $0xc80] sm:$0xff] }
 0x453   :  { %5544 = vmatprep.subr.bf16.mxu0 %v4723_v47  ;;  %5708 = vmatprep.subr.bf16.mxu1 %v4725_v49  ;;  %v4884_v47 = vld [vmem:[#allocation2 + $0xc90] sm:$0xff]  ;;  %v4899_v49 = vld [vmem:[#allocation2 + $0xd08] sm:$0xff] }
 0x456   :  { %5545 = vmatpush1.bf16.msra.mxu0 %v4722_v36  ;;  %5709 = vmatpush1.bf16.msra.mxu1 %v4724_v35  ;;  %v4901_v36 = vld [vmem:[#allocation2 + $0xd18] sm:$0xff]  ;;  %v4898_v35 = vld [vmem:[#allocation2 + $0xd00] sm:$0xff] }
 0x457   :  { %5555 = vmatprep.subr.bf16.mxu0 %v4739_v44  ;;  %5719 = vmatprep.subr.bf16.mxu1 %v4741_v50  ;;  %v4900_v44 = vld [vmem:[#allocation2 + $0xd10] sm:$0xff]  ;;  %v4915_v50 = vld [vmem:[#allocation2 + $0xd88] sm:$0xff] }
 0x459   :  { %5547 = vmatmul.mubr.bf16.vlgmr.msra.gmra.mrb[16].mxu0 %v9048_v51  ;;  %5711 = vmatmul.mubr.bf16.vlgmr.msra.gmra.mrb[16].mxu1 %v9048_v51 }
 0x45a   :  { %5556 = vmatpush1.bf16.msra.mxu0 %v4738_v52  ;;  %5720 = vmatpush1.bf16.msra.mxu1 %v4740_v54  ;;  %v4917_v52 = vld [vmem:[#allocation2 + $0xd98] sm:$0xff]  ;;  %v4914_v54 = vld [vmem:[#allocation2 + $0xd80] sm:$0xff] }
 0x45b   :  { %5557 = vmatprep.subr.bf16.mxu0 %v4755_v55  ;;  %5721 = vmatprep.subr.bf16.mxu1 %v4757_v48  ;;  %v4916_v55 = vld [vmem:[#allocation2 + $0xd90] sm:$0xff]  ;;  %v4931_v48 = vld [vmem:[#allocation2 + $0xe08] sm:$0xff] }
 0x45c   :  { %5587 = vmatprep.mubr.bf16.mxu0 %v9053_v56  ;;  %5751 = vmatprep.mubr.bf16.mxu1 %v9053_v56 }
 0x45e   :  { %5558 = vmatpush1.bf16.msra.mxu0 %v4754_v3  ;;  %5722 = vmatpush1.bf16.msra.mxu1 %v4756_v9  ;;  %v4933_v3 = vld [vmem:[#allocation2 + $0xe18] sm:$0xff]  ;;  %v4930_v9 = vld [vmem:[#allocation2 + $0xe00] sm:$0xff] }
 0x45f   :  { %5559 = vmatprep.subr.bf16.mxu0 %v4771_v57  ;;  %5723 = vmatprep.subr.bf16.mxu1 %v4773_v58  ;;  %v4932_v57 = vld [vmem:[#allocation2 + $0xe10] sm:$0xff]  ;;  %v4947_v58 = vld [vmem:[#allocation2 + $0xe88] sm:$0xff] }
 0x462   :  { %5560 = vmatpush1.bf16.msra.mxu0 %v4770_v7  ;;  %5724 = vmatpush1.bf16.msra.mxu1 %v4772_v20  ;;  %v4949_v7 = vld [vmem:[#allocation2 + $0xe98] sm:$0xff]  ;;  %v4946_v20 = vld [vmem:[#allocation2 + $0xe80] sm:$0xff] }
 0x463   :  { %5561 = vmatprep.subr.bf16.mxu0 %v4787_v59  ;;  %5725 = vmatprep.subr.bf16.mxu1 %v4789_v60  ;;  %v4948_v59 = vld [vmem:[#allocation2 + $0xe90] sm:$0xff]  ;;  %v4963_v60 = vld [vmem:[#allocation2 + $0xf08] sm:$0xff] }
 0x466   :  { %5562 = vmatpush1.bf16.msra.mxu0 %v4786_v61  ;;  %5726 = vmatpush1.bf16.msra.mxu1 %v4788_v62  ;;  %v4965_v61 = vld [vmem:[#allocation2 + $0xf18] sm:$0xff]  ;;  %v4962_v62 = vld [vmem:[#allocation2 + $0xf00] sm:$0xff] }
 0x467   :  { %5563 = vmatprep.subr.bf16.mxu0 %v4803_v22  ;;  %5727 = vmatprep.subr.bf16.mxu1 %v4805_v2  ;;  %v4964_v22 = vld [vmem:[#allocation2 + $0xf10] sm:$0xff]  ;;  %v4979_v2 = vld [vmem:[#allocation2 + $0xf88] sm:$0xff] }
 0x46a   :  { %5564 = vmatpush1.bf16.msra.mxu0 %v4802_v14  ;;  %5728 = vmatpush1.bf16.msra.mxu1 %v4804_v25  ;;  %v4981_v14 = vld [vmem:[#allocation2 + $0xf98] sm:$0xff]  ;;  %v4978_v25 = vld [vmem:[#allocation2 + $0xf80] sm:$0xff] }
 0x46b   :  { %5565 = vmatprep.subr.bf16.mxu0 %v4819_v11  ;;  %5729 = vmatprep.subr.bf16.mxu1 %v4821_v17  ;;  %v4980_v11 = vld [vmem:[#allocation2 + $0xf90] sm:$0xff]  ;;  %v4995_v17 = vld [vmem:[#allocation2 + $0x1008] sm:$0xff] }
 0x46e   :  { %5566 = vmatpush1.bf16.msra.mxu0 %v4818_v53  ;;  %5730 = vmatpush1.bf16.msra.mxu1 %v4820_v21  ;;  %v4997_v53 = vld [vmem:[#allocation2 + $0x1018] sm:$0xff]  ;;  %v9062_v21 = vpack.c.bf16 %v4472_v10, %v4472_v10  ;;  %v5012_v10 = vld [vmem:[#allocation2 + $0x1090] sm:$0xff] }
 0x46f   :  { %5567 = vmatprep.subr.bf16.mxu0 %v4835_v23  ;;  %5731 = vmatprep.subr.bf16.mxu1 %v4837_v26  ;;  %v4994_v23 = vld [vmem:[#allocation2 + $0x1000] sm:$0xff]  ;;  %v4996_v26 = vld [vmem:[#allocation2 + $0x1010] sm:$0xff] }
 0x472   :  { %5568 = vmatpush1.bf16.msra.mxu0 %v4834_v30  ;;  %5732 = vmatpush1.bf16.msra.mxu1 %v4836_v27  ;;  %v5011_v30 = vld [vmem:[#allocation2 + $0x1088] sm:$0xff]  ;;  %v5013_v27 = vld [vmem:[#allocation2 + $0x1098] sm:$0xff] }
 0x473   :  { %5569 = vmatprep.subr.bf16.mxu0 %v4851_v16  ;;  %5733 = vmatprep.subr.bf16.mxu1 %v4853_v28  ;;  %v9067_v16 = vpack.c.bf16 %v4475_v8, %v4475_v8  ;;  %v5027_v28 = vld [vmem:[#allocation2 + $0x1108] sm:$0xff]  ;;  %v5028_v8 = vld [vmem:[#allocation2 + $0x1110] sm:$0xff] }
 0x476   :  { %5570 = vmatpush1.bf16.msra.mxu0 %v4850_v31  ;;  %5734 = vmatpush1.bf16.msra.mxu1 %v4852_v32  ;;  %v5029_v31 = vld [vmem:[#allocation2 + $0x1118] sm:$0xff]  ;;  %v5043_v32 = vld [vmem:[#allocation2 + $0x1188] sm:$0xff] }
 0x477   :  { %5571 = vmatprep.subr.bf16.mxu0 %v4867_v33  ;;  %5735 = vmatprep.subr.bf16.mxu1 %v4869_v12  ;;  %v5045_v33 = vld [vmem:[#allocation2 + $0x1198] sm:$0xff]  ;;  %v5042_v12 = vld [vmem:[#allocation2 + $0x1180] sm:$0xff] }
 0x47a   :  { %5572 = vmatpush1.bf16.msra.mxu0 %v4866_v37  ;;  %5736 = vmatpush1.bf16.msra.mxu1 %v4868_v39  ;;  %v5044_v37 = vld [vmem:[#allocation2 + $0x1190] sm:$0xff]  ;;  %v5059_v39 = vld [vmem:[#allocation2 + $0x1208] sm:$0xff] }
 0x47b   :  { %5573 = vmatprep.subr.bf16.mxu0 %v4883_v41  ;;  %5737 = vmatprep.subr.bf16.mxu1 %v4885_v42  ;;  %v5061_v41 = vld [vmem:[#allocation2 + $0x1218] sm:$0xff]  ;;  %v5058_v42 = vld [vmem:[#allocation2 + $0x1200] sm:$0xff] }
 0x47e   :  { %5574 = vmatpush1.bf16.msra.mxu0 %v4882_v43  ;;  %5738 = vmatpush1.bf16.msra.mxu1 %v4884_v47  ;;  %v5060_v43 = vld [vmem:[#allocation2 + $0x1210] sm:$0xff]  ;;  %v5075_v47 = vld [vmem:[#allocation2 + $0x1288] sm:$0xff] }
 0x47f   :  { %5575 = vmatprep.subr.bf16.mxu0 %v4899_v49  ;;  %5739 = vmatprep.subr.bf16.mxu1 %v4901_v36  ;;  %v5077_v49 = vld [vmem:[#allocation2 + $0x1298] sm:$0xff]  ;;  %v5074_v36 = vld [vmem:[#allocation2 + $0x1280] sm:$0xff] }
 0x482   :  { %5576 = vmatpush1.bf16.msra.mxu0 %v4898_v35  ;;  %5740 = vmatpush1.bf16.msra.mxu1 %v4900_v44  ;;  %v5076_v35 = vld [vmem:[#allocation2 + $0x1290] sm:$0xff]  ;;  %v5091_v44 = vld [vmem:[#allocation2 + $0x1308] sm:$0xff] }
 0x483   :  { %5577 = vmatprep.subr.bf16.mxu0 %v4915_v50  ;;  %5741 = vmatprep.subr.bf16.mxu1 %v4917_v52  ;;  %v5093_v50 = vld [vmem:[#allocation2 + $0x1318] sm:$0xff]  ;;  %v5090_v52 = vld [vmem:[#allocation2 + $0x1300] sm:$0xff] }
 0x486   :  { %5578 = vmatpush1.bf16.msra.mxu0 %v4914_v54  ;;  %5742 = vmatpush1.bf16.msra.mxu1 %v4916_v55  ;;  %v5092_v54 = vld [vmem:[#allocation2 + $0x1310] sm:$0xff]  ;;  %v5107_v55 = vld [vmem:[#allocation2 + $0x1388] sm:$0xff] }
 0x487   :  { %5579 = vmatprep.subr.bf16.mxu0 %v4931_v48  ;;  %5743 = vmatprep.subr.bf16.mxu1 %v4933_v3  ;;  %v5109_v48 = vld [vmem:[#allocation2 + $0x1398] sm:$0xff]  ;;  %v5106_v3 = vld [vmem:[#allocation2 + $0x1380] sm:$0xff] }
 0x48a   :  { %5580 = vmatpush1.bf16.msra.mxu0 %v4930_v9  ;;  %5744 = vmatpush1.bf16.msra.mxu1 %v4932_v57  ;;  %v5108_v9 = vld [vmem:[#allocation2 + $0x1390] sm:$0xff]  ;;  %v5123_v57 = vld [vmem:[#allocation2 + $0x1408] sm:$0xff] }
 0x48b   :  { %5581 = vmatprep.subr.bf16.mxu0 %v4947_v58  ;;  %5745 = vmatprep.subr.bf16.mxu1 %v4949_v7  ;;  %v5125_v58 = vld [vmem:[#allocation2 + $0x1418] sm:$0xff]  ;;  %v5122_v7 = vld [vmem:[#allocation2 + $0x1400] sm:$0xff] }
 0x48e   :  { %5582 = vmatpush1.bf16.msra.mxu0 %v4946_v20  ;;  %5746 = vmatpush1.bf16.msra.mxu1 %v4948_v59  ;;  %v5124_v20 = vld [vmem:[#allocation2 + $0x1410] sm:$0xff]  ;;  %v5139_v59 = vld [vmem:[#allocation2 + $0x1488] sm:$0xff] }
 0x48f   :  { %5583 = vmatprep.subr.bf16.mxu0 %v4963_v60  ;;  %5747 = vmatprep.subr.bf16.mxu1 %v4965_v61  ;;  %v5141_v60 = vld [vmem:[#allocation2 + $0x1498] sm:$0xff]  ;;  %v5138_v61 = vld [vmem:[#allocation2 + $0x1480] sm:$0xff] }
 0x492   :  { %5584 = vmatpush1.bf16.msra.mxu0 %v4962_v62  ;;  %5748 = vmatpush1.bf16.msra.mxu1 %v4964_v22  ;;  %v5140_v62 = vld [vmem:[#allocation2 + $0x1490] sm:$0xff]  ;;  %v5155_v22 = vld [vmem:[#allocation2 + $0x1508] sm:$0xff] }
 0x493   :  { %5585 = vmatprep.subr.bf16.mxu0 %v4979_v2  ;;  %5749 = vmatprep.subr.bf16.mxu1 %v4981_v14  ;;  %v5157_v2 = vld [vmem:[#allocation2 + $0x1518] sm:$0xff]  ;;  %v5154_v14 = vld [vmem:[#allocation2 + $0x1500] sm:$0xff] }
 0x496   :  { %5586 = vmatpush1.bf16.msra.mxu0 %v4978_v25  ;;  %5750 = vmatpush1.bf16.msra.mxu1 %v4980_v11  ;;  %v5156_v25 = vld [vmem:[#allocation2 + $0x1510] sm:$0xff]  ;;  %v5171_v11 = vld [vmem:[#allocation2 + $0x1588] sm:$0xff] }
 0x497   :  { %5596 = vmatprep.subr.bf16.mxu0 %v4995_v17  ;;  %5760 = vmatprep.subr.bf16.mxu1 %v4997_v53  ;;  %v5173_v17 = vld [vmem:[#allocation2 + $0x1598] sm:$0xff]  ;;  %v5170_v53 = vld [vmem:[#allocation2 + $0x1580] sm:$0xff] }
 0x499   :  { %5588 = vmatmul.mubr.bf16.vlgmr.msra.gmra.mrb[16].mxu0 %v9062_v21  ;;  %5752 = vmatmul.mubr.bf16.vlgmr.msra.gmra.mrb[16].mxu1 %v9062_v21 }
 0x49a   :  { %5597 = vmatpush1.bf16.msra.mxu0 %v4994_v23  ;;  %5761 = vmatpush1.bf16.msra.mxu1 %v4996_v26  ;;  %v5172_v23 = vld [vmem:[#allocation2 + $0x1590] sm:$0xff]  ;;  %v5187_v26 = vld [vmem:[#allocation2 + $0x1608] sm:$0xff] }
 0x49b   :  { %5598 = vmatprep.subr.bf16.mxu0 %v5011_v30  ;;  %5762 = vmatprep.subr.bf16.mxu1 %v5013_v27  ;;  %v5189_v30 = vld [vmem:[#allocation2 + $0x1618] sm:$0xff]  ;;  %v5186_v27 = vld [vmem:[#allocation2 + $0x1600] sm:$0xff] }
 0x49c   :  { %5628 = vmatprep.mubr.bf16.mxu0 %v9067_v16  ;;  %5792 = vmatprep.mubr.bf16.mxu1 %v9067_v16 }
 0x49e   :  { %5599 = vmatpush1.bf16.msra.mxu0 %v5010_v4  ;;  %5763 = vmatpush1.bf16.msra.mxu1 %v5012_v10  ;;  %v5188_v4 = vld [vmem:[#allocation2 + $0x1610] sm:$0xff]  ;;  %v5203_v10 = vld [vmem:[#allocation2 + $0x1688] sm:$0xff] }
 0x49f   :  { %5600 = vmatprep.subr.bf16.mxu0 %v5027_v28  ;;  %5764 = vmatprep.subr.bf16.mxu1 %v5029_v31  ;;  %v5205_v28 = vld [vmem:[#allocation2 + $0x1698] sm:$0xff]  ;;  %v5202_v31 = vld [vmem:[#allocation2 + $0x1680] sm:$0xff] }
 0x4a2   :  { %5601 = vmatpush1.bf16.msra.mxu0 %v5026_v1  ;;  %5765 = vmatpush1.bf16.msra.mxu1 %v5028_v8  ;;  %v5204_v1 = vld [vmem:[#allocation2 + $0x1690] sm:$0xff]  ;;  %v5219_v8 = vld [vmem:[#allocation2 + $0x1708] sm:$0xff] }
 0x4a3   :  { %5602 = vmatprep.subr.bf16.mxu0 %v5043_v32  ;;  %5766 = vmatprep.subr.bf16.mxu1 %v5045_v33  ;;  %v5221_v32 = vld [vmem:[#allocation2 + $0x1718] sm:$0xff]  ;;  %v5218_v33 = vld [vmem:[#allocation2 + $0x1700] sm:$0xff] }
 0x4a6   :  { %5603 = vmatpush1.bf16.msra.mxu0 %v5042_v12  ;;  %5767 = vmatpush1.bf16.msra.mxu1 %v5044_v37  ;;  %v5220_v12 = vld [vmem:[#allocation2 + $0x1710] sm:$0xff]  ;;  %v5235_v37 = vld [vmem:[#allocation2 + $0x1788] sm:$0xff] }
 0x4a7   :  { %5604 = vmatprep.subr.bf16.mxu0 %v5059_v39  ;;  %5768 = vmatprep.subr.bf16.mxu1 %v5061_v41  ;;  %v5237_v39 = vld [vmem:[#allocation2 + $0x1798] sm:$0xff]  ;;  %v5234_v41 = vld [vmem:[#allocation2 + $0x1780] sm:$0xff] }
 0x4aa   :  { %5605 = vmatpush1.bf16.msra.mxu0 %v5058_v42  ;;  %5769 = vmatpush1.bf16.msra.mxu1 %v5060_v43  ;;  %v5236_v42 = vld [vmem:[#allocation2 + $0x1790] sm:$0xff]  ;;  %v5251_v43 = vld [vmem:[#allocation2 + $0x1808] sm:$0xff] }
 0x4ab   :  { %5606 = vmatprep.subr.bf16.mxu0 %v5075_v47  ;;  %5770 = vmatprep.subr.bf16.mxu1 %v5077_v49  ;;  %v5253_v47 = vld [vmem:[#allocation2 + $0x1818] sm:$0xff]  ;;  %v9076_v49 = vpack.c.bf16 %v4474_v6, %v4474_v6  ;;  %v5268_v6 = vld [vmem:[#allocation2 + $0x1890] sm:$0xff] }
 0x4ae   :  { %5607 = vmatpush1.bf16.msra.mxu0 %v5074_v36  ;;  %5771 = vmatpush1.bf16.msra.mxu1 %v5076_v35  ;;  %v5250_v36 = vld [vmem:[#allocation2 + $0x1800] sm:$0xff]  ;;  %v5252_v35 = vld [vmem:[#allocation2 + $0x1810] sm:$0xff] }
 0x4af   :  { %5608 = vmatprep.subr.bf16.mxu0 %v5091_v44  ;;  %5772 = vmatprep.subr.bf16.mxu1 %v5093_v50  ;;  %v5267_v44 = vld [vmem:[#allocation2 + $0x1888] sm:$0xff]  ;;  %v5269_v50 = vld [vmem:[#allocation2 + $0x1898] sm:$0xff] }
 0x4b2   :  { %5609 = vmatpush1.bf16.msra.mxu0 %v5090_v52  ;;  %5773 = vmatpush1.bf16.msra.mxu1 %v5092_v54  ;;  %v9081_v52 = vpack.c.bf16 %v4477_v45, %v4477_v45  ;;  %v5283_v54 = vld [vmem:[#allocation2 + $0x1908] sm:$0xff]  ;;  %v5284_v45 = vld [vmem:[#allocation2 + $0x1910] sm:$0xff] }
 0x4b3   :  { %5610 = vmatprep.subr.bf16.mxu0 %v5107_v55  ;;  %5774 = vmatprep.subr.bf16.mxu1 %v5109_v48  ;;  %v5285_v55 = vld [vmem:[#allocation2 + $0x1918] sm:$0xff]  ;;  %v5299_v48 = vld [vmem:[#allocation2 + $0x1988] sm:$0xff] }
 0x4b6   :  { %5611 = vmatpush1.bf16.msra.mxu0 %v5106_v3  ;;  %5775 = vmatpush1.bf16.msra.mxu1 %v5108_v9  ;;  %v5301_v3 = vld [vmem:[#allocation2 + $0x1998] sm:$0xff]  ;;  %v5298_v9 = vld [vmem:[#allocation2 + $0x1980] sm:$0xff] }
 0x4b7   :  { %5612 = vmatprep.subr.bf16.mxu0 %v5123_v57  ;;  %5776 = vmatprep.subr.bf16.mxu1 %v5125_v58  ;;  %v5300_v57 = vld [vmem:[#allocation2 + $0x1990] sm:$0xff]  ;;  %v5315_v58 = vld [vmem:[#allocation2 + $0x1a08] sm:$0xff] }
 0x4ba   :  { %5613 = vmatpush1.bf16.msra.mxu0 %v5122_v7  ;;  %5777 = vmatpush1.bf16.msra.mxu1 %v5124_v20  ;;  %v5317_v7 = vld [vmem:[#allocation2 + $0x1a18] sm:$0xff]  ;;  %v5314_v20 = vld [vmem:[#allocation2 + $0x1a00] sm:$0xff] }
 0x4bb   :  { %5614 = vmatprep.subr.bf16.mxu0 %v5139_v59  ;;  %5778 = vmatprep.subr.bf16.mxu1 %v5141_v60  ;;  %v5316_v59 = vld [vmem:[#allocation2 + $0x1a10] sm:$0xff]  ;;  %v5331_v60 = vld [vmem:[#allocation2 + $0x1a88] sm:$0xff] }
 0x4be   :  { %5615 = vmatpush1.bf16.msra.mxu0 %v5138_v61  ;;  %5779 = vmatpush1.bf16.msra.mxu1 %v5140_v62  ;;  %v5333_v61 = vld [vmem:[#allocation2 + $0x1a98] sm:$0xff]  ;;  %v5330_v62 = vld [vmem:[#allocation2 + $0x1a80] sm:$0xff] }
 0x4bf   :  { %5616 = vmatprep.subr.bf16.mxu0 %v5155_v22  ;;  %5780 = vmatprep.subr.bf16.mxu1 %v5157_v2  ;;  %v5332_v22 = vld [vmem:[#allocation2 + $0x1a90] sm:$0xff]  ;;  %v5347_v2 = vld [vmem:[#allocation2 + $0x1b08] sm:$0xff] }
 0x4c2   :  { %5617 = vmatpush1.bf16.msra.mxu0 %v5154_v14  ;;  %5781 = vmatpush1.bf16.msra.mxu1 %v5156_v25  ;;  %v5349_v14 = vld [vmem:[#allocation2 + $0x1b18] sm:$0xff]  ;;  %v5346_v25 = vld [vmem:[#allocation2 + $0x1b00] sm:$0xff] }
 0x4c3   :  { %5618 = vmatprep.subr.bf16.mxu0 %v5171_v11  ;;  %5782 = vmatprep.subr.bf16.mxu1 %v5173_v17  ;;  %v5348_v11 = vld [vmem:[#allocation2 + $0x1b10] sm:$0xff]  ;;  %v5363_v17 = vld [vmem:[#allocation2 + $0x1b88] sm:$0xff] }
 0x4c6   :  { %5619 = vmatpush1.bf16.msra.mxu0 %v5170_v53  ;;  %5783 = vmatpush1.bf16.msra.mxu1 %v5172_v23  ;;  %v5365_v53 = vld [vmem:[#allocation2 + $0x1b98] sm:$0xff]  ;;  %v5362_v23 = vld [vmem:[#allocation2 + $0x1b80] sm:$0xff] }
 0x4c7   :  { %5620 = vmatprep.subr.bf16.mxu0 %v5187_v26  ;;  %5784 = vmatprep.subr.bf16.mxu1 %v5189_v30  ;;  %v5364_v26 = vld [vmem:[#allocation2 + $0x1b90] sm:$0xff]  ;;  %v5379_v30 = vld [vmem:[#allocation2 + $0x1c08] sm:$0xff] }
 0x4ca   :  { %5621 = vmatpush1.bf16.msra.mxu0 %v5186_v27  ;;  %5785 = vmatpush1.bf16.msra.mxu1 %v5188_v4  ;;  %v5381_v27 = vld [vmem:[#allocation2 + $0x1c18] sm:$0xff]  ;;  %v5378_v4 = vld [vmem:[#allocation2 + $0x1c00] sm:$0xff] }
 0x4cb   :  { %5622 = vmatprep.subr.bf16.mxu0 %v5203_v10  ;;  %5786 = vmatprep.subr.bf16.mxu1 %v5205_v28  ;;  %v5380_v10 = vld [vmem:[#allocation2 + $0x1c10] sm:$0xff]  ;;  %v5395_v28 = vld [vmem:[#allocation2 + $0x1c88] sm:$0xff] }
 0x4ce   :  { %5623 = vmatpush1.bf16.msra.mxu0 %v5202_v31  ;;  %5787 = vmatpush1.bf16.msra.mxu1 %v5204_v1  ;;  %v5397_v31 = vld [vmem:[#allocation2 + $0x1c98] sm:$0xff]  ;;  %v5394_v1 = vld [vmem:[#allocation2 + $0x1c80] sm:$0xff] }
 0x4cf   :  { %5624 = vmatprep.subr.bf16.mxu0 %v5219_v8  ;;  %5788 = vmatprep.subr.bf16.mxu1 %v5221_v32  ;;  %v5396_v8 = vld [vmem:[#allocation2 + $0x1c90] sm:$0xff]  ;;  %v5411_v32 = vld [vmem:[#allocation2 + $0x1d08] sm:$0xff] }
 0x4d2   :  { %5625 = vmatpush1.bf16.msra.mxu0 %v5218_v33  ;;  %5789 = vmatpush1.bf16.msra.mxu1 %v5220_v12  ;;  %v5413_v33 = vld [vmem:[#allocation2 + $0x1d18] sm:$0xff]  ;;  %v5410_v12 = vld [vmem:[#allocation2 + $0x1d00] sm:$0xff] }
 0x4d3   :  { %5626 = vmatprep.subr.bf16.mxu0 %v5235_v37  ;;  %5790 = vmatprep.subr.bf16.mxu1 %v5237_v39  ;;  %v5412_v37 = vld [vmem:[#allocation2 + $0x1d10] sm:$0xff]  ;;  %v5427_v39 = vld [vmem:[#allocation2 + $0x1d88] sm:$0xff] }
 0x4d6   :  { %5627 = vmatpush1.bf16.msra.mxu0 %v5234_v41  ;;  %5791 = vmatpush1.bf16.msra.mxu1 %v5236_v42  ;;  %v5429_v41 = vld [vmem:[#allocation2 + $0x1d98] sm:$0xff]  ;;  %v5426_v42 = vld [vmem:[#allocation2 + $0x1d80] sm:$0xff] }
 0x4d7   :  { %5637 = vmatprep.subr.bf16.mxu0 %v5251_v43  ;;  %5801 = vmatprep.subr.bf16.mxu1 %v5253_v47  ;;  %v5428_v43 = vld [vmem:[#allocation2 + $0x1d90] sm:$0xff]  ;;  %v5443_v47 = vld [vmem:[#allocation2 + $0x1e08] sm:$0xff] }
 0x4d9   :  { %5629 = vmatmul.mubr.bf16.vlgmr.msra.gmra.mrb[16].mxu0 %v9076_v49  ;;  %5793 = vmatmul.mubr.bf16.vlgmr.msra.gmra.mrb[16].mxu1 %v9076_v49 }
 0x4da   :  { %5638 = vmatpush1.bf16.msra.mxu0 %v5250_v36  ;;  %5802 = vmatpush1.bf16.msra.mxu1 %v5252_v35  ;;  %v5445_v36 = vld [vmem:[#allocation2 + $0x1e18] sm:$0xff]  ;;  %v5442_v35 = vld [vmem:[#allocation2 + $0x1e00] sm:$0xff] }
 0x4db   :  { %5639 = vmatprep.subr.bf16.mxu0 %v5267_v44  ;;  %5803 = vmatprep.subr.bf16.mxu1 %v5269_v50  ;;  %v5444_v44 = vld [vmem:[#allocation2 + $0x1e10] sm:$0xff]  ;;  %v5459_v50 = vld [vmem:[#allocation2 + $0x1e88] sm:$0xff] }
 0x4dc   :  { %5669 = vmatprep.mubr.bf16.mxu0 %v9081_v52  ;;  %5833 = vmatprep.mubr.bf16.mxu1 %v9081_v52 }
 0x4de   :  { %5640 = vmatpush1.bf16.msra.mxu0 %v5266_v63  ;;  %5804 = vmatpush1.bf16.msra.mxu1 %v5268_v6  ;;  %v5461_v63 = vld [vmem:[#allocation2 + $0x1e98] sm:$0xff]  ;;  %v5458_v6 = vld [vmem:[#allocation2 + $0x1e80] sm:$0xff] }
 0x4df   :  { %5641 = vmatprep.subr.bf16.mxu0 %v5283_v54  ;;  %5805 = vmatprep.subr.bf16.mxu1 %v5285_v55  ;;  %v5460_v54 = vld [vmem:[#allocation2 + $0x1e90] sm:$0xff]  ;;  %v5475_v55 = vld [vmem:[#allocation2 + $0x1f08] sm:$0xff] }
 0x4e2   :  { %5642 = vmatpush1.bf16.msra.mxu0 %v5282_v0  ;;  %5806 = vmatpush1.bf16.msra.mxu1 %v5284_v45  ;;  %v5477_v0 = vld [vmem:[#allocation2 + $0x1f18] sm:$0xff]  ;;  %v5474_v45 = vld [vmem:[#allocation2 + $0x1f00] sm:$0xff] }
 0x4e3   :  { %5643 = vmatprep.subr.bf16.mxu0 %v5299_v48  ;;  %5807 = vmatprep.subr.bf16.mxu1 %v5301_v3  ;;  %v5476_v48 = vld [vmem:[#allocation2 + $0x1f10] sm:$0xff]  ;;  %v5491_v3 = vld [vmem:[#allocation2 + $0x1f88] sm:$0xff] }
 0x4e6   :  { %5644 = vmatpush1.bf16.msra.mxu0 %v5298_v9  ;;  %5808 = vmatpush1.bf16.msra.mxu1 %v5300_v57  ;;  %v5493_v9 = vld [vmem:[#allocation2 + $0x1f98] sm:$0xff]  ;;  %v5490_v57 = vld [vmem:[#allocation2 + $0x1f80] sm:$0xff] }
 0x4e7   :  { %5645 = vmatprep.subr.bf16.mxu0 %v5315_v58  ;;  %5809 = vmatprep.subr.bf16.mxu1 %v5317_v7  ;;  %v5492_v58 = vld [vmem:[#allocation2 + $0x1f90] sm:$0xff]  ;;  %v4487_v7 = vld [vmem:[#allocation2 + $0x28] sm:$0xff] }
 0x4ea   :  { %5646 = vmatpush1.bf16.msra.mxu0 %v5314_v20  ;;  %5810 = vmatpush1.bf16.msra.mxu1 %v5316_v59  ;;  %v4489_v20 = vld [vmem:[#allocation2 + $0x38] sm:$0xff]  ;;  %v9090_v59 = vpack.c.bf16 %v4476_v5, %v4476_v5  ;;  %v4519_v5 = vld [vmem:[#allocation2 + $0x128] sm:$0xff] }
 0x4eb   :  { %5647 = vmatprep.subr.bf16.mxu0 %v5331_v60  ;;  %5811 = vmatprep.subr.bf16.mxu1 %v5333_v61  ;;  %v4486_v60 = vld [vmem:[#allocation2 + $0x20] sm:$0xff]  ;;  %v4488_v61 = vld [vmem:[#allocation2 + $0x30] sm:$0xff] }
 0x4ee   :  { %5648 = vmatpush1.bf16.msra.mxu0 %v5330_v62  ;;  %5812 = vmatpush1.bf16.msra.mxu1 %v5332_v22  ;;  %v4503_v62 = vld [vmem:[#allocation2 + $0xa8] sm:$0xff]  ;;  %v4505_v22 = vld [vmem:[#allocation2 + $0xb8] sm:$0xff] }
 0x4ef   :  { %5649 = vmatprep.subr.bf16.mxu0 %v5347_v2  ;;  %5813 = vmatprep.subr.bf16.mxu1 %v5349_v14  ;;  %v4504_v2 = vld [vmem:[#allocation2 + $0xb0] sm:$0xff]  ;;  %v4521_v14 = vld [vmem:[#allocation2 + $0x138] sm:$0xff] }
 0x4f2   :  { %5650 = vmatpush1.bf16.msra.mxu0 %v5346_v25  ;;  %5814 = vmatpush1.bf16.msra.mxu1 %v5348_v11  ;;  %v4518_v25 = vld [vmem:[#allocation2 + $0x120] sm:$0xff]  ;;  %v4520_v11 = vld [vmem:[#allocation2 + $0x130] sm:$0xff] }
 0x4f3   :  { %5651 = vmatprep.subr.bf16.mxu0 %v5363_v17  ;;  %5815 = vmatprep.subr.bf16.mxu1 %v5365_v53  ;;  %v4535_v17 = vld [vmem:[#allocation2 + $0x1a8] sm:$0xff]  ;;  %v4537_v53 = vld [vmem:[#allocation2 + $0x1b8] sm:$0xff] }
 0x4f6   :  { %5652 = vmatpush1.bf16.msra.mxu0 %v5362_v23  ;;  %5816 = vmatpush1.bf16.msra.mxu1 %v5364_v26  ;;  %v4534_v23 = vld [vmem:[#allocation2 + $0x1a0] sm:$0xff]  ;;  %v4536_v26 = vld [vmem:[#allocation2 + $0x1b0] sm:$0xff] }
 0x4f7   :  { %5653 = vmatprep.subr.bf16.mxu0 %v5379_v30  ;;  %5817 = vmatprep.subr.bf16.mxu1 %v5381_v27  ;;  %v4551_v30 = vld [vmem:[#allocation2 + $0x228] sm:$0xff]  ;;  %v4553_v27 = vld [vmem:[#allocation2 + $0x238] sm:$0xff] }
 0x4fa   :  { %5654 = vmatpush1.bf16.msra.mxu0 %v5378_v4  ;;  %5818 = vmatpush1.bf16.msra.mxu1 %v5380_v10  ;;  %v4550_v4 = vld [vmem:[#allocation2 + $0x220] sm:$0xff]  ;;  %v4552_v10 = vld [vmem:[#allocation2 + $0x230] sm:$0xff] }
 0x4fb   :  { %5655 = vmatprep.subr.bf16.mxu0 %v5395_v28  ;;  %5819 = vmatprep.subr.bf16.mxu1 %v5397_v31  ;;  %v4567_v28 = vld [vmem:[#allocation2 + $0x2a8] sm:$0xff]  ;;  %v4569_v31 = vld [vmem:[#allocation2 + $0x2b8] sm:$0xff] }
 0x4fe   :  { %5656 = vmatpush1.bf16.msra.mxu0 %v5394_v1  ;;  %5820 = vmatpush1.bf16.msra.mxu1 %v5396_v8  ;;  %v4566_v1 = vld [vmem:[#allocation2 + $0x2a0] sm:$0xff]  ;;  %v4568_v8 = vld [vmem:[#allocation2 + $0x2b0] sm:$0xff] }
 0x4ff   :  { %5657 = vmatprep.subr.bf16.mxu0 %v5411_v32  ;;  %5821 = vmatprep.subr.bf16.mxu1 %v5413_v33  ;;  %v4583_v32 = vld [vmem:[#allocation2 + $0x328] sm:$0xff]  ;;  %v4585_v33 = vld [vmem:[#allocation2 + $0x338] sm:$0xff] }
 0x502   :  { %5658 = vmatpush1.bf16.msra.mxu0 %v5410_v12  ;;  %5822 = vmatpush1.bf16.msra.mxu1 %v5412_v37  ;;  %v4582_v12 = vld [vmem:[#allocation2 + $0x320] sm:$0xff]  ;;  %v4584_v37 = vld [vmem:[#allocation2 + $0x330] sm:$0xff] }
 0x503   :  { %5659 = vmatprep.subr.bf16.mxu0 %v5427_v39  ;;  %5823 = vmatprep.subr.bf16.mxu1 %v5429_v41  ;;  %v4599_v39 = vld [vmem:[#allocation2 + $0x3a8] sm:$0xff]  ;;  %v4601_v41 = vld [vmem:[#allocation2 + $0x3b8] sm:$0xff] }
 0x506   :  { %5660 = vmatpush1.bf16.msra.mxu0 %v5426_v42  ;;  %5824 = vmatpush1.bf16.msra.mxu1 %v5428_v43  ;;  %v4598_v42 = vld [vmem:[#allocation2 + $0x3a0] sm:$0xff]  ;;  %v4600_v43 = vld [vmem:[#allocation2 + $0x3b0] sm:$0xff] }
 0x507   :  { %5661 = vmatprep.subr.bf16.mxu0 %v5443_v47  ;;  %5825 = vmatprep.subr.bf16.mxu1 %v5445_v36  ;;  %v4615_v47 = vld [vmem:[#allocation2 + $0x428] sm:$0xff]  ;;  %v4617_v36 = vld [vmem:[#allocation2 + $0x438] sm:$0xff] }
 0x50a   :  { %5662 = vmatpush1.bf16.msra.mxu0 %v5442_v35  ;;  %5826 = vmatpush1.bf16.msra.mxu1 %v5444_v44  ;;  %v4614_v35 = vld [vmem:[#allocation2 + $0x420] sm:$0xff]  ;;  %v4616_v44 = vld [vmem:[#allocation2 + $0x430] sm:$0xff] }
 0x50b   :  { %5663 = vmatprep.subr.bf16.mxu0 %v5459_v50  ;;  %5827 = vmatprep.subr.bf16.mxu1 %v5461_v63  ;;  %v4631_v50 = vld [vmem:[#allocation2 + $0x4a8] sm:$0xff]  ;;  %v4633_v63 = vld [vmem:[#allocation2 + $0x4b8] sm:$0xff] }
 0x50e   :  { %5664 = vmatpush1.bf16.msra.mxu0 %v5458_v6  ;;  %5828 = vmatpush1.bf16.msra.mxu1 %v5460_v54  ;;  %v4630_v6 = vld [vmem:[#allocation2 + $0x4a0] sm:$0xff]  ;;  %v4632_v54 = vld [vmem:[#allocation2 + $0x4b0] sm:$0xff] }
 0x50f   :  { %5665 = vmatprep.subr.bf16.mxu0 %v5475_v55  ;;  %5829 = vmatprep.subr.bf16.mxu1 %v5477_v0  ;;  %v4647_v55 = vld [vmem:[#allocation2 + $0x528] sm:$0xff]  ;;  %v4649_v0 = vld [vmem:[#allocation2 + $0x538] sm:$0xff] }
 0x512   :  { %5666 = vmatpush1.bf16.msra.mxu0 %v5474_v45  ;;  %5830 = vmatpush1.bf16.msra.mxu1 %v5476_v48  ;;  %v4646_v45 = vld [vmem:[#allocation2 + $0x520] sm:$0xff]  ;;  %v4648_v48 = vld [vmem:[#allocation2 + $0x530] sm:$0xff] }
 0x513   :  { %5667 = vmatprep.subr.bf16.mxu0 %v5491_v3  ;;  %5831 = vmatprep.subr.bf16.mxu1 %v5493_v9  ;;  %v4663_v3 = vld [vmem:[#allocation2 + $0x5a8] sm:$0xff]  ;;  %v4665_v9 = vld [vmem:[#allocation2 + $0x5b8] sm:$0xff] }
 0x516   :  { %5668 = vmatpush1.bf16.msra.mxu0 %v5490_v57  ;;  %5832 = vmatpush1.bf16.msra.mxu1 %v5492_v58  ;;  %v4662_v57 = vld [vmem:[#allocation2 + $0x5a0] sm:$0xff]  ;;  %v4664_v58 = vld [vmem:[#allocation2 + $0x5b0] sm:$0xff] }
 0x517   :  { %5842 = vmatprep.subr.bf16.mxu0 %v4487_v7  ;;  %6006 = vmatprep.subr.bf16.mxu1 %v4489_v20  ;;  %v4679_v7 = vld [vmem:[#allocation2 + $0x628] sm:$0xff]  ;;  %v4681_v20 = vld [vmem:[#allocation2 + $0x638] sm:$0xff] }
 0x519   :  { %5670 = vmatmul.mubr.bf16.vlgmr.msra.gmra.mrb[16].mxu0 %v9090_v59  ;;  %5834 = vmatmul.mubr.bf16.vlgmr.msra.gmra.mrb[16].mxu1 %v9090_v59 }
 0x51a   :  { %5843 = vmatpush1.bf16.msra.mxu0 %v4486_v60  ;;  %6007 = vmatpush1.bf16.msra.mxu1 %v4488_v61  ;;  %v4678_v60 = vld [vmem:[#allocation2 + $0x620] sm:$0xff]  ;;  %v4680_v61 = vld [vmem:[#allocation2 + $0x630] sm:$0xff] }
 0x51b   :  { %5844 = vmatprep.subr.bf16.mxu0 %v4503_v62  ;;  %6008 = vmatprep.subr.bf16.mxu1 %v4505_v22  ;;  %v4695_v62 = vld [vmem:[#allocation2 + $0x6a8] sm:$0xff]  ;;  %v4697_v22 = vld [vmem:[#allocation2 + $0x6b8] sm:$0xff] }
 0x51c   :  { %5874 = vmatprep.mubr.bf16.mxu0 %v9041_v40  ;;  %6038 = vmatprep.mubr.bf16.mxu1 %v9041_v40 }
 0x51e   :  { %5845 = vmatpush1.bf16.msra.mxu0 %v4502_v29  ;;  %6009 = vmatpush1.bf16.msra.mxu1 %v4504_v2  ;;  %v4694_v29 = vld [vmem:[#allocation2 + $0x6a0] sm:$0xff]  ;;  %v4696_v2 = vld [vmem:[#allocation2 + $0x6b0] sm:$0xff] }
 0x51f   :  { %5846 = vmatprep.subr.bf16.mxu0 %v4519_v5  ;;  %6010 = vmatprep.subr.bf16.mxu1 %v4521_v14  ;;  %v4711_v5 = vld [vmem:[#allocation2 + $0x728] sm:$0xff]  ;;  %v4713_v14 = vld [vmem:[#allocation2 + $0x738] sm:$0xff] }
 0x522   :  { %5847 = vmatpush1.bf16.msra.mxu0 %v4518_v25  ;;  %6011 = vmatpush1.bf16.msra.mxu1 %v4520_v11  ;;  %v4710_v25 = vld [vmem:[#allocation2 + $0x720] sm:$0xff]  ;;  %v4712_v11 = vld [vmem:[#allocation2 + $0x730] sm:$0xff] }
 0x523   :  { %5848 = vmatprep.subr.bf16.mxu0 %v4535_v17  ;;  %6012 = vmatprep.subr.bf16.mxu1 %v4537_v53  ;;  %v4727_v17 = vld [vmem:[#allocation2 + $0x7a8] sm:$0xff]  ;;  %v4729_v53 = vld [vmem:[#allocation2 + $0x7b8] sm:$0xff] }
 0x526   :  { %5849 = vmatpush1.bf16.msra.mxu0 %v4534_v23  ;;  %6013 = vmatpush1.bf16.msra.mxu1 %v4536_v26  ;;  %v4726_v23 = vld [vmem:[#allocation2 + $0x7a0] sm:$0xff]  ;;  %v4728_v26 = vld [vmem:[#allocation2 + $0x7b0] sm:$0xff] }
 0x527   :  { %5850 = vmatprep.subr.bf16.mxu0 %v4551_v30  ;;  %6014 = vmatprep.subr.bf16.mxu1 %v4553_v27  ;;  %v4743_v30 = vld [vmem:[#allocation2 + $0x828] sm:$0xff]  ;;  %v4745_v27 = vld [vmem:[#allocation2 + $0x838] sm:$0xff] }
 0x52a   :  { %5851 = vmatpush1.bf16.msra.mxu0 %v4550_v4  ;;  %6015 = vmatpush1.bf16.msra.mxu1 %v4552_v10  ;;  %v4742_v4 = vld [vmem:[#allocation2 + $0x820] sm:$0xff]  ;;  %v4744_v10 = vld [vmem:[#allocation2 + $0x830] sm:$0xff] }
 0x52b   :  { %5852 = vmatprep.subr.bf16.mxu0 %v4567_v28  ;;  %6016 = vmatprep.subr.bf16.mxu1 %v4569_v31  ;;  %v4759_v28 = vld [vmem:[#allocation2 + $0x8a8] sm:$0xff]  ;;  %v4761_v31 = vld [vmem:[#allocation2 + $0x8b8] sm:$0xff] }
 0x52e   :  { %5853 = vmatpush1.bf16.msra.mxu0 %v4566_v1  ;;  %6017 = vmatpush1.bf16.msra.mxu1 %v4568_v8  ;;  %v4758_v1 = vld [vmem:[#allocation2 + $0x8a0] sm:$0xff]  ;;  %v4760_v8 = vld [vmem:[#allocation2 + $0x8b0] sm:$0xff] }
 0x52f   :  { %5854 = vmatprep.subr.bf16.mxu0 %v4583_v32  ;;  %6018 = vmatprep.subr.bf16.mxu1 %v4585_v33  ;;  %v4775_v32 = vld [vmem:[#allocation2 + $0x928] sm:$0xff]  ;;  %v4777_v33 = vld [vmem:[#allocation2 + $0x938] sm:$0xff] }
 0x532   :  { %5855 = vmatpush1.bf16.msra.mxu0 %v4582_v12  ;;  %6019 = vmatpush1.bf16.msra.mxu1 %v4584_v37  ;;  %v4774_v12 = vld [vmem:[#allocation2 + $0x920] sm:$0xff]  ;;  %v4776_v37 = vld [vmem:[#allocation2 + $0x930] sm:$0xff] }
 0x533   :  { %5856 = vmatprep.subr.bf16.mxu0 %v4599_v39  ;;  %6020 = vmatprep.subr.bf16.mxu1 %v4601_v41  ;;  %v4791_v39 = vld [vmem:[#allocation2 + $0x9a8] sm:$0xff]  ;;  %v4793_v41 = vld [vmem:[#allocation2 + $0x9b8] sm:$0xff] }
 0x536   :  { %5857 = vmatpush1.bf16.msra.mxu0 %v4598_v42  ;;  %6021 = vmatpush1.bf16.msra.mxu1 %v4600_v43  ;;  %v4790_v42 = vld [vmem:[#allocation2 + $0x9a0] sm:$0xff]  ;;  %v4792_v43 = vld [vmem:[#allocation2 + $0x9b0] sm:$0xff] }
 0x537   :  { %5858 = vmatprep.subr.bf16.mxu0 %v4615_v47  ;;  %6022 = vmatprep.subr.bf16.mxu1 %v4617_v36  ;;  %v4807_v47 = vld [vmem:[#allocation2 + $0xa28] sm:$0xff]  ;;  %v4809_v36 = vld [vmem:[#allocation2 + $0xa38] sm:$0xff] }
 0x53a   :  { %5859 = vmatpush1.bf16.msra.mxu0 %v4614_v35  ;;  %6023 = vmatpush1.bf16.msra.mxu1 %v4616_v44  ;;  %v4806_v35 = vld [vmem:[#allocation2 + $0xa20] sm:$0xff]  ;;  %v4808_v44 = vld [vmem:[#allocation2 + $0xa30] sm:$0xff] }
 0x53b   :  { %5860 = vmatprep.subr.bf16.mxu0 %v4631_v50  ;;  %6024 = vmatprep.subr.bf16.mxu1 %v4633_v63  ;;  %v4823_v50 = vld [vmem:[#allocation2 + $0xaa8] sm:$0xff]  ;;  %v4825_v63 = vld [vmem:[#allocation2 + $0xab8] sm:$0xff] }
 0x53e   :  { %5861 = vmatpush1.bf16.msra.mxu0 %v4630_v6  ;;  %6025 = vmatpush1.bf16.msra.mxu1 %v4632_v54  ;;  %v4822_v6 = vld [vmem:[#allocation2 + $0xaa0] sm:$0xff]  ;;  %v4824_v54 = vld [vmem:[#allocation2 + $0xab0] sm:$0xff] }
 0x53f   :  { %5862 = vmatprep.subr.bf16.mxu0 %v4647_v55  ;;  %6026 = vmatprep.subr.bf16.mxu1 %v4649_v0  ;;  %v4839_v55 = vld [vmem:[#allocation2 + $0xb28] sm:$0xff]  ;;  %v4841_v0 = vld [vmem:[#allocation2 + $0xb38] sm:$0xff] }
 0x542   :  { %5863 = vmatpush1.bf16.msra.mxu0 %v4646_v45  ;;  %6027 = vmatpush1.bf16.msra.mxu1 %v4648_v48  ;;  %v4838_v45 = vld [vmem:[#allocation2 + $0xb20] sm:$0xff]  ;;  %v4840_v48 = vld [vmem:[#allocation2 + $0xb30] sm:$0xff] }
 0x543   :  { %5864 = vmatprep.subr.bf16.mxu0 %v4663_v3  ;;  %6028 = vmatprep.subr.bf16.mxu1 %v4665_v9  ;;  %v4855_v3 = vld [vmem:[#allocation2 + $0xba8] sm:$0xff]  ;;  %v4857_v9 = vld [vmem:[#allocation2 + $0xbb8] sm:$0xff] }
 0x546   :  { %5865 = vmatpush1.bf16.msra.mxu0 %v4662_v57  ;;  %6029 = vmatpush1.bf16.msra.mxu1 %v4664_v58  ;;  %v4854_v57 = vld [vmem:[#allocation2 + $0xba0] sm:$0xff]  ;;  %v4856_v58 = vld [vmem:[#allocation2 + $0xbb0] sm:$0xff] }
 0x547   :  { %5866 = vmatprep.subr.bf16.mxu0 %v4679_v7  ;;  %6030 = vmatprep.subr.bf16.mxu1 %v4681_v20  ;;  %v4871_v7 = vld [vmem:[#allocation2 + $0xc28] sm:$0xff]  ;;  %v4873_v20 = vld [vmem:[#allocation2 + $0xc38] sm:$0xff] }
 0x54a   :  { %5867 = vmatpush1.bf16.msra.mxu0 %v4678_v60  ;;  %6031 = vmatpush1.bf16.msra.mxu1 %v4680_v61  ;;  %v4870_v60 = vld [vmem:[#allocation2 + $0xc20] sm:$0xff]  ;;  %v4872_v61 = vld [vmem:[#allocation2 + $0xc30] sm:$0xff] }
 0x54b   :  { %5868 = vmatprep.subr.bf16.mxu0 %v4695_v62  ;;  %6032 = vmatprep.subr.bf16.mxu1 %v4697_v22  ;;  %v4887_v62 = vld [vmem:[#allocation2 + $0xca8] sm:$0xff]  ;;  %v4889_v22 = vld [vmem:[#allocation2 + $0xcb8] sm:$0xff] }
 0x54e   :  { %5869 = vmatpush1.bf16.msra.mxu0 %v4694_v29  ;;  %6033 = vmatpush1.bf16.msra.mxu1 %v4696_v2  ;;  %v4886_v29 = vld [vmem:[#allocation2 + $0xca0] sm:$0xff]  ;;  %v4888_v2 = vld [vmem:[#allocation2 + $0xcb0] sm:$0xff] }
 0x54f   :  { %5870 = vmatprep.subr.bf16.mxu0 %v4711_v5  ;;  %6034 = vmatprep.subr.bf16.mxu1 %v4713_v14  ;;  %v4903_v5 = vld [vmem:[#allocation2 + $0xd28] sm:$0xff]  ;;  %v4905_v14 = vld [vmem:[#allocation2 + $0xd38] sm:$0xff] }
 0x552   :  { %5871 = vmatpush1.bf16.msra.mxu0 %v4710_v25  ;;  %6035 = vmatpush1.bf16.msra.mxu1 %v4712_v11  ;;  %v4902_v25 = vld [vmem:[#allocation2 + $0xd20] sm:$0xff]  ;;  %v4904_v11 = vld [vmem:[#allocation2 + $0xd30] sm:$0xff] }
 0x553   :  { %5872 = vmatprep.subr.bf16.mxu0 %v4727_v17  ;;  %6036 = vmatprep.subr.bf16.mxu1 %v4729_v53  ;;  %v4919_v17 = vld [vmem:[#allocation2 + $0xda8] sm:$0xff]  ;;  %v4921_v53 = vld [vmem:[#allocation2 + $0xdb8] sm:$0xff] }
 0x556   :  { %5873 = vmatpush1.bf16.msra.mxu0 %v4726_v23  ;;  %6037 = vmatpush1.bf16.msra.mxu1 %v4728_v26  ;;  %v4918_v23 = vld [vmem:[#allocation2 + $0xda0] sm:$0xff]  ;;  %v4920_v26 = vld [vmem:[#allocation2 + $0xdb0] sm:$0xff] }
 0x557   :  { %5883 = vmatprep.subr.bf16.mxu0 %v4743_v30  ;;  %6047 = vmatprep.subr.bf16.mxu1 %v4745_v27  ;;  %v4935_v30 = vld [vmem:[#allocation2 + $0xe28] sm:$0xff]  ;;  %v4937_v27 = vld [vmem:[#allocation2 + $0xe38] sm:$0xff] }
 0x559   :  { %5875 = vmatmul.mubr.bf16.vlgmr.msra.gmra.mrb[20].mxu0 %v9048_v51  ;;  %6039 = vmatmul.mubr.bf16.vlgmr.msra.gmra.mrb[20].mxu1 %v9048_v51 }
 0x55a   :  { %5884 = vmatpush1.bf16.msra.mxu0 %v4742_v4  ;;  %6048 = vmatpush1.bf16.msra.mxu1 %v4744_v10  ;;  %v4934_v4 = vld [vmem:[#allocation2 + $0xe20] sm:$0xff]  ;;  %v4936_v10 = vld [vmem:[#allocation2 + $0xe30] sm:$0xff] }
 0x55b   :  { %5885 = vmatprep.subr.bf16.mxu0 %v4759_v28  ;;  %6049 = vmatprep.subr.bf16.mxu1 %v4761_v31  ;;  %v4951_v28 = vld [vmem:[#allocation2 + $0xea8] sm:$0xff]  ;;  %v4953_v31 = vld [vmem:[#allocation2 + $0xeb8] sm:$0xff] }
 0x55c   :  { %5915 = vmatprep.mubr.bf16.mxu0 %v9053_v56  ;;  %6079 = vmatprep.mubr.bf16.mxu1 %v9053_v56 }
 0x55e   :  { %5886 = vmatpush1.bf16.msra.mxu0 %v4758_v1  ;;  %6050 = vmatpush1.bf16.msra.mxu1 %v4760_v8  ;;  %v4950_v1 = vld [vmem:[#allocation2 + $0xea0] sm:$0xff]  ;;  %v4952_v8 = vld [vmem:[#allocation2 + $0xeb0] sm:$0xff] }
 0x55f   :  { %5887 = vmatprep.subr.bf16.mxu0 %v4775_v32  ;;  %6051 = vmatprep.subr.bf16.mxu1 %v4777_v33  ;;  %v4967_v32 = vld [vmem:[#allocation2 + $0xf28] sm:$0xff]  ;;  %v4969_v33 = vld [vmem:[#allocation2 + $0xf38] sm:$0xff] }
 0x562   :  { %5888 = vmatpush1.bf16.msra.mxu0 %v4774_v12  ;;  %6052 = vmatpush1.bf16.msra.mxu1 %v4776_v37  ;;  %v4966_v12 = vld [vmem:[#allocation2 + $0xf20] sm:$0xff]  ;;  %v4968_v37 = vld [vmem:[#allocation2 + $0xf30] sm:$0xff] }
 0x563   :  { %5889 = vmatprep.subr.bf16.mxu0 %v4791_v39  ;;  %6053 = vmatprep.subr.bf16.mxu1 %v4793_v41  ;;  %v4983_v39 = vld [vmem:[#allocation2 + $0xfa8] sm:$0xff]  ;;  %v4985_v41 = vld [vmem:[#allocation2 + $0xfb8] sm:$0xff] }
 0x566   :  { %5890 = vmatpush1.bf16.msra.mxu0 %v4790_v42  ;;  %6054 = vmatpush1.bf16.msra.mxu1 %v4792_v43  ;;  %v4982_v42 = vld [vmem:[#allocation2 + $0xfa0] sm:$0xff]  ;;  %v4984_v43 = vld [vmem:[#allocation2 + $0xfb0] sm:$0xff] }
 0x567   :  { %5891 = vmatprep.subr.bf16.mxu0 %v4807_v47  ;;  %6055 = vmatprep.subr.bf16.mxu1 %v4809_v36  ;;  %v4999_v47 = vld [vmem:[#allocation2 + $0x1028] sm:$0xff]  ;;  %v5001_v36 = vld [vmem:[#allocation2 + $0x1038] sm:$0xff] }
 0x56a   :  { %5892 = vmatpush1.bf16.msra.mxu0 %v4806_v35  ;;  %6056 = vmatpush1.bf16.msra.mxu1 %v4808_v44  ;;  %v4998_v35 = vld [vmem:[#allocation2 + $0x1020] sm:$0xff]  ;;  %v5000_v44 = vld [vmem:[#allocation2 + $0x1030] sm:$0xff] }
 0x56b   :  { %5893 = vmatprep.subr.bf16.mxu0 %v4823_v50  ;;  %6057 = vmatprep.subr.bf16.mxu1 %v4825_v63  ;;  %v5015_v50 = vld [vmem:[#allocation2 + $0x10a8] sm:$0xff]  ;;  %v5017_v63 = vld [vmem:[#allocation2 + $0x10b8] sm:$0xff] }
 0x56e   :  { %5894 = vmatpush1.bf16.msra.mxu0 %v4822_v6  ;;  %6058 = vmatpush1.bf16.msra.mxu1 %v4824_v54  ;;  %v5014_v6 = vld [vmem:[#allocation2 + $0x10a0] sm:$0xff]  ;;  %v5016_v54 = vld [vmem:[#allocation2 + $0x10b0] sm:$0xff] }
 0x56f   :  { %5895 = vmatprep.subr.bf16.mxu0 %v4839_v55  ;;  %6059 = vmatprep.subr.bf16.mxu1 %v4841_v0  ;;  %v5031_v55 = vld [vmem:[#allocation2 + $0x1128] sm:$0xff]  ;;  %v5033_v0 = vld [vmem:[#allocation2 + $0x1138] sm:$0xff] }
 0x572   :  { %5896 = vmatpush1.bf16.msra.mxu0 %v4838_v45  ;;  %6060 = vmatpush1.bf16.msra.mxu1 %v4840_v48  ;;  %v5030_v45 = vld [vmem:[#allocation2 + $0x1120] sm:$0xff]  ;;  %v5032_v48 = vld [vmem:[#allocation2 + $0x1130] sm:$0xff] }
 0x573   :  { %5897 = vmatprep.subr.bf16.mxu0 %v4855_v3  ;;  %6061 = vmatprep.subr.bf16.mxu1 %v4857_v9  ;;  %v5047_v3 = vld [vmem:[#allocation2 + $0x11a8] sm:$0xff]  ;;  %v5049_v9 = vld [vmem:[#allocation2 + $0x11b8] sm:$0xff] }
 0x576   :  { %5898 = vmatpush1.bf16.msra.mxu0 %v4854_v57  ;;  %6062 = vmatpush1.bf16.msra.mxu1 %v4856_v58  ;;  %v5046_v57 = vld [vmem:[#allocation2 + $0x11a0] sm:$0xff]  ;;  %v5048_v58 = vld [vmem:[#allocation2 + $0x11b0] sm:$0xff] }
 0x577   :  { %5899 = vmatprep.subr.bf16.mxu0 %v4871_v7  ;;  %6063 = vmatprep.subr.bf16.mxu1 %v4873_v20  ;;  %v5063_v7 = vld [vmem:[#allocation2 + $0x1228] sm:$0xff]  ;;  %v5065_v20 = vld [vmem:[#allocation2 + $0x1238] sm:$0xff] }
 0x57a   :  { %5900 = vmatpush1.bf16.msra.mxu0 %v4870_v60  ;;  %6064 = vmatpush1.bf16.msra.mxu1 %v4872_v61  ;;  %v5062_v60 = vld [vmem:[#allocation2 + $0x1220] sm:$0xff]  ;;  %v5064_v61 = vld [vmem:[#allocation2 + $0x1230] sm:$0xff] }
 0x57b   :  { %5901 = vmatprep.subr.bf16.mxu0 %v4887_v62  ;;  %6065 = vmatprep.subr.bf16.mxu1 %v4889_v22  ;;  %v5079_v62 = vld [vmem:[#allocation2 + $0x12a8] sm:$0xff]  ;;  %v5081_v22 = vld [vmem:[#allocation2 + $0x12b8] sm:$0xff] }
 0x57e   :  { %5902 = vmatpush1.bf16.msra.mxu0 %v4886_v29  ;;  %6066 = vmatpush1.bf16.msra.mxu1 %v4888_v2  ;;  %v5078_v29 = vld [vmem:[#allocation2 + $0x12a0] sm:$0xff]  ;;  %v5080_v2 = vld [vmem:[#allocation2 + $0x12b0] sm:$0xff] }
 0x57f   :  { %5903 = vmatprep.subr.bf16.mxu0 %v4903_v5  ;;  %6067 = vmatprep.subr.bf16.mxu1 %v4905_v14  ;;  %v5095_v5 = vld [vmem:[#allocation2 + $0x1328] sm:$0xff]  ;;  %v5097_v14 = vld [vmem:[#allocation2 + $0x1338] sm:$0xff] }
 0x582   :  { %5904 = vmatpush1.bf16.msra.mxu0 %v4902_v25  ;;  %6068 = vmatpush1.bf16.msra.mxu1 %v4904_v11  ;;  %v5094_v25 = vld [vmem:[#allocation2 + $0x1320] sm:$0xff]  ;;  %v5096_v11 = vld [vmem:[#allocation2 + $0x1330] sm:$0xff] }
 0x583   :  { %5905 = vmatprep.subr.bf16.mxu0 %v4919_v17  ;;  %6069 = vmatprep.subr.bf16.mxu1 %v4921_v53  ;;  %v5111_v17 = vld [vmem:[#allocation2 + $0x13a8] sm:$0xff]  ;;  %v5113_v53 = vld [vmem:[#allocation2 + $0x13b8] sm:$0xff] }
 0x586   :  { %5906 = vmatpush1.bf16.msra.mxu0 %v4918_v23  ;;  %6070 = vmatpush1.bf16.msra.mxu1 %v4920_v26  ;;  %v5110_v23 = vld [vmem:[#allocation2 + $0x13a0] sm:$0xff]  ;;  %v5112_v26 = vld [vmem:[#allocation2 + $0x13b0] sm:$0xff] }
 0x587   :  { %5907 = vmatprep.subr.bf16.mxu0 %v4935_v30  ;;  %6071 = vmatprep.subr.bf16.mxu1 %v4937_v27  ;;  %v5127_v30 = vld [vmem:[#allocation2 + $0x1428] sm:$0xff]  ;;  %v5129_v27 = vld [vmem:[#allocation2 + $0x1438] sm:$0xff] }
 0x58a   :  { %5908 = vmatpush1.bf16.msra.mxu0 %v4934_v4  ;;  %6072 = vmatpush1.bf16.msra.mxu1 %v4936_v10  ;;  %v5126_v4 = vld [vmem:[#allocation2 + $0x1420] sm:$0xff]  ;;  %v5128_v10 = vld [vmem:[#allocation2 + $0x1430] sm:$0xff] }
 0x58b   :  { %5909 = vmatprep.subr.bf16.mxu0 %v4951_v28  ;;  %6073 = vmatprep.subr.bf16.mxu1 %v4953_v31  ;;  %v5143_v28 = vld [vmem:[#allocation2 + $0x14a8] sm:$0xff]  ;;  %v5145_v31 = vld [vmem:[#allocation2 + $0x14b8] sm:$0xff] }
 0x58e   :  { %5910 = vmatpush1.bf16.msra.mxu0 %v4950_v1  ;;  %6074 = vmatpush1.bf16.msra.mxu1 %v4952_v8  ;;  %v5142_v1 = vld [vmem:[#allocation2 + $0x14a0] sm:$0xff]  ;;  %v5144_v8 = vld [vmem:[#allocation2 + $0x14b0] sm:$0xff] }
 0x58f   :  { %5911 = vmatprep.subr.bf16.mxu0 %v4967_v32  ;;  %6075 = vmatprep.subr.bf16.mxu1 %v4969_v33  ;;  %v5159_v32 = vld [vmem:[#allocation2 + $0x1528] sm:$0xff]  ;;  %v5161_v33 = vld [vmem:[#allocation2 + $0x1538] sm:$0xff] }
 0x592   :  { %5912 = vmatpush1.bf16.msra.mxu0 %v4966_v12  ;;  %6076 = vmatpush1.bf16.msra.mxu1 %v4968_v37  ;;  %v5158_v12 = vld [vmem:[#allocation2 + $0x1520] sm:$0xff]  ;;  %v5160_v37 = vld [vmem:[#allocation2 + $0x1530] sm:$0xff] }
 0x593   :  { %5913 = vmatprep.subr.bf16.mxu0 %v4983_v39  ;;  %6077 = vmatprep.subr.bf16.mxu1 %v4985_v41  ;;  %v5175_v39 = vld [vmem:[#allocation2 + $0x15a8] sm:$0xff]  ;;  %v5177_v41 = vld [vmem:[#allocation2 + $0x15b8] sm:$0xff] }
 0x596   :  { %5914 = vmatpush1.bf16.msra.mxu0 %v4982_v42  ;;  %6078 = vmatpush1.bf16.msra.mxu1 %v4984_v43  ;;  %v5174_v42 = vld [vmem:[#allocation2 + $0x15a0] sm:$0xff]  ;;  %v5176_v43 = vld [vmem:[#allocation2 + $0x15b0] sm:$0xff] }
 0x597   :  { %5924 = vmatprep.subr.bf16.mxu0 %v4999_v47  ;;  %6088 = vmatprep.subr.bf16.mxu1 %v5001_v36  ;;  %v5191_v47 = vld [vmem:[#allocation2 + $0x1628] sm:$0xff]  ;;  %v5193_v36 = vld [vmem:[#allocation2 + $0x1638] sm:$0xff] }
 0x599   :  { %5916 = vmatmul.mubr.bf16.vlgmr.msra.gmra.mrb[20].mxu0 %v9062_v21  ;;  %6080 = vmatmul.mubr.bf16.vlgmr.msra.gmra.mrb[20].mxu1 %v9062_v21 }
 0x59a   :  { %5925 = vmatpush1.bf16.msra.mxu0 %v4998_v35  ;;  %6089 = vmatpush1.bf16.msra.mxu1 %v5000_v44  ;;  %v5190_v35 = vld [vmem:[#allocation2 + $0x1620] sm:$0xff]  ;;  %v5192_v44 = vld [vmem:[#allocation2 + $0x1630] sm:$0xff] }
 0x59b   :  { %5926 = vmatprep.subr.bf16.mxu0 %v5015_v50  ;;  %6090 = vmatprep.subr.bf16.mxu1 %v5017_v63  ;;  %v5207_v50 = vld [vmem:[#allocation2 + $0x16a8] sm:$0xff]  ;;  %v5209_v63 = vld [vmem:[#allocation2 + $0x16b8] sm:$0xff] }
 0x59c   :  { %5956 = vmatprep.mubr.bf16.mxu0 %v9067_v16  ;;  %6120 = vmatprep.mubr.bf16.mxu1 %v9067_v16 }
 0x59e   :  { %5927 = vmatpush1.bf16.msra.mxu0 %v5014_v6  ;;  %6091 = vmatpush1.bf16.msra.mxu1 %v5016_v54  ;;  %v5206_v6 = vld [vmem:[#allocation2 + $0x16a0] sm:$0xff]  ;;  %v5208_v54 = vld [vmem:[#allocation2 + $0x16b0] sm:$0xff] }
 0x59f   :  { %5928 = vmatprep.subr.bf16.mxu0 %v5031_v55  ;;  %6092 = vmatprep.subr.bf16.mxu1 %v5033_v0  ;;  %v5223_v55 = vld [vmem:[#allocation2 + $0x1728] sm:$0xff]  ;;  %v5225_v0 = vld [vmem:[#allocation2 + $0x1738] sm:$0xff] }
 0x5a2   :  { %5929 = vmatpush1.bf16.msra.mxu0 %v5030_v45  ;;  %6093 = vmatpush1.bf16.msra.mxu1 %v5032_v48  ;;  %v5222_v45 = vld [vmem:[#allocation2 + $0x1720] sm:$0xff]  ;;  %v5224_v48 = vld [vmem:[#allocation2 + $0x1730] sm:$0xff] }
 0x5a3   :  { %5930 = vmatprep.subr.bf16.mxu0 %v5047_v3  ;;  %6094 = vmatprep.subr.bf16.mxu1 %v5049_v9  ;;  %v5239_v3 = vld [vmem:[#allocation2 + $0x17a8] sm:$0xff]  ;;  %v5241_v9 = vld [vmem:[#allocation2 + $0x17b8] sm:$0xff] }
 0x5a6   :  { %5931 = vmatpush1.bf16.msra.mxu0 %v5046_v57  ;;  %6095 = vmatpush1.bf16.msra.mxu1 %v5048_v58  ;;  %v5238_v57 = vld [vmem:[#allocation2 + $0x17a0] sm:$0xff]  ;;  %v5240_v58 = vld [vmem:[#allocation2 + $0x17b0] sm:$0xff] }
 0x5a7   :  { %5932 = vmatprep.subr.bf16.mxu0 %v5063_v7  ;;  %6096 = vmatprep.subr.bf16.mxu1 %v5065_v20  ;;  %v5255_v7 = vld [vmem:[#allocation2 + $0x1828] sm:$0xff]  ;;  %v5257_v20 = vld [vmem:[#allocation2 + $0x1838] sm:$0xff] }
 0x5aa   :  { %5933 = vmatpush1.bf16.msra.mxu0 %v5062_v60  ;;  %6097 = vmatpush1.bf16.msra.mxu1 %v5064_v61  ;;  %v5254_v60 = vld [vmem:[#allocation2 + $0x1820] sm:$0xff]  ;;  %v5256_v61 = vld [vmem:[#allocation2 + $0x1830] sm:$0xff] }
 0x5ab   :  { %5934 = vmatprep.subr.bf16.mxu0 %v5079_v62  ;;  %6098 = vmatprep.subr.bf16.mxu1 %v5081_v22  ;;  %v5271_v62 = vld [vmem:[#allocation2 + $0x18a8] sm:$0xff]  ;;  %v5273_v22 = vld [vmem:[#allocation2 + $0x18b8] sm:$0xff] }
 0x5ae   :  { %5935 = vmatpush1.bf16.msra.mxu0 %v5078_v29  ;;  %6099 = vmatpush1.bf16.msra.mxu1 %v5080_v2  ;;  %v5270_v29 = vld [vmem:[#allocation2 + $0x18a0] sm:$0xff]  ;;  %v5272_v2 = vld [vmem:[#allocation2 + $0x18b0] sm:$0xff] }
 0x5af   :  { %5936 = vmatprep.subr.bf16.mxu0 %v5095_v5  ;;  %6100 = vmatprep.subr.bf16.mxu1 %v5097_v14  ;;  %v5287_v5 = vld [vmem:[#allocation2 + $0x1928] sm:$0xff]  ;;  %v5289_v14 = vld [vmem:[#allocation2 + $0x1938] sm:$0xff] }
 0x5b2   :  { %5937 = vmatpush1.bf16.msra.mxu0 %v5094_v25  ;;  %6101 = vmatpush1.bf16.msra.mxu1 %v5096_v11  ;;  %v5286_v25 = vld [vmem:[#allocation2 + $0x1920] sm:$0xff]  ;;  %v5288_v11 = vld [vmem:[#allocation2 + $0x1930] sm:$0xff] }
 0x5b3   :  { %5938 = vmatprep.subr.bf16.mxu0 %v5111_v17  ;;  %6102 = vmatprep.subr.bf16.mxu1 %v5113_v53  ;;  %v5303_v17 = vld [vmem:[#allocation2 + $0x19a8] sm:$0xff]  ;;  %v5305_v53 = vld [vmem:[#allocation2 + $0x19b8] sm:$0xff] }
 0x5b6   :  { %5939 = vmatpush1.bf16.msra.mxu0 %v5110_v23  ;;  %6103 = vmatpush1.bf16.msra.mxu1 %v5112_v26  ;;  %v5302_v23 = vld [vmem:[#allocation2 + $0x19a0] sm:$0xff]  ;;  %v5304_v26 = vld [vmem:[#allocation2 + $0x19b0] sm:$0xff] }
 0x5b7   :  { %5940 = vmatprep.subr.bf16.mxu0 %v5127_v30  ;;  %6104 = vmatprep.subr.bf16.mxu1 %v5129_v27  ;;  %v5319_v30 = vld [vmem:[#allocation2 + $0x1a28] sm:$0xff]  ;;  %v5321_v27 = vld [vmem:[#allocation2 + $0x1a38] sm:$0xff] }
 0x5ba   :  { %5941 = vmatpush1.bf16.msra.mxu0 %v5126_v4  ;;  %6105 = vmatpush1.bf16.msra.mxu1 %v5128_v10  ;;  %v6826_v4 = vld [vmem:[#allocation14] ss:$2 sm:$0xff]  ;;  %v5318_v10 = vld [vmem:[#allocation2 + $0x1a20] sm:$0xff] }
 0x5bb   :  { %5942 = vmatprep.subr.bf16.mxu0 %v5143_v28  ;;  %6106 = vmatprep.subr.bf16.mxu1 %v5145_v31  ;;  %v5320_v28 = vld [vmem:[#allocation2 + $0x1a30] sm:$0xff] }
 0x5bc   :  { %v6928_v31 = vld [vmem:[#allocation14 + $0x1] ss:$2 sm:$0xff] }
 0x5be   :  { %5943 = vmatpush1.bf16.msra.mxu0 %v5142_v1  ;;  %6107 = vmatpush1.bf16.msra.mxu1 %v5144_v8  ;;  %v5335_v1 = vld [vmem:[#allocation2 + $0x1aa8] sm:$0xff]  ;;  %v5337_v8 = vld [vmem:[#allocation2 + $0x1ab8] sm:$0xff] }
 0x5bf   :  { %5944 = vmatprep.subr.bf16.mxu0 %v5159_v32  ;;  %6108 = vmatprep.subr.bf16.mxu1 %v5161_v33  ;;  %v6834_v32 = vrot.slane %v6826_v4, %v8846_v13  ;;  %v6842_v33 = vrot.slane %v6826_v4, %v8893_v34 }
 0x5c2   :  { %5945 = vmatpush1.bf16.msra.mxu0 %v5158_v12  ;;  %6109 = vmatpush1.bf16.msra.mxu1 %v5160_v37  ;;  %v6838_v12 = vrot.slane %v6826_v4, %v8851_v15  ;;  %v6846_v37 = vrot.slane %v6826_v4, %v8858_v18  ;;  %v5399_v4 = vld [vmem:[#allocation2 + $0x1ca8] sm:$0xff] }
 0x5c3   :  { %5946 = vmatprep.subr.bf16.mxu0 %v5175_v39  ;;  %6110 = vmatprep.subr.bf16.mxu1 %v5177_v41  ;;  %v6936_v39 = vrot.slane %v6928_v31, %v8846_v13  ;;  %v6944_v41 = vrot.slane %v6928_v31, %v8893_v34 }
 0x5c6   :  { %5947 = vmatpush1.bf16.msra.mxu0 %v5174_v42  ;;  %6111 = vmatpush1.bf16.msra.mxu1 %v5176_v43  ;;  %v5334_v42 = vld [vmem:[#allocation2 + $0x1aa0] sm:$0xff]  ;;  %v5336_v43 = vld [vmem:[#allocation2 + $0x1ab0] sm:$0xff] }
 0x5c7   :  { %5948 = vmatprep.subr.bf16.mxu0 %v5191_v47  ;;  %6112 = vmatprep.subr.bf16.mxu1 %v5193_v36 }
 0x5ca   :  { %5949 = vmatpush1.bf16.msra.mxu0 %v5190_v35  ;;  %6113 = vmatpush1.bf16.msra.mxu1 %v5192_v44  ;;  %v6940_v35 = vrot.slane %v6928_v31, %v8851_v15  ;;  %v6948_v44 = vrot.slane %v6928_v31, %v8858_v18  ;;  %v5400_v31 = vld [vmem:[#allocation2 + $0x1cb0] sm:$0xff] }
 0x5cb   :  { %5950 = vmatprep.subr.bf16.mxu0 %v5207_v50  ;;  %6114 = vmatprep.subr.bf16.mxu1 %v5209_v63  ;;  %v5351_v50 = vld [vmem:[#allocation2 + $0x1b28] sm:$0xff]  ;;  %v5353_v63 = vld [vmem:[#allocation2 + $0x1b38] sm:$0xff] }
 0x5ce   :  { %5951 = vmatpush1.bf16.msra.mxu0 %v5206_v6  ;;  %6115 = vmatpush1.bf16.msra.mxu1 %v5208_v54 }
 0x5cf   :  { %5952 = vmatprep.subr.bf16.mxu0 %v5223_v55  ;;  %6116 = vmatprep.subr.bf16.mxu1 %v5225_v0 }
 0x5d2   :  { %5953 = vmatpush1.bf16.msra.mxu0 %v5222_v45  ;;  %6117 = vmatpush1.bf16.msra.mxu1 %v5224_v48 }
 0x5d3   :  { %5954 = vmatprep.subr.bf16.mxu0 %v5239_v3  ;;  %6118 = vmatprep.subr.bf16.mxu1 %v5241_v9 }
 0x5d6   :  { %5955 = vmatpush1.bf16.msra.mxu0 %v5238_v57  ;;  %6119 = vmatpush1.bf16.msra.mxu1 %v5240_v58 }
 0x5d7   :  { %5965 = vmatprep.subr.bf16.mxu0 %v5255_v7  ;;  %6129 = vmatprep.subr.bf16.mxu1 %v5257_v20 }
 0x5d9   :  { %5957 = vmatmul.mubr.bf16.vlgmr.msra.gmra.mrb[20].mxu0 %v9076_v49  ;;  %6121 = vmatmul.mubr.bf16.vlgmr.msra.gmra.mrb[20].mxu1 %v9076_v49 }
 0x5da   :  { %5966 = vmatpush1.bf16.msra.mxu0 %v5254_v60  ;;  %6130 = vmatpush1.bf16.msra.mxu1 %v5256_v61  ;;  %v5350_v60 = vld [vmem:[#allocation2 + $0x1b20] sm:$0xff]  ;;  %v5352_v61 = vld [vmem:[#allocation2 + $0x1b30] sm:$0xff] }
 0x5db   :  { %5967 = vmatprep.subr.bf16.mxu0 %v5271_v62  ;;  %6131 = vmatprep.subr.bf16.mxu1 %v5273_v22 }
 0x5dc   :  { %5997 = vmatprep.mubr.bf16.mxu0 %v9081_v52  ;;  %6161 = vmatprep.mubr.bf16.mxu1 %v9081_v52 }
 0x5de   :  { %5968 = vmatpush1.bf16.msra.mxu0 %v5270_v29  ;;  %6132 = vmatpush1.bf16.msra.mxu1 %v5272_v2  ;;  %v5367_v29 = vld [vmem:[#allocation2 + $0x1ba8] sm:$0xff]  ;;  %v5369_v2 = vld [vmem:[#allocation2 + $0x1bb8] sm:$0xff] }
 0x5df   :  { %5969 = vmatprep.subr.bf16.mxu0 %v5287_v5  ;;  %6133 = vmatprep.subr.bf16.mxu1 %v5289_v14 }
 0x5e2   :  { %5970 = vmatpush1.bf16.msra.mxu0 %v5286_v25  ;;  %6134 = vmatpush1.bf16.msra.mxu1 %v5288_v11 }
 0x5e3   :  { %5971 = vmatprep.subr.bf16.mxu0 %v5303_v17  ;;  %6135 = vmatprep.subr.bf16.mxu1 %v5305_v53  ;;  %v5366_v17 = vld [vmem:[#allocation2 + $0x1ba0] sm:$0xff]  ;;  %v5368_v53 = vld [vmem:[#allocation2 + $0x1bb0] sm:$0xff] }
 0x5e6   :  { %5972 = vmatpush1.bf16.msra.mxu0 %v5302_v23  ;;  %6136 = vmatpush1.bf16.msra.mxu1 %v5304_v26  ;;  %v5383_v23 = vld [vmem:[#allocation2 + $0x1c28] sm:$0xff]  ;;  %v5385_v26 = vld [vmem:[#allocation2 + $0x1c38] sm:$0xff] }
 0x5e7   :  { %5973 = vmatprep.subr.bf16.mxu0 %v5319_v30  ;;  %6137 = vmatprep.subr.bf16.mxu1 %v5321_v27  ;;  %v5382_v30 = vld [vmem:[#allocation2 + $0x1c20] sm:$0xff]  ;;  %v5384_v27 = vld [vmem:[#allocation2 + $0x1c30] sm:$0xff] }
 0x5ea   :  { %5974 = vmatpush1.bf16.msra.mxu0 %v5318_v10  ;;  %6138 = vmatpush1.bf16.msra.mxu1 %v5320_v28  ;;  %v5401_v10 = vld [vmem:[#allocation2 + $0x1cb8] sm:$0xff]  ;;  %v5398_v28 = vld [vmem:[#allocation2 + $0x1ca0] sm:$0xff] }
 0x5eb   :  { %5975 = vmatprep.subr.bf16.mxu0 %v5335_v1  ;;  %6139 = vmatprep.subr.bf16.mxu1 %v5337_v8  ;;  %v5415_v1 = vld [vmem:[#allocation2 + $0x1d28] sm:$0xff]  ;;  %v5417_v8 = vld [vmem:[#allocation2 + $0x1d38] sm:$0xff] }
 0x5ec   :  { %v5671_v47 = vpop.f32.mrb[16].mxu0  ;;  %v5835_v36 = vpop.f32.mrb[16].mxu1 }
 0x5ed   :  { %v6911_v6 = vmul.f32 %v6834_v32, %v5671_v47  ;;  %v6913_v54 = vmul.f32 %v6842_v33, %v5835_v36  ;;  %v5673_v55 = vpop.f32.mrb[17].mxu0  ;;  %v5837_v0 = vpop.f32.mrb[17].mxu1  ;;  %v5414_v32 = vld [vmem:[#allocation2 + $0x1d20] sm:$0xff]  ;;  %v5416_v33 = vld [vmem:[#allocation2 + $0x1d30] sm:$0xff] }
 0x5ee   :  { %v6912_v45 = vmul.f32 %v6838_v12, %v5673_v55  ;;  %v6914_v48 = vmul.f32 %v6846_v37, %v5837_v0  ;;  %v5675_v3 = vpop.f32.mrb[18].mxu0  ;;  %v5839_v9 = vpop.f32.mrb[18].mxu1  ;;  %5976 = vmatpush1.bf16.msra.mxu0 %v5334_v42  ;;  %6140 = vmatpush1.bf16.msra.mxu1 %v5336_v43  ;;  %v5431_v12 = vld [vmem:[#allocation2 + $0x1da8] sm:$0xff]  ;;  %v5433_v37 = vld [vmem:[#allocation2 + $0x1db8] sm:$0xff]  ;;  %v5446_v47 = vld [vmem:[#allocation2 + $0x1e20] sm:$0xff] }
 0x5ef   :  { %v9116_v57 = vadd.f32 %v6936_v39, %v6911_v6  ;;  %v9118_v58 = vadd.f32 %v6944_v41, %v6913_v54  ;;  %v5676_v7 = vpop.f32.mrb[19].mxu0  ;;  %v5840_v20 = vpop.f32.mrb[19].mxu1  ;;  %5977 = vmatprep.subr.bf16.mxu0 %v5351_v50  ;;  %6141 = vmatprep.subr.bf16.mxu1 %v5353_v63  ;;  %v5430_v39 = vld [vmem:[#allocation2 + $0x1da0] sm:$0xff]  ;;  %v5432_v41 = vld [vmem:[#allocation2 + $0x1db0] sm:$0xff]  ;;  %v5447_v42 = vld [vmem:[#allocation2 + $0x1e28] sm:$0xff] }
 0x5f0   :  { %v9120_v62 = vadd.f32 %v6940_v35, %v6912_v45  ;;  %v9122_v22 = vadd.f32 %v6948_v44, %v6914_v48  ;;  %v5449_v43 = vld [vmem:[#allocation2 + $0x1e38] sm:$0xff]  ;;  %v5448_v36 = vld [vmem:[#allocation2 + $0x1e30] sm:$0xff]  ;;  %v5463_v35 = vld [vmem:[#allocation2 + $0x1ea8] sm:$0xff] }
 0x5f1   :  { %v7029_v5 = vmax.f32 %v9116_v57, 0.0  ;;  %v7031_v14 = vmax.f32 %v9118_v58, 0.0  ;;  %v5465_v44 = vld [vmem:[#allocation2 + $0x1eb8] sm:$0xff]  ;;  %v5462_v50 = vld [vmem:[#allocation2 + $0x1ea0] sm:$0xff]  ;;  %v5464_v63 = vld [vmem:[#allocation2 + $0x1eb0] sm:$0xff] }
 0x5f2   :  { %v7030_v25 = vmax.f32 %v9120_v62, 0.0  ;;  %v7032_v11 = vmax.f32 %v9122_v22, 0.0  ;;  %5978 = vmatpush1.bf16.msra.mxu0 %v5350_v60  ;;  %6142 = vmatpush1.bf16.msra.mxu1 %v5352_v61  ;;  %v5479_v6 = vld [vmem:[#allocation2 + $0x1f28] sm:$0xff]  ;;  %v5481_v54 = vld [vmem:[#allocation2 + $0x1f38] sm:$0xff]  ;;  %v5478_v55 = vld [vmem:[#allocation2 + $0x1f20] sm:$0xff] }
 0x5f3   :  { %5979 = vmatprep.subr.bf16.mxu0 %v5367_v29  ;;  %6143 = vmatprep.subr.bf16.mxu1 %v5369_v2  ;;  %v5480_v0 = vld [vmem:[#allocation2 + $0x1f30] sm:$0xff]  ;;  %v5495_v45 = vld [vmem:[#allocation2 + $0x1fa8] sm:$0xff]  ;;  %v5497_v48 = vld [vmem:[#allocation2 + $0x1fb8] sm:$0xff] }
 0x5f4   :  { %v5494_v3 = vld [vmem:[#allocation2 + $0x1fa0] sm:$0xff]  ;;  %v5496_v9 = vld [vmem:[#allocation2 + $0x1fb0] sm:$0xff]  ;;  %v4491_v7 = vld [vmem:[#allocation2 + $0x48] sm:$0xff] }
 0x5f5   :  { %v4493_v20 = vld [vmem:[#allocation2 + $0x58] sm:$0xff]  ;;  %v4490_v60 = vld [vmem:[#allocation2 + $0x40] sm:$0xff]  ;;  %v4492_v61 = vld [vmem:[#allocation2 + $0x50] sm:$0xff] }
 0x5f6   :  { %5980 = vmatpush1.bf16.msra.mxu0 %v5366_v17  ;;  %6144 = vmatpush1.bf16.msra.mxu1 %v5368_v53  ;;  %v4507_v29 = vld [vmem:[#allocation2 + $0xc8] sm:$0xff]  ;;  %v4509_v2 = vld [vmem:[#allocation2 + $0xd8] sm:$0xff]  ;;  %v4506_v17 = vld [vmem:[#allocation2 + $0xc0] sm:$0xff] }
 0x5f7   :  { %5981 = vmatprep.subr.bf16.mxu0 %v5383_v23  ;;  %6145 = vmatprep.subr.bf16.mxu1 %v5385_v26  ;;  %v4508_v53 = vld [vmem:[#allocation2 + $0xd0] sm:$0xff]  ;;  %v4523_v23 = vld [vmem:[#allocation2 + $0x148] sm:$0xff]  ;;  %v4525_v26 = vld [vmem:[#allocation2 + $0x158] sm:$0xff] }
 0x5fa   :  { %5982 = vmatpush1.bf16.msra.mxu0 %v5382_v30  ;;  %6146 = vmatpush1.bf16.msra.mxu1 %v5384_v27  ;;  %v4522_v30 = vld [vmem:[#allocation2 + $0x140] sm:$0xff]  ;;  %v4524_v27 = vld [vmem:[#allocation2 + $0x150] sm:$0xff] }
 0x5fb   :  { %5983 = vmatprep.subr.bf16.mxu0 %v5399_v4  ;;  %6147 = vmatprep.subr.bf16.mxu1 %v5401_v10  ;;  %v4539_v4 = vld [vmem:[#allocation2 + $0x1c8] sm:$0xff]  ;;  %v4541_v10 = vld [vmem:[#allocation2 + $0x1d8] sm:$0xff] }
 0x5fe   :  { %5984 = vmatpush1.bf16.msra.mxu0 %v5398_v28  ;;  %6148 = vmatpush1.bf16.msra.mxu1 %v5400_v31  ;;  %v4538_v28 = vld [vmem:[#allocation2 + $0x1c0] sm:$0xff]  ;;  %v4540_v31 = vld [vmem:[#allocation2 + $0x1d0] sm:$0xff] }
 0x5ff   :  { %5985 = vmatprep.subr.bf16.mxu0 %v5415_v1  ;;  %6149 = vmatprep.subr.bf16.mxu1 %v5417_v8  ;;  %v4555_v1 = vld [vmem:[#allocation2 + $0x248] sm:$0xff]  ;;  %v4557_v8 = vld [vmem:[#allocation2 + $0x258] sm:$0xff] }
 0x602   :  { %5986 = vmatpush1.bf16.msra.mxu0 %v5414_v32  ;;  %6150 = vmatpush1.bf16.msra.mxu1 %v5416_v33  ;;  %v4554_v32 = vld [vmem:[#allocation2 + $0x240] sm:$0xff]  ;;  %v4556_v33 = vld [vmem:[#allocation2 + $0x250] sm:$0xff] }
 0x603   :  { %5987 = vmatprep.subr.bf16.mxu0 %v5431_v12  ;;  %6151 = vmatprep.subr.bf16.mxu1 %v5433_v37  ;;  %v4571_v12 = vld [vmem:[#allocation2 + $0x2c8] sm:$0xff]  ;;  %v4573_v37 = vld [vmem:[#allocation2 + $0x2d8] sm:$0xff] }
 0x606   :  { %5988 = vmatpush1.bf16.msra.mxu0 %v5430_v39  ;;  %6152 = vmatpush1.bf16.msra.mxu1 %v5432_v41  ;;  %v4570_v39 = vld [vmem:[#allocation2 + $0x2c0] sm:$0xff]  ;;  %v4572_v41 = vld [vmem:[#allocation2 + $0x2d0] sm:$0xff] }
 0x607   :  { %5989 = vmatprep.subr.bf16.mxu0 %v5447_v42  ;;  %6153 = vmatprep.subr.bf16.mxu1 %v5449_v43  ;;  %v4587_v42 = vld [vmem:[#allocation2 + $0x348] sm:$0xff]  ;;  %v4589_v43 = vld [vmem:[#allocation2 + $0x358] sm:$0xff] }
 0x60a   :  { %5990 = vmatpush1.bf16.msra.mxu0 %v5446_v47  ;;  %6154 = vmatpush1.bf16.msra.mxu1 %v5448_v36  ;;  %v4586_v47 = vld [vmem:[#allocation2 + $0x340] sm:$0xff]  ;;  %v4588_v36 = vld [vmem:[#allocation2 + $0x350] sm:$0xff] }
 0x60b   :  { %5991 = vmatprep.subr.bf16.mxu0 %v5463_v35  ;;  %6155 = vmatprep.subr.bf16.mxu1 %v5465_v44  ;;  %v4603_v35 = vld [vmem:[#allocation2 + $0x3c8] sm:$0xff]  ;;  %v4605_v44 = vld [vmem:[#allocation2 + $0x3d8] sm:$0xff] }
 0x60e   :  { %5992 = vmatpush1.bf16.msra.mxu0 %v5462_v50  ;;  %6156 = vmatpush1.bf16.msra.mxu1 %v5464_v63  ;;  %v4602_v50 = vld [vmem:[#allocation2 + $0x3c0] sm:$0xff]  ;;  %v4604_v63 = vld [vmem:[#allocation2 + $0x3d0] sm:$0xff] }
 0x60f   :  { %5993 = vmatprep.subr.bf16.mxu0 %v5479_v6  ;;  %6157 = vmatprep.subr.bf16.mxu1 %v5481_v54  ;;  %v4619_v6 = vld [vmem:[#allocation2 + $0x448] sm:$0xff]  ;;  %v4621_v54 = vld [vmem:[#allocation2 + $0x458] sm:$0xff] }
 0x612   :  { %5994 = vmatpush1.bf16.msra.mxu0 %v5478_v55  ;;  %6158 = vmatpush1.bf16.msra.mxu1 %v5480_v0  ;;  %v4618_v55 = vld [vmem:[#allocation2 + $0x440] sm:$0xff]  ;;  %v4620_v0 = vld [vmem:[#allocation2 + $0x450] sm:$0xff] }
 0x613   :  { %5995 = vmatprep.subr.bf16.mxu0 %v5495_v45  ;;  %6159 = vmatprep.subr.bf16.mxu1 %v5497_v48  ;;  %v4635_v45 = vld [vmem:[#allocation2 + $0x4c8] sm:$0xff]  ;;  %v4637_v48 = vld [vmem:[#allocation2 + $0x4d8] sm:$0xff] }
 0x616   :  { %5996 = vmatpush1.bf16.msra.mxu0 %v5494_v3  ;;  %6160 = vmatpush1.bf16.msra.mxu1 %v5496_v9  ;;  %v4634_v3 = vld [vmem:[#allocation2 + $0x4c0] sm:$0xff]  ;;  %v4636_v9 = vld [vmem:[#allocation2 + $0x4d0] sm:$0xff] }
 0x617   :  { %6170 = vmatprep.subr.bf16.mxu0 %v4491_v7  ;;  %6334 = vmatprep.subr.bf16.mxu1 %v4493_v20  ;;  %v4651_v7 = vld [vmem:[#allocation2 + $0x548] sm:$0xff]  ;;  %v4653_v20 = vld [vmem:[#allocation2 + $0x558] sm:$0xff] }
 0x619   :  { %5998 = vmatmul.mubr.bf16.vlgmr.msra.gmra.mrb[20].mxu0 %v9090_v59  ;;  %6162 = vmatmul.mubr.bf16.vlgmr.msra.gmra.mrb[20].mxu1 %v9090_v59 }
 0x61a   :  { %6171 = vmatpush1.bf16.msra.mxu0 %v4490_v60  ;;  %6335 = vmatpush1.bf16.msra.mxu1 %v4492_v61  ;;  %v4650_v60 = vld [vmem:[#allocation2 + $0x540] sm:$0xff]  ;;  %v4652_v61 = vld [vmem:[#allocation2 + $0x550] sm:$0xff] }
 0x61b   :  { %6172 = vmatprep.subr.bf16.mxu0 %v4507_v29  ;;  %6336 = vmatprep.subr.bf16.mxu1 %v4509_v2  ;;  %v4667_v29 = vld [vmem:[#allocation2 + $0x5c8] sm:$0xff]  ;;  %v4669_v2 = vld [vmem:[#allocation2 + $0x5d8] sm:$0xff] }
 0x61c   :  { %6202 = vmatprep.mubr.bf16.mxu0 %v9041_v40  ;;  %6366 = vmatprep.mubr.bf16.mxu1 %v9041_v40 }
 0x61e   :  { %6173 = vmatpush1.bf16.msra.mxu0 %v4506_v17  ;;  %6337 = vmatpush1.bf16.msra.mxu1 %v4508_v53  ;;  %v4666_v17 = vld [vmem:[#allocation2 + $0x5c0] sm:$0xff]  ;;  %v4668_v53 = vld [vmem:[#allocation2 + $0x5d0] sm:$0xff] }
 0x61f   :  { %6174 = vmatprep.subr.bf16.mxu0 %v4523_v23  ;;  %6338 = vmatprep.subr.bf16.mxu1 %v4525_v26  ;;  %v4683_v23 = vld [vmem:[#allocation2 + $0x648] sm:$0xff]  ;;  %v4685_v26 = vld [vmem:[#allocation2 + $0x658] sm:$0xff] }
 0x622   :  { %6175 = vmatpush1.bf16.msra.mxu0 %v4522_v30  ;;  %6339 = vmatpush1.bf16.msra.mxu1 %v4524_v27  ;;  %v4682_v30 = vld [vmem:[#allocation2 + $0x640] sm:$0xff]  ;;  %v4684_v27 = vld [vmem:[#allocation2 + $0x650] sm:$0xff] }
 0x623   :  { %6176 = vmatprep.subr.bf16.mxu0 %v4539_v4  ;;  %6340 = vmatprep.subr.bf16.mxu1 %v4541_v10  ;;  %v4699_v4 = vld [vmem:[#allocation2 + $0x6c8] sm:$0xff]  ;;  %v4701_v10 = vld [vmem:[#allocation2 + $0x6d8] sm:$0xff] }
 0x626   :  { %6177 = vmatpush1.bf16.msra.mxu0 %v4538_v28  ;;  %6341 = vmatpush1.bf16.msra.mxu1 %v4540_v31  ;;  %v4698_v28 = vld [vmem:[#allocation2 + $0x6c0] sm:$0xff]  ;;  %v4700_v31 = vld [vmem:[#allocation2 + $0x6d0] sm:$0xff] }
 0x627   :  { %6178 = vmatprep.subr.bf16.mxu0 %v4555_v1  ;;  %6342 = vmatprep.subr.bf16.mxu1 %v4557_v8  ;;  %v4715_v1 = vld [vmem:[#allocation2 + $0x748] sm:$0xff]  ;;  %v4717_v8 = vld [vmem:[#allocation2 + $0x758] sm:$0xff] }
 0x62a   :  { %6179 = vmatpush1.bf16.msra.mxu0 %v4554_v32  ;;  %6343 = vmatpush1.bf16.msra.mxu1 %v4556_v33  ;;  %v4714_v32 = vld [vmem:[#allocation2 + $0x740] sm:$0xff]  ;;  %v4716_v33 = vld [vmem:[#allocation2 + $0x750] sm:$0xff] }
 0x62b   :  { %6180 = vmatprep.subr.bf16.mxu0 %v4571_v12  ;;  %6344 = vmatprep.subr.bf16.mxu1 %v4573_v37  ;;  %v4731_v12 = vld [vmem:[#allocation2 + $0x7c8] sm:$0xff]  ;;  %v4733_v37 = vld [vmem:[#allocation2 + $0x7d8] sm:$0xff] }
 0x62e   :  { %6181 = vmatpush1.bf16.msra.mxu0 %v4570_v39  ;;  %6345 = vmatpush1.bf16.msra.mxu1 %v4572_v41  ;;  %v4730_v39 = vld [vmem:[#allocation2 + $0x7c0] sm:$0xff]  ;;  %v4732_v41 = vld [vmem:[#allocation2 + $0x7d0] sm:$0xff] }
 0x62f   :  { %6182 = vmatprep.subr.bf16.mxu0 %v4587_v42  ;;  %6346 = vmatprep.subr.bf16.mxu1 %v4589_v43  ;;  %v4747_v42 = vld [vmem:[#allocation2 + $0x848] sm:$0xff]  ;;  %v4749_v43 = vld [vmem:[#allocation2 + $0x858] sm:$0xff] }
 0x632   :  { %6183 = vmatpush1.bf16.msra.mxu0 %v4586_v47  ;;  %6347 = vmatpush1.bf16.msra.mxu1 %v4588_v36  ;;  %v4746_v47 = vld [vmem:[#allocation2 + $0x840] sm:$0xff]  ;;  %v4748_v36 = vld [vmem:[#allocation2 + $0x850] sm:$0xff] }
 0x633   :  { %6184 = vmatprep.subr.bf16.mxu0 %v4603_v35  ;;  %6348 = vmatprep.subr.bf16.mxu1 %v4605_v44  ;;  %v4763_v35 = vld [vmem:[#allocation2 + $0x8c8] sm:$0xff]  ;;  %v4765_v44 = vld [vmem:[#allocation2 + $0x8d8] sm:$0xff] }
 0x636   :  { %6185 = vmatpush1.bf16.msra.mxu0 %v4602_v50  ;;  %6349 = vmatpush1.bf16.msra.mxu1 %v4604_v63  ;;  %v4762_v50 = vld [vmem:[#allocation2 + $0x8c0] sm:$0xff]  ;;  %v4764_v63 = vld [vmem:[#allocation2 + $0x8d0] sm:$0xff] }
 0x637   :  { %6186 = vmatprep.subr.bf16.mxu0 %v4619_v6  ;;  %6350 = vmatprep.subr.bf16.mxu1 %v4621_v54  ;;  %v4779_v6 = vld [vmem:[#allocation2 + $0x948] sm:$0xff]  ;;  %v4781_v54 = vld [vmem:[#allocation2 + $0x958] sm:$0xff] }
 0x63a   :  { %6187 = vmatpush1.bf16.msra.mxu0 %v4618_v55  ;;  %6351 = vmatpush1.bf16.msra.mxu1 %v4620_v0  ;;  %v4778_v55 = vld [vmem:[#allocation2 + $0x940] sm:$0xff]  ;;  %v4780_v0 = vld [vmem:[#allocation2 + $0x950] sm:$0xff] }
 0x63b   :  { %6188 = vmatprep.subr.bf16.mxu0 %v4635_v45  ;;  %6352 = vmatprep.subr.bf16.mxu1 %v4637_v48  ;;  %v4795_v45 = vld [vmem:[#allocation2 + $0x9c8] sm:$0xff]  ;;  %v4797_v48 = vld [vmem:[#allocation2 + $0x9d8] sm:$0xff] }
 0x63e   :  { %6189 = vmatpush1.bf16.msra.mxu0 %v4634_v3  ;;  %6353 = vmatpush1.bf16.msra.mxu1 %v4636_v9  ;;  %v4794_v3 = vld [vmem:[#allocation2 + $0x9c0] sm:$0xff]  ;;  %v4796_v9 = vld [vmem:[#allocation2 + $0x9d0] sm:$0xff] }
 0x63f   :  { %6190 = vmatprep.subr.bf16.mxu0 %v4651_v7  ;;  %6354 = vmatprep.subr.bf16.mxu1 %v4653_v20  ;;  %v4811_v7 = vld [vmem:[#allocation2 + $0xa48] sm:$0xff]  ;;  %v4813_v20 = vld [vmem:[#allocation2 + $0xa58] sm:$0xff] }
 0x642   :  { %6191 = vmatpush1.bf16.msra.mxu0 %v4650_v60  ;;  %6355 = vmatpush1.bf16.msra.mxu1 %v4652_v61  ;;  %v4810_v60 = vld [vmem:[#allocation2 + $0xa40] sm:$0xff]  ;;  %v4812_v61 = vld [vmem:[#allocation2 + $0xa50] sm:$0xff] }
 0x643   :  { %6192 = vmatprep.subr.bf16.mxu0 %v4667_v29  ;;  %6356 = vmatprep.subr.bf16.mxu1 %v4669_v2  ;;  %v4827_v29 = vld [vmem:[#allocation2 + $0xac8] sm:$0xff]  ;;  %v4829_v2 = vld [vmem:[#allocation2 + $0xad8] sm:$0xff] }
 0x646   :  { %6193 = vmatpush1.bf16.msra.mxu0 %v4666_v17  ;;  %6357 = vmatpush1.bf16.msra.mxu1 %v4668_v53  ;;  %v4826_v17 = vld [vmem:[#allocation2 + $0xac0] sm:$0xff]  ;;  %v4828_v53 = vld [vmem:[#allocation2 + $0xad0] sm:$0xff] }
 0x647   :  { %6194 = vmatprep.subr.bf16.mxu0 %v4683_v23  ;;  %6358 = vmatprep.subr.bf16.mxu1 %v4685_v26  ;;  %v4843_v23 = vld [vmem:[#allocation2 + $0xb48] sm:$0xff]  ;;  %v4845_v26 = vld [vmem:[#allocation2 + $0xb58] sm:$0xff] }
 0x64a   :  { %6195 = vmatpush1.bf16.msra.mxu0 %v4682_v30  ;;  %6359 = vmatpush1.bf16.msra.mxu1 %v4684_v27  ;;  %v4842_v30 = vld [vmem:[#allocation2 + $0xb40] sm:$0xff]  ;;  %v4844_v27 = vld [vmem:[#allocation2 + $0xb50] sm:$0xff] }
 0x64b   :  { %6196 = vmatprep.subr.bf16.mxu0 %v4699_v4  ;;  %6360 = vmatprep.subr.bf16.mxu1 %v4701_v10  ;;  %v4859_v4 = vld [vmem:[#allocation2 + $0xbc8] sm:$0xff]  ;;  %v4861_v10 = vld [vmem:[#allocation2 + $0xbd8] sm:$0xff] }
 0x64e   :  { %6197 = vmatpush1.bf16.msra.mxu0 %v4698_v28  ;;  %6361 = vmatpush1.bf16.msra.mxu1 %v4700_v31  ;;  %v4858_v28 = vld [vmem:[#allocation2 + $0xbc0] sm:$0xff]  ;;  %v4860_v31 = vld [vmem:[#allocation2 + $0xbd0] sm:$0xff] }
 0x64f   :  { %6198 = vmatprep.subr.bf16.mxu0 %v4715_v1  ;;  %6362 = vmatprep.subr.bf16.mxu1 %v4717_v8  ;;  %v4875_v1 = vld [vmem:[#allocation2 + $0xc48] sm:$0xff]  ;;  %v4877_v8 = vld [vmem:[#allocation2 + $0xc58] sm:$0xff] }
 0x652   :  { %6199 = vmatpush1.bf16.msra.mxu0 %v4714_v32  ;;  %6363 = vmatpush1.bf16.msra.mxu1 %v4716_v33  ;;  %v4874_v32 = vld [vmem:[#allocation2 + $0xc40] sm:$0xff]  ;;  %v4876_v33 = vld [vmem:[#allocation2 + $0xc50] sm:$0xff] }
 0x653   :  { %6200 = vmatprep.subr.bf16.mxu0 %v4731_v12  ;;  %6364 = vmatprep.subr.bf16.mxu1 %v4733_v37  ;;  %v4891_v12 = vld [vmem:[#allocation2 + $0xcc8] sm:$0xff]  ;;  %v4893_v37 = vld [vmem:[#allocation2 + $0xcd8] sm:$0xff] }
 0x656   :  { %6201 = vmatpush1.bf16.msra.mxu0 %v4730_v39  ;;  %6365 = vmatpush1.bf16.msra.mxu1 %v4732_v41  ;;  %v4890_v39 = vld [vmem:[#allocation2 + $0xcc0] sm:$0xff]  ;;  %v4892_v41 = vld [vmem:[#allocation2 + $0xcd0] sm:$0xff] }
 0x657   :  { %6211 = vmatprep.subr.bf16.mxu0 %v4747_v42  ;;  %6375 = vmatprep.subr.bf16.mxu1 %v4749_v43  ;;  %v4907_v42 = vld [vmem:[#allocation2 + $0xd48] sm:$0xff]  ;;  %v4909_v43 = vld [vmem:[#allocation2 + $0xd58] sm:$0xff] }
 0x659   :  { %6203 = vmatmul.mubr.bf16.vlgmr.msra.gmra.mrb[24].mxu0 %v9048_v51  ;;  %6367 = vmatmul.mubr.bf16.vlgmr.msra.gmra.mrb[24].mxu1 %v9048_v51 }
 0x65a   :  { %6212 = vmatpush1.bf16.msra.mxu0 %v4746_v47  ;;  %6376 = vmatpush1.bf16.msra.mxu1 %v4748_v36  ;;  %v4906_v47 = vld [vmem:[#allocation2 + $0xd40] sm:$0xff]  ;;  %v4908_v36 = vld [vmem:[#allocation2 + $0xd50] sm:$0xff] }
 0x65b   :  { %6213 = vmatprep.subr.bf16.mxu0 %v4763_v35  ;;  %6377 = vmatprep.subr.bf16.mxu1 %v4765_v44  ;;  %v4923_v35 = vld [vmem:[#allocation2 + $0xdc8] sm:$0xff]  ;;  %v4925_v44 = vld [vmem:[#allocation2 + $0xdd8] sm:$0xff] }
 0x65c   :  { %6243 = vmatprep.mubr.bf16.mxu0 %v9053_v56  ;;  %6407 = vmatprep.mubr.bf16.mxu1 %v9053_v56 }
 0x65e   :  { %6214 = vmatpush1.bf16.msra.mxu0 %v4762_v50  ;;  %6378 = vmatpush1.bf16.msra.mxu1 %v4764_v63  ;;  %v4922_v50 = vld [vmem:[#allocation2 + $0xdc0] sm:$0xff]  ;;  %v4924_v63 = vld [vmem:[#allocation2 + $0xdd0] sm:$0xff] }
 0x65f   :  { %6215 = vmatprep.subr.bf16.mxu0 %v4779_v6  ;;  %6379 = vmatprep.subr.bf16.mxu1 %v4781_v54  ;;  %v4939_v6 = vld [vmem:[#allocation2 + $0xe48] sm:$0xff]  ;;  %v4941_v54 = vld [vmem:[#allocation2 + $0xe58] sm:$0xff] }
 0x662   :  { %6216 = vmatpush1.bf16.msra.mxu0 %v4778_v55  ;;  %6380 = vmatpush1.bf16.msra.mxu1 %v4780_v0  ;;  %v4938_v55 = vld [vmem:[#allocation2 + $0xe40] sm:$0xff]  ;;  %v4940_v0 = vld [vmem:[#allocation2 + $0xe50] sm:$0xff] }
 0x663   :  { %6217 = vmatprep.subr.bf16.mxu0 %v4795_v45  ;;  %6381 = vmatprep.subr.bf16.mxu1 %v4797_v48  ;;  %v4955_v45 = vld [vmem:[#allocation2 + $0xec8] sm:$0xff]  ;;  %v4957_v48 = vld [vmem:[#allocation2 + $0xed8] sm:$0xff] }
 0x666   :  { %6218 = vmatpush1.bf16.msra.mxu0 %v4794_v3  ;;  %6382 = vmatpush1.bf16.msra.mxu1 %v4796_v9  ;;  %v4954_v3 = vld [vmem:[#allocation2 + $0xec0] sm:$0xff]  ;;  %v4956_v9 = vld [vmem:[#allocation2 + $0xed0] sm:$0xff] }
 0x667   :  { %6219 = vmatprep.subr.bf16.mxu0 %v4811_v7  ;;  %6383 = vmatprep.subr.bf16.mxu1 %v4813_v20  ;;  %v4971_v7 = vld [vmem:[#allocation2 + $0xf48] sm:$0xff]  ;;  %v4973_v20 = vld [vmem:[#allocation2 + $0xf58] sm:$0xff] }
 0x66a   :  { %6220 = vmatpush1.bf16.msra.mxu0 %v4810_v60  ;;  %6384 = vmatpush1.bf16.msra.mxu1 %v4812_v61  ;;  %v4970_v60 = vld [vmem:[#allocation2 + $0xf40] sm:$0xff]  ;;  %v4972_v61 = vld [vmem:[#allocation2 + $0xf50] sm:$0xff] }
 0x66b   :  { %6221 = vmatprep.subr.bf16.mxu0 %v4827_v29  ;;  %6385 = vmatprep.subr.bf16.mxu1 %v4829_v2  ;;  %v4987_v29 = vld [vmem:[#allocation2 + $0xfc8] sm:$0xff]  ;;  %v4989_v2 = vld [vmem:[#allocation2 + $0xfd8] sm:$0xff] }
 0x66e   :  { %6222 = vmatpush1.bf16.msra.mxu0 %v4826_v17  ;;  %6386 = vmatpush1.bf16.msra.mxu1 %v4828_v53  ;;  %v4986_v17 = vld [vmem:[#allocation2 + $0xfc0] sm:$0xff]  ;;  %v4988_v53 = vld [vmem:[#allocation2 + $0xfd0] sm:$0xff] }
 0x66f   :  { %6223 = vmatprep.subr.bf16.mxu0 %v4843_v23  ;;  %6387 = vmatprep.subr.bf16.mxu1 %v4845_v26  ;;  %v5003_v23 = vld [vmem:[#allocation2 + $0x1048] sm:$0xff]  ;;  %v5005_v26 = vld [vmem:[#allocation2 + $0x1058] sm:$0xff] }
 0x672   :  { %6224 = vmatpush1.bf16.msra.mxu0 %v4842_v30  ;;  %6388 = vmatpush1.bf16.msra.mxu1 %v4844_v27  ;;  %v5002_v30 = vld [vmem:[#allocation2 + $0x1040] sm:$0xff]  ;;  %v5004_v27 = vld [vmem:[#allocation2 + $0x1050] sm:$0xff] }
 0x673   :  { %6225 = vmatprep.subr.bf16.mxu0 %v4859_v4  ;;  %6389 = vmatprep.subr.bf16.mxu1 %v4861_v10  ;;  %v5019_v4 = vld [vmem:[#allocation2 + $0x10c8] sm:$0xff]  ;;  %v5021_v10 = vld [vmem:[#allocation2 + $0x10d8] sm:$0xff] }
 0x676   :  { %6226 = vmatpush1.bf16.msra.mxu0 %v4858_v28  ;;  %6390 = vmatpush1.bf16.msra.mxu1 %v4860_v31  ;;  %v5018_v28 = vld [vmem:[#allocation2 + $0x10c0] sm:$0xff]  ;;  %v5020_v31 = vld [vmem:[#allocation2 + $0x10d0] sm:$0xff] }
 0x677   :  { %6227 = vmatprep.subr.bf16.mxu0 %v4875_v1  ;;  %6391 = vmatprep.subr.bf16.mxu1 %v4877_v8  ;;  %v5035_v1 = vld [vmem:[#allocation2 + $0x1148] sm:$0xff]  ;;  %v5037_v8 = vld [vmem:[#allocation2 + $0x1158] sm:$0xff] }
 0x67a   :  { %6228 = vmatpush1.bf16.msra.mxu0 %v4874_v32  ;;  %6392 = vmatpush1.bf16.msra.mxu1 %v4876_v33  ;;  %v5034_v32 = vld [vmem:[#allocation2 + $0x1140] sm:$0xff]  ;;  %v5036_v33 = vld [vmem:[#allocation2 + $0x1150] sm:$0xff] }
 0x67b   :  { %6229 = vmatprep.subr.bf16.mxu0 %v4891_v12  ;;  %6393 = vmatprep.subr.bf16.mxu1 %v4893_v37  ;;  %v5051_v12 = vld [vmem:[#allocation2 + $0x11c8] sm:$0xff]  ;;  %v5053_v37 = vld [vmem:[#allocation2 + $0x11d8] sm:$0xff] }
 0x67e   :  { %6230 = vmatpush1.bf16.msra.mxu0 %v4890_v39  ;;  %6394 = vmatpush1.bf16.msra.mxu1 %v4892_v41  ;;  %v5050_v39 = vld [vmem:[#allocation2 + $0x11c0] sm:$0xff]  ;;  %v5052_v41 = vld [vmem:[#allocation2 + $0x11d0] sm:$0xff] }
 0x67f   :  { %6231 = vmatprep.subr.bf16.mxu0 %v4907_v42  ;;  %6395 = vmatprep.subr.bf16.mxu1 %v4909_v43  ;;  %v5067_v42 = vld [vmem:[#allocation2 + $0x1248] sm:$0xff]  ;;  %v5069_v43 = vld [vmem:[#allocation2 + $0x1258] sm:$0xff] }
 0x682   :  { %6232 = vmatpush1.bf16.msra.mxu0 %v4906_v47  ;;  %6396 = vmatpush1.bf16.msra.mxu1 %v4908_v36  ;;  %v5066_v47 = vld [vmem:[#allocation2 + $0x1240] sm:$0xff]  ;;  %v5068_v36 = vld [vmem:[#allocation2 + $0x1250] sm:$0xff] }
 0x683   :  { %6233 = vmatprep.subr.bf16.mxu0 %v4923_v35  ;;  %6397 = vmatprep.subr.bf16.mxu1 %v4925_v44  ;;  %v5083_v35 = vld [vmem:[#allocation2 + $0x12c8] sm:$0xff]  ;;  %v5085_v44 = vld [vmem:[#allocation2 + $0x12d8] sm:$0xff] }
 0x686   :  { %6234 = vmatpush1.bf16.msra.mxu0 %v4922_v50  ;;  %6398 = vmatpush1.bf16.msra.mxu1 %v4924_v63  ;;  %v5082_v50 = vld [vmem:[#allocation2 + $0x12c0] sm:$0xff]  ;;  %v5084_v63 = vld [vmem:[#allocation2 + $0x12d0] sm:$0xff] }
 0x687   :  { %6235 = vmatprep.subr.bf16.mxu0 %v4939_v6  ;;  %6399 = vmatprep.subr.bf16.mxu1 %v4941_v54  ;;  %v5099_v6 = vld [vmem:[#allocation2 + $0x1348] sm:$0xff]  ;;  %v5101_v54 = vld [vmem:[#allocation2 + $0x1358] sm:$0xff] }
 0x68a   :  { %6236 = vmatpush1.bf16.msra.mxu0 %v4938_v55  ;;  %6400 = vmatpush1.bf16.msra.mxu1 %v4940_v0  ;;  %v5098_v55 = vld [vmem:[#allocation2 + $0x1340] sm:$0xff]  ;;  %v5100_v0 = vld [vmem:[#allocation2 + $0x1350] sm:$0xff] }
 0x68b   :  { %6237 = vmatprep.subr.bf16.mxu0 %v4955_v45  ;;  %6401 = vmatprep.subr.bf16.mxu1 %v4957_v48  ;;  %v5115_v45 = vld [vmem:[#allocation2 + $0x13c8] sm:$0xff]  ;;  %v5117_v48 = vld [vmem:[#allocation2 + $0x13d8] sm:$0xff] }
 0x68e   :  { %6238 = vmatpush1.bf16.msra.mxu0 %v4954_v3  ;;  %6402 = vmatpush1.bf16.msra.mxu1 %v4956_v9  ;;  %v5114_v3 = vld [vmem:[#allocation2 + $0x13c0] sm:$0xff]  ;;  %v5116_v9 = vld [vmem:[#allocation2 + $0x13d0] sm:$0xff] }
 0x68f   :  { %6239 = vmatprep.subr.bf16.mxu0 %v4971_v7  ;;  %6403 = vmatprep.subr.bf16.mxu1 %v4973_v20  ;;  %v5131_v7 = vld [vmem:[#allocation2 + $0x1448] sm:$0xff]  ;;  %v5133_v20 = vld [vmem:[#allocation2 + $0x1458] sm:$0xff] }
 0x692   :  { %6240 = vmatpush1.bf16.msra.mxu0 %v4970_v60  ;;  %6404 = vmatpush1.bf16.msra.mxu1 %v4972_v61  ;;  %v5130_v60 = vld [vmem:[#allocation2 + $0x1440] sm:$0xff]  ;;  %v5132_v61 = vld [vmem:[#allocation2 + $0x1450] sm:$0xff] }
 0x693   :  { %6241 = vmatprep.subr.bf16.mxu0 %v4987_v29  ;;  %6405 = vmatprep.subr.bf16.mxu1 %v4989_v2  ;;  %v5147_v29 = vld [vmem:[#allocation2 + $0x14c8] sm:$0xff]  ;;  %v5149_v2 = vld [vmem:[#allocation2 + $0x14d8] sm:$0xff] }
 0x696   :  { %6242 = vmatpush1.bf16.msra.mxu0 %v4986_v17  ;;  %6406 = vmatpush1.bf16.msra.mxu1 %v4988_v53  ;;  %v5146_v17 = vld [vmem:[#allocation2 + $0x14c0] sm:$0xff]  ;;  %v5148_v53 = vld [vmem:[#allocation2 + $0x14d0] sm:$0xff] }
 0x697   :  { %6252 = vmatprep.subr.bf16.mxu0 %v5003_v23  ;;  %6416 = vmatprep.subr.bf16.mxu1 %v5005_v26  ;;  %v5163_v23 = vld [vmem:[#allocation2 + $0x1548] sm:$0xff]  ;;  %v5165_v26 = vld [vmem:[#allocation2 + $0x1558] sm:$0xff] }
 0x699   :  { %6244 = vmatmul.mubr.bf16.vlgmr.msra.gmra.mrb[24].mxu0 %v9062_v21  ;;  %6408 = vmatmul.mubr.bf16.vlgmr.msra.gmra.mrb[24].mxu1 %v9062_v21 }
 0x69a   :  { %6253 = vmatpush1.bf16.msra.mxu0 %v5002_v30  ;;  %6417 = vmatpush1.bf16.msra.mxu1 %v5004_v27  ;;  %v5162_v30 = vld [vmem:[#allocation2 + $0x1540] sm:$0xff]  ;;  %v5164_v27 = vld [vmem:[#allocation2 + $0x1550] sm:$0xff] }
 0x69b   :  { %6254 = vmatprep.subr.bf16.mxu0 %v5019_v4  ;;  %6418 = vmatprep.subr.bf16.mxu1 %v5021_v10  ;;  %v5179_v4 = vld [vmem:[#allocation2 + $0x15c8] sm:$0xff]  ;;  %v5181_v10 = vld [vmem:[#allocation2 + $0x15d8] sm:$0xff] }
 0x69c   :  { %6284 = vmatprep.mubr.bf16.mxu0 %v9067_v16  ;;  %6448 = vmatprep.mubr.bf16.mxu1 %v9067_v16 }
 0x69e   :  { %6255 = vmatpush1.bf16.msra.mxu0 %v5018_v28  ;;  %6419 = vmatpush1.bf16.msra.mxu1 %v5020_v31  ;;  %v5178_v28 = vld [vmem:[#allocation2 + $0x15c0] sm:$0xff]  ;;  %v5180_v31 = vld [vmem:[#allocation2 + $0x15d0] sm:$0xff] }
 0x69f   :  { %6256 = vmatprep.subr.bf16.mxu0 %v5035_v1  ;;  %6420 = vmatprep.subr.bf16.mxu1 %v5037_v8  ;;  %v5195_v1 = vld [vmem:[#allocation2 + $0x1648] sm:$0xff]  ;;  %v5197_v8 = vld [vmem:[#allocation2 + $0x1658] sm:$0xff] }
 0x6a2   :  { %6257 = vmatpush1.bf16.msra.mxu0 %v5034_v32  ;;  %6421 = vmatpush1.bf16.msra.mxu1 %v5036_v33  ;;  %v5194_v32 = vld [vmem:[#allocation2 + $0x1640] sm:$0xff]  ;;  %v5196_v33 = vld [vmem:[#allocation2 + $0x1650] sm:$0xff] }
 0x6a3   :  { %6258 = vmatprep.subr.bf16.mxu0 %v5051_v12  ;;  %6422 = vmatprep.subr.bf16.mxu1 %v5053_v37  ;;  %v5211_v12 = vld [vmem:[#allocation2 + $0x16c8] sm:$0xff]  ;;  %v5213_v37 = vld [vmem:[#allocation2 + $0x16d8] sm:$0xff] }
 0x6a6   :  { %6259 = vmatpush1.bf16.msra.mxu0 %v5050_v39  ;;  %6423 = vmatpush1.bf16.msra.mxu1 %v5052_v41  ;;  %v5210_v39 = vld [vmem:[#allocation2 + $0x16c0] sm:$0xff]  ;;  %v5212_v41 = vld [vmem:[#allocation2 + $0x16d0] sm:$0xff] }
 0x6a7   :  { %6260 = vmatprep.subr.bf16.mxu0 %v5067_v42  ;;  %6424 = vmatprep.subr.bf16.mxu1 %v5069_v43  ;;  %v5227_v42 = vld [vmem:[#allocation2 + $0x1748] sm:$0xff]  ;;  %v5229_v43 = vld [vmem:[#allocation2 + $0x1758] sm:$0xff] }
 0x6aa   :  { %6261 = vmatpush1.bf16.msra.mxu0 %v5066_v47  ;;  %6425 = vmatpush1.bf16.msra.mxu1 %v5068_v36  ;;  %v5226_v47 = vld [vmem:[#allocation2 + $0x1740] sm:$0xff]  ;;  %v5228_v36 = vld [vmem:[#allocation2 + $0x1750] sm:$0xff] }
 0x6ab   :  { %6262 = vmatprep.subr.bf16.mxu0 %v5083_v35  ;;  %6426 = vmatprep.subr.bf16.mxu1 %v5085_v44  ;;  %v5243_v35 = vld [vmem:[#allocation2 + $0x17c8] sm:$0xff]  ;;  %v5245_v44 = vld [vmem:[#allocation2 + $0x17d8] sm:$0xff] }
 0x6ae   :  { %6263 = vmatpush1.bf16.msra.mxu0 %v5082_v50  ;;  %6427 = vmatpush1.bf16.msra.mxu1 %v5084_v63  ;;  %v5242_v50 = vld [vmem:[#allocation2 + $0x17c0] sm:$0xff]  ;;  %v5244_v63 = vld [vmem:[#allocation2 + $0x17d0] sm:$0xff] }
 0x6af   :  { %6264 = vmatprep.subr.bf16.mxu0 %v5099_v6  ;;  %6428 = vmatprep.subr.bf16.mxu1 %v5101_v54  ;;  %v5259_v6 = vld [vmem:[#allocation2 + $0x1848] sm:$0xff]  ;;  %v5261_v54 = vld [vmem:[#allocation2 + $0x1858] sm:$0xff] }
 0x6b2   :  { %6265 = vmatpush1.bf16.msra.mxu0 %v5098_v55  ;;  %6429 = vmatpush1.bf16.msra.mxu1 %v5100_v0  ;;  %v5258_v55 = vld [vmem:[#allocation2 + $0x1840] sm:$0xff]  ;;  %v5260_v0 = vld [vmem:[#allocation2 + $0x1850] sm:$0xff] }
 0x6b3   :  { %6266 = vmatprep.subr.bf16.mxu0 %v5115_v45  ;;  %6430 = vmatprep.subr.bf16.mxu1 %v5117_v48  ;;  %v5275_v45 = vld [vmem:[#allocation2 + $0x18c8] sm:$0xff]  ;;  %v5277_v48 = vld [vmem:[#allocation2 + $0x18d8] sm:$0xff] }
 0x6b6   :  { %6267 = vmatpush1.bf16.msra.mxu0 %v5114_v3  ;;  %6431 = vmatpush1.bf16.msra.mxu1 %v5116_v9  ;;  %v5274_v3 = vld [vmem:[#allocation2 + $0x18c0] sm:$0xff]  ;;  %v5276_v9 = vld [vmem:[#allocation2 + $0x18d0] sm:$0xff] }
 0x6b7   :  { %6268 = vmatprep.subr.bf16.mxu0 %v5131_v7  ;;  %6432 = vmatprep.subr.bf16.mxu1 %v5133_v20  ;;  %v5291_v7 = vld [vmem:[#allocation2 + $0x1948] sm:$0xff]  ;;  %v5293_v20 = vld [vmem:[#allocation2 + $0x1958] sm:$0xff] }
 0x6ba   :  { %6269 = vmatpush1.bf16.msra.mxu0 %v5130_v60  ;;  %6433 = vmatpush1.bf16.msra.mxu1 %v5132_v61  ;;  %v5290_v60 = vld [vmem:[#allocation2 + $0x1940] sm:$0xff]  ;;  %v5292_v61 = vld [vmem:[#allocation2 + $0x1950] sm:$0xff] }
 0x6bb   :  { %6270 = vmatprep.subr.bf16.mxu0 %v5147_v29  ;;  %6434 = vmatprep.subr.bf16.mxu1 %v5149_v2  ;;  %v5307_v29 = vld [vmem:[#allocation2 + $0x19c8] sm:$0xff]  ;;  %v5309_v2 = vld [vmem:[#allocation2 + $0x19d8] sm:$0xff] }
 0x6be   :  { %6271 = vmatpush1.bf16.msra.mxu0 %v5146_v17  ;;  %6435 = vmatpush1.bf16.msra.mxu1 %v5148_v53  ;;  %v5306_v17 = vld [vmem:[#allocation2 + $0x19c0] sm:$0xff]  ;;  %v5308_v53 = vld [vmem:[#allocation2 + $0x19d0] sm:$0xff] }
 0x6bf   :  { %6272 = vmatprep.subr.bf16.mxu0 %v5163_v23  ;;  %6436 = vmatprep.subr.bf16.mxu1 %v5165_v26  ;;  %v5323_v23 = vld [vmem:[#allocation2 + $0x1a48] sm:$0xff]  ;;  %v5325_v26 = vld [vmem:[#allocation2 + $0x1a58] sm:$0xff] }
 0x6c2   :  { %6273 = vmatpush1.bf16.msra.mxu0 %v5162_v30  ;;  %6437 = vmatpush1.bf16.msra.mxu1 %v5164_v27  ;;  %v5322_v30 = vld [vmem:[#allocation2 + $0x1a40] sm:$0xff]  ;;  %v5324_v27 = vld [vmem:[#allocation2 + $0x1a50] sm:$0xff] }
 0x6c3   :  { %6274 = vmatprep.subr.bf16.mxu0 %v5179_v4  ;;  %6438 = vmatprep.subr.bf16.mxu1 %v5181_v10  ;;  %v5339_v4 = vld [vmem:[#allocation2 + $0x1ac8] sm:$0xff]  ;;  %v5341_v10 = vld [vmem:[#allocation2 + $0x1ad8] sm:$0xff] }
 0x6c6   :  { %6275 = vmatpush1.bf16.msra.mxu0 %v5178_v28  ;;  %6439 = vmatpush1.bf16.msra.mxu1 %v5180_v31  ;;  %v8456_v28 = vld [vmem:[#allocation14] ss:$2 sm:$0xff] }
 0x6c7   :  { %6276 = vmatprep.subr.bf16.mxu0 %v5195_v1  ;;  %6440 = vmatprep.subr.bf16.mxu1 %v5197_v8  ;;  %v6850_v31 = vrot.slane %v8456_v28, %v8917_v24  ;;  %v6858_v1 = vrot.slane %v8456_v28, %v8941_v19  ;;  %v6854_v8 = vrot.slane %v8456_v28, %v8896_v46 }
 0x6ca   :  { %6277 = vmatpush1.bf16.msra.mxu0 %v5194_v32  ;;  %6441 = vmatpush1.bf16.msra.mxu1 %v5196_v33  ;;  %v6862_v32 = vrot.slane %v8456_v28, %v8920_v38  ;;  %v8457_v33 = vld [vmem:[#allocation14 + $0x1] ss:$2 sm:$0xff] }
 0x6cb   :  { %6278 = vmatprep.subr.bf16.mxu0 %v5211_v12  ;;  %6442 = vmatprep.subr.bf16.mxu1 %v5213_v37  ;;  %v6952_v12 = vrot.slane %v8457_v33, %v8917_v24  ;;  %v6960_v37 = vrot.slane %v8457_v33, %v8941_v19  ;;  %v5387_v28 = vld [vmem:[#allocation2 + $0x1c48] sm:$0xff] }
 0x6ce   :  { %6279 = vmatpush1.bf16.msra.mxu0 %v5210_v39  ;;  %6443 = vmatpush1.bf16.msra.mxu1 %v5212_v41  ;;  %v5338_v39 = vld [vmem:[#allocation2 + $0x1ac0] sm:$0xff]  ;;  %v5340_v41 = vld [vmem:[#allocation2 + $0x1ad0] sm:$0xff] }
 0x6cf   :  { %6280 = vmatprep.subr.bf16.mxu0 %v5227_v42  ;;  %6444 = vmatprep.subr.bf16.mxu1 %v5229_v43 }
 0x6d2   :  { %6281 = vmatpush1.bf16.msra.mxu0 %v5226_v47  ;;  %6445 = vmatpush1.bf16.msra.mxu1 %v5228_v36  ;;  %v6956_v47 = vrot.slane %v8457_v33, %v8896_v46  ;;  %v6964_v36 = vrot.slane %v8457_v33, %v8920_v38  ;;  %v5405_v33 = vld [vmem:[#allocation2 + $0x1cd8] sm:$0xff] }
 0x6d3   :  { %6282 = vmatprep.subr.bf16.mxu0 %v5243_v35  ;;  %6446 = vmatprep.subr.bf16.mxu1 %v5245_v44  ;;  %v5355_v35 = vld [vmem:[#allocation2 + $0x1b48] sm:$0xff]  ;;  %v5357_v44 = vld [vmem:[#allocation2 + $0x1b58] sm:$0xff] }
 0x6d6   :  { %6283 = vmatpush1.bf16.msra.mxu0 %v5242_v50  ;;  %6447 = vmatpush1.bf16.msra.mxu1 %v5244_v63 }
 0x6d7   :  { %6293 = vmatprep.subr.bf16.mxu0 %v5259_v6  ;;  %6457 = vmatprep.subr.bf16.mxu1 %v5261_v54 }
 0x6d9   :  { %6285 = vmatmul.mubr.bf16.vlgmr.msra.gmra.mrb[24].mxu0 %v9076_v49  ;;  %6449 = vmatmul.mubr.bf16.vlgmr.msra.gmra.mrb[24].mxu1 %v9076_v49 }
 0x6da   :  { %6294 = vmatpush1.bf16.msra.mxu0 %v5258_v55  ;;  %6458 = vmatpush1.bf16.msra.mxu1 %v5260_v0 }
 0x6db   :  { %6295 = vmatprep.subr.bf16.mxu0 %v5275_v45  ;;  %6459 = vmatprep.subr.bf16.mxu1 %v5277_v48 }
 0x6dc   :  { %6325 = vmatprep.mubr.bf16.mxu0 %v9081_v52  ;;  %6489 = vmatprep.mubr.bf16.mxu1 %v9081_v52 }
 0x6de   :  { %6296 = vmatpush1.bf16.msra.mxu0 %v5274_v3  ;;  %6460 = vmatpush1.bf16.msra.mxu1 %v5276_v9 }
 0x6df   :  { %6297 = vmatprep.subr.bf16.mxu0 %v5291_v7  ;;  %6461 = vmatprep.subr.bf16.mxu1 %v5293_v20 }
 0x6e2   :  { %6298 = vmatpush1.bf16.msra.mxu0 %v5290_v60  ;;  %6462 = vmatpush1.bf16.msra.mxu1 %v5292_v61  ;;  %v5354_v60 = vld [vmem:[#allocation2 + $0x1b40] sm:$0xff]  ;;  %v5356_v61 = vld [vmem:[#allocation2 + $0x1b50] sm:$0xff] }
 0x6e3   :  { %6299 = vmatprep.subr.bf16.mxu0 %v5307_v29  ;;  %6463 = vmatprep.subr.bf16.mxu1 %v5309_v2 }
 0x6e6   :  { %6300 = vmatpush1.bf16.msra.mxu0 %v5306_v17  ;;  %6464 = vmatpush1.bf16.msra.mxu1 %v5308_v53  ;;  %v5371_v17 = vld [vmem:[#allocation2 + $0x1bc8] sm:$0xff]  ;;  %v5373_v53 = vld [vmem:[#allocation2 + $0x1bd8] sm:$0xff] }
 0x6e7   :  { %6301 = vmatprep.subr.bf16.mxu0 %v5323_v23  ;;  %6465 = vmatprep.subr.bf16.mxu1 %v5325_v26 }
 0x6ea   :  { %6302 = vmatpush1.bf16.msra.mxu0 %v5322_v30  ;;  %6466 = vmatpush1.bf16.msra.mxu1 %v5324_v27 }
 0x6eb   :  { %6303 = vmatprep.subr.bf16.mxu0 %v5339_v4  ;;  %6467 = vmatprep.subr.bf16.mxu1 %v5341_v10  ;;  %v5370_v4 = vld [vmem:[#allocation2 + $0x1bc0] sm:$0xff]  ;;  %v5372_v10 = vld [vmem:[#allocation2 + $0x1bd0] sm:$0xff] }
 0x6ec   :  { %v5999_v42 = vpop.f32.mrb[20].mxu0  ;;  %v6163_v43 = vpop.f32.mrb[20].mxu1 }
 0x6ed   :  { %v6915_v50 = vmul.f32 %v6850_v31, %v5999_v42  ;;  %v6917_v63 = vmul.f32 %v6858_v1, %v6163_v43  ;;  %v6001_v6 = vpop.f32.mrb[21].mxu0  ;;  %v6165_v54 = vpop.f32.mrb[21].mxu1  ;;  %v5389_v31 = vld [vmem:[#allocation2 + $0x1c58] sm:$0xff]  ;;  %v5386_v1 = vld [vmem:[#allocation2 + $0x1c40] sm:$0xff]  ;;  %v5420_v43 = vld [vmem:[#allocation2 + $0x1d50] sm:$0xff] }
 0x6ee   :  { %v6916_v55 = vmul.f32 %v6854_v8, %v6001_v6  ;;  %v6918_v0 = vmul.f32 %v6862_v32, %v6165_v54  ;;  %v6003_v45 = vpop.f32.mrb[22].mxu0  ;;  %v6167_v48 = vpop.f32.mrb[22].mxu1  ;;  %6304 = vmatpush1.bf16.msra.mxu0 %v5338_v39  ;;  %6468 = vmatpush1.bf16.msra.mxu1 %v5340_v41  ;;  %v5388_v8 = vld [vmem:[#allocation2 + $0x1c50] sm:$0xff]  ;;  %v5403_v32 = vld [vmem:[#allocation2 + $0x1cc8] sm:$0xff]  ;;  %v5421_v41 = vld [vmem:[#allocation2 + $0x1d58] sm:$0xff] }
 0x6ef   :  { %v9152_v3 = vadd.f32 %v6952_v12, %v6915_v50  ;;  %v9154_v9 = vadd.f32 %v6960_v37, %v6917_v63  ;;  %v6004_v7 = vpop.f32.mrb[23].mxu0  ;;  %v6168_v20 = vpop.f32.mrb[23].mxu1  ;;  %6305 = vmatprep.subr.bf16.mxu0 %v5355_v35  ;;  %6469 = vmatprep.subr.bf16.mxu1 %v5357_v44  ;;  %v5402_v12 = vld [vmem:[#allocation2 + $0x1cc0] sm:$0xff]  ;;  %v5404_v37 = vld [vmem:[#allocation2 + $0x1cd0] sm:$0xff]  ;;  %v5419_v39 = vld [vmem:[#allocation2 + $0x1d48] sm:$0xff] }
 0x6f0   :  { %v9156_v29 = vadd.f32 %v6956_v47, %v6916_v55  ;;  %v9158_v2 = vadd.f32 %v6964_v36, %v6918_v0  ;;  %v5418_v42 = vld [vmem:[#allocation2 + $0x1d40] sm:$0xff]  ;;  %v5435_v47 = vld [vmem:[#allocation2 + $0x1dc8] sm:$0xff]  ;;  %v5437_v36 = vld [vmem:[#allocation2 + $0x1dd8] sm:$0xff] }
 0x6f1   :  { %v7033_v23 = vmax.f32 %v9152_v3, 0.0  ;;  %v7035_v26 = vmax.f32 %v9154_v9, 0.0  ;;  %v5434_v35 = vld [vmem:[#allocation2 + $0x1dc0] sm:$0xff]  ;;  %v5436_v44 = vld [vmem:[#allocation2 + $0x1dd0] sm:$0xff]  ;;  %v5451_v50 = vld [vmem:[#allocation2 + $0x1e48] sm:$0xff] }
 0x6f2   :  { %v7034_v30 = vmax.f32 %v9156_v29, 0.0  ;;  %v7036_v27 = vmax.f32 %v9158_v2, 0.0  ;;  %6306 = vmatpush1.bf16.msra.mxu0 %v5354_v60  ;;  %6470 = vmatpush1.bf16.msra.mxu1 %v5356_v61  ;;  %v5453_v63 = vld [vmem:[#allocation2 + $0x1e58] sm:$0xff]  ;;  %v5450_v6 = vld [vmem:[#allocation2 + $0x1e40] sm:$0xff]  ;;  %v5452_v54 = vld [vmem:[#allocation2 + $0x1e50] sm:$0xff] }
 0x6f3   :  { %6307 = vmatprep.subr.bf16.mxu0 %v5371_v17  ;;  %6471 = vmatprep.subr.bf16.mxu1 %v5373_v53  ;;  %v5467_v55 = vld [vmem:[#allocation2 + $0x1ec8] sm:$0xff]  ;;  %v5469_v0 = vld [vmem:[#allocation2 + $0x1ed8] sm:$0xff]  ;;  %v5466_v45 = vld [vmem:[#allocation2 + $0x1ec0] sm:$0xff] }
 0x6f4   :  { %v5468_v48 = vld [vmem:[#allocation2 + $0x1ed0] sm:$0xff]  ;;  %v5483_v7 = vld [vmem:[#allocation2 + $0x1f48] sm:$0xff]  ;;  %v5485_v20 = vld [vmem:[#allocation2 + $0x1f58] sm:$0xff] }
 0x6f5   :  { %v5482_v60 = vld [vmem:[#allocation2 + $0x1f40] sm:$0xff]  ;;  %v5484_v61 = vld [vmem:[#allocation2 + $0x1f50] sm:$0xff]  ;;  %v5499_v17 = vld [vmem:[#allocation2 + $0x1fc8] sm:$0xff] }
 0x6f6   :  { %6308 = vmatpush1.bf16.msra.mxu0 %v5370_v4  ;;  %6472 = vmatpush1.bf16.msra.mxu1 %v5372_v10  ;;  %v5501_v53 = vld [vmem:[#allocation2 + $0x1fd8] sm:$0xff]  ;;  %v5498_v4 = vld [vmem:[#allocation2 + $0x1fc0] sm:$0xff]  ;;  %v5500_v10 = vld [vmem:[#allocation2 + $0x1fd0] sm:$0xff] }
 0x6f7   :  { %6309 = vmatprep.subr.bf16.mxu0 %v5387_v28  ;;  %6473 = vmatprep.subr.bf16.mxu1 %v5389_v31  ;;  %v4495_v28 = vld [vmem:[#allocation2 + $0x68] sm:$0xff]  ;;  %v4497_v31 = vld [vmem:[#allocation2 + $0x78] sm:$0xff] }
 0x6fa   :  { %6310 = vmatpush1.bf16.msra.mxu0 %v5386_v1  ;;  %6474 = vmatpush1.bf16.msra.mxu1 %v5388_v8  ;;  %v4494_v1 = vld [vmem:[#allocation2 + $0x60] sm:$0xff]  ;;  %v4496_v8 = vld [vmem:[#allocation2 + $0x70] sm:$0xff] }
 0x6fb   :  { %6311 = vmatprep.subr.bf16.mxu0 %v5403_v32  ;;  %6475 = vmatprep.subr.bf16.mxu1 %v5405_v33  ;;  %v4511_v32 = vld [vmem:[#allocation2 + $0xe8] sm:$0xff]  ;;  %v4513_v33 = vld [vmem:[#allocation2 + $0xf8] sm:$0xff] }
 0x6fe   :  { %6312 = vmatpush1.bf16.msra.mxu0 %v5402_v12  ;;  %6476 = vmatpush1.bf16.msra.mxu1 %v5404_v37  ;;  %v4510_v12 = vld [vmem:[#allocation2 + $0xe0] sm:$0xff]  ;;  %v4512_v37 = vld [vmem:[#allocation2 + $0xf0] sm:$0xff] }
 0x6ff   :  { %6313 = vmatprep.subr.bf16.mxu0 %v5419_v39  ;;  %6477 = vmatprep.subr.bf16.mxu1 %v5421_v41  ;;  %v4527_v39 = vld [vmem:[#allocation2 + $0x168] sm:$0xff]  ;;  %v4529_v41 = vld [vmem:[#allocation2 + $0x178] sm:$0xff] }
 0x702   :  { %6314 = vmatpush1.bf16.msra.mxu0 %v5418_v42  ;;  %6478 = vmatpush1.bf16.msra.mxu1 %v5420_v43  ;;  %v4526_v42 = vld [vmem:[#allocation2 + $0x160] sm:$0xff]  ;;  %v4528_v43 = vld [vmem:[#allocation2 + $0x170] sm:$0xff] }
 0x703   :  { %6315 = vmatprep.subr.bf16.mxu0 %v5435_v47  ;;  %6479 = vmatprep.subr.bf16.mxu1 %v5437_v36  ;;  %v4543_v47 = vld [vmem:[#allocation2 + $0x1e8] sm:$0xff]  ;;  %v4545_v36 = vld [vmem:[#allocation2 + $0x1f8] sm:$0xff] }
 0x706   :  { %6316 = vmatpush1.bf16.msra.mxu0 %v5434_v35  ;;  %6480 = vmatpush1.bf16.msra.mxu1 %v5436_v44  ;;  %v4542_v35 = vld [vmem:[#allocation2 + $0x1e0] sm:$0xff]  ;;  %v4544_v44 = vld [vmem:[#allocation2 + $0x1f0] sm:$0xff] }
 0x707   :  { %6317 = vmatprep.subr.bf16.mxu0 %v5451_v50  ;;  %6481 = vmatprep.subr.bf16.mxu1 %v5453_v63  ;;  %v4559_v50 = vld [vmem:[#allocation2 + $0x268] sm:$0xff]  ;;  %v4561_v63 = vld [vmem:[#allocation2 + $0x278] sm:$0xff] }
 0x70a   :  { %6318 = vmatpush1.bf16.msra.mxu0 %v5450_v6  ;;  %6482 = vmatpush1.bf16.msra.mxu1 %v5452_v54  ;;  %v4560_v6 = vld [vmem:[#allocation2 + $0x270] sm:$0xff]  ;;  %v4575_v54 = vld [vmem:[#allocation2 + $0x2e8] sm:$0xff] }
 0x70b   :  { %6319 = vmatprep.subr.bf16.mxu0 %v5467_v55  ;;  %6483 = vmatprep.subr.bf16.mxu1 %v5469_v0  ;;  %v4577_v55 = vld [vmem:[#allocation2 + $0x2f8] sm:$0xff]  ;;  %v4574_v0 = vld [vmem:[#allocation2 + $0x2e0] sm:$0xff] }
 0x70e   :  { %6320 = vmatpush1.bf16.msra.mxu0 %v5466_v45  ;;  %6484 = vmatpush1.bf16.msra.mxu1 %v5468_v48  ;;  %v4576_v45 = vld [vmem:[#allocation2 + $0x2f0] sm:$0xff]  ;;  %v4591_v48 = vld [vmem:[#allocation2 + $0x368] sm:$0xff] }
 0x70f   :  { %6321 = vmatprep.subr.bf16.mxu0 %v5483_v7  ;;  %6485 = vmatprep.subr.bf16.mxu1 %v5485_v20  ;;  %v4593_v7 = vld [vmem:[#allocation2 + $0x378] sm:$0xff]  ;;  %v4590_v20 = vld [vmem:[#allocation2 + $0x360] sm:$0xff] }
 0x712   :  { %6322 = vmatpush1.bf16.msra.mxu0 %v5482_v60  ;;  %6486 = vmatpush1.bf16.msra.mxu1 %v5484_v61  ;;  %v4592_v60 = vld [vmem:[#allocation2 + $0x370] sm:$0xff]  ;;  %v4607_v61 = vld [vmem:[#allocation2 + $0x3e8] sm:$0xff] }
 0x713   :  { %6323 = vmatprep.subr.bf16.mxu0 %v5499_v17  ;;  %6487 = vmatprep.subr.bf16.mxu1 %v5501_v53  ;;  %v4609_v17 = vld [vmem:[#allocation2 + $0x3f8] sm:$0xff]  ;;  %v4606_v53 = vld [vmem:[#allocation2 + $0x3e0] sm:$0xff] }
 0x716   :  { %6324 = vmatpush1.bf16.msra.mxu0 %v5498_v4  ;;  %6488 = vmatpush1.bf16.msra.mxu1 %v5500_v10  ;;  %v4608_v4 = vld [vmem:[#allocation2 + $0x3f0] sm:$0xff]  ;;  %v4623_v10 = vld [vmem:[#allocation2 + $0x468] sm:$0xff] }
 0x717   :  { %6498 = vmatprep.subr.bf16.mxu0 %v4495_v28  ;;  %6662 = vmatprep.subr.bf16.mxu1 %v4497_v31  ;;  %v4625_v28 = vld [vmem:[#allocation2 + $0x478] sm:$0xff]  ;;  %v4622_v31 = vld [vmem:[#allocation2 + $0x460] sm:$0xff] }
 0x719   :  { %6326 = vmatmul.mubr.bf16.vlgmr.msra.gmra.mrb[24].mxu0 %v9090_v59  ;;  %6490 = vmatmul.mubr.bf16.vlgmr.msra.gmra.mrb[24].mxu1 %v9090_v59 }
 0x71a   :  { %6499 = vmatpush1.bf16.msra.mxu0 %v4494_v1  ;;  %6663 = vmatpush1.bf16.msra.mxu1 %v4496_v8  ;;  %v4624_v1 = vld [vmem:[#allocation2 + $0x470] sm:$0xff]  ;;  %v4639_v8 = vld [vmem:[#allocation2 + $0x4e8] sm:$0xff] }
 0x71b   :  { %6500 = vmatprep.subr.bf16.mxu0 %v4511_v32  ;;  %6664 = vmatprep.subr.bf16.mxu1 %v4513_v33  ;;  %v4641_v32 = vld [vmem:[#allocation2 + $0x4f8] sm:$0xff]  ;;  %v4638_v33 = vld [vmem:[#allocation2 + $0x4e0] sm:$0xff] }
 0x71c   :  { %6530 = vmatprep.mubr.bf16.mxu0 %v9041_v40  ;;  %6694 = vmatprep.mubr.bf16.mxu1 %v9041_v40  ;;  %v4558_v40 = vld [vmem:[#allocation2 + $0x260] sm:$0xff] }
 0x71e   :  { %6501 = vmatpush1.bf16.msra.mxu0 %v4510_v12  ;;  %6665 = vmatpush1.bf16.msra.mxu1 %v4512_v37  ;;  %v4640_v12 = vld [vmem:[#allocation2 + $0x4f0] sm:$0xff]  ;;  %v4655_v37 = vld [vmem:[#allocation2 + $0x568] sm:$0xff] }
 0x71f   :  { %6502 = vmatprep.subr.bf16.mxu0 %v4527_v39  ;;  %6666 = vmatprep.subr.bf16.mxu1 %v4529_v41  ;;  %v4657_v39 = vld [vmem:[#allocation2 + $0x578] sm:$0xff]  ;;  %v4654_v41 = vld [vmem:[#allocation2 + $0x560] sm:$0xff] }
 0x722   :  { %6503 = vmatpush1.bf16.msra.mxu0 %v4526_v42  ;;  %6667 = vmatpush1.bf16.msra.mxu1 %v4528_v43  ;;  %v4656_v42 = vld [vmem:[#allocation2 + $0x570] sm:$0xff]  ;;  %v4671_v43 = vld [vmem:[#allocation2 + $0x5e8] sm:$0xff] }
 0x723   :  { %6504 = vmatprep.subr.bf16.mxu0 %v4543_v47  ;;  %6668 = vmatprep.subr.bf16.mxu1 %v4545_v36  ;;  %v4673_v47 = vld [vmem:[#allocation2 + $0x5f8] sm:$0xff]  ;;  %v4670_v36 = vld [vmem:[#allocation2 + $0x5e0] sm:$0xff] }
 0x726   :  { %6505 = vmatpush1.bf16.msra.mxu0 %v4542_v35  ;;  %6669 = vmatpush1.bf16.msra.mxu1 %v4544_v44  ;;  %v4672_v35 = vld [vmem:[#allocation2 + $0x5f0] sm:$0xff]  ;;  %v4687_v44 = vld [vmem:[#allocation2 + $0x668] sm:$0xff] }
 0x727   :  { %6506 = vmatprep.subr.bf16.mxu0 %v4559_v50  ;;  %6670 = vmatprep.subr.bf16.mxu1 %v4561_v63  ;;  %v4689_v50 = vld [vmem:[#allocation2 + $0x678] sm:$0xff]  ;;  %v4686_v63 = vld [vmem:[#allocation2 + $0x660] sm:$0xff] }
 0x72a   :  { %6507 = vmatpush1.bf16.msra.mxu0 %v4558_v40  ;;  %6671 = vmatpush1.bf16.msra.mxu1 %v4560_v6  ;;  %v4688_v40 = vld [vmem:[#allocation2 + $0x670] sm:$0xff]  ;;  %v4703_v6 = vld [vmem:[#allocation2 + $0x6e8] sm:$0xff] }
 0x72b   :  { %6508 = vmatprep.subr.bf16.mxu0 %v4575_v54  ;;  %6672 = vmatprep.subr.bf16.mxu1 %v4577_v55  ;;  %v4705_v54 = vld [vmem:[#allocation2 + $0x6f8] sm:$0xff]  ;;  %v4702_v55 = vld [vmem:[#allocation2 + $0x6e0] sm:$0xff] }
 0x72e   :  { %6509 = vmatpush1.bf16.msra.mxu0 %v4574_v0  ;;  %6673 = vmatpush1.bf16.msra.mxu1 %v4576_v45  ;;  %v4704_v0 = vld [vmem:[#allocation2 + $0x6f0] sm:$0xff]  ;;  %v4719_v45 = vld [vmem:[#allocation2 + $0x768] sm:$0xff] }
 0x72f   :  { %6510 = vmatprep.subr.bf16.mxu0 %v4591_v48  ;;  %6674 = vmatprep.subr.bf16.mxu1 %v4593_v7  ;;  %v4721_v48 = vld [vmem:[#allocation2 + $0x778] sm:$0xff]  ;;  %v4718_v7 = vld [vmem:[#allocation2 + $0x760] sm:$0xff] }
 0x732   :  { %6511 = vmatpush1.bf16.msra.mxu0 %v4590_v20  ;;  %6675 = vmatpush1.bf16.msra.mxu1 %v4592_v60  ;;  %v4720_v20 = vld [vmem:[#allocation2 + $0x770] sm:$0xff]  ;;  %v4735_v60 = vld [vmem:[#allocation2 + $0x7e8] sm:$0xff] }
 0x733   :  { %6512 = vmatprep.subr.bf16.mxu0 %v4607_v61  ;;  %6676 = vmatprep.subr.bf16.mxu1 %v4609_v17  ;;  %v4737_v61 = vld [vmem:[#allocation2 + $0x7f8] sm:$0xff]  ;;  %v4734_v17 = vld [vmem:[#allocation2 + $0x7e0] sm:$0xff] }
 0x736   :  { %6513 = vmatpush1.bf16.msra.mxu0 %v4606_v53  ;;  %6677 = vmatpush1.bf16.msra.mxu1 %v4608_v4  ;;  %v4736_v53 = vld [vmem:[#allocation2 + $0x7f0] sm:$0xff]  ;;  %v4751_v4 = vld [vmem:[#allocation2 + $0x868] sm:$0xff] }
 0x737   :  { %6514 = vmatprep.subr.bf16.mxu0 %v4623_v10  ;;  %6678 = vmatprep.subr.bf16.mxu1 %v4625_v28  ;;  %v4753_v10 = vld [vmem:[#allocation2 + $0x878] sm:$0xff]  ;;  %v4750_v28 = vld [vmem:[#allocation2 + $0x860] sm:$0xff] }
 0x73a   :  { %6515 = vmatpush1.bf16.msra.mxu0 %v4622_v31  ;;  %6679 = vmatpush1.bf16.msra.mxu1 %v4624_v1  ;;  %v4752_v31 = vld [vmem:[#allocation2 + $0x870] sm:$0xff]  ;;  %v4767_v1 = vld [vmem:[#allocation2 + $0x8e8] sm:$0xff] }
 0x73b   :  { %6516 = vmatprep.subr.bf16.mxu0 %v4639_v8  ;;  %6680 = vmatprep.subr.bf16.mxu1 %v4641_v32  ;;  %v4769_v8 = vld [vmem:[#allocation2 + $0x8f8] sm:$0xff]  ;;  %v4766_v32 = vld [vmem:[#allocation2 + $0x8e0] sm:$0xff] }
 0x73e   :  { %6517 = vmatpush1.bf16.msra.mxu0 %v4638_v33  ;;  %6681 = vmatpush1.bf16.msra.mxu1 %v4640_v12  ;;  %v4768_v33 = vld [vmem:[#allocation2 + $0x8f0] sm:$0xff]  ;;  %v4783_v12 = vld [vmem:[#allocation2 + $0x968] sm:$0xff] }
 0x73f   :  { %6518 = vmatprep.subr.bf16.mxu0 %v4655_v37  ;;  %6682 = vmatprep.subr.bf16.mxu1 %v4657_v39  ;;  %v4785_v37 = vld [vmem:[#allocation2 + $0x978] sm:$0xff]  ;;  %v4782_v39 = vld [vmem:[#allocation2 + $0x960] sm:$0xff] }
 0x742   :  { %6519 = vmatpush1.bf16.msra.mxu0 %v4654_v41  ;;  %6683 = vmatpush1.bf16.msra.mxu1 %v4656_v42  ;;  %v4784_v41 = vld [vmem:[#allocation2 + $0x970] sm:$0xff]  ;;  %v4799_v42 = vld [vmem:[#allocation2 + $0x9e8] sm:$0xff] }
 0x743   :  { %6520 = vmatprep.subr.bf16.mxu0 %v4671_v43  ;;  %6684 = vmatprep.subr.bf16.mxu1 %v4673_v47  ;;  %v4798_v43 = vld [vmem:[#allocation2 + $0x9e0] sm:$0xff]  ;;  %v4800_v47 = vld [vmem:[#allocation2 + $0x9f0] sm:$0xff] }
 0x746   :  { %6521 = vmatpush1.bf16.msra.mxu0 %v4670_v36  ;;  %6685 = vmatpush1.bf16.msra.mxu1 %v4672_v35  ;;  %v4815_v36 = vld [vmem:[#allocation2 + $0xa68] sm:$0xff]  ;;  %v4817_v35 = vld [vmem:[#allocation2 + $0xa78] sm:$0xff] }
 0x747   :  { %6522 = vmatprep.subr.bf16.mxu0 %v4687_v44  ;;  %6686 = vmatprep.subr.bf16.mxu1 %v4689_v50  ;;  %v4816_v44 = vld [vmem:[#allocation2 + $0xa70] sm:$0xff]  ;;  %v4831_v50 = vld [vmem:[#allocation2 + $0xae8] sm:$0xff] }
 0x74a   :  { %6523 = vmatpush1.bf16.msra.mxu0 %v4686_v63  ;;  %6687 = vmatpush1.bf16.msra.mxu1 %v4688_v40  ;;  %v4833_v63 = vld [vmem:[#allocation2 + $0xaf8] sm:$0xff]  ;;  %v4830_v40 = vld [vmem:[#allocation2 + $0xae0] sm:$0xff] }
 0x74b   :  { %6524 = vmatprep.subr.bf16.mxu0 %v4703_v6  ;;  %6688 = vmatprep.subr.bf16.mxu1 %v4705_v54  ;;  %v4832_v6 = vld [vmem:[#allocation2 + $0xaf0] sm:$0xff]  ;;  %v4847_v54 = vld [vmem:[#allocation2 + $0xb68] sm:$0xff] }
 0x74e   :  { %6525 = vmatpush1.bf16.msra.mxu0 %v4702_v55  ;;  %6689 = vmatpush1.bf16.msra.mxu1 %v4704_v0  ;;  %v4849_v55 = vld [vmem:[#allocation2 + $0xb78] sm:$0xff]  ;;  %v4846_v0 = vld [vmem:[#allocation2 + $0xb60] sm:$0xff] }
 0x74f   :  { %6526 = vmatprep.subr.bf16.mxu0 %v4719_v45  ;;  %6690 = vmatprep.subr.bf16.mxu1 %v4721_v48  ;;  %v4848_v45 = vld [vmem:[#allocation2 + $0xb70] sm:$0xff]  ;;  %v4863_v48 = vld [vmem:[#allocation2 + $0xbe8] sm:$0xff] }
 0x752   :  { %6527 = vmatpush1.bf16.msra.mxu0 %v4718_v7  ;;  %6691 = vmatpush1.bf16.msra.mxu1 %v4720_v20  ;;  %v4865_v7 = vld [vmem:[#allocation2 + $0xbf8] sm:$0xff]  ;;  %v4862_v20 = vld [vmem:[#allocation2 + $0xbe0] sm:$0xff] }
 0x753   :  { %6528 = vmatprep.subr.bf16.mxu0 %v4735_v60  ;;  %6692 = vmatprep.subr.bf16.mxu1 %v4737_v61  ;;  %v4864_v60 = vld [vmem:[#allocation2 + $0xbf0] sm:$0xff]  ;;  %v4879_v61 = vld [vmem:[#allocation2 + $0xc68] sm:$0xff] }
 0x756   :  { %6529 = vmatpush1.bf16.msra.mxu0 %v4734_v17  ;;  %6693 = vmatpush1.bf16.msra.mxu1 %v4736_v53  ;;  %v4881_v17 = vld [vmem:[#allocation2 + $0xc78] sm:$0xff]  ;;  %v4878_v53 = vld [vmem:[#allocation2 + $0xc60] sm:$0xff] }
 0x757   :  { %6539 = vmatprep.subr.bf16.mxu0 %v4751_v4  ;;  %6703 = vmatprep.subr.bf16.mxu1 %v4753_v10  ;;  %v4880_v4 = vld [vmem:[#allocation2 + $0xc70] sm:$0xff]  ;;  %v4895_v10 = vld [vmem:[#allocation2 + $0xce8] sm:$0xff] }
 0x759   :  { %6531 = vmatmul.mubr.bf16.vlgmr.msra.gmra.mrb[28].mxu0 %v9048_v51  ;;  %6695 = vmatmul.mubr.bf16.vlgmr.msra.gmra.mrb[28].mxu1 %v9048_v51  ;;  %v4801_v51 = vld [vmem:[#allocation2 + $0x9f8] sm:$0xff] }
 0x75a   :  { %6540 = vmatpush1.bf16.msra.mxu0 %v4750_v28  ;;  %6704 = vmatpush1.bf16.msra.mxu1 %v4752_v31  ;;  %v4897_v28 = vld [vmem:[#allocation2 + $0xcf8] sm:$0xff]  ;;  %v4894_v31 = vld [vmem:[#allocation2 + $0xce0] sm:$0xff] }
 0x75b   :  { %6541 = vmatprep.subr.bf16.mxu0 %v4767_v1  ;;  %6705 = vmatprep.subr.bf16.mxu1 %v4769_v8  ;;  %v4896_v1 = vld [vmem:[#allocation2 + $0xcf0] sm:$0xff]  ;;  %v4911_v8 = vld [vmem:[#allocation2 + $0xd68] sm:$0xff] }
 0x75c   :  { %6571 = vmatprep.mubr.bf16.mxu0 %v9053_v56  ;;  %6735 = vmatprep.mubr.bf16.mxu1 %v9053_v56  ;;  %v4814_v56 = vld [vmem:[#allocation2 + $0xa60] sm:$0xff] }
 0x75e   :  { %6542 = vmatpush1.bf16.msra.mxu0 %v4766_v32  ;;  %6706 = vmatpush1.bf16.msra.mxu1 %v4768_v33  ;;  %v4913_v32 = vld [vmem:[#allocation2 + $0xd78] sm:$0xff]  ;;  %v4910_v33 = vld [vmem:[#allocation2 + $0xd60] sm:$0xff] }
 0x75f   :  { %6543 = vmatprep.subr.bf16.mxu0 %v4783_v12  ;;  %6707 = vmatprep.subr.bf16.mxu1 %v4785_v37  ;;  %v4912_v12 = vld [vmem:[#allocation2 + $0xd70] sm:$0xff]  ;;  %v4927_v37 = vld [vmem:[#allocation2 + $0xde8] sm:$0xff] }
 0x762   :  { %6544 = vmatpush1.bf16.msra.mxu0 %v4782_v39  ;;  %6708 = vmatpush1.bf16.msra.mxu1 %v4784_v41  ;;  %v4929_v39 = vld [vmem:[#allocation2 + $0xdf8] sm:$0xff]  ;;  %v4926_v41 = vld [vmem:[#allocation2 + $0xde0] sm:$0xff] }
 0x763   :  { %6545 = vmatprep.subr.bf16.mxu0 %v4799_v42  ;;  %6709 = vmatprep.subr.bf16.mxu1 %v4801_v51  ;;  %v4928_v42 = vld [vmem:[#allocation2 + $0xdf0] sm:$0xff]  ;;  %v4943_v51 = vld [vmem:[#allocation2 + $0xe68] sm:$0xff] }
 0x766   :  { %6546 = vmatpush1.bf16.msra.mxu0 %v4798_v43  ;;  %6710 = vmatpush1.bf16.msra.mxu1 %v4800_v47  ;;  %v4945_v43 = vld [vmem:[#allocation2 + $0xe78] sm:$0xff]  ;;  %v4942_v47 = vld [vmem:[#allocation2 + $0xe60] sm:$0xff] }
 0x767   :  { %6547 = vmatprep.subr.bf16.mxu0 %v4815_v36  ;;  %6711 = vmatprep.subr.bf16.mxu1 %v4817_v35  ;;  %v4944_v36 = vld [vmem:[#allocation2 + $0xe70] sm:$0xff]  ;;  %v4959_v35 = vld [vmem:[#allocation2 + $0xee8] sm:$0xff] }
 0x76a   :  { %6548 = vmatpush1.bf16.msra.mxu0 %v4814_v56  ;;  %6712 = vmatpush1.bf16.msra.mxu1 %v4816_v44  ;;  %v4961_v56 = vld [vmem:[#allocation2 + $0xef8] sm:$0xff]  ;;  %v4958_v44 = vld [vmem:[#allocation2 + $0xee0] sm:$0xff] }
 0x76b   :  { %6549 = vmatprep.subr.bf16.mxu0 %v4831_v50  ;;  %6713 = vmatprep.subr.bf16.mxu1 %v4833_v63  ;;  %v4960_v50 = vld [vmem:[#allocation2 + $0xef0] sm:$0xff]  ;;  %v4975_v63 = vld [vmem:[#allocation2 + $0xf68] sm:$0xff] }
 0x76e   :  { %6550 = vmatpush1.bf16.msra.mxu0 %v4830_v40  ;;  %6714 = vmatpush1.bf16.msra.mxu1 %v4832_v6  ;;  %v4977_v40 = vld [vmem:[#allocation2 + $0xf78] sm:$0xff]  ;;  %v4974_v6 = vld [vmem:[#allocation2 + $0xf60] sm:$0xff] }
 0x76f   :  { %6551 = vmatprep.subr.bf16.mxu0 %v4847_v54  ;;  %6715 = vmatprep.subr.bf16.mxu1 %v4849_v55  ;;  %v4976_v54 = vld [vmem:[#allocation2 + $0xf70] sm:$0xff]  ;;  %v4991_v55 = vld [vmem:[#allocation2 + $0xfe8] sm:$0xff] }
 0x772   :  { %6552 = vmatpush1.bf16.msra.mxu0 %v4846_v0  ;;  %6716 = vmatpush1.bf16.msra.mxu1 %v4848_v45  ;;  %v4993_v0 = vld [vmem:[#allocation2 + $0xff8] sm:$0xff]  ;;  %v4990_v45 = vld [vmem:[#allocation2 + $0xfe0] sm:$0xff] }
 0x773   :  { %6553 = vmatprep.subr.bf16.mxu0 %v4863_v48  ;;  %6717 = vmatprep.subr.bf16.mxu1 %v4865_v7  ;;  %v4992_v48 = vld [vmem:[#allocation2 + $0xff0] sm:$0xff]  ;;  %v5007_v7 = vld [vmem:[#allocation2 + $0x1068] sm:$0xff] }
 0x776   :  { %6554 = vmatpush1.bf16.msra.mxu0 %v4862_v20  ;;  %6718 = vmatpush1.bf16.msra.mxu1 %v4864_v60  ;;  %v5009_v20 = vld [vmem:[#allocation2 + $0x1078] sm:$0xff]  ;;  %v5006_v60 = vld [vmem:[#allocation2 + $0x1060] sm:$0xff] }
 0x777   :  { %6555 = vmatprep.subr.bf16.mxu0 %v4879_v61  ;;  %6719 = vmatprep.subr.bf16.mxu1 %v4881_v17  ;;  %v5008_v61 = vld [vmem:[#allocation2 + $0x1070] sm:$0xff]  ;;  %v5023_v17 = vld [vmem:[#allocation2 + $0x10e8] sm:$0xff] }
 0x77a   :  { %6556 = vmatpush1.bf16.msra.mxu0 %v4878_v53  ;;  %6720 = vmatpush1.bf16.msra.mxu1 %v4880_v4  ;;  %v5025_v53 = vld [vmem:[#allocation2 + $0x10f8] sm:$0xff]  ;;  %v5022_v4 = vld [vmem:[#allocation2 + $0x10e0] sm:$0xff] }
 0x77b   :  { %6557 = vmatprep.subr.bf16.mxu0 %v4895_v10  ;;  %6721 = vmatprep.subr.bf16.mxu1 %v4897_v28  ;;  %v5024_v10 = vld [vmem:[#allocation2 + $0x10f0] sm:$0xff]  ;;  %v5039_v28 = vld [vmem:[#allocation2 + $0x1168] sm:$0xff] }
 0x77e   :  { %6558 = vmatpush1.bf16.msra.mxu0 %v4894_v31  ;;  %6722 = vmatpush1.bf16.msra.mxu1 %v4896_v1  ;;  %v5041_v31 = vld [vmem:[#allocation2 + $0x1178] sm:$0xff]  ;;  %v5038_v1 = vld [vmem:[#allocation2 + $0x1160] sm:$0xff] }
 0x77f   :  { %6559 = vmatprep.subr.bf16.mxu0 %v4911_v8  ;;  %6723 = vmatprep.subr.bf16.mxu1 %v4913_v32  ;;  %v5040_v8 = vld [vmem:[#allocation2 + $0x1170] sm:$0xff]  ;;  %v5055_v32 = vld [vmem:[#allocation2 + $0x11e8] sm:$0xff] }
 0x782   :  { %6560 = vmatpush1.bf16.msra.mxu0 %v4910_v33  ;;  %6724 = vmatpush1.bf16.msra.mxu1 %v4912_v12  ;;  %v5054_v33 = vld [vmem:[#allocation2 + $0x11e0] sm:$0xff]  ;;  %v5056_v12 = vld [vmem:[#allocation2 + $0x11f0] sm:$0xff] }
 0x783   :  { %6561 = vmatprep.subr.bf16.mxu0 %v4927_v37  ;;  %6725 = vmatprep.subr.bf16.mxu1 %v4929_v39  ;;  %v5071_v37 = vld [vmem:[#allocation2 + $0x1268] sm:$0xff]  ;;  %v5073_v39 = vld [vmem:[#allocation2 + $0x1278] sm:$0xff] }
 0x786   :  { %6562 = vmatpush1.bf16.msra.mxu0 %v4926_v41  ;;  %6726 = vmatpush1.bf16.msra.mxu1 %v4928_v42  ;;  %v5072_v41 = vld [vmem:[#allocation2 + $0x1270] sm:$0xff]  ;;  %v5087_v42 = vld [vmem:[#allocation2 + $0x12e8] sm:$0xff] }
 0x787   :  { %6563 = vmatprep.subr.bf16.mxu0 %v4943_v51  ;;  %6727 = vmatprep.subr.bf16.mxu1 %v4945_v43  ;;  %v5089_v51 = vld [vmem:[#allocation2 + $0x12f8] sm:$0xff]  ;;  %v5086_v43 = vld [vmem:[#allocation2 + $0x12e0] sm:$0xff] }
 0x78a   :  { %6564 = vmatpush1.bf16.msra.mxu0 %v4942_v47  ;;  %6728 = vmatpush1.bf16.msra.mxu1 %v4944_v36  ;;  %v5088_v47 = vld [vmem:[#allocation2 + $0x12f0] sm:$0xff]  ;;  %v5103_v36 = vld [vmem:[#allocation2 + $0x1368] sm:$0xff] }
 0x78b   :  { %6565 = vmatprep.subr.bf16.mxu0 %v4959_v35  ;;  %6729 = vmatprep.subr.bf16.mxu1 %v4961_v56  ;;  %v5105_v35 = vld [vmem:[#allocation2 + $0x1378] sm:$0xff]  ;;  %v5102_v56 = vld [vmem:[#allocation2 + $0x1360] sm:$0xff] }
 0x78e   :  { %6566 = vmatpush1.bf16.msra.mxu0 %v4958_v44  ;;  %6730 = vmatpush1.bf16.msra.mxu1 %v4960_v50  ;;  %v5104_v44 = vld [vmem:[#allocation2 + $0x1370] sm:$0xff]  ;;  %v5119_v50 = vld [vmem:[#allocation2 + $0x13e8] sm:$0xff] }
 0x78f   :  { %6567 = vmatprep.subr.bf16.mxu0 %v4975_v63  ;;  %6731 = vmatprep.subr.bf16.mxu1 %v4977_v40  ;;  %v5121_v63 = vld [vmem:[#allocation2 + $0x13f8] sm:$0xff]  ;;  %v5118_v40 = vld [vmem:[#allocation2 + $0x13e0] sm:$0xff] }
 0x792   :  { %6568 = vmatpush1.bf16.msra.mxu0 %v4974_v6  ;;  %6732 = vmatpush1.bf16.msra.mxu1 %v4976_v54  ;;  %v5120_v6 = vld [vmem:[#allocation2 + $0x13f0] sm:$0xff]  ;;  %v5135_v54 = vld [vmem:[#allocation2 + $0x1468] sm:$0xff] }
 0x793   :  { %6569 = vmatprep.subr.bf16.mxu0 %v4991_v55  ;;  %6733 = vmatprep.subr.bf16.mxu1 %v4993_v0  ;;  %v5137_v55 = vld [vmem:[#allocation2 + $0x1478] sm:$0xff]  ;;  %v5134_v0 = vld [vmem:[#allocation2 + $0x1460] sm:$0xff] }
 0x796   :  { %6570 = vmatpush1.bf16.msra.mxu0 %v4990_v45  ;;  %6734 = vmatpush1.bf16.msra.mxu1 %v4992_v48  ;;  %v5136_v45 = vld [vmem:[#allocation2 + $0x1470] sm:$0xff]  ;;  %v5151_v48 = vld [vmem:[#allocation2 + $0x14e8] sm:$0xff] }
 0x797   :  { %6580 = vmatprep.subr.bf16.mxu0 %v5007_v7  ;;  %6744 = vmatprep.subr.bf16.mxu1 %v5009_v20  ;;  %v5153_v7 = vld [vmem:[#allocation2 + $0x14f8] sm:$0xff]  ;;  %v5150_v20 = vld [vmem:[#allocation2 + $0x14e0] sm:$0xff] }
 0x799   :  { %6572 = vmatmul.mubr.bf16.vlgmr.msra.gmra.mrb[28].mxu0 %v9062_v21  ;;  %6736 = vmatmul.mubr.bf16.vlgmr.msra.gmra.mrb[28].mxu1 %v9062_v21  ;;  %v5057_v21 = vld [vmem:[#allocation2 + $0x11f8] sm:$0xff] }
 0x79a   :  { %6581 = vmatpush1.bf16.msra.mxu0 %v5006_v60  ;;  %6745 = vmatpush1.bf16.msra.mxu1 %v5008_v61  ;;  %v5152_v60 = vld [vmem:[#allocation2 + $0x14f0] sm:$0xff]  ;;  %v5167_v61 = vld [vmem:[#allocation2 + $0x1568] sm:$0xff] }
 0x79b   :  { %6582 = vmatprep.subr.bf16.mxu0 %v5023_v17  ;;  %6746 = vmatprep.subr.bf16.mxu1 %v5025_v53  ;;  %v5169_v17 = vld [vmem:[#allocation2 + $0x1578] sm:$0xff]  ;;  %v5166_v53 = vld [vmem:[#allocation2 + $0x1560] sm:$0xff] }
 0x79c   :  { %6612 = vmatprep.mubr.bf16.mxu0 %v9067_v16  ;;  %6776 = vmatprep.mubr.bf16.mxu1 %v9067_v16  ;;  %v5070_v16 = vld [vmem:[#allocation2 + $0x1260] sm:$0xff] }
 0x79e   :  { %6583 = vmatpush1.bf16.msra.mxu0 %v5022_v4  ;;  %6747 = vmatpush1.bf16.msra.mxu1 %v5024_v10  ;;  %v5168_v4 = vld [vmem:[#allocation2 + $0x1570] sm:$0xff]  ;;  %v5183_v10 = vld [vmem:[#allocation2 + $0x15e8] sm:$0xff] }
 0x79f   :  { %6584 = vmatprep.subr.bf16.mxu0 %v5039_v28  ;;  %6748 = vmatprep.subr.bf16.mxu1 %v5041_v31  ;;  %v5185_v28 = vld [vmem:[#allocation2 + $0x15f8] sm:$0xff]  ;;  %v5182_v31 = vld [vmem:[#allocation2 + $0x15e0] sm:$0xff] }
 0x7a2   :  { %6585 = vmatpush1.bf16.msra.mxu0 %v5038_v1  ;;  %6749 = vmatpush1.bf16.msra.mxu1 %v5040_v8  ;;  %v5184_v1 = vld [vmem:[#allocation2 + $0x15f0] sm:$0xff]  ;;  %v5199_v8 = vld [vmem:[#allocation2 + $0x1668] sm:$0xff] }
 0x7a3   :  { %6586 = vmatprep.subr.bf16.mxu0 %v5055_v32  ;;  %6750 = vmatprep.subr.bf16.mxu1 %v5057_v21  ;;  %v5201_v32 = vld [vmem:[#allocation2 + $0x1678] sm:$0xff]  ;;  %v5198_v21 = vld [vmem:[#allocation2 + $0x1660] sm:$0xff] }
 0x7a6   :  { %6587 = vmatpush1.bf16.msra.mxu0 %v5054_v33  ;;  %6751 = vmatpush1.bf16.msra.mxu1 %v5056_v12  ;;  %v5200_v33 = vld [vmem:[#allocation2 + $0x1670] sm:$0xff]  ;;  %v5215_v12 = vld [vmem:[#allocation2 + $0x16e8] sm:$0xff] }
 0x7a7   :  { %6588 = vmatprep.subr.bf16.mxu0 %v5071_v37  ;;  %6752 = vmatprep.subr.bf16.mxu1 %v5073_v39  ;;  %v5217_v37 = vld [vmem:[#allocation2 + $0x16f8] sm:$0xff]  ;;  %v5214_v39 = vld [vmem:[#allocation2 + $0x16e0] sm:$0xff] }
 0x7aa   :  { %6589 = vmatpush1.bf16.msra.mxu0 %v5070_v16  ;;  %6753 = vmatpush1.bf16.msra.mxu1 %v5072_v41  ;;  %v5216_v16 = vld [vmem:[#allocation2 + $0x16f0] sm:$0xff]  ;;  %v5231_v41 = vld [vmem:[#allocation2 + $0x1768] sm:$0xff] }
 0x7ab   :  { %6590 = vmatprep.subr.bf16.mxu0 %v5087_v42  ;;  %6754 = vmatprep.subr.bf16.mxu1 %v5089_v51  ;;  %v5233_v42 = vld [vmem:[#allocation2 + $0x1778] sm:$0xff]  ;;  %v5230_v51 = vld [vmem:[#allocation2 + $0x1760] sm:$0xff] }
 0x7ae   :  { %6591 = vmatpush1.bf16.msra.mxu0 %v5086_v43  ;;  %6755 = vmatpush1.bf16.msra.mxu1 %v5088_v47  ;;  %v5232_v43 = vld [vmem:[#allocation2 + $0x1770] sm:$0xff]  ;;  %v5247_v47 = vld [vmem:[#allocation2 + $0x17e8] sm:$0xff] }
 0x7af   :  { %6592 = vmatprep.subr.bf16.mxu0 %v5103_v36  ;;  %6756 = vmatprep.subr.bf16.mxu1 %v5105_v35  ;;  %v5249_v36 = vld [vmem:[#allocation2 + $0x17f8] sm:$0xff]  ;;  %v5246_v35 = vld [vmem:[#allocation2 + $0x17e0] sm:$0xff] }
 0x7b2   :  { %6593 = vmatpush1.bf16.msra.mxu0 %v5102_v56  ;;  %6757 = vmatpush1.bf16.msra.mxu1 %v5104_v44  ;;  %v5248_v56 = vld [vmem:[#allocation2 + $0x17f0] sm:$0xff]  ;;  %v5263_v44 = vld [vmem:[#allocation2 + $0x1868] sm:$0xff] }
 0x7b3   :  { %6594 = vmatprep.subr.bf16.mxu0 %v5119_v50  ;;  %6758 = vmatprep.subr.bf16.mxu1 %v5121_v63  ;;  %v5265_v50 = vld [vmem:[#allocation2 + $0x1878] sm:$0xff]  ;;  %v5262_v63 = vld [vmem:[#allocation2 + $0x1860] sm:$0xff] }
 0x7b6   :  { %6595 = vmatpush1.bf16.msra.mxu0 %v5118_v40  ;;  %6759 = vmatpush1.bf16.msra.mxu1 %v5120_v6  ;;  %v5264_v40 = vld [vmem:[#allocation2 + $0x1870] sm:$0xff]  ;;  %v5279_v6 = vld [vmem:[#allocation2 + $0x18e8] sm:$0xff] }
 0x7b7   :  { %6596 = vmatprep.subr.bf16.mxu0 %v5135_v54  ;;  %6760 = vmatprep.subr.bf16.mxu1 %v5137_v55  ;;  %v5281_v54 = vld [vmem:[#allocation2 + $0x18f8] sm:$0xff]  ;;  %v5278_v55 = vld [vmem:[#allocation2 + $0x18e0] sm:$0xff] }
 0x7ba   :  { %6597 = vmatpush1.bf16.msra.mxu0 %v5134_v0  ;;  %6761 = vmatpush1.bf16.msra.mxu1 %v5136_v45  ;;  %v5280_v0 = vld [vmem:[#allocation2 + $0x18f0] sm:$0xff]  ;;  %v5295_v45 = vld [vmem:[#allocation2 + $0x1968] sm:$0xff] }
 0x7bb   :  { %6598 = vmatprep.subr.bf16.mxu0 %v5151_v48  ;;  %6762 = vmatprep.subr.bf16.mxu1 %v5153_v7  ;;  %v5297_v48 = vld [vmem:[#allocation2 + $0x1978] sm:$0xff]  ;;  %v5294_v7 = vld [vmem:[#allocation2 + $0x1960] sm:$0xff] }
 0x7be   :  { %6599 = vmatpush1.bf16.msra.mxu0 %v5150_v20  ;;  %6763 = vmatpush1.bf16.msra.mxu1 %v5152_v60  ;;  %v5296_v20 = vld [vmem:[#allocation2 + $0x1970] sm:$0xff]  ;;  %v5311_v60 = vld [vmem:[#allocation2 + $0x19e8] sm:$0xff] }
 0x7bf   :  { %6600 = vmatprep.subr.bf16.mxu0 %v5167_v61  ;;  %6764 = vmatprep.subr.bf16.mxu1 %v5169_v17  ;;  %v5310_v61 = vld [vmem:[#allocation2 + $0x19e0] sm:$0xff]  ;;  %v5312_v17 = vld [vmem:[#allocation2 + $0x19f0] sm:$0xff] }
 0x7c2   :  { %6601 = vmatpush1.bf16.msra.mxu0 %v5166_v53  ;;  %6765 = vmatpush1.bf16.msra.mxu1 %v5168_v4  ;;  %v5327_v53 = vld [vmem:[#allocation2 + $0x1a68] sm:$0xff]  ;;  %v5329_v4 = vld [vmem:[#allocation2 + $0x1a78] sm:$0xff] }
 0x7c3   :  { %6602 = vmatprep.subr.bf16.mxu0 %v5183_v10  ;;  %6766 = vmatprep.subr.bf16.mxu1 %v5185_v28  ;;  %v9180_v10 = vld [vmem:[#allocation14 + $0x10] ss:$2 sm:$0xff]  ;;  %v5328_v28 = vld [vmem:[#allocation2 + $0x1a70] sm:$0xff] }
 0x7c6   :  { %6603 = vmatpush1.bf16.msra.mxu0 %v5182_v31  ;;  %6767 = vmatpush1.bf16.msra.mxu1 %v5184_v1  ;;  %v9182_v31 = vld [vmem:[#allocation14 + $0x11] ss:$2 sm:$0xff]  ;;  %v5343_v1 = vld [vmem:[#allocation2 + $0x1ae8] sm:$0xff] }
 0x7c7   :  { %6604 = vmatprep.subr.bf16.mxu0 %v5199_v8  ;;  %6768 = vmatprep.subr.bf16.mxu1 %v5201_v32  ;;  %v5345_v8 = vld [vmem:[#allocation2 + $0x1af8] sm:$0xff]  ;;  %v6866_v32 = vrot.slane %v9180_v10, %v8846_v13 }
 0x7ca   :  { %6605 = vmatpush1.bf16.msra.mxu0 %v5198_v21  ;;  %6769 = vmatpush1.bf16.msra.mxu1 %v5200_v33  ;;  %v6874_v21 = vrot.slane %v9180_v10, %v8893_v34  ;;  %v6870_v33 = vrot.slane %v9180_v10, %v8851_v15 }
 0x7cb   :  { %6606 = vmatprep.subr.bf16.mxu0 %v5215_v12  ;;  %6770 = vmatprep.subr.bf16.mxu1 %v5217_v37  ;;  %v6878_v12 = vrot.slane %v9180_v10, %v8858_v18  ;;  %v6968_v37 = vrot.slane %v9182_v31, %v8846_v13 }
 0x7ce   :  { %6607 = vmatpush1.bf16.msra.mxu0 %v5214_v39  ;;  %6771 = vmatpush1.bf16.msra.mxu1 %v5216_v16  ;;  %v6976_v39 = vrot.slane %v9182_v31, %v8893_v34  ;;  %v5342_v16 = vld [vmem:[#allocation2 + $0x1ae0] sm:$0xff] }
 0x7cf   :  { %6608 = vmatprep.subr.bf16.mxu0 %v5231_v41  ;;  %6772 = vmatprep.subr.bf16.mxu1 %v5233_v42  ;;  %v5344_v41 = vld [vmem:[#allocation2 + $0x1af0] sm:$0xff] }
 0x7d2   :  { %6609 = vmatpush1.bf16.msra.mxu0 %v5230_v51  ;;  %6773 = vmatpush1.bf16.msra.mxu1 %v5232_v43  ;;  %v6972_v43 = vrot.slane %v9182_v31, %v8851_v15 }
 0x7d3   :  { %6610 = vmatprep.subr.bf16.mxu0 %v5247_v47  ;;  %6774 = vmatprep.subr.bf16.mxu1 %v5249_v36  ;;  %v6980_v47 = vrot.slane %v9182_v31, %v8858_v18  ;;  %v5359_v36 = vld [vmem:[#allocation2 + $0x1b68] sm:$0xff]  ;;  %v5358_v18 = vld [vmem:[#allocation2 + $0x1b60] sm:$0xff] }
 0x7d6   :  { %6611 = vmatpush1.bf16.msra.mxu0 %v5246_v35  ;;  %6775 = vmatpush1.bf16.msra.mxu1 %v5248_v56  ;;  %v5361_v35 = vld [vmem:[#allocation2 + $0x1b78] sm:$0xff] }
 0x7d7   :  { %6621 = vmatprep.subr.bf16.mxu0 %v5263_v44  ;;  %6785 = vmatprep.subr.bf16.mxu1 %v5265_v50 }
 0x7d9   :  { %6613 = vmatmul.mubr.bf16.vlgmr.msra.gmra.mrb[28].mxu0 %v9076_v49  ;;  %6777 = vmatmul.mubr.bf16.vlgmr.msra.gmra.mrb[28].mxu1 %v9076_v49  ;;  %v5313_v49 = vld [vmem:[#allocation2 + $0x19f8] sm:$0xff] }
 0x7da   :  { %6622 = vmatpush1.bf16.msra.mxu0 %v5262_v63  ;;  %6786 = vmatpush1.bf16.msra.mxu1 %v5264_v40 }
 0x7db   :  { %6623 = vmatprep.subr.bf16.mxu0 %v5279_v6  ;;  %6787 = vmatprep.subr.bf16.mxu1 %v5281_v54 }
 0x7dc   :  { %6653 = vmatprep.mubr.bf16.mxu0 %v9081_v52  ;;  %6817 = vmatprep.mubr.bf16.mxu1 %v9081_v52  ;;  %v5326_v52 = vld [vmem:[#allocation2 + $0x1a60] sm:$0xff] }
 0x7de   :  { %6624 = vmatpush1.bf16.msra.mxu0 %v5278_v55  ;;  %6788 = vmatpush1.bf16.msra.mxu1 %v5280_v0 }
 0x7df   :  { %6625 = vmatprep.subr.bf16.mxu0 %v5295_v45  ;;  %6789 = vmatprep.subr.bf16.mxu1 %v5297_v48  ;;  %v5360_v45 = vld [vmem:[#allocation2 + $0x1b70] sm:$0xff] }
 0x7e2   :  { %6626 = vmatpush1.bf16.msra.mxu0 %v5294_v7  ;;  %6790 = vmatpush1.bf16.msra.mxu1 %v5296_v20  ;;  %v5375_v20 = vld [vmem:[#allocation2 + $0x1be8] sm:$0xff] }
 0x7e3   :  { %6627 = vmatprep.subr.bf16.mxu0 %v5311_v60  ;;  %6791 = vmatprep.subr.bf16.mxu1 %v5313_v49  ;;  %v5377_v60 = vld [vmem:[#allocation2 + $0x1bf8] sm:$0xff] }
 0x7e6   :  { %6628 = vmatpush1.bf16.msra.mxu0 %v5310_v61  ;;  %6792 = vmatpush1.bf16.msra.mxu1 %v5312_v17 }
 0x7e7   :  { %6629 = vmatprep.subr.bf16.mxu0 %v5327_v53  ;;  %6793 = vmatprep.subr.bf16.mxu1 %v5329_v4  ;;  %v5374_v4 = vld [vmem:[#allocation2 + $0x1be0] sm:$0xff] }
 0x7ea   :  { %6630 = vmatpush1.bf16.msra.mxu0 %v5326_v52  ;;  %6794 = vmatpush1.bf16.msra.mxu1 %v5328_v28  ;;  %v5376_v52 = vld [vmem:[#allocation2 + $0x1bf0] sm:$0xff]  ;;  %v5391_v28 = vld [vmem:[#allocation2 + $0x1c68] sm:$0xff] }
 0x7eb   :  { %6631 = vmatprep.subr.bf16.mxu0 %v5343_v1  ;;  %6795 = vmatprep.subr.bf16.mxu1 %v5345_v8  ;;  %v5393_v1 = vld [vmem:[#allocation2 + $0x1c78] sm:$0xff]  ;;  %v5390_v8 = vld [vmem:[#allocation2 + $0x1c60] sm:$0xff] }
 0x7ec   :  { %v6327_v42 = vpop.f32.mrb[24].mxu0  ;;  %v6491_v51 = vpop.f32.mrb[24].mxu1 }
 0x7ed   :  { %v6919_v56 = vmul.f32 %v6866_v32, %v6327_v42  ;;  %v6921_v44 = vmul.f32 %v6874_v21, %v6491_v51  ;;  %v6329_v13 = vpop.f32.mrb[25].mxu0  ;;  %v6493_v50 = vpop.f32.mrb[25].mxu1  ;;  %v5392_v32 = vld [vmem:[#allocation2 + $0x1c70] sm:$0xff]  ;;  %v5407_v21 = vld [vmem:[#allocation2 + $0x1ce8] sm:$0xff] }
 0x7ee   :  { %v6920_v63 = vmul.f32 %v6870_v33, %v6329_v13  ;;  %v6922_v34 = vmul.f32 %v6878_v12, %v6493_v50  ;;  %v6331_v40 = vpop.f32.mrb[26].mxu0  ;;  %v6495_v6 = vpop.f32.mrb[26].mxu1  ;;  %6632 = vmatpush1.bf16.msra.mxu0 %v5342_v16  ;;  %6796 = vmatpush1.bf16.msra.mxu1 %v5344_v41  ;;  %v5409_v33 = vld [vmem:[#allocation2 + $0x1cf8] sm:$0xff]  ;;  %v5406_v12 = vld [vmem:[#allocation2 + $0x1ce0] sm:$0xff]  ;;  %v5424_v42 = vld [vmem:[#allocation2 + $0x1d70] sm:$0xff] }
 0x7ef   :  { %v9200_v54 = vadd.f32 %v6968_v37, %v6919_v56  ;;  %v9202_v55 = vadd.f32 %v6976_v39, %v6921_v44  ;;  %v6332_v15 = vpop.f32.mrb[27].mxu0  ;;  %v6496_v0 = vpop.f32.mrb[27].mxu1  ;;  %6633 = vmatprep.subr.bf16.mxu0 %v5359_v36  ;;  %6797 = vmatprep.subr.bf16.mxu1 %v5361_v35  ;;  %v5408_v37 = vld [vmem:[#allocation2 + $0x1cf0] sm:$0xff]  ;;  %v5423_v39 = vld [vmem:[#allocation2 + $0x1d68] sm:$0xff]  ;;  %v5425_v16 = vld [vmem:[#allocation2 + $0x1d78] sm:$0xff] }
 0x7f0   :  { %v9204_v48 = vadd.f32 %v6972_v43, %v6920_v63  ;;  %v9206_v7 = vadd.f32 %v6980_v47, %v6922_v34  ;;  %v5422_v41 = vld [vmem:[#allocation2 + $0x1d60] sm:$0xff]  ;;  %v5439_v51 = vld [vmem:[#allocation2 + $0x1de8] sm:$0xff]  ;;  %v5441_v43 = vld [vmem:[#allocation2 + $0x1df8] sm:$0xff] }
 0x7f1   :  { %v7037_v49 = vmax.f32 %v9200_v54, 0.0  ;;  %v7039_v61 = vmax.f32 %v9202_v55, 0.0  ;;  %v5438_v47 = vld [vmem:[#allocation2 + $0x1de0] sm:$0xff]  ;;  %v5440_v36 = vld [vmem:[#allocation2 + $0x1df0] sm:$0xff]  ;;  %v5455_v35 = vld [vmem:[#allocation2 + $0x1e68] sm:$0xff] }
 0x7f2   :  { %v7038_v17 = vmax.f32 %v9204_v48, 0.0  ;;  %v7040_v53 = vmax.f32 %v9206_v7, 0.0  ;;  %6634 = vmatpush1.bf16.msra.mxu0 %v5358_v18  ;;  %6798 = vmatpush1.bf16.msra.mxu1 %v5360_v45  ;;  %v5457_v56 = vld [vmem:[#allocation2 + $0x1e78] sm:$0xff]  ;;  %v5454_v44 = vld [vmem:[#allocation2 + $0x1e60] sm:$0xff]  ;;  %v5456_v13 = vld [vmem:[#allocation2 + $0x1e70] sm:$0xff] }
 0x7f3   :  { %6635 = vmatprep.subr.bf16.mxu0 %v5375_v20  ;;  %6799 = vmatprep.subr.bf16.mxu1 %v5377_v60  ;;  %v5471_v50 = vld [vmem:[#allocation2 + $0x1ee8] sm:$0xff]  ;;  %v5473_v63 = vld [vmem:[#allocation2 + $0x1ef8] sm:$0xff]  ;;  %v5470_v34 = vld [vmem:[#allocation2 + $0x1ee0] sm:$0xff] }
 0x7f4   :  { %v5472_v40 = vld [vmem:[#allocation2 + $0x1ef0] sm:$0xff]  ;;  %v5487_v6 = vld [vmem:[#allocation2 + $0x1f68] sm:$0xff]  ;;  %v5489_v15 = vld [vmem:[#allocation2 + $0x1f78] sm:$0xff] }
 0x7f5   :  { %v5486_v0 = vld [vmem:[#allocation2 + $0x1f60] sm:$0xff]  ;;  %v5488_v18 = vld [vmem:[#allocation2 + $0x1f70] sm:$0xff]  ;;  %v5503_v45 = vld [vmem:[#allocation2 + $0x1fe8] sm:$0xff] }
 0x7f6   :  { %6636 = vmatpush1.bf16.msra.mxu0 %v5374_v4  ;;  %6800 = vmatpush1.bf16.msra.mxu1 %v5376_v52  ;;  %v5505_v20 = vld [vmem:[#allocation2 + $0x1ff8] sm:$0xff]  ;;  %v5502_v60 = vld [vmem:[#allocation2 + $0x1fe0] sm:$0xff]  ;;  %v5504_v4 = vld [vmem:[#allocation2 + $0x1ff0] sm:$0xff]  ;;  %v6882_v52 = vrot.slane %v9180_v10, %v8917_v24 }
 0x7f7   :  { %6637 = vmatprep.subr.bf16.mxu0 %v5391_v28  ;;  %6801 = vmatprep.subr.bf16.mxu1 %v5393_v1  ;;  %v6890_v28 = vrot.slane %v9180_v10, %v8941_v19  ;;  %v6886_v1 = vrot.slane %v9180_v10, %v8896_v46 }
 0x7fa   :  { %6638 = vmatpush1.bf16.msra.mxu0 %v5390_v8  ;;  %6802 = vmatpush1.bf16.msra.mxu1 %v5392_v32  ;;  %v6894_v8 = vrot.slane %v9180_v10, %v8920_v38  ;;  %v6984_v32 = vrot.slane %v9182_v31, %v8917_v24 }
 0x7fb   :  { %6639 = vmatprep.subr.bf16.mxu0 %v5407_v21  ;;  %6803 = vmatprep.subr.bf16.mxu1 %v5409_v33  ;;  %v6992_v21 = vrot.slane %v9182_v31, %v8941_v19 }
 0x7fe   :  { %6640 = vmatpush1.bf16.msra.mxu0 %v5406_v12  ;;  %6804 = vmatpush1.bf16.msra.mxu1 %v5408_v37  ;;  %v6988_v12 = vrot.slane %v9182_v31, %v8896_v46  ;;  %v6996_v37 = vrot.slane %v9182_v31, %v8920_v38 }
 0x7ff   :  { %6641 = vmatprep.subr.bf16.mxu0 %v5423_v39  ;;  %6805 = vmatprep.subr.bf16.mxu1 %v5425_v16 }
 0x802   :  { %6642 = vmatpush1.bf16.msra.mxu0 %v5422_v41  ;;  %6806 = vmatpush1.bf16.msra.mxu1 %v5424_v42 }
 0x803   :  { %6643 = vmatprep.subr.bf16.mxu0 %v5439_v51  ;;  %6807 = vmatprep.subr.bf16.mxu1 %v5441_v43 }
 0x806   :  { %6644 = vmatpush1.bf16.msra.mxu0 %v5438_v47  ;;  %6808 = vmatpush1.bf16.msra.mxu1 %v5440_v36 }
 0x807   :  { %6645 = vmatprep.subr.bf16.mxu0 %v5455_v35  ;;  %6809 = vmatprep.subr.bf16.mxu1 %v5457_v56 }
 0x80a   :  { %6646 = vmatpush1.bf16.msra.mxu0 %v5454_v44  ;;  %6810 = vmatpush1.bf16.msra.mxu1 %v5456_v13 }
 0x80b   :  { %6647 = vmatprep.subr.bf16.mxu0 %v5471_v50  ;;  %6811 = vmatprep.subr.bf16.mxu1 %v5473_v63 }
 0x80e   :  { %6648 = vmatpush1.bf16.msra.mxu0 %v5470_v34  ;;  %6812 = vmatpush1.bf16.msra.mxu1 %v5472_v40 }
 0x80f   :  { %6649 = vmatprep.subr.bf16.mxu0 %v5487_v6  ;;  %6813 = vmatprep.subr.bf16.mxu1 %v5489_v15 }
 0x812   :  { %6650 = vmatpush1.bf16.msra.mxu0 %v5486_v0  ;;  %6814 = vmatpush1.bf16.msra.mxu1 %v5488_v18 }
 0x813   :  { %6651 = vmatprep.subr.bf16.mxu0 %v5503_v45  ;;  %6815 = vmatprep.subr.bf16.mxu1 %v5505_v20 }
 0x816   :  { %6652 = vmatpush1.bf16.msra.mxu0 %v5502_v60  ;;  %6816 = vmatpush1.bf16.msra.mxu1 %v5504_v4 }
 0x819   :  { %6654 = vmatmul.mubr.bf16.vlgmr.msra.gmra.mrb[28].mxu0 %v9090_v59  ;;  %6818 = vmatmul.mubr.bf16.vlgmr.msra.gmra.mrb[28].mxu1 %v9090_v59 }
 0x8ec   :  { %v6655_v33 = vpop.f32.mrb[28].mxu0  ;;  %v6819_v59 = vpop.f32.mrb[28].mxu1 }
 0x8ed   :  { %v6923_v39 = vmul.f32 %v6882_v52, %v6655_v33  ;;  %v6925_v16 = vmul.f32 %v6890_v28, %v6819_v59  ;;  %v6657_v41 = vpop.f32.mrb[29].mxu0  ;;  %v6821_v42 = vpop.f32.mrb[29].mxu1 }
 0x8ee   :  { %v6924_v51 = vmul.f32 %v6886_v1, %v6657_v41  ;;  %v6926_v10 = vmul.f32 %v6894_v8, %v6821_v42  ;;  %v6659_v43 = vpop.f32.mrb[30].mxu0  ;;  %v6823_v47 = vpop.f32.mrb[30].mxu1 }
 0x8ef   :  { %v9230_v24 = vadd.f32 %v6984_v32, %v6923_v39  ;;  %v9232_v36 = vadd.f32 %v6992_v21, %v6925_v16  ;;  %v6660_v19 = vpop.f32.mrb[31].mxu0  ;;  %v6824_v35 = vpop.f32.mrb[31].mxu1 }
 0x8f0   :  { %v9234_v56 = vadd.f32 %v6988_v12, %v6924_v51  ;;  %v9236_v46 = vadd.f32 %v6996_v37, %v6926_v10 }
 0x8f1   :  { %v7041_v38 = vmax.f32 %v9230_v24, 0.0  ;;  %v7043_v31 = vmax.f32 %v9232_v36, 0.0 }
 0x8f2   :  { %v7042_v44 = vmax.f32 %v9234_v56, 0.0  ;;  %v7044_v13 = vmax.f32 %v9236_v46, 0.0 }
 0x8f3   :  { %8666 = dma.done.wait [#allocation4 + $0x1], 16384 }
 0x8f4   :  { %8667 = vsyncadd [#allocation4 + $0x1], 4294950912  ;;  %v7178_v50 = vpack.c.bf16 %v7030_v25, %v7030_v25  ;;  %v7180_v63 = vpack.c.bf16 %v7032_v11, %v7032_v11  ;;  %v7057_v34 = vld [vmem:[#allocation3 + $0x40] sm:$0xff]  ;;  %v7058_v0 = vld [vmem:[#allocation3 + $0x48] sm:$0xff]  ;;  %v7184_v57 = vpack.c.bf16 %v7036_v27, %v7036_v27  ;;  %v7188_v3 = vpack.c.bf16 %v7040_v53, %v7040_v53  ;;  %s8691_s7 = smov [#allocation17]  }
 0x8f5   :  { %v7073_v40 = vld [vmem:[#allocation3 + $0xc0] sm:$0xff]  ;;  %8112 = vmatprep.subr.bf16.mxu0 %v7057_v34  ;;  %v7074_v18 = vld [vmem:[#allocation3 + $0xc8] sm:$0xff]  ;;  %v7059_v45 = vld [vmem:[#allocation3 + $0x50] sm:$0xff]  ;;  %v7192_v54 = vpack.c.bf16 %v7044_v13, %v7044_v13  ;;  %s7533_s23 = sshll.u32 %s8691_s7, 4  ;;  %vm7525_vm1 = vcmask 80896   ;;  %s7534_s23 = int_to_ptr.vmem [resolvable:$true] %s7533_s23 }
 0x8f6   :  { %7225 = vmatprep.mubr.bf16.mxu0 %v7178_v50  ;;  %7265 = vmatprep.mubr.bf16.mxu1 %v7180_v63  ;;  %v7049_v6 = vld [vmem:[#allocation3] sm:$0xff]  ;;  %v7050_v62 = vld [vmem:[#allocation3 + $0x8] sm:$0xff]  ;;  %v7075_v22 = vld [vmem:[#allocation3 + $0xd0] sm:$0xff]  ;;  %v7177_v50 = vpack.c.bf16 %v7029_v5, %v7029_v5  ;;  %v7179_v63 = vpack.c.bf16 %v7031_v14, %v7031_v14  ;;  %s8634_s25 = scalar_lea.vmem %s7534_s23, 128  ;;  %p8639_p9 = scmp.lt.s32.totalorder %s7534_s23, %s7534_s23 }
 0x8f7   :  { %8134 = vmatprep.subr.bf16.mxu1 %v7073_v40  ;;  %v7065_v15 = vld [vmem:[#allocation3 + $0x80] sm:$0xff]  ;;  %8113 = vmatpush3.bf16.msra.mxu0 %v7049_v6  ;;  %v7066_v25 = vld [vmem:[#allocation3 + $0x88] sm:$0xff]  ;;  %v7051_v11 = vld [vmem:[#allocation3 + $0x10] sm:$0xff]  ;;  %p8635_p8 = scmp.ne.s32.totalorder %s7534_s23, %s8634_s25  ;;  %p8640_p10 = scmp.lt.s32.totalorder %s8634_s25, %s8634_s25 }
 0x8f8   :  { %8135 = vmatpush3.bf16.msra.mxu1 %v7065_v15  ;;  %8114 = vmatprep.subr.bf16.mxu0 %v7058_v0  ;;  %v7067_v20 = vld [vmem:[#allocation3 + $0x90] sm:$0xff]  ;;  %v7060_v60 = vld [vmem:[#allocation3 + $0x58] sm:$0xff]  ;;  %v7061_v1 = vld [vmem:[#allocation3 + $0x60] sm:$0xff]  ;;  %v7182_v0 = vpack.c.bf16 %v7034_v30, %v7034_v30 }
 0x8f9   :  { %8136 = vmatprep.subr.bf16.mxu1 %v7074_v18  ;;  %v7076_v4 = vld [vmem:[#allocation3 + $0xd8] sm:$0xff]  ;;  %v7077_v8 = vld [vmem:[#allocation3 + $0xe0] sm:$0xff]  ;;  %v7062_v33 = vld [vmem:[#allocation3 + $0x68] sm:$0xff]  ;;  %p8641_p11 = por %p8640_p10, %p8639_p9 }
 0x8fa   :  { %v7052_v52 = vld [vmem:[#allocation3 + $0x18] sm:$0xff]  ;;  %v7053_v32 = vld [vmem:[#allocation3 + $0x20] sm:$0xff]  ;;  %v7078_v59 = vld [vmem:[#allocation3 + $0xe8] sm:$0xff] }
 0x8fb   :  { %8115 = vmatpush3.bf16.msra.mxu0 %v7050_v62  ;;  %v7068_v28 = vld [vmem:[#allocation3 + $0x98] sm:$0xff]  ;;  %v7069_v21 = vld [vmem:[#allocation3 + $0xa0] sm:$0xff]  ;;  %v7054_v12 = vld [vmem:[#allocation3 + $0x28] sm:$0xff]  ;;  %p8642_p12 = pnand %p8641_p11, %p8635_p8 }
 0x8fc   :  { %8137 = vmatpush3.bf16.msra.mxu1 %v7066_v25  ;;  %8116 = vmatprep.subr.bf16.mxu0 %v7059_v45  ;;  %v7070_v37 = vld [vmem:[#allocation3 + $0xa8] sm:$0xff]  ;;  %v7063_v39 = vld [vmem:[#allocation3 + $0x70] sm:$0xff]  ;;  %v7064_v51 = vld [vmem:[#allocation3 + $0x78] sm:$0xff] }
 0x8fd   :  { %8138 = vmatprep.subr.bf16.mxu1 %v7075_v22  ;;  %v7079_v16 = vld [vmem:[#allocation3 + $0xf0] sm:$0xff]  ;;  %v7080_v10 = vld [vmem:[#allocation3 + $0xf8] sm:$0xff]  ;;  %v7089_v19 = vld [vmem:[#allocation3 + $0x140] sm:$0xff] }
 0x8fe   :  { %v7055_v41 = vld [vmem:[#allocation3 + $0x30] sm:$0xff]  ;;  %v7056_v43 = vld [vmem:[#allocation3 + $0x38] sm:$0xff]  ;;  %v7105_v35 = vld [vmem:[#allocation3 + $0x1c0] sm:$0xff] }
 0x8ff   :  { %8117 = vmatpush3.bf16.msra.mxu0 %v7051_v11  ;;  %v7071_v42 = vld [vmem:[#allocation3 + $0xb0] sm:$0xff]  ;;  %v7072_v47 = vld [vmem:[#allocation3 + $0xb8] sm:$0xff]  ;;  %v7081_v34 = vld [vmem:[#allocation3 + $0x100] sm:$0xff] }
 0x900   :  { %8139 = vmatpush3.bf16.msra.mxu1 %v7067_v20  ;;  %8118 = vmatprep.subr.bf16.mxu0 %v7060_v60  ;;  %v7097_v40 = vld [vmem:[#allocation3 + $0x180] sm:$0xff]  ;;  %v7090_v6 = vld [vmem:[#allocation3 + $0x148] sm:$0xff]  ;;  %v7091_v14 = vld [vmem:[#allocation3 + $0x150] sm:$0xff] }
 0x901   :  { %8140 = vmatprep.subr.bf16.mxu1 %v7076_v4  ;;  %v7106_v15 = vld [vmem:[#allocation3 + $0x1c8] sm:$0xff]  ;;  %v7107_v18 = vld [vmem:[#allocation3 + $0x1d0] sm:$0xff]  ;;  %v7092_v30 = vld [vmem:[#allocation3 + $0x158] sm:$0xff] }
 0x902   :  { %v7082_v58 = vld [vmem:[#allocation3 + $0x108] sm:$0xff]  ;;  %v7083_v29 = vld [vmem:[#allocation3 + $0x110] sm:$0xff]  ;;  %v7108_v27 = vld [vmem:[#allocation3 + $0x1d8] sm:$0xff] }
 0x903   :  { %8119 = vmatpush3.bf16.msra.mxu0 %v7052_v52  ;;  %v7098_v5 = vld [vmem:[#allocation3 + $0x188] sm:$0xff]  ;;  %v7099_v2 = vld [vmem:[#allocation3 + $0x190] sm:$0xff]  ;;  %v7084_v62 = vld [vmem:[#allocation3 + $0x118] sm:$0xff] }
 0x904   :  { %8141 = vmatpush3.bf16.msra.mxu1 %v7068_v28  ;;  %8120 = vmatprep.subr.bf16.mxu0 %v7061_v1  ;;  %v7100_v25 = vld [vmem:[#allocation3 + $0x198] sm:$0xff]  ;;  %v7093_v45 = vld [vmem:[#allocation3 + $0x160] sm:$0xff]  ;;  %v7094_v60 = vld [vmem:[#allocation3 + $0x168] sm:$0xff] }
 0x905   :  { %8142 = vmatprep.subr.bf16.mxu1 %v7077_v8  ;;  %v7109_v22 = vld [vmem:[#allocation3 + $0x1e0] sm:$0xff]  ;;  %v7110_v4 = vld [vmem:[#allocation3 + $0x1e8] sm:$0xff]  ;;  %v7095_v1 = vld [vmem:[#allocation3 + $0x170] sm:$0xff] }
 0x906   :  { %v7085_v11 = vld [vmem:[#allocation3 + $0x120] sm:$0xff]  ;;  %v7086_v52 = vld [vmem:[#allocation3 + $0x128] sm:$0xff]  ;;  %v7111_v8 = vld [vmem:[#allocation3 + $0x1f0] sm:$0xff] }
 0x907   :  { %8121 = vmatpush3.bf16.msra.mxu0 %v7053_v32  ;;  %v7101_v20 = vld [vmem:[#allocation3 + $0x1a0] sm:$0xff]  ;;  %v7102_v28 = vld [vmem:[#allocation3 + $0x1a8] sm:$0xff]  ;;  %v7087_v32 = vld [vmem:[#allocation3 + $0x130] sm:$0xff] }
 0x908   :  { %8143 = vmatpush3.bf16.msra.mxu1 %v7069_v21  ;;  %8122 = vmatprep.subr.bf16.mxu0 %v7062_v33  ;;  %v7103_v21 = vld [vmem:[#allocation3 + $0x1b0] sm:$0xff]  ;;  %v7096_v33 = vld [vmem:[#allocation3 + $0x178] sm:$0xff]  ;;  %v7114_v9 = vld [vmem:[#allocation3 + $0x208] sm:$0xff] }
 0x909   :  { %8144 = vmatprep.subr.bf16.mxu1 %v7078_v59  ;;  %v7112_v59 = vld [vmem:[#allocation3 + $0x1f8] sm:$0xff]  ;;  %v7115_v48 = vld [vmem:[#allocation3 + $0x210] sm:$0xff]  ;;  %v7146_v55 = vld [vmem:[#allocation3 + $0x308] sm:$0xff] }
 0x90a   :  { %v7131_v7 = vld [vmem:[#allocation3 + $0x290] sm:$0xff]  ;;  %v7140_v53 = vld [vmem:[#allocation3 + $0x2d8] sm:$0xff] }
 0x90b   :  { %8123 = vmatpush3.bf16.msra.mxu0 %v7054_v12  ;;  %v7088_v12 = vld [vmem:[#allocation3 + $0x138] sm:$0xff]  ;;  %v7147_v56 = vld [vmem:[#allocation3 + $0x310] sm:$0xff] }
 0x90c   :  { %8145 = vmatpush3.bf16.msra.mxu1 %v7070_v37  ;;  %8124 = vmatprep.subr.bf16.mxu0 %v7063_v39  ;;  %v7104_v37 = vld [vmem:[#allocation3 + $0x1b8] sm:$0xff]  ;;  %v7121_v39 = vld [vmem:[#allocation3 + $0x240] sm:$0xff]  ;;  %v7163_v46 = vld [vmem:[#allocation3 + $0x390] sm:$0xff] }
 0x90d   :  { %8146 = vmatprep.subr.bf16.mxu1 %v7079_v16  ;;  %v7137_v16 = vld [vmem:[#allocation3 + $0x2c0] sm:$0xff]  ;;  %v7172_v13 = vld [vmem:[#allocation3 + $0x3d8] sm:$0xff] }
 0x90f   :  { %8125 = vmatpush3.bf16.msra.mxu0 %v7055_v41  ;;  %v7181_v41 = vpack.c.bf16 %v7033_v23, %v7033_v23  ;;  %v7130_v23 = vld [vmem:[#allocation3 + $0x288] sm:$0xff] }
 0x910   :  { %8147 = vmatpush3.bf16.msra.mxu1 %v7071_v42  ;;  %8126 = vmatprep.subr.bf16.mxu0 %v7064_v51  ;;  %v7183_v42 = vpack.c.bf16 %v7035_v26, %v7035_v26  ;;  %v7113_v51 = vld [vmem:[#allocation3 + $0x200] sm:$0xff]  ;;  %v7123_v26 = vld [vmem:[#allocation3 + $0x250] sm:$0xff] }
 0x911   :  { %8148 = vmatprep.subr.bf16.mxu1 %v7080_v10  ;;  %v7129_v10 = vld [vmem:[#allocation3 + $0x280] sm:$0xff] }
 0x913   :  { %8127 = vmatpush3.bf16.msra.mxu0 %v7056_v43  ;;  %v7122_v43 = vld [vmem:[#allocation3 + $0x248] sm:$0xff] }
 0x914   :  { %8149 = vmatpush3.bf16.msra.mxu1 %v7072_v47  ;;  %8156 = vmatprep.subr.bf16.mxu0 %v7089_v19  ;;  %v7138_v47 = vld [vmem:[#allocation3 + $0x2c8] sm:$0xff]  ;;  %v7186_v19 = vpack.c.bf16 %v7038_v17, %v7038_v17  ;;  %v7124_v17 = vld [vmem:[#allocation3 + $0x258] sm:$0xff] }
 0x915   :  { %8178 = vmatprep.subr.bf16.mxu1 %v7105_v35  ;;  %v7139_v35 = vld [vmem:[#allocation3 + $0x2d0] sm:$0xff] }
 0x916   :  { %7226 = vmatmul.mubr.bf16.vlgmr.msra.gmra.mrb[32].mxu0 %v7177_v50  ;;  %v7116_v50 = vld [vmem:[#allocation3 + $0x218] sm:$0xff] }
 0x917   :  { %7266 = vmatmul.mubr.bf16.vlgmr.msra.gmra.mrb[32].mxu1 %v7179_v63  ;;  %8157 = vmatpush3.bf16.msra.mxu0 %v7081_v34  ;;  %v7132_v63 = vld [vmem:[#allocation3 + $0x298] sm:$0xff]  ;;  %v7125_v34 = vld [vmem:[#allocation3 + $0x260] sm:$0xff] }
 0x918   :  { %8179 = vmatpush3.bf16.msra.mxu1 %v7097_v40  ;;  %8158 = vmatprep.subr.bf16.mxu0 %v7090_v6  ;;  %v7141_v40 = vld [vmem:[#allocation3 + $0x2e0] sm:$0xff] }
 0x919   :  { %8180 = vmatprep.subr.bf16.mxu1 %v7106_v15  ;;  %7305 = vmatprep.mubr.bf16.mxu0 %v7182_v0  ;;  %v7117_v6 = vld [vmem:[#allocation3 + $0x220] sm:$0xff]  ;;  %v7126_v0 = vld [vmem:[#allocation3 + $0x268] sm:$0xff] }
 0x91a   :  { %7345 = vmatprep.mubr.bf16.mxu1 %v7184_v57  ;;  %v7133_v15 = vld [vmem:[#allocation3 + $0x2a0] sm:$0xff]  ;;  %v7142_v57 = vld [vmem:[#allocation3 + $0x2e8] sm:$0xff] }
 0x91b   :  { %8159 = vmatpush3.bf16.msra.mxu0 %v7082_v58  ;;  %v7118_v58 = vld [vmem:[#allocation3 + $0x228] sm:$0xff] }
 0x91c   :  { %8181 = vmatpush3.bf16.msra.mxu1 %v7098_v5  ;;  %8160 = vmatprep.subr.bf16.mxu0 %v7091_v14  ;;  %v7134_v5 = vld [vmem:[#allocation3 + $0x2a8] sm:$0xff]  ;;  %v7127_v14 = vld [vmem:[#allocation3 + $0x270] sm:$0xff] }
 0x91d   :  { %8182 = vmatprep.subr.bf16.mxu1 %v7107_v18  ;;  %v7143_v18 = vld [vmem:[#allocation3 + $0x2f0] sm:$0xff] }
 0x91f   :  { %8161 = vmatpush3.bf16.msra.mxu0 %v7083_v29  ;;  %v7119_v29 = vld [vmem:[#allocation3 + $0x230] sm:$0xff] }
 0x920   :  { %8183 = vmatpush3.bf16.msra.mxu1 %v7099_v2  ;;  %8162 = vmatprep.subr.bf16.mxu0 %v7092_v30  ;;  %v7135_v2 = vld [vmem:[#allocation3 + $0x2b0] sm:$0xff]  ;;  %v7128_v30 = vld [vmem:[#allocation3 + $0x278] sm:$0xff] }
 0x921   :  { %8184 = vmatprep.subr.bf16.mxu1 %v7108_v27  ;;  %v7144_v27 = vld [vmem:[#allocation3 + $0x2f8] sm:$0xff] }
 0x923   :  { %8163 = vmatpush3.bf16.msra.mxu0 %v7084_v62  ;;  %v7120_v62 = vld [vmem:[#allocation3 + $0x238] sm:$0xff] }
 0x924   :  { %8185 = vmatpush3.bf16.msra.mxu1 %v7100_v25  ;;  %8164 = vmatprep.subr.bf16.mxu0 %v7093_v45  ;;  %v7136_v25 = vld [vmem:[#allocation3 + $0x2b8] sm:$0xff]  ;;  %v7153_v45 = vld [vmem:[#allocation3 + $0x340] sm:$0xff] }
 0x925   :  { %8186 = vmatprep.subr.bf16.mxu1 %v7109_v22  ;;  %v7169_v22 = vld [vmem:[#allocation3 + $0x3c0] sm:$0xff] }
 0x927   :  { %8165 = vmatpush3.bf16.msra.mxu0 %v7085_v11  ;;  %v7185_v11 = vpack.c.bf16 %v7037_v49, %v7037_v49  ;;  %v7162_v49 = vld [vmem:[#allocation3 + $0x388] sm:$0xff] }
 0x928   :  { %8187 = vmatpush3.bf16.msra.mxu1 %v7101_v20  ;;  %8166 = vmatprep.subr.bf16.mxu0 %v7094_v60  ;;  %v7187_v20 = vpack.c.bf16 %v7039_v61, %v7039_v61  ;;  %v7145_v60 = vld [vmem:[#allocation3 + $0x300] sm:$0xff]  ;;  %v7155_v61 = vld [vmem:[#allocation3 + $0x350] sm:$0xff] }
 0x929   :  { %8188 = vmatprep.subr.bf16.mxu1 %v7110_v4  ;;  %v7161_v4 = vld [vmem:[#allocation3 + $0x380] sm:$0xff] }
 0x92b   :  { %8167 = vmatpush3.bf16.msra.mxu0 %v7086_v52  ;;  %v7154_v52 = vld [vmem:[#allocation3 + $0x348] sm:$0xff] }
 0x92c   :  { %8189 = vmatpush3.bf16.msra.mxu1 %v7102_v28  ;;  %8168 = vmatprep.subr.bf16.mxu0 %v7095_v1  ;;  %v7170_v28 = vld [vmem:[#allocation3 + $0x3c8] sm:$0xff]  ;;  %v7190_v1 = vpack.c.bf16 %v7042_v44, %v7042_v44  ;;  %v7156_v44 = vld [vmem:[#allocation3 + $0x358] sm:$0xff] }
 0x92d   :  { %8190 = vmatprep.subr.bf16.mxu1 %v7111_v8  ;;  %v7171_v8 = vld [vmem:[#allocation3 + $0x3d0] sm:$0xff] }
 0x92f   :  { %8169 = vmatpush3.bf16.msra.mxu0 %v7087_v32  ;;  %v7148_v32 = vld [vmem:[#allocation3 + $0x318] sm:$0xff] }
 0x930   :  { %8191 = vmatpush3.bf16.msra.mxu1 %v7103_v21  ;;  %8170 = vmatprep.subr.bf16.mxu0 %v7096_v33  ;;  %v7164_v21 = vld [vmem:[#allocation3 + $0x398] sm:$0xff]  ;;  %v7157_v33 = vld [vmem:[#allocation3 + $0x360] sm:$0xff] }
 0x931   :  { %8192 = vmatprep.subr.bf16.mxu1 %v7112_v59  ;;  %v7173_v59 = vld [vmem:[#allocation3 + $0x3e0] sm:$0xff] }
 0x933   :  { %8171 = vmatpush3.bf16.msra.mxu0 %v7088_v12  ;;  %v7149_v12 = vld [vmem:[#allocation3 + $0x320] sm:$0xff] }
 0x934   :  { %8193 = vmatpush3.bf16.msra.mxu1 %v7104_v37  ;;  %8200 = vmatprep.subr.bf16.mxu0 %v7121_v39  ;;  %v7165_v37 = vld [vmem:[#allocation3 + $0x3a0] sm:$0xff]  ;;  %v7158_v39 = vld [vmem:[#allocation3 + $0x368] sm:$0xff] }
 0x935   :  { %8222 = vmatprep.subr.bf16.mxu1 %v7137_v16  ;;  %v7174_v16 = vld [vmem:[#allocation3 + $0x3e8] sm:$0xff] }
 0x936   :  { %7306 = vmatmul.mubr.bf16.vlgmr.msra.gmra.mrb[36].mxu0 %v7181_v41  ;;  %v7150_v41 = vld [vmem:[#allocation3 + $0x328] sm:$0xff] }
 0x937   :  { %7346 = vmatmul.mubr.bf16.vlgmr.msra.gmra.mrb[36].mxu1 %v7183_v42  ;;  %8201 = vmatpush3.bf16.msra.mxu0 %v7113_v51  ;;  %v7166_v42 = vld [vmem:[#allocation3 + $0x3a8] sm:$0xff]  ;;  %v7159_v51 = vld [vmem:[#allocation3 + $0x370] sm:$0xff] }
 0x938   :  { %8223 = vmatpush3.bf16.msra.mxu1 %v7129_v10  ;;  %8202 = vmatprep.subr.bf16.mxu0 %v7122_v43  ;;  %v7175_v10 = vld [vmem:[#allocation3 + $0x3f0] sm:$0xff] }
 0x939   :  { %8224 = vmatprep.subr.bf16.mxu1 %v7138_v47  ;;  %7385 = vmatprep.mubr.bf16.mxu0 %v7186_v19  ;;  %v7151_v43 = vld [vmem:[#allocation3 + $0x330] sm:$0xff]  ;;  %v7160_v19 = vld [vmem:[#allocation3 + $0x378] sm:$0xff] }
 0x93a   :  { %7425 = vmatprep.mubr.bf16.mxu1 %v7188_v3  ;;  %v7167_v47 = vld [vmem:[#allocation3 + $0x3b0] sm:$0xff]  ;;  %v7176_v3 = vld [vmem:[#allocation3 + $0x3f8] sm:$0xff] }
 0x93b   :  { %8203 = vmatpush3.bf16.msra.mxu0 %v7114_v9  ;;  %v7152_v9 = vld [vmem:[#allocation3 + $0x338] sm:$0xff] }
 0x93c   :  { %8225 = vmatpush3.bf16.msra.mxu1 %v7130_v23  ;;  %8204 = vmatprep.subr.bf16.mxu0 %v7123_v26  ;;  %v7168_v23 = vld [vmem:[#allocation3 + $0x3b8] sm:$0xff]  ;;  %v7189_v26 = vpack.c.bf16 %v7041_v38, %v7041_v38 }
 0x93d   :  { %8226 = vmatprep.subr.bf16.mxu1 %v7139_v35  ;;  %v7191_v35 = vpack.c.bf16 %v7043_v31, %v7043_v31 }
 0x93f   :  { %8205 = vmatpush3.bf16.msra.mxu0 %v7115_v48 }
 0x940   :  { %8227 = vmatpush3.bf16.msra.mxu1 %v7131_v7  ;;  %8206 = vmatprep.subr.bf16.mxu0 %v7124_v17 }
 0x941   :  { %8228 = vmatprep.subr.bf16.mxu1 %v7140_v53 }
 0x943   :  { %8207 = vmatpush3.bf16.msra.mxu0 %v7116_v50 }
 0x944   :  { %8229 = vmatpush3.bf16.msra.mxu1 %v7132_v63  ;;  %8208 = vmatprep.subr.bf16.mxu0 %v7125_v34 }
 0x945   :  { %8230 = vmatprep.subr.bf16.mxu1 %v7141_v40 }
 0x947   :  { %8209 = vmatpush3.bf16.msra.mxu0 %v7117_v6 }
 0x948   :  { %8231 = vmatpush3.bf16.msra.mxu1 %v7133_v15  ;;  %8210 = vmatprep.subr.bf16.mxu0 %v7126_v0 }
 0x949   :  { %8232 = vmatprep.subr.bf16.mxu1 %v7142_v57 }
 0x94b   :  { %8211 = vmatpush3.bf16.msra.mxu0 %v7118_v58 }
 0x94c   :  { %8233 = vmatpush3.bf16.msra.mxu1 %v7134_v5  ;;  %8212 = vmatprep.subr.bf16.mxu0 %v7127_v14 }
 0x94d   :  { %8234 = vmatprep.subr.bf16.mxu1 %v7143_v18 }
 0x94f   :  { %8213 = vmatpush3.bf16.msra.mxu0 %v7119_v29 }
 0x950   :  { %8235 = vmatpush3.bf16.msra.mxu1 %v7135_v2  ;;  %8214 = vmatprep.subr.bf16.mxu0 %v7128_v30 }
 0x951   :  { %8236 = vmatprep.subr.bf16.mxu1 %v7144_v27 }
 0x953   :  { %8215 = vmatpush3.bf16.msra.mxu0 %v7120_v62 }
 0x954   :  { %8237 = vmatpush3.bf16.msra.mxu1 %v7136_v25  ;;  %8244 = vmatprep.subr.bf16.mxu0 %v7153_v45 }
 0x955   :  { %8266 = vmatprep.subr.bf16.mxu1 %v7169_v22 }
 0x956   :  { %7386 = vmatmul.mubr.bf16.vlgmr.msra.gmra.mrb[40].mxu0 %v7185_v11 }
 0x957   :  { %7426 = vmatmul.mubr.bf16.vlgmr.msra.gmra.mrb[40].mxu1 %v7187_v20  ;;  %8245 = vmatpush3.bf16.msra.mxu0 %v7145_v60 }
 0x958   :  { %8267 = vmatpush3.bf16.msra.mxu1 %v7161_v4  ;;  %8246 = vmatprep.subr.bf16.mxu0 %v7154_v52 }
 0x959   :  { %8268 = vmatprep.subr.bf16.mxu1 %v7170_v28  ;;  %7465 = vmatprep.mubr.bf16.mxu0 %v7190_v1 }
 0x95a   :  { %7505 = vmatprep.mubr.bf16.mxu1 %v7192_v54 }
 0x95b   :  { %8247 = vmatpush3.bf16.msra.mxu0 %v7146_v55 }
 0x95c   :  { %8269 = vmatpush3.bf16.msra.mxu1 %v7162_v49  ;;  %8248 = vmatprep.subr.bf16.mxu0 %v7155_v61 }
 0x95d   :  { %8270 = vmatprep.subr.bf16.mxu1 %v7171_v8 }
 0x95f   :  { %8249 = vmatpush3.bf16.msra.mxu0 %v7147_v56 }
 0x960   :  { %8271 = vmatpush3.bf16.msra.mxu1 %v7163_v46  ;;  %8250 = vmatprep.subr.bf16.mxu0 %v7156_v44 }
 0x961   :  { %8272 = vmatprep.subr.bf16.mxu1 %v7172_v13 }
 0x963   :  { %8251 = vmatpush3.bf16.msra.mxu0 %v7148_v32 }
 0x964   :  { %8273 = vmatpush3.bf16.msra.mxu1 %v7164_v21  ;;  %8252 = vmatprep.subr.bf16.mxu0 %v7157_v33  ;;  %v8108_v33 = vld [vmem:[#allocation16] ss:$0 sm:$0xff] }
 0x965   :  { %8274 = vmatprep.subr.bf16.mxu1 %v7173_v59 }
 0x967   :  { %8253 = vmatpush3.bf16.msra.mxu0 %v7149_v12  ;;  %v8109_v12 = vld [vmem:[#allocation16 + $0x1] ss:$0 sm:$0xff] }
 0x968   :  { %8275 = vmatpush3.bf16.msra.mxu1 %v7165_v37  ;;  %8254 = vmatprep.subr.bf16.mxu0 %v7158_v39 }
 0x969   :  { %8276 = vmatprep.subr.bf16.mxu1 %v7174_v16 }
 0x96b   :  { %8255 = vmatpush3.bf16.msra.mxu0 %v7150_v41 }
 0x96c   :  { %8277 = vmatpush3.bf16.msra.mxu1 %v7166_v42  ;;  %8256 = vmatprep.subr.bf16.mxu0 %v7159_v51 }
 0x96d   :  { %8278 = vmatprep.subr.bf16.mxu1 %v7175_v10 }
 0x96f   :  { %8257 = vmatpush3.bf16.msra.mxu0 %v7151_v43 }
 0x970   :  { %8279 = vmatpush3.bf16.msra.mxu1 %v7167_v47  ;;  %8258 = vmatprep.subr.bf16.mxu0 %v7160_v19 }
 0x971   :  { %8280 = vmatprep.subr.bf16.mxu1 %v7176_v3 }
 0x973   :  { %8259 = vmatpush3.bf16.msra.mxu0 %v7152_v9 }
 0x974   :  { %8281 = vmatpush3.bf16.msra.mxu1 %v7168_v23 }
 0x976   :  { %7466 = vmatmul.mubr.bf16.vlgmr.msra.gmra.mrb[44].mxu0 %v7189_v26 }
 0x977   :  { %7506 = vmatmul.mubr.bf16.vlgmr.msra.gmra.mrb[44].mxu1 %v7191_v35 }
 0x9e9   :  { %v8128_v48 = vpop.f32.mrb[32].mxu0 }
 0x9ea   :  { %v8150_v7 = vpop.f32.mrb[32].mxu1  ;;  %v8129_v17 = vpop.f32.mrb[33].mxu0 }
 0x9eb   :  { %v8151_v53 = vpop.f32.mrb[33].mxu1  ;;  %v8130_v50 = vadd.f32 %v8129_v17, %v8128_v48  ;;  %v8131_v34 = vpop.f32.mrb[34].mxu0 }
 0x9ec   :  { %v8152_v63 = vadd.f32 %v8151_v53, %v8150_v7  ;;  %v8153_v40 = vpop.f32.mrb[34].mxu1  ;;  %v8132_v6 = vpop.f32.mrb[35].mxu0 }
 0x9ed   :  { %v8154_v24 = vpop.f32.mrb[35].mxu1 }
 0x9ee   :  { %v7268_v15 = vadd.f32 %v8152_v63, %v8130_v50 }
 0xa09   :  { %v8172_v38 = vpop.f32.mrb[36].mxu0 }
 0xa0a   :  { %v8194_v0 = vpop.f32.mrb[36].mxu1  ;;  %v8173_v36 = vpop.f32.mrb[37].mxu0 }
 0xa0b   :  { %v8195_v57 = vpop.f32.mrb[37].mxu1  ;;  %v8174_v31 = vadd.f32 %v8173_v36, %v8172_v38  ;;  %v8175_v5 = vpop.f32.mrb[38].mxu0 }
 0xa0c   :  { %v8196_v58 = vadd.f32 %v8195_v57, %v8194_v0  ;;  %v8197_v14 = vpop.f32.mrb[38].mxu1  ;;  %v8176_v18 = vpop.f32.mrb[39].mxu0 }
 0xa0d   :  { %v8198_v29 = vpop.f32.mrb[39].mxu1  ;;  %v7308_v2 = vadd.f32 %v8174_v31, %v7268_v15 }
 0xa0f   :  { %v7348_v30 = vadd.f32 %v8196_v58, %v7308_v2 }
 0xa29   :  { %v8216_v27 = vpop.f32.mrb[40].mxu0 }
 0xa2a   :  { %v8238_v62 = vpop.f32.mrb[40].mxu1  ;;  %v8217_v25 = vpop.f32.mrb[41].mxu0 }
 0xa2b   :  { %v8239_v45 = vpop.f32.mrb[41].mxu1  ;;  %v8218_v22 = vadd.f32 %v8217_v25, %v8216_v27  ;;  %v8219_v20 = vpop.f32.mrb[42].mxu0 }
 0xa2c   :  { %v8240_v11 = vadd.f32 %v8239_v45, %v8238_v62  ;;  %v8241_v60 = vpop.f32.mrb[42].mxu1  ;;  %v8220_v4 = vpop.f32.mrb[43].mxu0 }
 0xa2d   :  { %v8242_v52 = vpop.f32.mrb[43].mxu1  ;;  %v7388_v28 = vadd.f32 %v8218_v22, %v7348_v30 }
 0xa2f   :  { %v7428_v1 = vadd.f32 %v8240_v11, %v7388_v28 }
 0xa49   :  { %v8260_v54 = vpop.f32.mrb[44].mxu0 }
 0xa4a   :  { %v8282_v55 = vpop.f32.mrb[44].mxu1  ;;  %v8261_v49 = vpop.f32.mrb[45].mxu0 }
 0xa4b   :  { %v8283_v61 = vpop.f32.mrb[45].mxu1  ;;  %v8262_v8 = vadd.f32 %v8261_v49, %v8260_v54  ;;  %v8263_v46 = vpop.f32.mrb[46].mxu0 }
 0xa4c   :  { %v8284_v56 = vadd.f32 %v8283_v61, %v8282_v55  ;;  %v8285_v44 = vpop.f32.mrb[46].mxu1  ;;  %v8264_v13 = vpop.f32.mrb[47].mxu0 }
 0xa4d   :  { %v8286_v32 = vpop.f32.mrb[47].mxu1  ;;  %v7468_v21 = vadd.f32 %v8262_v8, %v7428_v1 }
 0xa4f   :  { %v7508_v59 = vadd.f32 %v8284_v56, %v7468_v21 }
 0xa51   :  { %v7518_v37 = vmul.f32 %v8108_v33, %v7508_v59 }
 0xa53   :  { %v7524_v39 = vadd.f32 %v8109_v12, %v7518_v37 }
 0xa55   :  { %7526 = vst.msk [vmem:[#allocation17] sm:$0xff] %vm7525_vm1, %v7524_v39 }
 0xa56   :  { %8645 = shalt.err (!%p8642_p12)
}
 0xa57   :  { %s8646_s8 = scalar_lea.hbm %s9311_s9, 128 }
 0xa58   :  { %p8647_p13 = scmp.ne.s32.totalorder %s9311_s9, %s8646_s8  ;;  %p8650_p0 = scmp.lt.u32.totalorder %s8646_s8, %s9311_s9 }
 0xa5a   :  { %p8652_p1 = pnand %p8650_p0, %p8647_p13 }
 0xa5c   :  { %8655 = shalt.err (!%p8652_p1)
}
 0xa5d   :  { %7536 = dma.vmem_to_hbm [thread:$0]  %s7534_s23, 128, %s9311_s9, [#allocation7]  }
 0xa5e   :  { %8668 = dma.done.wait [#allocation7], 128  }
 0xa5f   :  { %8669 = vsyncadd [#allocation7], 4294967168 }
 0xa60   :  { %7540 = vsyncpa [#allocation6], 1 }
 0xa61   :  { %7541 = vsyncpa [#allocation9], 1 }
 0xa62   :  { %7542 = vsyncpa [#allocation12], 1 }
 0xa63   :  { %7543 = vsyncpa [#allocation15], 1 }
 0xa64   :  { %7544 = vsyncpa [#allocation7], 1 }
 0xa65   :  { %7545 = vsyncmov [#allocation4] }
 0xa68   :  { %s7546_s11 = vpop.sfrf %7545 }
 0xa69   :  { %p8110_p2 = scmp.ne.s32.totalorder %s7546_s11, 0 }
 0xa6b   :  { %7550 = shalt.err (%p8110_p2)  }
 0xa6c   :  { %7552 = vsyncmov [#allocation4 + $0x1] }
 0xa6f   :  { %s7553_s12 = vpop.sfrf %7552 }
 0xa70   :  { %p8111_p3 = scmp.ne.s32.totalorder %s7553_s12, 0 }
 0xa72   :  { %7557 = shalt.err (%p8111_p3)  }

</bundles_post_ra>
